<compile_context>
chip_gen: v7x
topology: tpu7x:2x2x1
jax: 0.10.0
libtpu: 0.0.40
codegen_flags: <defaults>
</compile_context>

<pallas_src>
import jax
import jax.numpy as jnp
from jax import lax
from jax.experimental import pallas as pl
from jax.experimental.pallas import tpu as pltpu


# -----------------------------------------------------------------------------
# Fused conv (+ InstanceNorm / ReLU / residual / tanh) Pallas kernel.
#
# Flat-row formulation: the padded NHWC image (Hp, Wp, Cin) is flattened to
# (Hp*Wp, Cin).  For kernel tap (di, dj) the contribution to flat output row
# q = ho*Wp + wo is  x_flat[q + di*Wp + dj] @ W[di, dj]  -- a plain contiguous
# sublane-offset slice, so the kernel needs no in-kernel reshapes or strided
# loads.  Output rows with (q mod Wp) >= Wo are "wrap" garbage; they are masked
# out of the InstanceNorm statistics and trimmed outside the kernel.
# -----------------------------------------------------------------------------
def _make_conv_kernel(offsets, rows, wp, wo, groups, epilogue):
    def kernel(*refs):
        if epilogue == "tanh":
            x_ref, w_ref, o_ref = refs
        elif epilogue == "in_relu":
            x_ref, w_ref, g_ref, b_ref, o_ref = refs
        else:  # "in_res"
            x_ref, w_ref, g_ref, b_ref, r_ref, o_ref = refs

        gc = o_ref.shape[-1]                      # groups * Cout

        # ---- conv: sum of shifted-window matmuls (bf16 x bf16 -> f32) ----
        acc = jnp.zeros((rows, gc), jnp.float32)
        for t, off in enumerate(offsets):
            win = x_ref[0, pl.ds(off, rows), :]   # (rows, Cin) bf16
            acc = acc + jnp.dot(win, w_ref[t],
                                preferred_element_type=jnp.float32)

        if epilogue == "tanh":
            y = jnp.tanh(acc)
        else:
            # ---- fused InstanceNorm (f32 stats, masked to valid columns,
            #      pooled over phase groups for the transposed-conv case) ----
            ridx = lax.broadcasted_iota(jnp.int32, (rows, gc), 0)
            mask = jnp.where((ridx % wp) < wo, 1.0, 0.0)
            inv_count = 1.0 / float((rows // wp) * wo)

            def pool(v):                          # (1, gc) -> per-channel stat
                if groups == 1:
                    return v
                c = gc // groups
                p = v[:, 0:c]
                for k in range(1, groups):
                    p = p + v[:, k * c:(k + 1) * c]
                p = p * (1.0 / groups)
                return jnp.concatenate([p] * groups, axis=1)

            mean = pool(jnp.sum(acc * mask, axis=0, keepdims=True) * inv_count)
            xc = acc - mean
            var = pool(jnp.sum(xc * xc * mask, axis=0, keepdims=True)
                       * inv_count)
            g = g_ref[...].astype(jnp.float32)
            b = b_ref[...].astype(jnp.float32)
            if groups > 1:
                g = jnp.concatenate([g] * groups, axis=1)
                b = jnp.concatenate([b] * groups, axis=1)
            y = xc * lax.rsqrt(var + 1e-5) * g + b
            if epilogue == "in_relu":
                y = jnp.maximum(y, 0.0)
            else:  # "in_res": residual add (residual supplied pre-flattened)
                y = y + r_ref[0].astype(jnp.float32)

        o_ref[0] = y.astype(o_ref.dtype)

    return kernel


def _fused_conv(x_nhwc, w_taps, *, kh, kw, pad, epilogue, groups=1,
                gamma=None, beta=None, residual=None, out_dtype=jnp.bfloat16):
    """Stride-1 conv with fused epilogue.

    x_nhwc : (N, H, W, Cin)  bf16 activations (unpadded).
    w_taps : (kh*kw, Cin, groups*Cout) bf16, tap-major (di*kw + dj).
    returns: (N, Ho, Wo, groups*Cout) in `out_dtype`.
    """
    N, H, W, Cin = x_nhwc.shape
    taps, _, GC = w_taps.shape
    Hp, Wp = H + 2 * pad, W + 2 * pad
    Ho, Wo = Hp - kh + 1, Wp - kw + 1
    rows = Ho * Wp

    xp = x_nhwc
    if pad:
        xp = jnp.pad(xp, ((0, 0), (pad, pad), (pad, pad), (0, 0)))
    xf = xp.reshape(N, Hp * Wp, Cin)
    if kw > 1:                                    # tail rows for the last taps
        xf = jnp.pad(xf, ((0, 0), (0, kw - 1), (0, 0)))
    rows_in = xf.shape[1]

    offsets = [di * Wp + dj for di in range(kh) for dj in range(kw)]
    kernel = _make_conv_kernel(offsets, rows, Wp, Wo, groups, epilogue)

    in_specs = [
        pl.BlockSpec((1, rows_in, Cin), lambda n: (n, 0, 0)),
        pl.BlockSpec((taps, Cin, GC), lambda n: (0, 0, 0)),
    ]
    args = [xf, w_taps]
    if epilogue != "tanh":
        C = GC // groups
        in_specs += [pl.BlockSpec((1, C), lambda n: (0, 0)),
                     pl.BlockSpec((1, C), lambda n: (0, 0))]
        args += [gamma.reshape(1, C).astype(jnp.float32),
                 beta.reshape(1, C).astype(jnp.float32)]
    if epilogue == "in_res":
        r = jnp.pad(residual, ((0, 0), (0, 0), (0, Wp - Wo), (0, 0)))
        args += [r.reshape(N, rows, GC)]
        in_specs += [pl.BlockSpec((1, rows, GC), lambda n: (n, 0, 0))]

    out = pl.pallas_call(
        kernel,
        grid=(N,),
        in_specs=in_specs,
        out_specs=pl.BlockSpec((1, rows, GC), lambda n: (n, 0, 0)),
        out_shape=jax.ShapeDtypeStruct((N, rows, GC), out_dtype),
        compiler_params=pltpu.CompilerParams(
            dimension_semantics=("parallel",)),
    )(*args)
    # drop the (kw-1) wrap-around columns of the flat-row formulation
    return out.reshape(N, Ho, Wp, GC)[:, :, :Wo, :]


# -----------------------------------------------------------------------------
# Layer wrappers (PyTorch weight layouts in, NHWC bf16 activations throughout).
# -----------------------------------------------------------------------------
def conv3x3(x, w_pt, *, epilogue, gamma=None, beta=None, residual=None,
            out_dtype=jnp.bfloat16):
    """Conv2d(k=3, s=1, p=1, bias=False). w_pt: (Cout, Cin, 3, 3)."""
    Cout, Cin, kh, kw = w_pt.shape
    w = jnp.transpose(w_pt, (2, 3, 1, 0)).reshape(kh * kw, Cin, Cout)
    return _fused_conv(x, w.astype(jnp.bfloat16), kh=kh, kw=kw, pad=1,
                       epilogue=epilogue, gamma=gamma, beta=beta,
                       residual=residual, out_dtype=out_dtype)


def conv4x4s2_in_relu(x, w_pt, gamma, beta):
    """Conv2d(k=4, s=2, p=1) -> space-to-depth + 2x2 stride-1 conv."""
    Cout, Cin, _, _ = w_pt.shape
    N, H, W, _ = x.shape
    xp = jnp.pad(x, ((0, 0), (1, 1), (1, 1), (0, 0)))
    Hp, Wp = H + 2, W + 2
    x2 = xp.reshape(N, Hp // 2, 2, Wp // 2, 2, Cin)
    x2 = x2.transpose(0, 1, 3, 2, 4, 5).reshape(N, Hp // 2, Wp // 2, 4 * Cin)
    w = jnp.transpose(w_pt, (2, 3, 1, 0))                       # (4,4,Cin,Cout)
    w2 = w.reshape(2, 2, 2, 2, Cin, Cout).transpose(0, 2, 1, 3, 4, 5)
    w2 = w2.reshape(4, 4 * Cin, Cout)
    return _fused_conv(x2, w2.astype(jnp.bfloat16), kh=2, kw=2, pad=0,
                       epilogue="in_relu", gamma=gamma, beta=beta)


def conv_transpose4x4s2_in_relu(x, w_pt, gamma, beta):
    """ConvTranspose2d(k=4, s=2, p=1) as a phase-packed 3x3 conv + depth-to-space.

    out[2u+r, 2v+s] = sum_{a,b} pad(X,1)[u+r+a, v+s+b] @ Wflip[r+2a, s+2b]
    """
    Cin, Cout, _, _ = w_pt.shape
    wf = jnp.flip(w_pt, axis=(-2, -1))            # Wflip[ci,co,i,j]=W[ci,co,3-i,3-j]
    k3 = jnp.zeros((3, 3, Cin, 2, 2, Cout), w_pt.dtype)
    for th in range(3):
        for tw in range(3):
            for r in range(2):
                for s in range(2):
                    i, j = 2 * th - r, 2 * tw - s
                    if 0 <= i <= 3 and 0 <= j <= 3:
                        k3 = k3.at[th, tw, :, r, s, :].set(wf[:, :, i, j])
    k3 = k3.reshape(9, Cin, 4 * Cout)
    y = _fused_conv(x, k3.astype(jnp.bfloat16), kh=3, kw=3, pad=1,
                    epilogue="in_relu", groups=4, gamma=gamma, beta=beta)
    N, H, W, _ = x.shape                          # depth-to-space interleave
    y = y.reshape(N, H, W, 2, 2, Cout).transpose(0, 1, 3, 2, 4, 5)
    return y.reshape(N, 2 * H, 2 * W, Cout)


# -----------------------------------------------------------------------------
# Generator: parameter init + forward
# -----------------------------------------------------------------------------
def init_params(key, conv_dim, repeat_num, num_down, num_up, num_init, c_dim):
    params = {}
    keys = iter(jax.random.split(key, 128))

    def conv_w(cout, cin, k):
        return (jax.random.normal(next(keys), (cout, cin, k, k), jnp.float32)
                * 0.1)

    in_ch = 3 + c_dim
    cur = conv_dim
    for i in range(num_init):
        params[f"enc{i}_w"] = conv_w(conv_dim, in_ch if i == 0 else conv_dim, 3)
        params[f"enc{i}_g"] = jnp.ones((conv_dim,), jnp.float32)
        params[f"enc{i}_b"] = jnp.zeros((conv_dim,), jnp.float32)
    for i in range(num_down):
        params[f"down{i}_w"] = conv_w(cur * 2, cur, 4)
        params[f"down{i}_g"] = jnp.ones((cur * 2,), jnp.float32)
        params[f"down{i}_b"] = jnp.zeros((cur * 2,), jnp.float32)
        cur *= 2
    for i in range(repeat_num):
        params[f"res{i}_w1"] = conv_w(cur, cur, 3)
        params[f"res{i}_g1"] = jnp.ones((cur,), jnp.float32)
        params[f"res{i}_b1"] = jnp.zeros((cur,), jnp.float32)
        params[f"res{i}_w2"] = conv_w(cur, cur, 3)
        params[f"res{i}_g2"] = jnp.ones((cur,), jnp.float32)
        params[f"res{i}_b2"] = jnp.zeros((cur,), jnp.float32)
    for i in range(num_up):
        # ConvTranspose2d weight layout: (Cin, Cout, kh, kw)
        params[f"up{i}_w"] = (jax.random.normal(
            next(keys), (cur, cur // 2, 4, 4), jnp.float32) * 0.1)
        params[f"up{i}_g"] = jnp.ones((cur // 2,), jnp.float32)
        params[f"up{i}_b"] = jnp.zeros((cur // 2,), jnp.float32)
        cur //= 2
    params["out_w"] = conv_w(3, cur, 3)
    return params


def make_generator(conv_dim=8, repeat_num=2, num_down=2, num_up=2,
                   num_init=1, c_dim=1):
    def forward(params, x, c):
        N, _, H, W = x.shape
        # c.view(N,Cc,1,1).repeat(1,1,H,W); cat on channels; go channels-last.
        cmap = jnp.broadcast_to(c[:, :, None, None], (N, c.shape[1], H, W))
        h = jnp.concatenate([x, cmap], axis=1)
        h = jnp.transpose(h, (0, 2, 3, 1)).astype(jnp.bfloat16)   # NHWC bf16

        # ----- encoder -----  (Dropout(p=0.0) is identity)
        for i in range(num_init):
            h = conv3x3(h, params[f"enc{i}_w"], epilogue="in_relu",
                        gamma=params[f"enc{i}_g"], beta=params[f"enc{i}_b"])
        for i in range(num_down):
            h = conv4x4s2_in_relu(h, params[f"down{i}_w"],
                                  params[f"down{i}_g"], params[f"down{i}_b"])
        for i in range(repeat_num):
            t = conv3x3(h, params[f"res{i}_w1"], epilogue="in_relu",
                        gamma=params[f"res{i}_g1"], beta=params[f"res{i}_b1"])
            h = conv3x3(t, params[f"res{i}_w2"], epilogue="in_res",
                        gamma=params[f"res{i}_g2"], beta=params[f"res{i}_b2"],
                        residual=h)

        # ----- decoder -----
        d = h
        for i in range(num_up):
            d = conv_transpose4x4s2_in_relu(d, params[f"up{i}_w"],
                                            params[f"up{i}_g"],
                                            params[f"up{i}_b"])
        d = conv3x3(d, params["out_w"], epilogue="tanh",
                    out_dtype=jnp.float32)                        # fused tanh

        out = jnp.transpose(d, (0, 3, 1, 2))                      # NCHW f32
        h_out = jnp.transpose(h, (0, 3, 1, 2)).astype(jnp.float32)
        return out, h_out

    return forward


# -----------------------------------------------------------------------------
# Pure-XLA reference (same bf16-operand / f32-statistics precision policy)
# used only for the numerical check in __main__.
# -----------------------------------------------------------------------------
def _ref_conv(x, w, stride, pad):
    return lax.conv_general_dilated(
        x.astype(jnp.bfloat16), w.astype(jnp.bfloat16),
        window_strides=(stride, stride), padding=[(pad, pad), (pad, pad)],
        dimension_numbers=("NCHW", "OIHW", "NCHW"),
        preferred_element_type=jnp.float32)


def _ref_conv_t(x, w, stride, pad):
    k = w.shape[-1]
    wf = jnp.flip(w, axis=(-2, -1)).transpose(1, 0, 2, 3)
    return lax.conv_general_dilated(
        x.astype(jnp.bfloat16), wf.astype(jnp.bfloat16),
        window_strides=(1, 1), padding=[(k - 1 - pad, k - 1 - pad)] * 2,
        lhs_dilation=(stride, stride),
        dimension_numbers=("NCHW", "OIHW", "NCHW"),
        preferred_element_type=jnp.float32)


def _ref_in(x, g, b):
    m = jnp.mean(x, axis=(2, 3), keepdims=True)
    v = jnp.mean(jnp.square(x - m), axis=(2, 3), keepdims=True)
    return ((x - m) * lax.rsqrt(v + 1e-5) * g.reshape(1, -1, 1, 1)
            + b.reshape(1, -1, 1, 1))


def make_reference(conv_dim, repeat_num, num_down, num_up, num_init, c_dim):
    def forward(params, x, c):
        N, _, H, W = x.shape
        cmap = jnp.broadcast_to(c[:, :, None, None], (N, c.shape[1], H, W))
        h = jnp.concatenate([x, cmap], axis=1).astype(jnp.bfloat16)
        act = lambda y: y.astype(jnp.bfloat16)
        for i in range(num_init):
            h = act(jnp.maximum(_ref_in(_ref_conv(h, params[f"enc{i}_w"], 1, 1),
                                        params[f"enc{i}_g"],
                                        params[f"enc{i}_b"]), 0.0))
        for i in range(num_down):
            h = act(jnp.maximum(_ref_in(_ref_conv(h, params[f"down{i}_w"], 2, 1),
                                        params[f"down{i}_g"],
                                        params[f"down{i}_b"]), 0.0))
        for i in range(repeat_num):
            t = act(jnp.maximum(_ref_in(_ref_conv(h, params[f"res{i}_w1"], 1, 1),
                                        params[f"res{i}_g1"],
                                        params[f"res{i}_b1"]), 0.0))
            t = _ref_in(_ref_conv(t, params[f"res{i}_w2"], 1, 1),
                        params[f"res{i}_g2"], params[f"res{i}_b2"])
            h = act(t + h.astype(jnp.float32))
        d = h
        for i in range(num_up):
            d = act(jnp.maximum(_ref_in(_ref_conv_t(d, params[f"up{i}_w"], 2, 1),
                                        params[f"up{i}_g"],
                                        params[f"up{i}_b"]), 0.0))
        d = jnp.tanh(_ref_conv(d, params["out_w"], 1, 1))
        return d.astype(jnp.float32), h.astype(jnp.float32)

    return forward


if __name__ == "__main__":
    conv_dim, repeat_num, num_down, num_up, num_init, c_dim = 8, 2, 2, 2, 1, 1
    N, H, W = 2, 16, 16

    key = jax.random.PRNGKey(0)
    kx, kc, kp = jax.random.split(key, 3)
    x = jax.random.normal(kx, (N, 3, H, W), jnp.float32)
    c = jax.random.normal(kc, (N, c_dim), jnp.float32)
    params = init_params(kp, conv_dim, repeat_num, num_down, num_up,
                         num_init, c_dim)

    fwd = jax.jit(make_generator(conv_dim, repeat_num, num_down, num_up,
                                 num_init, c_dim))
    out, h = fwd(params, x, c)
    jax.block_until_ready((out, h))

    bottleneck_dim = conv_dim * (2 ** num_down)
    assert out.shape == (N, 3, H, W), out.shape
    assert h.shape == (N, bottleneck_dim, H // (2 ** num_down),
                       W // (2 ** num_down)), h.shape
    assert bool(jnp.all(jnp.isfinite(out))) and bool(jnp.all(jnp.isfinite(h)))
    assert bool(jnp.all(jnp.abs(out) <= 1.0 + 1e-5))  # tanh range

    # Numerical check against a pure-XLA reference with the same precision policy.
    ref = jax.jit(make_reference(conv_dim, repeat_num, num_down, num_up,
                                 num_init, c_dim))
    out_r, h_r = ref(params, x, c)
    jax.block_until_ready((out_r, h_r))
    assert bool(jnp.allclose(out, out_r, atol=2e-2, rtol=2e-2)), \
        float(jnp.max(jnp.abs(out - out_r)))
    assert bool(jnp.allclose(h, h_r, atol=2e-2, rtol=2e-2)), \
        float(jnp.max(jnp.abs(h - h_r)))

    print("KERNEL_OK")
</pallas_src>

<mosaic_0001>
module attributes {stable_mosaic.version = 11 : i64} {
  func.func @kernel(%arg0: i32, %arg1: memref<1x326x4xbf16, #tpu.memory_space<vmem>>, %arg2: memref<9x4x8xbf16, #tpu.memory_space<vmem>>, %arg3: memref<1x8xf32, #tpu.memory_space<vmem>>, %arg4: memref<1x8xf32, #tpu.memory_space<vmem>>, %arg5: memref<1x288x8xbf16, #tpu.memory_space<vmem>>) attributes {dimension_semantics = [#tpu.dimension_semantics<parallel>], iteration_bounds = array<i64: 2>, scalar_prefetch = 0 : i64, scratch_operands = 0 : i64, tpu.core_type = #tpu.core_type<tc>, window_params = [{transform_indices = @transform_0, window_bounds = array<i64: 1, 326, 4>}, {pipeline_mode = #tpu.pipeline_mode<synchronous>, transform_indices = @transform_1, window_bounds = array<i64: 9, 4, 8>}, {pipeline_mode = #tpu.pipeline_mode<synchronous>, transform_indices = @transform_2, window_bounds = array<i64: 1, 8>}, {pipeline_mode = #tpu.pipeline_mode<synchronous>, transform_indices = @transform_3, window_bounds = array<i64: 1, 8>}, {transform_indices = @transform_4, window_bounds = array<i64: 1, 288, 8>}]} {
    %cst = arith.constant 0.000000e+00 : f32
    %0 = vector.broadcast %cst : f32 to vector<288x8xf32>
    %c0 = arith.constant 0 : index
    %c0_0 = arith.constant 0 : index
    %c0_1 = arith.constant 0 : index
    %1 = vector.load %arg1[%c0, %c0_0, %c0_1] : memref<1x326x4xbf16, #tpu.memory_space<vmem>>, vector<1x288x4xbf16>
    %2 = vector.shape_cast %1 : vector<1x288x4xbf16> to vector<288x4xbf16>
    %c0_2 = arith.constant 0 : index
    %c0_3 = arith.constant 0 : index
    %c0_4 = arith.constant 0 : index
    %3 = vector.load %arg2[%c0_2, %c0_3, %c0_4] : memref<9x4x8xbf16, #tpu.memory_space<vmem>>, vector<1x4x8xbf16>
    %4 = vector.shape_cast %3 : vector<1x4x8xbf16> to vector<4x8xbf16>
    %cst_5 = arith.constant dense<0.000000e+00> : vector<288x8xf32>
    %5 = tpu.matmul %2, %4, %cst_5 {dimension_numbers = #tpu.dot_dimension_numbers<[1], [0], [0], [1], [0, 0, 1, 1], [], []>} : vector<288x4xbf16>, vector<4x8xbf16>, vector<288x8xf32> -> vector<288x8xf32>
    %6 = arith.addf %0, %5 : vector<288x8xf32>
    %c0_6 = arith.constant 0 : index
    %c1 = arith.constant 1 : index
    %c0_7 = arith.constant 0 : index
    %7 = vector.load %arg1[%c0_6, %c1, %c0_7] : memref<1x326x4xbf16, #tpu.memory_space<vmem>>, vector<1x288x4xbf16>
    %8 = vector.shape_cast %7 : vector<1x288x4xbf16> to vector<288x4xbf16>
    %c1_8 = arith.constant 1 : index
    %c0_9 = arith.constant 0 : index
    %c0_10 = arith.constant 0 : index
    %9 = vector.load %arg2[%c1_8, %c0_9, %c0_10] : memref<9x4x8xbf16, #tpu.memory_space<vmem>>, vector<1x4x8xbf16>
    %10 = vector.shape_cast %9 : vector<1x4x8xbf16> to vector<4x8xbf16>
    %cst_11 = arith.constant dense<0.000000e+00> : vector<288x8xf32>
    %11 = tpu.matmul %8, %10, %cst_11 {dimension_numbers = #tpu.dot_dimension_numbers<[1], [0], [0], [1], [0, 0, 1, 1], [], []>} : vector<288x4xbf16>, vector<4x8xbf16>, vector<288x8xf32> -> vector<288x8xf32>
    %12 = arith.addf %6, %11 : vector<288x8xf32>
    %c0_12 = arith.constant 0 : index
    %c2 = arith.constant 2 : index
    %c0_13 = arith.constant 0 : index
    %13 = vector.load %arg1[%c0_12, %c2, %c0_13] : memref<1x326x4xbf16, #tpu.memory_space<vmem>>, vector<1x288x4xbf16>
    %14 = vector.shape_cast %13 : vector<1x288x4xbf16> to vector<288x4xbf16>
    %c2_14 = arith.constant 2 : index
    %c0_15 = arith.constant 0 : index
    %c0_16 = arith.constant 0 : index
    %15 = vector.load %arg2[%c2_14, %c0_15, %c0_16] : memref<9x4x8xbf16, #tpu.memory_space<vmem>>, vector<1x4x8xbf16>
    %16 = vector.shape_cast %15 : vector<1x4x8xbf16> to vector<4x8xbf16>
    %cst_17 = arith.constant dense<0.000000e+00> : vector<288x8xf32>
    %17 = tpu.matmul %14, %16, %cst_17 {dimension_numbers = #tpu.dot_dimension_numbers<[1], [0], [0], [1], [0, 0, 1, 1], [], []>} : vector<288x4xbf16>, vector<4x8xbf16>, vector<288x8xf32> -> vector<288x8xf32>
    %18 = arith.addf %12, %17 : vector<288x8xf32>
    %c0_18 = arith.constant 0 : index
    %c18 = arith.constant 18 : index
    %c0_19 = arith.constant 0 : index
    %19 = vector.load %arg1[%c0_18, %c18, %c0_19] : memref<1x326x4xbf16, #tpu.memory_space<vmem>>, vector<1x288x4xbf16>
    %20 = vector.shape_cast %19 : vector<1x288x4xbf16> to vector<288x4xbf16>
    %c3 = arith.constant 3 : index
    %c0_20 = arith.constant 0 : index
    %c0_21 = arith.constant 0 : index
    %21 = vector.load %arg2[%c3, %c0_20, %c0_21] : memref<9x4x8xbf16, #tpu.memory_space<vmem>>, vector<1x4x8xbf16>
    %22 = vector.shape_cast %21 : vector<1x4x8xbf16> to vector<4x8xbf16>
    %cst_22 = arith.constant dense<0.000000e+00> : vector<288x8xf32>
    %23 = tpu.matmul %20, %22, %cst_22 {dimension_numbers = #tpu.dot_dimension_numbers<[1], [0], [0], [1], [0, 0, 1, 1], [], []>} : vector<288x4xbf16>, vector<4x8xbf16>, vector<288x8xf32> -> vector<288x8xf32>
    %24 = arith.addf %18, %23 : vector<288x8xf32>
    %c0_23 = arith.constant 0 : index
    %c19 = arith.constant 19 : index
    %c0_24 = arith.constant 0 : index
    %25 = vector.load %arg1[%c0_23, %c19, %c0_24] : memref<1x326x4xbf16, #tpu.memory_space<vmem>>, vector<1x288x4xbf16>
    %26 = vector.shape_cast %25 : vector<1x288x4xbf16> to vector<288x4xbf16>
    %c4 = arith.constant 4 : index
    %c0_25 = arith.constant 0 : index
    %c0_26 = arith.constant 0 : index
    %27 = vector.load %arg2[%c4, %c0_25, %c0_26] : memref<9x4x8xbf16, #tpu.memory_space<vmem>>, vector<1x4x8xbf16>
    %28 = vector.shape_cast %27 : vector<1x4x8xbf16> to vector<4x8xbf16>
    %cst_27 = arith.constant dense<0.000000e+00> : vector<288x8xf32>
    %29 = tpu.matmul %26, %28, %cst_27 {dimension_numbers = #tpu.dot_dimension_numbers<[1], [0], [0], [1], [0, 0, 1, 1], [], []>} : vector<288x4xbf16>, vector<4x8xbf16>, vector<288x8xf32> -> vector<288x8xf32>
    %30 = arith.addf %24, %29 : vector<288x8xf32>
    %c0_28 = arith.constant 0 : index
    %c20 = arith.constant 20 : index
    %c0_29 = arith.constant 0 : index
    %31 = vector.load %arg1[%c0_28, %c20, %c0_29] : memref<1x326x4xbf16, #tpu.memory_space<vmem>>, vector<1x288x4xbf16>
    %32 = vector.shape_cast %31 : vector<1x288x4xbf16> to vector<288x4xbf16>
    %c5 = arith.constant 5 : index
    %c0_30 = arith.constant 0 : index
    %c0_31 = arith.constant 0 : index
    %33 = vector.load %arg2[%c5, %c0_30, %c0_31] : memref<9x4x8xbf16, #tpu.memory_space<vmem>>, vector<1x4x8xbf16>
    %34 = vector.shape_cast %33 : vector<1x4x8xbf16> to vector<4x8xbf16>
    %cst_32 = arith.constant dense<0.000000e+00> : vector<288x8xf32>
    %35 = tpu.matmul %32, %34, %cst_32 {dimension_numbers = #tpu.dot_dimension_numbers<[1], [0], [0], [1], [0, 0, 1, 1], [], []>} : vector<288x4xbf16>, vector<4x8xbf16>, vector<288x8xf32> -> vector<288x8xf32>
    %36 = arith.addf %30, %35 : vector<288x8xf32>
    %c0_33 = arith.constant 0 : index
    %c36 = arith.constant 36 : index
    %c0_34 = arith.constant 0 : index
    %37 = vector.load %arg1[%c0_33, %c36, %c0_34] : memref<1x326x4xbf16, #tpu.memory_space<vmem>>, vector<1x288x4xbf16>
    %38 = vector.shape_cast %37 : vector<1x288x4xbf16> to vector<288x4xbf16>
    %c6 = arith.constant 6 : index
    %c0_35 = arith.constant 0 : index
    %c0_36 = arith.constant 0 : index
    %39 = vector.load %arg2[%c6, %c0_35, %c0_36] : memref<9x4x8xbf16, #tpu.memory_space<vmem>>, vector<1x4x8xbf16>
    %40 = vector.shape_cast %39 : vector<1x4x8xbf16> to vector<4x8xbf16>
    %cst_37 = arith.constant dense<0.000000e+00> : vector<288x8xf32>
    %41 = tpu.matmul %38, %40, %cst_37 {dimension_numbers = #tpu.dot_dimension_numbers<[1], [0], [0], [1], [0, 0, 1, 1], [], []>} : vector<288x4xbf16>, vector<4x8xbf16>, vector<288x8xf32> -> vector<288x8xf32>
    %42 = arith.addf %36, %41 : vector<288x8xf32>
    %c0_38 = arith.constant 0 : index
    %c37 = arith.constant 37 : index
    %c0_39 = arith.constant 0 : index
    %43 = vector.load %arg1[%c0_38, %c37, %c0_39] : memref<1x326x4xbf16, #tpu.memory_space<vmem>>, vector<1x288x4xbf16>
    %44 = vector.shape_cast %43 : vector<1x288x4xbf16> to vector<288x4xbf16>
    %c7 = arith.constant 7 : index
    %c0_40 = arith.constant 0 : index
    %c0_41 = arith.constant 0 : index
    %45 = vector.load %arg2[%c7, %c0_40, %c0_41] : memref<9x4x8xbf16, #tpu.memory_space<vmem>>, vector<1x4x8xbf16>
    %46 = vector.shape_cast %45 : vector<1x4x8xbf16> to vector<4x8xbf16>
    %cst_42 = arith.constant dense<0.000000e+00> : vector<288x8xf32>
    %47 = tpu.matmul %44, %46, %cst_42 {dimension_numbers = #tpu.dot_dimension_numbers<[1], [0], [0], [1], [0, 0, 1, 1], [], []>} : vector<288x4xbf16>, vector<4x8xbf16>, vector<288x8xf32> -> vector<288x8xf32>
    %48 = arith.addf %42, %47 : vector<288x8xf32>
    %c0_43 = arith.constant 0 : index
    %c38 = arith.constant 38 : index
    %c0_44 = arith.constant 0 : index
    %49 = vector.load %arg1[%c0_43, %c38, %c0_44] : memref<1x326x4xbf16, #tpu.memory_space<vmem>>, vector<1x288x4xbf16>
    %50 = vector.shape_cast %49 : vector<1x288x4xbf16> to vector<288x4xbf16>
    %c8 = arith.constant 8 : index
    %c0_45 = arith.constant 0 : index
    %c0_46 = arith.constant 0 : index
    %51 = vector.load %arg2[%c8, %c0_45, %c0_46] : memref<9x4x8xbf16, #tpu.memory_space<vmem>>, vector<1x4x8xbf16>
    %52 = vector.shape_cast %51 : vector<1x4x8xbf16> to vector<4x8xbf16>
    %cst_47 = arith.constant dense<0.000000e+00> : vector<288x8xf32>
    %53 = tpu.matmul %50, %52, %cst_47 {dimension_numbers = #tpu.dot_dimension_numbers<[1], [0], [0], [1], [0, 0, 1, 1], [], []>} : vector<288x4xbf16>, vector<4x8xbf16>, vector<288x8xf32> -> vector<288x8xf32>
    %54 = arith.addf %48, %53 : vector<288x8xf32>
    %55 = tpu.iota {dimensions = array<i32: 0>} : vector<288x8xi32>
    %c18_i32 = arith.constant 18 : i32
    %c0_i32 = arith.constant 0 : i32
    %56 = arith.cmpi eq, %c18_i32, %c0_i32 : i32
    %c1_i32 = arith.constant 1 : i32
    %57 = arith.select %56, %c1_i32, %c18_i32 : i32
    %58 = vector.broadcast %57 : i32 to vector<288x8xi32>
    %59 = arith.remsi %55, %58 : vector<288x8xi32>
    %c0_i32_48 = arith.constant 0 : i32
    %60 = vector.broadcast %c0_i32_48 : i32 to vector<288x8xi32>
    %61 = arith.cmpi ne, %59, %60 : vector<288x8xi32>
    %c0_i32_49 = arith.constant 0 : i32
    %62 = vector.broadcast %c0_i32_49 : i32 to vector<288x8xi32>
    %63 = arith.cmpi slt, %59, %62 : vector<288x8xi32>
    %c0_i32_50 = arith.constant 0 : i32
    %64 = arith.cmpi slt, %57, %c0_i32_50 : i32
    %65 = vector.broadcast %64 : i1 to vector<288x8xi1>
    %66 = vector.broadcast %65 : vector<288x8xi1> to vector<288x8xi1>
    %67 = arith.xori %63, %66 : vector<288x8xi1>
    %68 = arith.andi %67, %61 : vector<288x8xi1>
    %69 = vector.broadcast %57 : i32 to vector<288x8xi32>
    %70 = arith.addi %59, %69 : vector<288x8xi32>
    %71 = arith.select %68, %70, %59 : vector<288x8xi1>, vector<288x8xi32>
    %c16_i32 = arith.constant 16 : i32
    %72 = vector.broadcast %c16_i32 : i32 to vector<288x8xi32>
    %73 = arith.cmpi slt, %71, %72 : vector<288x8xi32>
    %cst_51 = arith.constant 1.000000e+00 : f32
    %cst_52 = arith.constant 0.000000e+00 : f32
    %74 = vector.broadcast %cst_51 : f32 to vector<288x8xf32>
    %75 = vector.broadcast %cst_52 : f32 to vector<288x8xf32>
    %76 = arith.select %73, %74, %75 : vector<288x8xi1>, vector<288x8xf32>
    %77 = arith.mulf %54, %76 : vector<288x8xf32>
    %cst_53 = arith.constant dense<0.000000e+00> : vector<8xf32>
    %78 = vector.multi_reduction <add>, %77, %cst_53 [0] : vector<288x8xf32> to vector<8xf32>
    %79 = vector.shape_cast %78 : vector<8xf32> to vector<1x8xf32>
    %cst_54 = arith.constant 3.906250e-03 : f32
    %80 = vector.broadcast %cst_54 : f32 to vector<1x8xf32>
    %81 = arith.mulf %79, %80 : vector<1x8xf32>
    %82 = vector.broadcast %81 : vector<1x8xf32> to vector<288x8xf32>
    %83 = arith.subf %54, %82 : vector<288x8xf32>
    %84 = arith.mulf %83, %83 : vector<288x8xf32>
    %85 = arith.mulf %84, %76 : vector<288x8xf32>
    %cst_55 = arith.constant dense<0.000000e+00> : vector<8xf32>
    %86 = vector.multi_reduction <add>, %85, %cst_55 [0] : vector<288x8xf32> to vector<8xf32>
    %87 = vector.shape_cast %86 : vector<8xf32> to vector<1x8xf32>
    %cst_56 = arith.constant 3.906250e-03 : f32
    %88 = vector.broadcast %cst_56 : f32 to vector<1x8xf32>
    %89 = arith.mulf %87, %88 : vector<1x8xf32>
    %c0_57 = arith.constant 0 : index
    %c0_58 = arith.constant 0 : index
    %90 = vector.load %arg3[%c0_57, %c0_58] : memref<1x8xf32, #tpu.memory_space<vmem>>, vector<1x8xf32>
    %c0_59 = arith.constant 0 : index
    %c0_60 = arith.constant 0 : index
    %91 = vector.load %arg4[%c0_59, %c0_60] : memref<1x8xf32, #tpu.memory_space<vmem>>, vector<1x8xf32>
    %cst_61 = arith.constant 9.99999974E-6 : f32
    %92 = vector.broadcast %cst_61 : f32 to vector<1x8xf32>
    %93 = arith.addf %89, %92 : vector<1x8xf32>
    %94 = math.rsqrt %93 : vector<1x8xf32>
    %95 = vector.broadcast %94 : vector<1x8xf32> to vector<288x8xf32>
    %96 = arith.mulf %83, %95 : vector<288x8xf32>
    %97 = vector.broadcast %90 : vector<1x8xf32> to vector<288x8xf32>
    %98 = arith.mulf %96, %97 : vector<288x8xf32>
    %99 = vector.broadcast %91 : vector<1x8xf32> to vector<288x8xf32>
    %100 = arith.addf %98, %99 : vector<288x8xf32>
    %cst_62 = arith.constant 0.000000e+00 : f32
    %101 = vector.broadcast %cst_62 : f32 to vector<288x8xf32>
    %102 = arith.maximumf %100, %101 : vector<288x8xf32>
    %103 = arith.truncf %102 : vector<288x8xf32> to vector<288x8xbf16>
    %c0_63 = arith.constant 0 : index
    %c0_64 = arith.constant 0 : index
    %c0_65 = arith.constant 0 : index
    %104 = vector.load %arg5[%c0_63, %c0_64, %c0_65] : memref<1x288x8xbf16, #tpu.memory_space<vmem>>, vector<1x288x8xbf16>
    %105 = vector.shape_cast %104 : vector<1x288x8xbf16> to vector<288x8xbf16>
    %106 = vector.shape_cast %103 : vector<288x8xbf16> to vector<1x288x8xbf16>
    tpu.vector_store %arg5[%c0_63, %c0_64, %c0_65], %106 {strides = array<i32>} : memref<1x288x8xbf16, #tpu.memory_space<vmem>>, vector<1x288x8xbf16>,
    return
  }
  func.func @transform_0(%arg0: i32) -> (i32, i32, i32) {
    %c0_i32 = arith.constant 0 : i32
    %c0_i32_0 = arith.constant 0 : i32
    %c0_i32_1 = arith.constant 0 : i32
    return %arg0, %c0_i32, %c0_i32_0 : i32, i32, i32
  }
  func.func @transform_1(%arg0: i32) -> (i32, i32, i32) {
    %c0_i32 = arith.constant 0 : i32
    %c0_i32_0 = arith.constant 0 : i32
    %c0_i32_1 = arith.constant 0 : i32
    %c0_i32_2 = arith.constant 0 : i32
    return %c0_i32, %c0_i32_0, %c0_i32_1 : i32, i32, i32
  }
  func.func @transform_2(%arg0: i32) -> (i32, i32) {
    %c0_i32 = arith.constant 0 : i32
    %c0_i32_0 = arith.constant 0 : i32
    %c0_i32_1 = arith.constant 0 : i32
    return %c0_i32, %c0_i32_0 : i32, i32
  }
  func.func @transform_3(%arg0: i32) -> (i32, i32) {
    %c0_i32 = arith.constant 0 : i32
    %c0_i32_0 = arith.constant 0 : i32
    %c0_i32_1 = arith.constant 0 : i32
    return %c0_i32, %c0_i32_0 : i32, i32
  }
  func.func @transform_4(%arg0: i32) -> (i32, i32, i32) {
    %c0_i32 = arith.constant 0 : i32
    %c0_i32_0 = arith.constant 0 : i32
    %c0_i32_1 = arith.constant 0 : i32
    return %arg0, %c0_i32, %c0_i32_0 : i32, i32, i32
  }
}

module attributes {stable_mosaic.version = 11 : i64} {
  func.func @kernel(%arg0: i32, %arg1: memref<1x82x32xbf16, #tpu.memory_space<vmem>>, %arg2: memref<4x32x16xbf16, #tpu.memory_space<vmem>>, %arg3: memref<1x16xf32, #tpu.memory_space<vmem>>, %arg4: memref<1x16xf32, #tpu.memory_space<vmem>>, %arg5: memref<1x72x16xbf16, #tpu.memory_space<vmem>>) attributes {dimension_semantics = [#tpu.dimension_semantics<parallel>], iteration_bounds = array<i64: 2>, scalar_prefetch = 0 : i64, scratch_operands = 0 : i64, tpu.core_type = #tpu.core_type<tc>, window_params = [{transform_indices = @transform_0, window_bounds = array<i64: 1, 82, 32>}, {pipeline_mode = #tpu.pipeline_mode<synchronous>, transform_indices = @transform_1, window_bounds = array<i64: 4, 32, 16>}, {pipeline_mode = #tpu.pipeline_mode<synchronous>, transform_indices = @transform_2, window_bounds = array<i64: 1, 16>}, {pipeline_mode = #tpu.pipeline_mode<synchronous>, transform_indices = @transform_3, window_bounds = array<i64: 1, 16>}, {transform_indices = @transform_4, window_bounds = array<i64: 1, 72, 16>}]} {
    %cst = arith.constant 0.000000e+00 : f32
    %0 = vector.broadcast %cst : f32 to vector<72x16xf32>
    %c0 = arith.constant 0 : index
    %c0_0 = arith.constant 0 : index
    %c0_1 = arith.constant 0 : index
    %1 = vector.load %arg1[%c0, %c0_0, %c0_1] : memref<1x82x32xbf16, #tpu.memory_space<vmem>>, vector<1x72x32xbf16>
    %2 = vector.shape_cast %1 : vector<1x72x32xbf16> to vector<72x32xbf16>
    %c0_2 = arith.constant 0 : index
    %c0_3 = arith.constant 0 : index
    %c0_4 = arith.constant 0 : index
    %3 = vector.load %arg2[%c0_2, %c0_3, %c0_4] : memref<4x32x16xbf16, #tpu.memory_space<vmem>>, vector<1x32x16xbf16>
    %4 = vector.shape_cast %3 : vector<1x32x16xbf16> to vector<32x16xbf16>
    %cst_5 = arith.constant dense<0.000000e+00> : vector<72x16xf32>
    %5 = tpu.matmul %2, %4, %cst_5 {dimension_numbers = #tpu.dot_dimension_numbers<[1], [0], [0], [1], [0, 0, 1, 1], [], []>} : vector<72x32xbf16>, vector<32x16xbf16>, vector<72x16xf32> -> vector<72x16xf32>
    %6 = arith.addf %0, %5 : vector<72x16xf32>
    %c0_6 = arith.constant 0 : index
    %c1 = arith.constant 1 : index
    %c0_7 = arith.constant 0 : index
    %7 = vector.load %arg1[%c0_6, %c1, %c0_7] : memref<1x82x32xbf16, #tpu.memory_space<vmem>>, vector<1x72x32xbf16>
    %8 = vector.shape_cast %7 : vector<1x72x32xbf16> to vector<72x32xbf16>
    %c1_8 = arith.constant 1 : index
    %c0_9 = arith.constant 0 : index
    %c0_10 = arith.constant 0 : index
    %9 = vector.load %arg2[%c1_8, %c0_9, %c0_10] : memref<4x32x16xbf16, #tpu.memory_space<vmem>>, vector<1x32x16xbf16>
    %10 = vector.shape_cast %9 : vector<1x32x16xbf16> to vector<32x16xbf16>
    %cst_11 = arith.constant dense<0.000000e+00> : vector<72x16xf32>
    %11 = tpu.matmul %8, %10, %cst_11 {dimension_numbers = #tpu.dot_dimension_numbers<[1], [0], [0], [1], [0, 0, 1, 1], [], []>} : vector<72x32xbf16>, vector<32x16xbf16>, vector<72x16xf32> -> vector<72x16xf32>
    %12 = arith.addf %6, %11 : vector<72x16xf32>
    %c0_12 = arith.constant 0 : index
    %c9 = arith.constant 9 : index
    %c0_13 = arith.constant 0 : index
    %13 = vector.load %arg1[%c0_12, %c9, %c0_13] : memref<1x82x32xbf16, #tpu.memory_space<vmem>>, vector<1x72x32xbf16>
    %14 = vector.shape_cast %13 : vector<1x72x32xbf16> to vector<72x32xbf16>
    %c2 = arith.constant 2 : index
    %c0_14 = arith.constant 0 : index
    %c0_15 = arith.constant 0 : index
    %15 = vector.load %arg2[%c2, %c0_14, %c0_15] : memref<4x32x16xbf16, #tpu.memory_space<vmem>>, vector<1x32x16xbf16>
    %16 = vector.shape_cast %15 : vector<1x32x16xbf16> to vector<32x16xbf16>
    %cst_16 = arith.constant dense<0.000000e+00> : vector<72x16xf32>
    %17 = tpu.matmul %14, %16, %cst_16 {dimension_numbers = #tpu.dot_dimension_numbers<[1], [0], [0], [1], [0, 0, 1, 1], [], []>} : vector<72x32xbf16>, vector<32x16xbf16>, vector<72x16xf32> -> vector<72x16xf32>
    %18 = arith.addf %12, %17 : vector<72x16xf32>
    %c0_17 = arith.constant 0 : index
    %c10 = arith.constant 10 : index
    %c0_18 = arith.constant 0 : index
    %19 = vector.load %arg1[%c0_17, %c10, %c0_18] : memref<1x82x32xbf16, #tpu.memory_space<vmem>>, vector<1x72x32xbf16>
    %20 = vector.shape_cast %19 : vector<1x72x32xbf16> to vector<72x32xbf16>
    %c3 = arith.constant 3 : index
    %c0_19 = arith.constant 0 : index
    %c0_20 = arith.constant 0 : index
    %21 = vector.load %arg2[%c3, %c0_19, %c0_20] : memref<4x32x16xbf16, #tpu.memory_space<vmem>>, vector<1x32x16xbf16>
    %22 = vector.shape_cast %21 : vector<1x32x16xbf16> to vector<32x16xbf16>
    %cst_21 = arith.constant dense<0.000000e+00> : vector<72x16xf32>
    %23 = tpu.matmul %20, %22, %cst_21 {dimension_numbers = #tpu.dot_dimension_numbers<[1], [0], [0], [1], [0, 0, 1, 1], [], []>} : vector<72x32xbf16>, vector<32x16xbf16>, vector<72x16xf32> -> vector<72x16xf32>
    %24 = arith.addf %18, %23 : vector<72x16xf32>
    %25 = tpu.iota {dimensions = array<i32: 0>} : vector<72x16xi32>
    %c9_i32 = arith.constant 9 : i32
    %c0_i32 = arith.constant 0 : i32
    %26 = arith.cmpi eq, %c9_i32, %c0_i32 : i32
    %c1_i32 = arith.constant 1 : i32
    %27 = arith.select %26, %c1_i32, %c9_i32 : i32
    %28 = vector.broadcast %27 : i32 to vector<72x16xi32>
    %29 = arith.remsi %25, %28 : vector<72x16xi32>
    %c0_i32_22 = arith.constant 0 : i32
    %30 = vector.broadcast %c0_i32_22 : i32 to vector<72x16xi32>
    %31 = arith.cmpi ne, %29, %30 : vector<72x16xi32>
    %c0_i32_23 = arith.constant 0 : i32
    %32 = vector.broadcast %c0_i32_23 : i32 to vector<72x16xi32>
    %33 = arith.cmpi slt, %29, %32 : vector<72x16xi32>
    %c0_i32_24 = arith.constant 0 : i32
    %34 = arith.cmpi slt, %27, %c0_i32_24 : i32
    %35 = vector.broadcast %34 : i1 to vector<72x16xi1>
    %36 = vector.broadcast %35 : vector<72x16xi1> to vector<72x16xi1>
    %37 = arith.xori %33, %36 : vector<72x16xi1>
    %38 = arith.andi %37, %31 : vector<72x16xi1>
    %39 = vector.broadcast %27 : i32 to vector<72x16xi32>
    %40 = arith.addi %29, %39 : vector<72x16xi32>
    %41 = arith.select %38, %40, %29 : vector<72x16xi1>, vector<72x16xi32>
    %c8_i32 = arith.constant 8 : i32
    %42 = vector.broadcast %c8_i32 : i32 to vector<72x16xi32>
    %43 = arith.cmpi slt, %41, %42 : vector<72x16xi32>
    %cst_25 = arith.constant 1.000000e+00 : f32
    %cst_26 = arith.constant 0.000000e+00 : f32
    %44 = vector.broadcast %cst_25 : f32 to vector<72x16xf32>
    %45 = vector.broadcast %cst_26 : f32 to vector<72x16xf32>
    %46 = arith.select %43, %44, %45 : vector<72x16xi1>, vector<72x16xf32>
    %47 = arith.mulf %24, %46 : vector<72x16xf32>
    %cst_27 = arith.constant dense<0.000000e+00> : vector<16xf32>
    %48 = vector.multi_reduction <add>, %47, %cst_27 [0] : vector<72x16xf32> to vector<16xf32>
    %49 = vector.shape_cast %48 : vector<16xf32> to vector<1x16xf32>
    %cst_28 = arith.constant 1.562500e-02 : f32
    %50 = vector.broadcast %cst_28 : f32 to vector<1x16xf32>
    %51 = arith.mulf %49, %50 : vector<1x16xf32>
    %52 = vector.broadcast %51 : vector<1x16xf32> to vector<72x16xf32>
    %53 = arith.subf %24, %52 : vector<72x16xf32>
    %54 = arith.mulf %53, %53 : vector<72x16xf32>
    %55 = arith.mulf %54, %46 : vector<72x16xf32>
    %cst_29 = arith.constant dense<0.000000e+00> : vector<16xf32>
    %56 = vector.multi_reduction <add>, %55, %cst_29 [0] : vector<72x16xf32> to vector<16xf32>
    %57 = vector.shape_cast %56 : vector<16xf32> to vector<1x16xf32>
    %cst_30 = arith.constant 1.562500e-02 : f32
    %58 = vector.broadcast %cst_30 : f32 to vector<1x16xf32>
    %59 = arith.mulf %57, %58 : vector<1x16xf32>
    %c0_31 = arith.constant 0 : index
    %c0_32 = arith.constant 0 : index
    %60 = vector.load %arg3[%c0_31, %c0_32] : memref<1x16xf32, #tpu.memory_space<vmem>>, vector<1x16xf32>
    %c0_33 = arith.constant 0 : index
    %c0_34 = arith.constant 0 : index
    %61 = vector.load %arg4[%c0_33, %c0_34] : memref<1x16xf32, #tpu.memory_space<vmem>>, vector<1x16xf32>
    %cst_35 = arith.constant 9.99999974E-6 : f32
    %62 = vector.broadcast %cst_35 : f32 to vector<1x16xf32>
    %63 = arith.addf %59, %62 : vector<1x16xf32>
    %64 = math.rsqrt %63 : vector<1x16xf32>
    %65 = vector.broadcast %64 : vector<1x16xf32> to vector<72x16xf32>
    %66 = arith.mulf %53, %65 : vector<72x16xf32>
    %67 = vector.broadcast %60 : vector<1x16xf32> to vector<72x16xf32>
    %68 = arith.mulf %66, %67 : vector<72x16xf32>
    %69 = vector.broadcast %61 : vector<1x16xf32> to vector<72x16xf32>
    %70 = arith.addf %68, %69 : vector<72x16xf32>
    %cst_36 = arith.constant 0.000000e+00 : f32
    %71 = vector.broadcast %cst_36 : f32 to vector<72x16xf32>
    %72 = arith.maximumf %70, %71 : vector<72x16xf32>
    %73 = arith.truncf %72 : vector<72x16xf32> to vector<72x16xbf16>
    %c0_37 = arith.constant 0 : index
    %c0_38 = arith.constant 0 : index
    %c0_39 = arith.constant 0 : index
    %74 = vector.load %arg5[%c0_37, %c0_38, %c0_39] : memref<1x72x16xbf16, #tpu.memory_space<vmem>>, vector<1x72x16xbf16>
    %75 = vector.shape_cast %74 : vector<1x72x16xbf16> to vector<72x16xbf16>
    %76 = vector.shape_cast %73 : vector<72x16xbf16> to vector<1x72x16xbf16>
    tpu.vector_store %arg5[%c0_37, %c0_38, %c0_39], %76 {strides = array<i32>} : memref<1x72x16xbf16, #tpu.memory_space<vmem>>, vector<1x72x16xbf16>,
    return
  }
  func.func @transform_0(%arg0: i32) -> (i32, i32, i32) {
    %c0_i32 = arith.constant 0 : i32
    %c0_i32_0 = arith.constant 0 : i32
    %c0_i32_1 = arith.constant 0 : i32
    return %arg0, %c0_i32, %c0_i32_0 : i32, i32, i32
  }
  func.func @transform_1(%arg0: i32) -> (i32, i32, i32) {
    %c0_i32 = arith.constant 0 : i32
    %c0_i32_0 = arith.constant 0 : i32
    %c0_i32_1 = arith.constant 0 : i32
    %c0_i32_2 = arith.constant 0 : i32
    return %c0_i32, %c0_i32_0, %c0_i32_1 : i32, i32, i32
  }
  func.func @transform_2(%arg0: i32) -> (i32, i32) {
    %c0_i32 = arith.constant 0 : i32
    %c0_i32_0 = arith.constant 0 : i32
    %c0_i32_1 = arith.constant 0 : i32
    return %c0_i32, %c0_i32_0 : i32, i32
  }
  func.func @transform_3(%arg0: i32) -> (i32, i32) {
    %c0_i32 = arith.constant 0 : i32
    %c0_i32_0 = arith.constant 0 : i32
    %c0_i32_1 = arith.constant 0 : i32
    return %c0_i32, %c0_i32_0 : i32, i32
  }
  func.func @transform_4(%arg0: i32) -> (i32, i32, i32) {
    %c0_i32 = arith.constant 0 : i32
    %c0_i32_0 = arith.constant 0 : i32
    %c0_i32_1 = arith.constant 0 : i32
    return %arg0, %c0_i32, %c0_i32_0 : i32, i32, i32
  }
}

module attributes {stable_mosaic.version = 11 : i64} {
  func.func @kernel(%arg0: i32, %arg1: memref<1x26x64xbf16, #tpu.memory_space<vmem>>, %arg2: memref<4x64x32xbf16, #tpu.memory_space<vmem>>, %arg3: memref<1x32xf32, #tpu.memory_space<vmem>>, %arg4: memref<1x32xf32, #tpu.memory_space<vmem>>, %arg5: memref<1x20x32xbf16, #tpu.memory_space<vmem>>) attributes {dimension_semantics = [#tpu.dimension_semantics<parallel>], iteration_bounds = array<i64: 2>, scalar_prefetch = 0 : i64, scratch_operands = 0 : i64, tpu.core_type = #tpu.core_type<tc>, window_params = [{transform_indices = @transform_0, window_bounds = array<i64: 1, 26, 64>}, {pipeline_mode = #tpu.pipeline_mode<synchronous>, transform_indices = @transform_1, window_bounds = array<i64: 4, 64, 32>}, {pipeline_mode = #tpu.pipeline_mode<synchronous>, transform_indices = @transform_2, window_bounds = array<i64: 1, 32>}, {pipeline_mode = #tpu.pipeline_mode<synchronous>, transform_indices = @transform_3, window_bounds = array<i64: 1, 32>}, {transform_indices = @transform_4, window_bounds = array<i64: 1, 20, 32>}]} {
    %cst = arith.constant 0.000000e+00 : f32
    %0 = vector.broadcast %cst : f32 to vector<20x32xf32>
    %c0 = arith.constant 0 : index
    %c0_0 = arith.constant 0 : index
    %c0_1 = arith.constant 0 : index
    %1 = vector.load %arg1[%c0, %c0_0, %c0_1] : memref<1x26x64xbf16, #tpu.memory_space<vmem>>, vector<1x20x64xbf16>
    %2 = vector.shape_cast %1 : vector<1x20x64xbf16> to vector<20x64xbf16>
    %c0_2 = arith.constant 0 : index
    %c0_3 = arith.constant 0 : index
    %c0_4 = arith.constant 0 : index
    %3 = vector.load %arg2[%c0_2, %c0_3, %c0_4] : memref<4x64x32xbf16, #tpu.memory_space<vmem>>, vector<1x64x32xbf16>
    %4 = vector.shape_cast %3 : vector<1x64x32xbf16> to vector<64x32xbf16>
    %cst_5 = arith.constant dense<0.000000e+00> : vector<20x32xf32>
    %5 = tpu.matmul %2, %4, %cst_5 {dimension_numbers = #tpu.dot_dimension_numbers<[1], [0], [0], [1], [0, 0, 1, 1], [], []>} : vector<20x64xbf16>, vector<64x32xbf16>, vector<20x32xf32> -> vector<20x32xf32>
    %6 = arith.addf %0, %5 : vector<20x32xf32>
    %c0_6 = arith.constant 0 : index
    %c1 = arith.constant 1 : index
    %c0_7 = arith.constant 0 : index
    %7 = vector.load %arg1[%c0_6, %c1, %c0_7] : memref<1x26x64xbf16, #tpu.memory_space<vmem>>, vector<1x20x64xbf16>
    %8 = vector.shape_cast %7 : vector<1x20x64xbf16> to vector<20x64xbf16>
    %c1_8 = arith.constant 1 : index
    %c0_9 = arith.constant 0 : index
    %c0_10 = arith.constant 0 : index
    %9 = vector.load %arg2[%c1_8, %c0_9, %c0_10] : memref<4x64x32xbf16, #tpu.memory_space<vmem>>, vector<1x64x32xbf16>
    %10 = vector.shape_cast %9 : vector<1x64x32xbf16> to vector<64x32xbf16>
    %cst_11 = arith.constant dense<0.000000e+00> : vector<20x32xf32>
    %11 = tpu.matmul %8, %10, %cst_11 {dimension_numbers = #tpu.dot_dimension_numbers<[1], [0], [0], [1], [0, 0, 1, 1], [], []>} : vector<20x64xbf16>, vector<64x32xbf16>, vector<20x32xf32> -> vector<20x32xf32>
    %12 = arith.addf %6, %11 : vector<20x32xf32>
    %c0_12 = arith.constant 0 : index
    %c5 = arith.constant 5 : index
    %c0_13 = arith.constant 0 : index
    %13 = vector.load %arg1[%c0_12, %c5, %c0_13] : memref<1x26x64xbf16, #tpu.memory_space<vmem>>, vector<1x20x64xbf16>
    %14 = vector.shape_cast %13 : vector<1x20x64xbf16> to vector<20x64xbf16>
    %c2 = arith.constant 2 : index
    %c0_14 = arith.constant 0 : index
    %c0_15 = arith.constant 0 : index
    %15 = vector.load %arg2[%c2, %c0_14, %c0_15] : memref<4x64x32xbf16, #tpu.memory_space<vmem>>, vector<1x64x32xbf16>
    %16 = vector.shape_cast %15 : vector<1x64x32xbf16> to vector<64x32xbf16>
    %cst_16 = arith.constant dense<0.000000e+00> : vector<20x32xf32>
    %17 = tpu.matmul %14, %16, %cst_16 {dimension_numbers = #tpu.dot_dimension_numbers<[1], [0], [0], [1], [0, 0, 1, 1], [], []>} : vector<20x64xbf16>, vector<64x32xbf16>, vector<20x32xf32> -> vector<20x32xf32>
    %18 = arith.addf %12, %17 : vector<20x32xf32>
    %c0_17 = arith.constant 0 : index
    %c6 = arith.constant 6 : index
    %c0_18 = arith.constant 0 : index
    %19 = vector.load %arg1[%c0_17, %c6, %c0_18] : memref<1x26x64xbf16, #tpu.memory_space<vmem>>, vector<1x20x64xbf16>
    %20 = vector.shape_cast %19 : vector<1x20x64xbf16> to vector<20x64xbf16>
    %c3 = arith.constant 3 : index
    %c0_19 = arith.constant 0 : index
    %c0_20 = arith.constant 0 : index
    %21 = vector.load %arg2[%c3, %c0_19, %c0_20] : memref<4x64x32xbf16, #tpu.memory_space<vmem>>, vector<1x64x32xbf16>
    %22 = vector.shape_cast %21 : vector<1x64x32xbf16> to vector<64x32xbf16>
    %cst_21 = arith.constant dense<0.000000e+00> : vector<20x32xf32>
    %23 = tpu.matmul %20, %22, %cst_21 {dimension_numbers = #tpu.dot_dimension_numbers<[1], [0], [0], [1], [0, 0, 1, 1], [], []>} : vector<20x64xbf16>, vector<64x32xbf16>, vector<20x32xf32> -> vector<20x32xf32>
    %24 = arith.addf %18, %23 : vector<20x32xf32>
    %25 = tpu.iota {dimensions = array<i32: 0>} : vector<20x32xi32>
    %c5_i32 = arith.constant 5 : i32
    %c0_i32 = arith.constant 0 : i32
    %26 = arith.cmpi eq, %c5_i32, %c0_i32 : i32
    %c1_i32 = arith.constant 1 : i32
    %27 = arith.select %26, %c1_i32, %c5_i32 : i32
    %28 = vector.broadcast %27 : i32 to vector<20x32xi32>
    %29 = arith.remsi %25, %28 : vector<20x32xi32>
    %c0_i32_22 = arith.constant 0 : i32
    %30 = vector.broadcast %c0_i32_22 : i32 to vector<20x32xi32>
    %31 = arith.cmpi ne, %29, %30 : vector<20x32xi32>
    %c0_i32_23 = arith.constant 0 : i32
    %32 = vector.broadcast %c0_i32_23 : i32 to vector<20x32xi32>
    %33 = arith.cmpi slt, %29, %32 : vector<20x32xi32>
    %c0_i32_24 = arith.constant 0 : i32
    %34 = arith.cmpi slt, %27, %c0_i32_24 : i32
    %35 = vector.broadcast %34 : i1 to vector<20x32xi1>
    %36 = vector.broadcast %35 : vector<20x32xi1> to vector<20x32xi1>
    %37 = arith.xori %33, %36 : vector<20x32xi1>
    %38 = arith.andi %37, %31 : vector<20x32xi1>
    %39 = vector.broadcast %27 : i32 to vector<20x32xi32>
    %40 = arith.addi %29, %39 : vector<20x32xi32>
    %41 = arith.select %38, %40, %29 : vector<20x32xi1>, vector<20x32xi32>
    %c4_i32 = arith.constant 4 : i32
    %42 = vector.broadcast %c4_i32 : i32 to vector<20x32xi32>
    %43 = arith.cmpi slt, %41, %42 : vector<20x32xi32>
    %cst_25 = arith.constant 1.000000e+00 : f32
    %cst_26 = arith.constant 0.000000e+00 : f32
    %44 = vector.broadcast %cst_25 : f32 to vector<20x32xf32>
    %45 = vector.broadcast %cst_26 : f32 to vector<20x32xf32>
    %46 = arith.select %43, %44, %45 : vector<20x32xi1>, vector<20x32xf32>
    %47 = arith.mulf %24, %46 : vector<20x32xf32>
    %cst_27 = arith.constant dense<0.000000e+00> : vector<32xf32>
    %48 = vector.multi_reduction <add>, %47, %cst_27 [0] : vector<20x32xf32> to vector<32xf32>
    %49 = vector.shape_cast %48 : vector<32xf32> to vector<1x32xf32>
    %cst_28 = arith.constant 6.250000e-02 : f32
    %50 = vector.broadcast %cst_28 : f32 to vector<1x32xf32>
    %51 = arith.mulf %49, %50 : vector<1x32xf32>
    %52 = vector.broadcast %51 : vector<1x32xf32> to vector<20x32xf32>
    %53 = arith.subf %24, %52 : vector<20x32xf32>
    %54 = arith.mulf %53, %53 : vector<20x32xf32>
    %55 = arith.mulf %54, %46 : vector<20x32xf32>
    %cst_29 = arith.constant dense<0.000000e+00> : vector<32xf32>
    %56 = vector.multi_reduction <add>, %55, %cst_29 [0] : vector<20x32xf32> to vector<32xf32>
    %57 = vector.shape_cast %56 : vector<32xf32> to vector<1x32xf32>
    %cst_30 = arith.constant 6.250000e-02 : f32
    %58 = vector.broadcast %cst_30 : f32 to vector<1x32xf32>
    %59 = arith.mulf %57, %58 : vector<1x32xf32>
    %c0_31 = arith.constant 0 : index
    %c0_32 = arith.constant 0 : index
    %60 = vector.load %arg3[%c0_31, %c0_32] : memref<1x32xf32, #tpu.memory_space<vmem>>, vector<1x32xf32>
    %c0_33 = arith.constant 0 : index
    %c0_34 = arith.constant 0 : index
    %61 = vector.load %arg4[%c0_33, %c0_34] : memref<1x32xf32, #tpu.memory_space<vmem>>, vector<1x32xf32>
    %cst_35 = arith.constant 9.99999974E-6 : f32
    %62 = vector.broadcast %cst_35 : f32 to vector<1x32xf32>
    %63 = arith.addf %59, %62 : vector<1x32xf32>
    %64 = math.rsqrt %63 : vector<1x32xf32>
    %65 = vector.broadcast %64 : vector<1x32xf32> to vector<20x32xf32>
    %66 = arith.mulf %53, %65 : vector<20x32xf32>
    %67 = vector.broadcast %60 : vector<1x32xf32> to vector<20x32xf32>
    %68 = arith.mulf %66, %67 : vector<20x32xf32>
    %69 = vector.broadcast %61 : vector<1x32xf32> to vector<20x32xf32>
    %70 = arith.addf %68, %69 : vector<20x32xf32>
    %cst_36 = arith.constant 0.000000e+00 : f32
    %71 = vector.broadcast %cst_36 : f32 to vector<20x32xf32>
    %72 = arith.maximumf %70, %71 : vector<20x32xf32>
    %73 = arith.truncf %72 : vector<20x32xf32> to vector<20x32xbf16>
    %c0_37 = arith.constant 0 : index
    %c0_38 = arith.constant 0 : index
    %c0_39 = arith.constant 0 : index
    %74 = vector.load %arg5[%c0_37, %c0_38, %c0_39] : memref<1x20x32xbf16, #tpu.memory_space<vmem>>, vector<1x20x32xbf16>
    %75 = vector.shape_cast %74 : vector<1x20x32xbf16> to vector<20x32xbf16>
    %76 = vector.shape_cast %73 : vector<20x32xbf16> to vector<1x20x32xbf16>
    tpu.vector_store %arg5[%c0_37, %c0_38, %c0_39], %76 {strides = array<i32>} : memref<1x20x32xbf16, #tpu.memory_space<vmem>>, vector<1x20x32xbf16>,
    return
  }
  func.func @transform_0(%arg0: i32) -> (i32, i32, i32) {
    %c0_i32 = arith.constant 0 : i32
    %c0_i32_0 = arith.constant 0 : i32
    %c0_i32_1 = arith.constant 0 : i32
    return %arg0, %c0_i32, %c0_i32_0 : i32, i32, i32
  }
  func.func @transform_1(%arg0: i32) -> (i32, i32, i32) {
    %c0_i32 = arith.constant 0 : i32
    %c0_i32_0 = arith.constant 0 : i32
    %c0_i32_1 = arith.constant 0 : i32
    %c0_i32_2 = arith.constant 0 : i32
    return %c0_i32, %c0_i32_0, %c0_i32_1 : i32, i32, i32
  }
  func.func @transform_2(%arg0: i32) -> (i32, i32) {
    %c0_i32 = arith.constant 0 : i32
    %c0_i32_0 = arith.constant 0 : i32
    %c0_i32_1 = arith.constant 0 : i32
    return %c0_i32, %c0_i32_0 : i32, i32
  }
  func.func @transform_3(%arg0: i32) -> (i32, i32) {
    %c0_i32 = arith.constant 0 : i32
    %c0_i32_0 = arith.constant 0 : i32
    %c0_i32_1 = arith.constant 0 : i32
    return %c0_i32, %c0_i32_0 : i32, i32
  }
  func.func @transform_4(%arg0: i32) -> (i32, i32, i32) {
    %c0_i32 = arith.constant 0 : i32
    %c0_i32_0 = arith.constant 0 : i32
    %c0_i32_1 = arith.constant 0 : i32
    return %arg0, %c0_i32, %c0_i32_0 : i32, i32, i32
  }
}

module attributes {stable_mosaic.version = 11 : i64} {
  func.func @kernel(%arg0: i32, %arg1: memref<1x38x32xbf16, #tpu.memory_space<vmem>>, %arg2: memref<9x32x32xbf16, #tpu.memory_space<vmem>>, %arg3: memref<1x32xf32, #tpu.memory_space<vmem>>, %arg4: memref<1x32xf32, #tpu.memory_space<vmem>>, %arg5: memref<1x24x32xbf16, #tpu.memory_space<vmem>>) attributes {dimension_semantics = [#tpu.dimension_semantics<parallel>], iteration_bounds = array<i64: 2>, scalar_prefetch = 0 : i64, scratch_operands = 0 : i64, tpu.core_type = #tpu.core_type<tc>, window_params = [{transform_indices = @transform_0, window_bounds = array<i64: 1, 38, 32>}, {pipeline_mode = #tpu.pipeline_mode<synchronous>, transform_indices = @transform_1, window_bounds = array<i64: 9, 32, 32>}, {pipeline_mode = #tpu.pipeline_mode<synchronous>, transform_indices = @transform_2, window_bounds = array<i64: 1, 32>}, {pipeline_mode = #tpu.pipeline_mode<synchronous>, transform_indices = @transform_3, window_bounds = array<i64: 1, 32>}, {transform_indices = @transform_4, window_bounds = array<i64: 1, 24, 32>}]} {
    %cst = arith.constant 0.000000e+00 : f32
    %0 = vector.broadcast %cst : f32 to vector<24x32xf32>
    %c0 = arith.constant 0 : index
    %c0_0 = arith.constant 0 : index
    %c0_1 = arith.constant 0 : index
    %1 = vector.load %arg1[%c0, %c0_0, %c0_1] : memref<1x38x32xbf16, #tpu.memory_space<vmem>>, vector<1x24x32xbf16>
    %2 = vector.shape_cast %1 : vector<1x24x32xbf16> to vector<24x32xbf16>
    %c0_2 = arith.constant 0 : index
    %c0_3 = arith.constant 0 : index
    %c0_4 = arith.constant 0 : index
    %3 = vector.load %arg2[%c0_2, %c0_3, %c0_4] : memref<9x32x32xbf16, #tpu.memory_space<vmem>>, vector<1x32x32xbf16>
    %4 = vector.shape_cast %3 : vector<1x32x32xbf16> to vector<32x32xbf16>
    %cst_5 = arith.constant dense<0.000000e+00> : vector<24x32xf32>
    %5 = tpu.matmul %2, %4, %cst_5 {dimension_numbers = #tpu.dot_dimension_numbers<[1], [0], [0], [1], [0, 0, 1, 1], [], []>} : vector<24x32xbf16>, vector<32x32xbf16>, vector<24x32xf32> -> vector<24x32xf32>
    %6 = arith.addf %0, %5 : vector<24x32xf32>
    %c0_6 = arith.constant 0 : index
    %c1 = arith.constant 1 : index
    %c0_7 = arith.constant 0 : index
    %7 = vector.load %arg1[%c0_6, %c1, %c0_7] : memref<1x38x32xbf16, #tpu.memory_space<vmem>>, vector<1x24x32xbf16>
    %8 = vector.shape_cast %7 : vector<1x24x32xbf16> to vector<24x32xbf16>
    %c1_8 = arith.constant 1 : index
    %c0_9 = arith.constant 0 : index
    %c0_10 = arith.constant 0 : index
    %9 = vector.load %arg2[%c1_8, %c0_9, %c0_10] : memref<9x32x32xbf16, #tpu.memory_space<vmem>>, vector<1x32x32xbf16>
    %10 = vector.shape_cast %9 : vector<1x32x32xbf16> to vector<32x32xbf16>
    %cst_11 = arith.constant dense<0.000000e+00> : vector<24x32xf32>
    %11 = tpu.matmul %8, %10, %cst_11 {dimension_numbers = #tpu.dot_dimension_numbers<[1], [0], [0], [1], [0, 0, 1, 1], [], []>} : vector<24x32xbf16>, vector<32x32xbf16>, vector<24x32xf32> -> vector<24x32xf32>
    %12 = arith.addf %6, %11 : vector<24x32xf32>
    %c0_12 = arith.constant 0 : index
    %c2 = arith.constant 2 : index
    %c0_13 = arith.constant 0 : index
    %13 = vector.load %arg1[%c0_12, %c2, %c0_13] : memref<1x38x32xbf16, #tpu.memory_space<vmem>>, vector<1x24x32xbf16>
    %14 = vector.shape_cast %13 : vector<1x24x32xbf16> to vector<24x32xbf16>
    %c2_14 = arith.constant 2 : index
    %c0_15 = arith.constant 0 : index
    %c0_16 = arith.constant 0 : index
    %15 = vector.load %arg2[%c2_14, %c0_15, %c0_16] : memref<9x32x32xbf16, #tpu.memory_space<vmem>>, vector<1x32x32xbf16>
    %16 = vector.shape_cast %15 : vector<1x32x32xbf16> to vector<32x32xbf16>
    %cst_17 = arith.constant dense<0.000000e+00> : vector<24x32xf32>
    %17 = tpu.matmul %14, %16, %cst_17 {dimension_numbers = #tpu.dot_dimension_numbers<[1], [0], [0], [1], [0, 0, 1, 1], [], []>} : vector<24x32xbf16>, vector<32x32xbf16>, vector<24x32xf32> -> vector<24x32xf32>
    %18 = arith.addf %12, %17 : vector<24x32xf32>
    %c0_18 = arith.constant 0 : index
    %c6 = arith.constant 6 : index
    %c0_19 = arith.constant 0 : index
    %19 = vector.load %arg1[%c0_18, %c6, %c0_19] : memref<1x38x32xbf16, #tpu.memory_space<vmem>>, vector<1x24x32xbf16>
    %20 = vector.shape_cast %19 : vector<1x24x32xbf16> to vector<24x32xbf16>
    %c3 = arith.constant 3 : index
    %c0_20 = arith.constant 0 : index
    %c0_21 = arith.constant 0 : index
    %21 = vector.load %arg2[%c3, %c0_20, %c0_21] : memref<9x32x32xbf16, #tpu.memory_space<vmem>>, vector<1x32x32xbf16>
    %22 = vector.shape_cast %21 : vector<1x32x32xbf16> to vector<32x32xbf16>
    %cst_22 = arith.constant dense<0.000000e+00> : vector<24x32xf32>
    %23 = tpu.matmul %20, %22, %cst_22 {dimension_numbers = #tpu.dot_dimension_numbers<[1], [0], [0], [1], [0, 0, 1, 1], [], []>} : vector<24x32xbf16>, vector<32x32xbf16>, vector<24x32xf32> -> vector<24x32xf32>
    %24 = arith.addf %18, %23 : vector<24x32xf32>
    %c0_23 = arith.constant 0 : index
    %c7 = arith.constant 7 : index
    %c0_24 = arith.constant 0 : index
    %25 = vector.load %arg1[%c0_23, %c7, %c0_24] : memref<1x38x32xbf16, #tpu.memory_space<vmem>>, vector<1x24x32xbf16>
    %26 = vector.shape_cast %25 : vector<1x24x32xbf16> to vector<24x32xbf16>
    %c4 = arith.constant 4 : index
    %c0_25 = arith.constant 0 : index
    %c0_26 = arith.constant 0 : index
    %27 = vector.load %arg2[%c4, %c0_25, %c0_26] : memref<9x32x32xbf16, #tpu.memory_space<vmem>>, vector<1x32x32xbf16>
    %28 = vector.shape_cast %27 : vector<1x32x32xbf16> to vector<32x32xbf16>
    %cst_27 = arith.constant dense<0.000000e+00> : vector<24x32xf32>
    %29 = tpu.matmul %26, %28, %cst_27 {dimension_numbers = #tpu.dot_dimension_numbers<[1], [0], [0], [1], [0, 0, 1, 1], [], []>} : vector<24x32xbf16>, vector<32x32xbf16>, vector<24x32xf32> -> vector<24x32xf32>
    %30 = arith.addf %24, %29 : vector<24x32xf32>
    %c0_28 = arith.constant 0 : index
    %c8 = arith.constant 8 : index
    %c0_29 = arith.constant 0 : index
    %31 = vector.load %arg1[%c0_28, %c8, %c0_29] : memref<1x38x32xbf16, #tpu.memory_space<vmem>>, vector<1x24x32xbf16>
    %32 = vector.shape_cast %31 : vector<1x24x32xbf16> to vector<24x32xbf16>
    %c5 = arith.constant 5 : index
    %c0_30 = arith.constant 0 : index
    %c0_31 = arith.constant 0 : index
    %33 = vector.load %arg2[%c5, %c0_30, %c0_31] : memref<9x32x32xbf16, #tpu.memory_space<vmem>>, vector<1x32x32xbf16>
    %34 = vector.shape_cast %33 : vector<1x32x32xbf16> to vector<32x32xbf16>
    %cst_32 = arith.constant dense<0.000000e+00> : vector<24x32xf32>
    %35 = tpu.matmul %32, %34, %cst_32 {dimension_numbers = #tpu.dot_dimension_numbers<[1], [0], [0], [1], [0, 0, 1, 1], [], []>} : vector<24x32xbf16>, vector<32x32xbf16>, vector<24x32xf32> -> vector<24x32xf32>
    %36 = arith.addf %30, %35 : vector<24x32xf32>
    %c0_33 = arith.constant 0 : index
    %c12 = arith.constant 12 : index
    %c0_34 = arith.constant 0 : index
    %37 = vector.load %arg1[%c0_33, %c12, %c0_34] : memref<1x38x32xbf16, #tpu.memory_space<vmem>>, vector<1x24x32xbf16>
    %38 = vector.shape_cast %37 : vector<1x24x32xbf16> to vector<24x32xbf16>
    %c6_35 = arith.constant 6 : index
    %c0_36 = arith.constant 0 : index
    %c0_37 = arith.constant 0 : index
    %39 = vector.load %arg2[%c6_35, %c0_36, %c0_37] : memref<9x32x32xbf16, #tpu.memory_space<vmem>>, vector<1x32x32xbf16>
    %40 = vector.shape_cast %39 : vector<1x32x32xbf16> to vector<32x32xbf16>
    %cst_38 = arith.constant dense<0.000000e+00> : vector<24x32xf32>
    %41 = tpu.matmul %38, %40, %cst_38 {dimension_numbers = #tpu.dot_dimension_numbers<[1], [0], [0], [1], [0, 0, 1, 1], [], []>} : vector<24x32xbf16>, vector<32x32xbf16>, vector<24x32xf32> -> vector<24x32xf32>
    %42 = arith.addf %36, %41 : vector<24x32xf32>
    %c0_39 = arith.constant 0 : index
    %c13 = arith.constant 13 : index
    %c0_40 = arith.constant 0 : index
    %43 = vector.load %arg1[%c0_39, %c13, %c0_40] : memref<1x38x32xbf16, #tpu.memory_space<vmem>>, vector<1x24x32xbf16>
    %44 = vector.shape_cast %43 : vector<1x24x32xbf16> to vector<24x32xbf16>
    %c7_41 = arith.constant 7 : index
    %c0_42 = arith.constant 0 : index
    %c0_43 = arith.constant 0 : index
    %45 = vector.load %arg2[%c7_41, %c0_42, %c0_43] : memref<9x32x32xbf16, #tpu.memory_space<vmem>>, vector<1x32x32xbf16>
    %46 = vector.shape_cast %45 : vector<1x32x32xbf16> to vector<32x32xbf16>
    %cst_44 = arith.constant dense<0.000000e+00> : vector<24x32xf32>
    %47 = tpu.matmul %44, %46, %cst_44 {dimension_numbers = #tpu.dot_dimension_numbers<[1], [0], [0], [1], [0, 0, 1, 1], [], []>} : vector<24x32xbf16>, vector<32x32xbf16>, vector<24x32xf32> -> vector<24x32xf32>
    %48 = arith.addf %42, %47 : vector<24x32xf32>
    %c0_45 = arith.constant 0 : index
    %c14 = arith.constant 14 : index
    %c0_46 = arith.constant 0 : index
    %49 = vector.load %arg1[%c0_45, %c14, %c0_46] : memref<1x38x32xbf16, #tpu.memory_space<vmem>>, vector<1x24x32xbf16>
    %50 = vector.shape_cast %49 : vector<1x24x32xbf16> to vector<24x32xbf16>
    %c8_47 = arith.constant 8 : index
    %c0_48 = arith.constant 0 : index
    %c0_49 = arith.constant 0 : index
    %51 = vector.load %arg2[%c8_47, %c0_48, %c0_49] : memref<9x32x32xbf16, #tpu.memory_space<vmem>>, vector<1x32x32xbf16>
    %52 = vector.shape_cast %51 : vector<1x32x32xbf16> to vector<32x32xbf16>
    %cst_50 = arith.constant dense<0.000000e+00> : vector<24x32xf32>
    %53 = tpu.matmul %50, %52, %cst_50 {dimension_numbers = #tpu.dot_dimension_numbers<[1], [0], [0], [1], [0, 0, 1, 1], [], []>} : vector<24x32xbf16>, vector<32x32xbf16>, vector<24x32xf32> -> vector<24x32xf32>
    %54 = arith.addf %48, %53 : vector<24x32xf32>
    %55 = tpu.iota {dimensions = array<i32: 0>} : vector<24x32xi32>
    %c6_i32 = arith.constant 6 : i32
    %c0_i32 = arith.constant 0 : i32
    %56 = arith.cmpi eq, %c6_i32, %c0_i32 : i32
    %c1_i32 = arith.constant 1 : i32
    %57 = arith.select %56, %c1_i32, %c6_i32 : i32
    %58 = vector.broadcast %57 : i32 to vector<24x32xi32>
    %59 = arith.remsi %55, %58 : vector<24x32xi32>
    %c0_i32_51 = arith.constant 0 : i32
    %60 = vector.broadcast %c0_i32_51 : i32 to vector<24x32xi32>
    %61 = arith.cmpi ne, %59, %60 : vector<24x32xi32>
    %c0_i32_52 = arith.constant 0 : i32
    %62 = vector.broadcast %c0_i32_52 : i32 to vector<24x32xi32>
    %63 = arith.cmpi slt, %59, %62 : vector<24x32xi32>
    %c0_i32_53 = arith.constant 0 : i32
    %64 = arith.cmpi slt, %57, %c0_i32_53 : i32
    %65 = vector.broadcast %64 : i1 to vector<24x32xi1>
    %66 = vector.broadcast %65 : vector<24x32xi1> to vector<24x32xi1>
    %67 = arith.xori %63, %66 : vector<24x32xi1>
    %68 = arith.andi %67, %61 : vector<24x32xi1>
    %69 = vector.broadcast %57 : i32 to vector<24x32xi32>
    %70 = arith.addi %59, %69 : vector<24x32xi32>
    %71 = arith.select %68, %70, %59 : vector<24x32xi1>, vector<24x32xi32>
    %c4_i32 = arith.constant 4 : i32
    %72 = vector.broadcast %c4_i32 : i32 to vector<24x32xi32>
    %73 = arith.cmpi slt, %71, %72 : vector<24x32xi32>
    %cst_54 = arith.constant 1.000000e+00 : f32
    %cst_55 = arith.constant 0.000000e+00 : f32
    %74 = vector.broadcast %cst_54 : f32 to vector<24x32xf32>
    %75 = vector.broadcast %cst_55 : f32 to vector<24x32xf32>
    %76 = arith.select %73, %74, %75 : vector<24x32xi1>, vector<24x32xf32>
    %77 = arith.mulf %54, %76 : vector<24x32xf32>
    %cst_56 = arith.constant dense<0.000000e+00> : vector<32xf32>
    %78 = vector.multi_reduction <add>, %77, %cst_56 [0] : vector<24x32xf32> to vector<32xf32>
    %79 = vector.shape_cast %78 : vector<32xf32> to vector<1x32xf32>
    %cst_57 = arith.constant 6.250000e-02 : f32
    %80 = vector.broadcast %cst_57 : f32 to vector<1x32xf32>
    %81 = arith.mulf %79, %80 : vector<1x32xf32>
    %82 = vector.broadcast %81 : vector<1x32xf32> to vector<24x32xf32>
    %83 = arith.subf %54, %82 : vector<24x32xf32>
    %84 = arith.mulf %83, %83 : vector<24x32xf32>
    %85 = arith.mulf %84, %76 : vector<24x32xf32>
    %cst_58 = arith.constant dense<0.000000e+00> : vector<32xf32>
    %86 = vector.multi_reduction <add>, %85, %cst_58 [0] : vector<24x32xf32> to vector<32xf32>
    %87 = vector.shape_cast %86 : vector<32xf32> to vector<1x32xf32>
    %cst_59 = arith.constant 6.250000e-02 : f32
    %88 = vector.broadcast %cst_59 : f32 to vector<1x32xf32>
    %89 = arith.mulf %87, %88 : vector<1x32xf32>
    %c0_60 = arith.constant 0 : index
    %c0_61 = arith.constant 0 : index
    %90 = vector.load %arg3[%c0_60, %c0_61] : memref<1x32xf32, #tpu.memory_space<vmem>>, vector<1x32xf32>
    %c0_62 = arith.constant 0 : index
    %c0_63 = arith.constant 0 : index
    %91 = vector.load %arg4[%c0_62, %c0_63] : memref<1x32xf32, #tpu.memory_space<vmem>>, vector<1x32xf32>
    %cst_64 = arith.constant 9.99999974E-6 : f32
    %92 = vector.broadcast %cst_64 : f32 to vector<1x32xf32>
    %93 = arith.addf %89, %92 : vector<1x32xf32>
    %94 = math.rsqrt %93 : vector<1x32xf32>
    %95 = vector.broadcast %94 : vector<1x32xf32> to vector<24x32xf32>
    %96 = arith.mulf %83, %95 : vector<24x32xf32>
    %97 = vector.broadcast %90 : vector<1x32xf32> to vector<24x32xf32>
    %98 = arith.mulf %96, %97 : vector<24x32xf32>
    %99 = vector.broadcast %91 : vector<1x32xf32> to vector<24x32xf32>
    %100 = arith.addf %98, %99 : vector<24x32xf32>
    %cst_65 = arith.constant 0.000000e+00 : f32
    %101 = vector.broadcast %cst_65 : f32 to vector<24x32xf32>
    %102 = arith.maximumf %100, %101 : vector<24x32xf32>
    %103 = arith.truncf %102 : vector<24x32xf32> to vector<24x32xbf16>
    %c0_66 = arith.constant 0 : index
    %c0_67 = arith.constant 0 : index
    %c0_68 = arith.constant 0 : index
    %104 = vector.load %arg5[%c0_66, %c0_67, %c0_68] : memref<1x24x32xbf16, #tpu.memory_space<vmem>>, vector<1x24x32xbf16>
    %105 = vector.shape_cast %104 : vector<1x24x32xbf16> to vector<24x32xbf16>
    %106 = vector.shape_cast %103 : vector<24x32xbf16> to vector<1x24x32xbf16>
    tpu.vector_store %arg5[%c0_66, %c0_67, %c0_68], %106 {strides = array<i32>} : memref<1x24x32xbf16, #tpu.memory_space<vmem>>, vector<1x24x32xbf16>,
    return
  }
  func.func @transform_0(%arg0: i32) -> (i32, i32, i32) {
    %c0_i32 = arith.constant 0 : i32
    %c0_i32_0 = arith.constant 0 : i32
    %c0_i32_1 = arith.constant 0 : i32
    return %arg0, %c0_i32, %c0_i32_0 : i32, i32, i32
  }
  func.func @transform_1(%arg0: i32) -> (i32, i32, i32) {
    %c0_i32 = arith.constant 0 : i32
    %c0_i32_0 = arith.constant 0 : i32
    %c0_i32_1 = arith.constant 0 : i32
    %c0_i32_2 = arith.constant 0 : i32
    return %c0_i32, %c0_i32_0, %c0_i32_1 : i32, i32, i32
  }
  func.func @transform_2(%arg0: i32) -> (i32, i32) {
    %c0_i32 = arith.constant 0 : i32
    %c0_i32_0 = arith.constant 0 : i32
    %c0_i32_1 = arith.constant 0 : i32
    return %c0_i32, %c0_i32_0 : i32, i32
  }
  func.func @transform_3(%arg0: i32) -> (i32, i32) {
    %c0_i32 = arith.constant 0 : i32
    %c0_i32_0 = arith.constant 0 : i32
    %c0_i32_1 = arith.constant 0 : i32
    return %c0_i32, %c0_i32_0 : i32, i32
  }
  func.func @transform_4(%arg0: i32) -> (i32, i32, i32) {
    %c0_i32 = arith.constant 0 : i32
    %c0_i32_0 = arith.constant 0 : i32
    %c0_i32_1 = arith.constant 0 : i32
    return %arg0, %c0_i32, %c0_i32_0 : i32, i32, i32
  }
}

module attributes {stable_mosaic.version = 11 : i64} {
  func.func @kernel(%arg0: i32, %arg1: memref<1x38x32xbf16, #tpu.memory_space<vmem>>, %arg2: memref<9x32x32xbf16, #tpu.memory_space<vmem>>, %arg3: memref<1x32xf32, #tpu.memory_space<vmem>>, %arg4: memref<1x32xf32, #tpu.memory_space<vmem>>, %arg5: memref<1x24x32xbf16, #tpu.memory_space<vmem>>, %arg6: memref<1x24x32xbf16, #tpu.memory_space<vmem>>) attributes {dimension_semantics = [#tpu.dimension_semantics<parallel>], iteration_bounds = array<i64: 2>, scalar_prefetch = 0 : i64, scratch_operands = 0 : i64, tpu.core_type = #tpu.core_type<tc>, window_params = [{transform_indices = @transform_0, window_bounds = array<i64: 1, 38, 32>}, {pipeline_mode = #tpu.pipeline_mode<synchronous>, transform_indices = @transform_1, window_bounds = array<i64: 9, 32, 32>}, {pipeline_mode = #tpu.pipeline_mode<synchronous>, transform_indices = @transform_2, window_bounds = array<i64: 1, 32>}, {pipeline_mode = #tpu.pipeline_mode<synchronous>, transform_indices = @transform_3, window_bounds = array<i64: 1, 32>}, {transform_indices = @transform_4, window_bounds = array<i64: 1, 24, 32>}, {transform_indices = @transform_5, window_bounds = array<i64: 1, 24, 32>}]} {
    %cst = arith.constant 0.000000e+00 : f32
    %0 = vector.broadcast %cst : f32 to vector<24x32xf32>
    %c0 = arith.constant 0 : index
    %c0_0 = arith.constant 0 : index
    %c0_1 = arith.constant 0 : index
    %1 = vector.load %arg1[%c0, %c0_0, %c0_1] : memref<1x38x32xbf16, #tpu.memory_space<vmem>>, vector<1x24x32xbf16>
    %2 = vector.shape_cast %1 : vector<1x24x32xbf16> to vector<24x32xbf16>
    %c0_2 = arith.constant 0 : index
    %c0_3 = arith.constant 0 : index
    %c0_4 = arith.constant 0 : index
    %3 = vector.load %arg2[%c0_2, %c0_3, %c0_4] : memref<9x32x32xbf16, #tpu.memory_space<vmem>>, vector<1x32x32xbf16>
    %4 = vector.shape_cast %3 : vector<1x32x32xbf16> to vector<32x32xbf16>
    %cst_5 = arith.constant dense<0.000000e+00> : vector<24x32xf32>
    %5 = tpu.matmul %2, %4, %cst_5 {dimension_numbers = #tpu.dot_dimension_numbers<[1], [0], [0], [1], [0, 0, 1, 1], [], []>} : vector<24x32xbf16>, vector<32x32xbf16>, vector<24x32xf32> -> vector<24x32xf32>
    %6 = arith.addf %0, %5 : vector<24x32xf32>
    %c0_6 = arith.constant 0 : index
    %c1 = arith.constant 1 : index
    %c0_7 = arith.constant 0 : index
    %7 = vector.load %arg1[%c0_6, %c1, %c0_7] : memref<1x38x32xbf16, #tpu.memory_space<vmem>>, vector<1x24x32xbf16>
    %8 = vector.shape_cast %7 : vector<1x24x32xbf16> to vector<24x32xbf16>
    %c1_8 = arith.constant 1 : index
    %c0_9 = arith.constant 0 : index
    %c0_10 = arith.constant 0 : index
    %9 = vector.load %arg2[%c1_8, %c0_9, %c0_10] : memref<9x32x32xbf16, #tpu.memory_space<vmem>>, vector<1x32x32xbf16>
    %10 = vector.shape_cast %9 : vector<1x32x32xbf16> to vector<32x32xbf16>
    %cst_11 = arith.constant dense<0.000000e+00> : vector<24x32xf32>
    %11 = tpu.matmul %8, %10, %cst_11 {dimension_numbers = #tpu.dot_dimension_numbers<[1], [0], [0], [1], [0, 0, 1, 1], [], []>} : vector<24x32xbf16>, vector<32x32xbf16>, vector<24x32xf32> -> vector<24x32xf32>
    %12 = arith.addf %6, %11 : vector<24x32xf32>
    %c0_12 = arith.constant 0 : index
    %c2 = arith.constant 2 : index
    %c0_13 = arith.constant 0 : index
    %13 = vector.load %arg1[%c0_12, %c2, %c0_13] : memref<1x38x32xbf16, #tpu.memory_space<vmem>>, vector<1x24x32xbf16>
    %14 = vector.shape_cast %13 : vector<1x24x32xbf16> to vector<24x32xbf16>
    %c2_14 = arith.constant 2 : index
    %c0_15 = arith.constant 0 : index
    %c0_16 = arith.constant 0 : index
    %15 = vector.load %arg2[%c2_14, %c0_15, %c0_16] : memref<9x32x32xbf16, #tpu.memory_space<vmem>>, vector<1x32x32xbf16>
    %16 = vector.shape_cast %15 : vector<1x32x32xbf16> to vector<32x32xbf16>
    %cst_17 = arith.constant dense<0.000000e+00> : vector<24x32xf32>
    %17 = tpu.matmul %14, %16, %cst_17 {dimension_numbers = #tpu.dot_dimension_numbers<[1], [0], [0], [1], [0, 0, 1, 1], [], []>} : vector<24x32xbf16>, vector<32x32xbf16>, vector<24x32xf32> -> vector<24x32xf32>
    %18 = arith.addf %12, %17 : vector<24x32xf32>
    %c0_18 = arith.constant 0 : index
    %c6 = arith.constant 6 : index
    %c0_19 = arith.constant 0 : index
    %19 = vector.load %arg1[%c0_18, %c6, %c0_19] : memref<1x38x32xbf16, #tpu.memory_space<vmem>>, vector<1x24x32xbf16>
    %20 = vector.shape_cast %19 : vector<1x24x32xbf16> to vector<24x32xbf16>
    %c3 = arith.constant 3 : index
    %c0_20 = arith.constant 0 : index
    %c0_21 = arith.constant 0 : index
    %21 = vector.load %arg2[%c3, %c0_20, %c0_21] : memref<9x32x32xbf16, #tpu.memory_space<vmem>>, vector<1x32x32xbf16>
    %22 = vector.shape_cast %21 : vector<1x32x32xbf16> to vector<32x32xbf16>
    %cst_22 = arith.constant dense<0.000000e+00> : vector<24x32xf32>
    %23 = tpu.matmul %20, %22, %cst_22 {dimension_numbers = #tpu.dot_dimension_numbers<[1], [0], [0], [1], [0, 0, 1, 1], [], []>} : vector<24x32xbf16>, vector<32x32xbf16>, vector<24x32xf32> -> vector<24x32xf32>
    %24 = arith.addf %18, %23 : vector<24x32xf32>
    %c0_23 = arith.constant 0 : index
    %c7 = arith.constant 7 : index
    %c0_24 = arith.constant 0 : index
    %25 = vector.load %arg1[%c0_23, %c7, %c0_24] : memref<1x38x32xbf16, #tpu.memory_space<vmem>>, vector<1x24x32xbf16>
    %26 = vector.shape_cast %25 : vector<1x24x32xbf16> to vector<24x32xbf16>
    %c4 = arith.constant 4 : index
    %c0_25 = arith.constant 0 : index
    %c0_26 = arith.constant 0 : index
    %27 = vector.load %arg2[%c4, %c0_25, %c0_26] : memref<9x32x32xbf16, #tpu.memory_space<vmem>>, vector<1x32x32xbf16>
    %28 = vector.shape_cast %27 : vector<1x32x32xbf16> to vector<32x32xbf16>
    %cst_27 = arith.constant dense<0.000000e+00> : vector<24x32xf32>
    %29 = tpu.matmul %26, %28, %cst_27 {dimension_numbers = #tpu.dot_dimension_numbers<[1], [0], [0], [1], [0, 0, 1, 1], [], []>} : vector<24x32xbf16>, vector<32x32xbf16>, vector<24x32xf32> -> vector<24x32xf32>
    %30 = arith.addf %24, %29 : vector<24x32xf32>
    %c0_28 = arith.constant 0 : index
    %c8 = arith.constant 8 : index
    %c0_29 = arith.constant 0 : index
    %31 = vector.load %arg1[%c0_28, %c8, %c0_29] : memref<1x38x32xbf16, #tpu.memory_space<vmem>>, vector<1x24x32xbf16>
    %32 = vector.shape_cast %31 : vector<1x24x32xbf16> to vector<24x32xbf16>
    %c5 = arith.constant 5 : index
    %c0_30 = arith.constant 0 : index
    %c0_31 = arith.constant 0 : index
    %33 = vector.load %arg2[%c5, %c0_30, %c0_31] : memref<9x32x32xbf16, #tpu.memory_space<vmem>>, vector<1x32x32xbf16>
    %34 = vector.shape_cast %33 : vector<1x32x32xbf16> to vector<32x32xbf16>
    %cst_32 = arith.constant dense<0.000000e+00> : vector<24x32xf32>
    %35 = tpu.matmul %32, %34, %cst_32 {dimension_numbers = #tpu.dot_dimension_numbers<[1], [0], [0], [1], [0, 0, 1, 1], [], []>} : vector<24x32xbf16>, vector<32x32xbf16>, vector<24x32xf32> -> vector<24x32xf32>
    %36 = arith.addf %30, %35 : vector<24x32xf32>
    %c0_33 = arith.constant 0 : index
    %c12 = arith.constant 12 : index
    %c0_34 = arith.constant 0 : index
    %37 = vector.load %arg1[%c0_33, %c12, %c0_34] : memref<1x38x32xbf16, #tpu.memory_space<vmem>>, vector<1x24x32xbf16>
    %38 = vector.shape_cast %37 : vector<1x24x32xbf16> to vector<24x32xbf16>
    %c6_35 = arith.constant 6 : index
    %c0_36 = arith.constant 0 : index
    %c0_37 = arith.constant 0 : index
    %39 = vector.load %arg2[%c6_35, %c0_36, %c0_37] : memref<9x32x32xbf16, #tpu.memory_space<vmem>>, vector<1x32x32xbf16>
    %40 = vector.shape_cast %39 : vector<1x32x32xbf16> to vector<32x32xbf16>
    %cst_38 = arith.constant dense<0.000000e+00> : vector<24x32xf32>
    %41 = tpu.matmul %38, %40, %cst_38 {dimension_numbers = #tpu.dot_dimension_numbers<[1], [0], [0], [1], [0, 0, 1, 1], [], []>} : vector<24x32xbf16>, vector<32x32xbf16>, vector<24x32xf32> -> vector<24x32xf32>
    %42 = arith.addf %36, %41 : vector<24x32xf32>
    %c0_39 = arith.constant 0 : index
    %c13 = arith.constant 13 : index
    %c0_40 = arith.constant 0 : index
    %43 = vector.load %arg1[%c0_39, %c13, %c0_40] : memref<1x38x32xbf16, #tpu.memory_space<vmem>>, vector<1x24x32xbf16>
    %44 = vector.shape_cast %43 : vector<1x24x32xbf16> to vector<24x32xbf16>
    %c7_41 = arith.constant 7 : index
    %c0_42 = arith.constant 0 : index
    %c0_43 = arith.constant 0 : index
    %45 = vector.load %arg2[%c7_41, %c0_42, %c0_43] : memref<9x32x32xbf16, #tpu.memory_space<vmem>>, vector<1x32x32xbf16>
    %46 = vector.shape_cast %45 : vector<1x32x32xbf16> to vector<32x32xbf16>
    %cst_44 = arith.constant dense<0.000000e+00> : vector<24x32xf32>
    %47 = tpu.matmul %44, %46, %cst_44 {dimension_numbers = #tpu.dot_dimension_numbers<[1], [0], [0], [1], [0, 0, 1, 1], [], []>} : vector<24x32xbf16>, vector<32x32xbf16>, vector<24x32xf32> -> vector<24x32xf32>
    %48 = arith.addf %42, %47 : vector<24x32xf32>
    %c0_45 = arith.constant 0 : index
    %c14 = arith.constant 14 : index
    %c0_46 = arith.constant 0 : index
    %49 = vector.load %arg1[%c0_45, %c14, %c0_46] : memref<1x38x32xbf16, #tpu.memory_space<vmem>>, vector<1x24x32xbf16>
    %50 = vector.shape_cast %49 : vector<1x24x32xbf16> to vector<24x32xbf16>
    %c8_47 = arith.constant 8 : index
    %c0_48 = arith.constant 0 : index
    %c0_49 = arith.constant 0 : index
    %51 = vector.load %arg2[%c8_47, %c0_48, %c0_49] : memref<9x32x32xbf16, #tpu.memory_space<vmem>>, vector<1x32x32xbf16>
    %52 = vector.shape_cast %51 : vector<1x32x32xbf16> to vector<32x32xbf16>
    %cst_50 = arith.constant dense<0.000000e+00> : vector<24x32xf32>
    %53 = tpu.matmul %50, %52, %cst_50 {dimension_numbers = #tpu.dot_dimension_numbers<[1], [0], [0], [1], [0, 0, 1, 1], [], []>} : vector<24x32xbf16>, vector<32x32xbf16>, vector<24x32xf32> -> vector<24x32xf32>
    %54 = arith.addf %48, %53 : vector<24x32xf32>
    %55 = tpu.iota {dimensions = array<i32: 0>} : vector<24x32xi32>
    %c6_i32 = arith.constant 6 : i32
    %c0_i32 = arith.constant 0 : i32
    %56 = arith.cmpi eq, %c6_i32, %c0_i32 : i32
    %c1_i32 = arith.constant 1 : i32
    %57 = arith.select %56, %c1_i32, %c6_i32 : i32
    %58 = vector.broadcast %57 : i32 to vector<24x32xi32>
    %59 = arith.remsi %55, %58 : vector<24x32xi32>
    %c0_i32_51 = arith.constant 0 : i32
    %60 = vector.broadcast %c0_i32_51 : i32 to vector<24x32xi32>
    %61 = arith.cmpi ne, %59, %60 : vector<24x32xi32>
    %c0_i32_52 = arith.constant 0 : i32
    %62 = vector.broadcast %c0_i32_52 : i32 to vector<24x32xi32>
    %63 = arith.cmpi slt, %59, %62 : vector<24x32xi32>
    %c0_i32_53 = arith.constant 0 : i32
    %64 = arith.cmpi slt, %57, %c0_i32_53 : i32
    %65 = vector.broadcast %64 : i1 to vector<24x32xi1>
    %66 = vector.broadcast %65 : vector<24x32xi1> to vector<24x32xi1>
    %67 = arith.xori %63, %66 : vector<24x32xi1>
    %68 = arith.andi %67, %61 : vector<24x32xi1>
    %69 = vector.broadcast %57 : i32 to vector<24x32xi32>
    %70 = arith.addi %59, %69 : vector<24x32xi32>
    %71 = arith.select %68, %70, %59 : vector<24x32xi1>, vector<24x32xi32>
    %c4_i32 = arith.constant 4 : i32
    %72 = vector.broadcast %c4_i32 : i32 to vector<24x32xi32>
    %73 = arith.cmpi slt, %71, %72 : vector<24x32xi32>
    %cst_54 = arith.constant 1.000000e+00 : f32
    %cst_55 = arith.constant 0.000000e+00 : f32
    %74 = vector.broadcast %cst_54 : f32 to vector<24x32xf32>
    %75 = vector.broadcast %cst_55 : f32 to vector<24x32xf32>
    %76 = arith.select %73, %74, %75 : vector<24x32xi1>, vector<24x32xf32>
    %77 = arith.mulf %54, %76 : vector<24x32xf32>
    %cst_56 = arith.constant dense<0.000000e+00> : vector<32xf32>
    %78 = vector.multi_reduction <add>, %77, %cst_56 [0] : vector<24x32xf32> to vector<32xf32>
    %79 = vector.shape_cast %78 : vector<32xf32> to vector<1x32xf32>
    %cst_57 = arith.constant 6.250000e-02 : f32
    %80 = vector.broadcast %cst_57 : f32 to vector<1x32xf32>
    %81 = arith.mulf %79, %80 : vector<1x32xf32>
    %82 = vector.broadcast %81 : vector<1x32xf32> to vector<24x32xf32>
    %83 = arith.subf %54, %82 : vector<24x32xf32>
    %84 = arith.mulf %83, %83 : vector<24x32xf32>
    %85 = arith.mulf %84, %76 : vector<24x32xf32>
    %cst_58 = arith.constant dense<0.000000e+00> : vector<32xf32>
    %86 = vector.multi_reduction <add>, %85, %cst_58 [0] : vector<24x32xf32> to vector<32xf32>
    %87 = vector.shape_cast %86 : vector<32xf32> to vector<1x32xf32>
    %cst_59 = arith.constant 6.250000e-02 : f32
    %88 = vector.broadcast %cst_59 : f32 to vector<1x32xf32>
    %89 = arith.mulf %87, %88 : vector<1x32xf32>
    %c0_60 = arith.constant 0 : index
    %c0_61 = arith.constant 0 : index
    %90 = vector.load %arg3[%c0_60, %c0_61] : memref<1x32xf32, #tpu.memory_space<vmem>>, vector<1x32xf32>
    %c0_62 = arith.constant 0 : index
    %c0_63 = arith.constant 0 : index
    %91 = vector.load %arg4[%c0_62, %c0_63] : memref<1x32xf32, #tpu.memory_space<vmem>>, vector<1x32xf32>
    %cst_64 = arith.constant 9.99999974E-6 : f32
    %92 = vector.broadcast %cst_64 : f32 to vector<1x32xf32>
    %93 = arith.addf %89, %92 : vector<1x32xf32>
    %94 = math.rsqrt %93 : vector<1x32xf32>
    %95 = vector.broadcast %94 : vector<1x32xf32> to vector<24x32xf32>
    %96 = arith.mulf %83, %95 : vector<24x32xf32>
    %97 = vector.broadcast %90 : vector<1x32xf32> to vector<24x32xf32>
    %98 = arith.mulf %96, %97 : vector<24x32xf32>
    %99 = vector.broadcast %91 : vector<1x32xf32> to vector<24x32xf32>
    %100 = arith.addf %98, %99 : vector<24x32xf32>
    %c0_65 = arith.constant 0 : index
    %c0_66 = arith.constant 0 : index
    %c0_67 = arith.constant 0 : index
    %101 = vector.load %arg5[%c0_65, %c0_66, %c0_67] : memref<1x24x32xbf16, #tpu.memory_space<vmem>>, vector<1x24x32xbf16>
    %102 = vector.shape_cast %101 : vector<1x24x32xbf16> to vector<24x32xbf16>
    %103 = arith.extf %102 : vector<24x32xbf16> to vector<24x32xf32>
    %104 = arith.addf %100, %103 : vector<24x32xf32>
    %105 = arith.truncf %104 : vector<24x32xf32> to vector<24x32xbf16>
    %c0_68 = arith.constant 0 : index
    %c0_69 = arith.constant 0 : index
    %c0_70 = arith.constant 0 : index
    %106 = vector.load %arg6[%c0_68, %c0_69, %c0_70] : memref<1x24x32xbf16, #tpu.memory_space<vmem>>, vector<1x24x32xbf16>
    %107 = vector.shape_cast %106 : vector<1x24x32xbf16> to vector<24x32xbf16>
    %108 = vector.shape_cast %105 : vector<24x32xbf16> to vector<1x24x32xbf16>
    tpu.vector_store %arg6[%c0_68, %c0_69, %c0_70], %108 {strides = array<i32>} : memref<1x24x32xbf16, #tpu.memory_space<vmem>>, vector<1x24x32xbf16>,
    return
  }
  func.func @transform_0(%arg0: i32) -> (i32, i32, i32) {
    %c0_i32 = arith.constant 0 : i32
    %c0_i32_0 = arith.constant 0 : i32
    %c0_i32_1 = arith.constant 0 : i32
    return %arg0, %c0_i32, %c0_i32_0 : i32, i32, i32
  }
  func.func @transform_1(%arg0: i32) -> (i32, i32, i32) {
    %c0_i32 = arith.constant 0 : i32
    %c0_i32_0 = arith.constant 0 : i32
    %c0_i32_1 = arith.constant 0 : i32
    %c0_i32_2 = arith.constant 0 : i32
    return %c0_i32, %c0_i32_0, %c0_i32_1 : i32, i32, i32
  }
  func.func @transform_2(%arg0: i32) -> (i32, i32) {
    %c0_i32 = arith.constant 0 : i32
    %c0_i32_0 = arith.constant 0 : i32
    %c0_i32_1 = arith.constant 0 : i32
    return %c0_i32, %c0_i32_0 : i32, i32
  }
  func.func @transform_3(%arg0: i32) -> (i32, i32) {
    %c0_i32 = arith.constant 0 : i32
    %c0_i32_0 = arith.constant 0 : i32
    %c0_i32_1 = arith.constant 0 : i32
    return %c0_i32, %c0_i32_0 : i32, i32
  }
  func.func @transform_4(%arg0: i32) -> (i32, i32, i32) {
    %c0_i32 = arith.constant 0 : i32
    %c0_i32_0 = arith.constant 0 : i32
    %c0_i32_1 = arith.constant 0 : i32
    return %arg0, %c0_i32, %c0_i32_0 : i32, i32, i32
  }
  func.func @transform_5(%arg0: i32) -> (i32, i32, i32) {
    %c0_i32 = arith.constant 0 : i32
    %c0_i32_0 = arith.constant 0 : i32
    %c0_i32_1 = arith.constant 0 : i32
    return %arg0, %c0_i32, %c0_i32_0 : i32, i32, i32
  }
}

module attributes {stable_mosaic.version = 11 : i64} {
  func.func @kernel(%arg0: i32, %arg1: memref<1x38x32xbf16, #tpu.memory_space<vmem>>, %arg2: memref<9x32x64xbf16, #tpu.memory_space<vmem>>, %arg3: memref<1x16xf32, #tpu.memory_space<vmem>>, %arg4: memref<1x16xf32, #tpu.memory_space<vmem>>, %arg5: memref<1x24x64xbf16, #tpu.memory_space<vmem>>) attributes {dimension_semantics = [#tpu.dimension_semantics<parallel>], iteration_bounds = array<i64: 2>, scalar_prefetch = 0 : i64, scratch_operands = 0 : i64, tpu.core_type = #tpu.core_type<tc>, window_params = [{transform_indices = @transform_0, window_bounds = array<i64: 1, 38, 32>}, {pipeline_mode = #tpu.pipeline_mode<synchronous>, transform_indices = @transform_1, window_bounds = array<i64: 9, 32, 64>}, {pipeline_mode = #tpu.pipeline_mode<synchronous>, transform_indices = @transform_2, window_bounds = array<i64: 1, 16>}, {pipeline_mode = #tpu.pipeline_mode<synchronous>, transform_indices = @transform_3, window_bounds = array<i64: 1, 16>}, {transform_indices = @transform_4, window_bounds = array<i64: 1, 24, 64>}]} {
    %cst = arith.constant 0.000000e+00 : f32
    %0 = vector.broadcast %cst : f32 to vector<24x64xf32>
    %c0 = arith.constant 0 : index
    %c0_0 = arith.constant 0 : index
    %c0_1 = arith.constant 0 : index
    %1 = vector.load %arg1[%c0, %c0_0, %c0_1] : memref<1x38x32xbf16, #tpu.memory_space<vmem>>, vector<1x24x32xbf16>
    %2 = vector.shape_cast %1 : vector<1x24x32xbf16> to vector<24x32xbf16>
    %c0_2 = arith.constant 0 : index
    %c0_3 = arith.constant 0 : index
    %c0_4 = arith.constant 0 : index
    %3 = vector.load %arg2[%c0_2, %c0_3, %c0_4] : memref<9x32x64xbf16, #tpu.memory_space<vmem>>, vector<1x32x64xbf16>
    %4 = vector.shape_cast %3 : vector<1x32x64xbf16> to vector<32x64xbf16>
    %cst_5 = arith.constant dense<0.000000e+00> : vector<24x64xf32>
    %5 = tpu.matmul %2, %4, %cst_5 {dimension_numbers = #tpu.dot_dimension_numbers<[1], [0], [0], [1], [0, 0, 1, 1], [], []>} : vector<24x32xbf16>, vector<32x64xbf16>, vector<24x64xf32> -> vector<24x64xf32>
    %6 = arith.addf %0, %5 : vector<24x64xf32>
    %c0_6 = arith.constant 0 : index
    %c1 = arith.constant 1 : index
    %c0_7 = arith.constant 0 : index
    %7 = vector.load %arg1[%c0_6, %c1, %c0_7] : memref<1x38x32xbf16, #tpu.memory_space<vmem>>, vector<1x24x32xbf16>
    %8 = vector.shape_cast %7 : vector<1x24x32xbf16> to vector<24x32xbf16>
    %c1_8 = arith.constant 1 : index
    %c0_9 = arith.constant 0 : index
    %c0_10 = arith.constant 0 : index
    %9 = vector.load %arg2[%c1_8, %c0_9, %c0_10] : memref<9x32x64xbf16, #tpu.memory_space<vmem>>, vector<1x32x64xbf16>
    %10 = vector.shape_cast %9 : vector<1x32x64xbf16> to vector<32x64xbf16>
    %cst_11 = arith.constant dense<0.000000e+00> : vector<24x64xf32>
    %11 = tpu.matmul %8, %10, %cst_11 {dimension_numbers = #tpu.dot_dimension_numbers<[1], [0], [0], [1], [0, 0, 1, 1], [], []>} : vector<24x32xbf16>, vector<32x64xbf16>, vector<24x64xf32> -> vector<24x64xf32>
    %12 = arith.addf %6, %11 : vector<24x64xf32>
    %c0_12 = arith.constant 0 : index
    %c2 = arith.constant 2 : index
    %c0_13 = arith.constant 0 : index
    %13 = vector.load %arg1[%c0_12, %c2, %c0_13] : memref<1x38x32xbf16, #tpu.memory_space<vmem>>, vector<1x24x32xbf16>
    %14 = vector.shape_cast %13 : vector<1x24x32xbf16> to vector<24x32xbf16>
    %c2_14 = arith.constant 2 : index
    %c0_15 = arith.constant 0 : index
    %c0_16 = arith.constant 0 : index
    %15 = vector.load %arg2[%c2_14, %c0_15, %c0_16] : memref<9x32x64xbf16, #tpu.memory_space<vmem>>, vector<1x32x64xbf16>
    %16 = vector.shape_cast %15 : vector<1x32x64xbf16> to vector<32x64xbf16>
    %cst_17 = arith.constant dense<0.000000e+00> : vector<24x64xf32>
    %17 = tpu.matmul %14, %16, %cst_17 {dimension_numbers = #tpu.dot_dimension_numbers<[1], [0], [0], [1], [0, 0, 1, 1], [], []>} : vector<24x32xbf16>, vector<32x64xbf16>, vector<24x64xf32> -> vector<24x64xf32>
    %18 = arith.addf %12, %17 : vector<24x64xf32>
    %c0_18 = arith.constant 0 : index
    %c6 = arith.constant 6 : index
    %c0_19 = arith.constant 0 : index
    %19 = vector.load %arg1[%c0_18, %c6, %c0_19] : memref<1x38x32xbf16, #tpu.memory_space<vmem>>, vector<1x24x32xbf16>
    %20 = vector.shape_cast %19 : vector<1x24x32xbf16> to vector<24x32xbf16>
    %c3 = arith.constant 3 : index
    %c0_20 = arith.constant 0 : index
    %c0_21 = arith.constant 0 : index
    %21 = vector.load %arg2[%c3, %c0_20, %c0_21] : memref<9x32x64xbf16, #tpu.memory_space<vmem>>, vector<1x32x64xbf16>
    %22 = vector.shape_cast %21 : vector<1x32x64xbf16> to vector<32x64xbf16>
    %cst_22 = arith.constant dense<0.000000e+00> : vector<24x64xf32>
    %23 = tpu.matmul %20, %22, %cst_22 {dimension_numbers = #tpu.dot_dimension_numbers<[1], [0], [0], [1], [0, 0, 1, 1], [], []>} : vector<24x32xbf16>, vector<32x64xbf16>, vector<24x64xf32> -> vector<24x64xf32>
    %24 = arith.addf %18, %23 : vector<24x64xf32>
    %c0_23 = arith.constant 0 : index
    %c7 = arith.constant 7 : index
    %c0_24 = arith.constant 0 : index
    %25 = vector.load %arg1[%c0_23, %c7, %c0_24] : memref<1x38x32xbf16, #tpu.memory_space<vmem>>, vector<1x24x32xbf16>
    %26 = vector.shape_cast %25 : vector<1x24x32xbf16> to vector<24x32xbf16>
    %c4 = arith.constant 4 : index
    %c0_25 = arith.constant 0 : index
    %c0_26 = arith.constant 0 : index
    %27 = vector.load %arg2[%c4, %c0_25, %c0_26] : memref<9x32x64xbf16, #tpu.memory_space<vmem>>, vector<1x32x64xbf16>
    %28 = vector.shape_cast %27 : vector<1x32x64xbf16> to vector<32x64xbf16>
    %cst_27 = arith.constant dense<0.000000e+00> : vector<24x64xf32>
    %29 = tpu.matmul %26, %28, %cst_27 {dimension_numbers = #tpu.dot_dimension_numbers<[1], [0], [0], [1], [0, 0, 1, 1], [], []>} : vector<24x32xbf16>, vector<32x64xbf16>, vector<24x64xf32> -> vector<24x64xf32>
    %30 = arith.addf %24, %29 : vector<24x64xf32>
    %c0_28 = arith.constant 0 : index
    %c8 = arith.constant 8 : index
    %c0_29 = arith.constant 0 : index
    %31 = vector.load %arg1[%c0_28, %c8, %c0_29] : memref<1x38x32xbf16, #tpu.memory_space<vmem>>, vector<1x24x32xbf16>
    %32 = vector.shape_cast %31 : vector<1x24x32xbf16> to vector<24x32xbf16>
    %c5 = arith.constant 5 : index
    %c0_30 = arith.constant 0 : index
    %c0_31 = arith.constant 0 : index
    %33 = vector.load %arg2[%c5, %c0_30, %c0_31] : memref<9x32x64xbf16, #tpu.memory_space<vmem>>, vector<1x32x64xbf16>
    %34 = vector.shape_cast %33 : vector<1x32x64xbf16> to vector<32x64xbf16>
    %cst_32 = arith.constant dense<0.000000e+00> : vector<24x64xf32>
    %35 = tpu.matmul %32, %34, %cst_32 {dimension_numbers = #tpu.dot_dimension_numbers<[1], [0], [0], [1], [0, 0, 1, 1], [], []>} : vector<24x32xbf16>, vector<32x64xbf16>, vector<24x64xf32> -> vector<24x64xf32>
    %36 = arith.addf %30, %35 : vector<24x64xf32>
    %c0_33 = arith.constant 0 : index
    %c12 = arith.constant 12 : index
    %c0_34 = arith.constant 0 : index
    %37 = vector.load %arg1[%c0_33, %c12, %c0_34] : memref<1x38x32xbf16, #tpu.memory_space<vmem>>, vector<1x24x32xbf16>
    %38 = vector.shape_cast %37 : vector<1x24x32xbf16> to vector<24x32xbf16>
    %c6_35 = arith.constant 6 : index
    %c0_36 = arith.constant 0 : index
    %c0_37 = arith.constant 0 : index
    %39 = vector.load %arg2[%c6_35, %c0_36, %c0_37] : memref<9x32x64xbf16, #tpu.memory_space<vmem>>, vector<1x32x64xbf16>
    %40 = vector.shape_cast %39 : vector<1x32x64xbf16> to vector<32x64xbf16>
    %cst_38 = arith.constant dense<0.000000e+00> : vector<24x64xf32>
    %41 = tpu.matmul %38, %40, %cst_38 {dimension_numbers = #tpu.dot_dimension_numbers<[1], [0], [0], [1], [0, 0, 1, 1], [], []>} : vector<24x32xbf16>, vector<32x64xbf16>, vector<24x64xf32> -> vector<24x64xf32>
    %42 = arith.addf %36, %41 : vector<24x64xf32>
    %c0_39 = arith.constant 0 : index
    %c13 = arith.constant 13 : index
    %c0_40 = arith.constant 0 : index
    %43 = vector.load %arg1[%c0_39, %c13, %c0_40] : memref<1x38x32xbf16, #tpu.memory_space<vmem>>, vector<1x24x32xbf16>
    %44 = vector.shape_cast %43 : vector<1x24x32xbf16> to vector<24x32xbf16>
    %c7_41 = arith.constant 7 : index
    %c0_42 = arith.constant 0 : index
    %c0_43 = arith.constant 0 : index
    %45 = vector.load %arg2[%c7_41, %c0_42, %c0_43] : memref<9x32x64xbf16, #tpu.memory_space<vmem>>, vector<1x32x64xbf16>
    %46 = vector.shape_cast %45 : vector<1x32x64xbf16> to vector<32x64xbf16>
    %cst_44 = arith.constant dense<0.000000e+00> : vector<24x64xf32>
    %47 = tpu.matmul %44, %46, %cst_44 {dimension_numbers = #tpu.dot_dimension_numbers<[1], [0], [0], [1], [0, 0, 1, 1], [], []>} : vector<24x32xbf16>, vector<32x64xbf16>, vector<24x64xf32> -> vector<24x64xf32>
    %48 = arith.addf %42, %47 : vector<24x64xf32>
    %c0_45 = arith.constant 0 : index
    %c14 = arith.constant 14 : index
    %c0_46 = arith.constant 0 : index
    %49 = vector.load %arg1[%c0_45, %c14, %c0_46] : memref<1x38x32xbf16, #tpu.memory_space<vmem>>, vector<1x24x32xbf16>
    %50 = vector.shape_cast %49 : vector<1x24x32xbf16> to vector<24x32xbf16>
    %c8_47 = arith.constant 8 : index
    %c0_48 = arith.constant 0 : index
    %c0_49 = arith.constant 0 : index
    %51 = vector.load %arg2[%c8_47, %c0_48, %c0_49] : memref<9x32x64xbf16, #tpu.memory_space<vmem>>, vector<1x32x64xbf16>
    %52 = vector.shape_cast %51 : vector<1x32x64xbf16> to vector<32x64xbf16>
    %cst_50 = arith.constant dense<0.000000e+00> : vector<24x64xf32>
    %53 = tpu.matmul %50, %52, %cst_50 {dimension_numbers = #tpu.dot_dimension_numbers<[1], [0], [0], [1], [0, 0, 1, 1], [], []>} : vector<24x32xbf16>, vector<32x64xbf16>, vector<24x64xf32> -> vector<24x64xf32>
    %54 = arith.addf %48, %53 : vector<24x64xf32>
    %55 = tpu.iota {dimensions = array<i32: 0>} : vector<24x64xi32>
    %c6_i32 = arith.constant 6 : i32
    %c0_i32 = arith.constant 0 : i32
    %56 = arith.cmpi eq, %c6_i32, %c0_i32 : i32
    %c1_i32 = arith.constant 1 : i32
    %57 = arith.select %56, %c1_i32, %c6_i32 : i32
    %58 = vector.broadcast %57 : i32 to vector<24x64xi32>
    %59 = arith.remsi %55, %58 : vector<24x64xi32>
    %c0_i32_51 = arith.constant 0 : i32
    %60 = vector.broadcast %c0_i32_51 : i32 to vector<24x64xi32>
    %61 = arith.cmpi ne, %59, %60 : vector<24x64xi32>
    %c0_i32_52 = arith.constant 0 : i32
    %62 = vector.broadcast %c0_i32_52 : i32 to vector<24x64xi32>
    %63 = arith.cmpi slt, %59, %62 : vector<24x64xi32>
    %c0_i32_53 = arith.constant 0 : i32
    %64 = arith.cmpi slt, %57, %c0_i32_53 : i32
    %65 = vector.broadcast %64 : i1 to vector<24x64xi1>
    %66 = vector.broadcast %65 : vector<24x64xi1> to vector<24x64xi1>
    %67 = arith.xori %63, %66 : vector<24x64xi1>
    %68 = arith.andi %67, %61 : vector<24x64xi1>
    %69 = vector.broadcast %57 : i32 to vector<24x64xi32>
    %70 = arith.addi %59, %69 : vector<24x64xi32>
    %71 = arith.select %68, %70, %59 : vector<24x64xi1>, vector<24x64xi32>
    %c4_i32 = arith.constant 4 : i32
    %72 = vector.broadcast %c4_i32 : i32 to vector<24x64xi32>
    %73 = arith.cmpi slt, %71, %72 : vector<24x64xi32>
    %cst_54 = arith.constant 1.000000e+00 : f32
    %cst_55 = arith.constant 0.000000e+00 : f32
    %74 = vector.broadcast %cst_54 : f32 to vector<24x64xf32>
    %75 = vector.broadcast %cst_55 : f32 to vector<24x64xf32>
    %76 = arith.select %73, %74, %75 : vector<24x64xi1>, vector<24x64xf32>
    %77 = arith.mulf %54, %76 : vector<24x64xf32>
    %cst_56 = arith.constant dense<0.000000e+00> : vector<64xf32>
    %78 = vector.multi_reduction <add>, %77, %cst_56 [0] : vector<24x64xf32> to vector<64xf32>
    %79 = vector.shape_cast %78 : vector<64xf32> to vector<1x64xf32>
    %cst_57 = arith.constant 6.250000e-02 : f32
    %80 = vector.broadcast %cst_57 : f32 to vector<1x64xf32>
    %81 = arith.mulf %79, %80 : vector<1x64xf32>
    %82 = vector.extract_strided_slice %81 {offsets = [0, 0], sizes = [1, 16], strides = [1, 1]} : vector<1x64xf32> to vector<1x16xf32>
    %83 = vector.extract_strided_slice %81 {offsets = [0, 16], sizes = [1, 16], strides = [1, 1]} : vector<1x64xf32> to vector<1x16xf32>
    %84 = arith.addf %82, %83 : vector<1x16xf32>
    %85 = vector.extract_strided_slice %81 {offsets = [0, 32], sizes = [1, 16], strides = [1, 1]} : vector<1x64xf32> to vector<1x16xf32>
    %86 = arith.addf %84, %85 : vector<1x16xf32>
    %87 = vector.extract_strided_slice %81 {offsets = [0, 48], sizes = [1, 16], strides = [1, 1]} : vector<1x64xf32> to vector<1x16xf32>
    %88 = arith.addf %86, %87 : vector<1x16xf32>
    %cst_58 = arith.constant 2.500000e-01 : f32
    %89 = vector.broadcast %cst_58 : f32 to vector<1x16xf32>
    %90 = arith.mulf %88, %89 : vector<1x16xf32>
    %91 = tpu.concatenate %90, %90, %90, %90 in 1 : vector<1x16xf32>, vector<1x16xf32>, vector<1x16xf32>, vector<1x16xf32> -> vector<1x64xf32>
    %92 = vector.broadcast %91 : vector<1x64xf32> to vector<24x64xf32>
    %93 = arith.subf %54, %92 : vector<24x64xf32>
    %94 = arith.mulf %93, %93 : vector<24x64xf32>
    %95 = arith.mulf %94, %76 : vector<24x64xf32>
    %cst_59 = arith.constant dense<0.000000e+00> : vector<64xf32>
    %96 = vector.multi_reduction <add>, %95, %cst_59 [0] : vector<24x64xf32> to vector<64xf32>
    %97 = vector.shape_cast %96 : vector<64xf32> to vector<1x64xf32>
    %cst_60 = arith.constant 6.250000e-02 : f32
    %98 = vector.broadcast %cst_60 : f32 to vector<1x64xf32>
    %99 = arith.mulf %97, %98 : vector<1x64xf32>
    %100 = vector.extract_strided_slice %99 {offsets = [0, 0], sizes = [1, 16], strides = [1, 1]} : vector<1x64xf32> to vector<1x16xf32>
    %101 = vector.extract_strided_slice %99 {offsets = [0, 16], sizes = [1, 16], strides = [1, 1]} : vector<1x64xf32> to vector<1x16xf32>
    %102 = arith.addf %100, %101 : vector<1x16xf32>
    %103 = vector.extract_strided_slice %99 {offsets = [0, 32], sizes = [1, 16], strides = [1, 1]} : vector<1x64xf32> to vector<1x16xf32>
    %104 = arith.addf %102, %103 : vector<1x16xf32>
    %105 = vector.extract_strided_slice %99 {offsets = [0, 48], sizes = [1, 16], strides = [1, 1]} : vector<1x64xf32> to vector<1x16xf32>
    %106 = arith.addf %104, %105 : vector<1x16xf32>
    %cst_61 = arith.constant 2.500000e-01 : f32
    %107 = vector.broadcast %cst_61 : f32 to vector<1x16xf32>
    %108 = arith.mulf %106, %107 : vector<1x16xf32>
    %109 = tpu.concatenate %108, %108, %108, %108 in 1 : vector<1x16xf32>, vector<1x16xf32>, vector<1x16xf32>, vector<1x16xf32> -> vector<1x64xf32>
    %c0_62 = arith.constant 0 : index
    %c0_63 = arith.constant 0 : index
    %110 = vector.load %arg3[%c0_62, %c0_63] : memref<1x16xf32, #tpu.memory_space<vmem>>, vector<1x16xf32>
    %c0_64 = arith.constant 0 : index
    %c0_65 = arith.constant 0 : index
    %111 = vector.load %arg4[%c0_64, %c0_65] : memref<1x16xf32, #tpu.memory_space<vmem>>, vector<1x16xf32>
    %112 = tpu.concatenate %110, %110, %110, %110 in 1 : vector<1x16xf32>, vector<1x16xf32>, vector<1x16xf32>, vector<1x16xf32> -> vector<1x64xf32>
    %113 = tpu.concatenate %111, %111, %111, %111 in 1 : vector<1x16xf32>, vector<1x16xf32>, vector<1x16xf32>, vector<1x16xf32> -> vector<1x64xf32>
    %cst_66 = arith.constant 9.99999974E-6 : f32
    %114 = vector.broadcast %cst_66 : f32 to vector<1x64xf32>
    %115 = arith.addf %109, %114 : vector<1x64xf32>
    %116 = math.rsqrt %115 : vector<1x64xf32>
    %117 = vector.broadcast %116 : vector<1x64xf32> to vector<24x64xf32>
    %118 = arith.mulf %93, %117 : vector<24x64xf32>
    %119 = vector.broadcast %112 : vector<1x64xf32> to vector<24x64xf32>
    %120 = arith.mulf %118, %119 : vector<24x64xf32>
    %121 = vector.broadcast %113 : vector<1x64xf32> to vector<24x64xf32>
    %122 = arith.addf %120, %121 : vector<24x64xf32>
    %cst_67 = arith.constant 0.000000e+00 : f32
    %123 = vector.broadcast %cst_67 : f32 to vector<24x64xf32>
    %124 = arith.maximumf %122, %123 : vector<24x64xf32>
    %125 = arith.truncf %124 : vector<24x64xf32> to vector<24x64xbf16>
    %c0_68 = arith.constant 0 : index
    %c0_69 = arith.constant 0 : index
    %c0_70 = arith.constant 0 : index
    %126 = vector.load %arg5[%c0_68, %c0_69, %c0_70] : memref<1x24x64xbf16, #tpu.memory_space<vmem>>, vector<1x24x64xbf16>
    %127 = vector.shape_cast %126 : vector<1x24x64xbf16> to vector<24x64xbf16>
    %128 = vector.shape_cast %125 : vector<24x64xbf16> to vector<1x24x64xbf16>
    tpu.vector_store %arg5[%c0_68, %c0_69, %c0_70], %128 {strides = array<i32>} : memref<1x24x64xbf16, #tpu.memory_space<vmem>>, vector<1x24x64xbf16>,
    return
  }
  func.func @transform_0(%arg0: i32) -> (i32, i32, i32) {
    %c0_i32 = arith.constant 0 : i32
    %c0_i32_0 = arith.constant 0 : i32
    %c0_i32_1 = arith.constant 0 : i32
    return %arg0, %c0_i32, %c0_i32_0 : i32, i32, i32
  }
  func.func @transform_1(%arg0: i32) -> (i32, i32, i32) {
    %c0_i32 = arith.constant 0 : i32
    %c0_i32_0 = arith.constant 0 : i32
    %c0_i32_1 = arith.constant 0 : i32
    %c0_i32_2 = arith.constant 0 : i32
    return %c0_i32, %c0_i32_0, %c0_i32_1 : i32, i32, i32
  }
  func.func @transform_2(%arg0: i32) -> (i32, i32) {
    %c0_i32 = arith.constant 0 : i32
    %c0_i32_0 = arith.constant 0 : i32
    %c0_i32_1 = arith.constant 0 : i32
    return %c0_i32, %c0_i32_0 : i32, i32
  }
  func.func @transform_3(%arg0: i32) -> (i32, i32) {
    %c0_i32 = arith.constant 0 : i32
    %c0_i32_0 = arith.constant 0 : i32
    %c0_i32_1 = arith.constant 0 : i32
    return %c0_i32, %c0_i32_0 : i32, i32
  }
  func.func @transform_4(%arg0: i32) -> (i32, i32, i32) {
    %c0_i32 = arith.constant 0 : i32
    %c0_i32_0 = arith.constant 0 : i32
    %c0_i32_1 = arith.constant 0 : i32
    return %arg0, %c0_i32, %c0_i32_0 : i32, i32, i32
  }
}

module attributes {stable_mosaic.version = 11 : i64} {
  func.func @kernel(%arg0: i32, %arg1: memref<1x102x16xbf16, #tpu.memory_space<vmem>>, %arg2: memref<9x16x32xbf16, #tpu.memory_space<vmem>>, %arg3: memref<1x8xf32, #tpu.memory_space<vmem>>, %arg4: memref<1x8xf32, #tpu.memory_space<vmem>>, %arg5: memref<1x80x32xbf16, #tpu.memory_space<vmem>>) attributes {dimension_semantics = [#tpu.dimension_semantics<parallel>], iteration_bounds = array<i64: 2>, scalar_prefetch = 0 : i64, scratch_operands = 0 : i64, tpu.core_type = #tpu.core_type<tc>, window_params = [{transform_indices = @transform_0, window_bounds = array<i64: 1, 102, 16>}, {pipeline_mode = #tpu.pipeline_mode<synchronous>, transform_indices = @transform_1, window_bounds = array<i64: 9, 16, 32>}, {pipeline_mode = #tpu.pipeline_mode<synchronous>, transform_indices = @transform_2, window_bounds = array<i64: 1, 8>}, {pipeline_mode = #tpu.pipeline_mode<synchronous>, transform_indices = @transform_3, window_bounds = array<i64: 1, 8>}, {transform_indices = @transform_4, window_bounds = array<i64: 1, 80, 32>}]} {
    %cst = arith.constant 0.000000e+00 : f32
    %0 = vector.broadcast %cst : f32 to vector<80x32xf32>
    %c0 = arith.constant 0 : index
    %c0_0 = arith.constant 0 : index
    %c0_1 = arith.constant 0 : index
    %1 = vector.load %arg1[%c0, %c0_0, %c0_1] : memref<1x102x16xbf16, #tpu.memory_space<vmem>>, vector<1x80x16xbf16>
    %2 = vector.shape_cast %1 : vector<1x80x16xbf16> to vector<80x16xbf16>
    %c0_2 = arith.constant 0 : index
    %c0_3 = arith.constant 0 : index
    %c0_4 = arith.constant 0 : index
    %3 = vector.load %arg2[%c0_2, %c0_3, %c0_4] : memref<9x16x32xbf16, #tpu.memory_space<vmem>>, vector<1x16x32xbf16>
    %4 = vector.shape_cast %3 : vector<1x16x32xbf16> to vector<16x32xbf16>
    %cst_5 = arith.constant dense<0.000000e+00> : vector<80x32xf32>
    %5 = tpu.matmul %2, %4, %cst_5 {dimension_numbers = #tpu.dot_dimension_numbers<[1], [0], [0], [1], [0, 0, 1, 1], [], []>} : vector<80x16xbf16>, vector<16x32xbf16>, vector<80x32xf32> -> vector<80x32xf32>
    %6 = arith.addf %0, %5 : vector<80x32xf32>
    %c0_6 = arith.constant 0 : index
    %c1 = arith.constant 1 : index
    %c0_7 = arith.constant 0 : index
    %7 = vector.load %arg1[%c0_6, %c1, %c0_7] : memref<1x102x16xbf16, #tpu.memory_space<vmem>>, vector<1x80x16xbf16>
    %8 = vector.shape_cast %7 : vector<1x80x16xbf16> to vector<80x16xbf16>
    %c1_8 = arith.constant 1 : index
    %c0_9 = arith.constant 0 : index
    %c0_10 = arith.constant 0 : index
    %9 = vector.load %arg2[%c1_8, %c0_9, %c0_10] : memref<9x16x32xbf16, #tpu.memory_space<vmem>>, vector<1x16x32xbf16>
    %10 = vector.shape_cast %9 : vector<1x16x32xbf16> to vector<16x32xbf16>
    %cst_11 = arith.constant dense<0.000000e+00> : vector<80x32xf32>
    %11 = tpu.matmul %8, %10, %cst_11 {dimension_numbers = #tpu.dot_dimension_numbers<[1], [0], [0], [1], [0, 0, 1, 1], [], []>} : vector<80x16xbf16>, vector<16x32xbf16>, vector<80x32xf32> -> vector<80x32xf32>
    %12 = arith.addf %6, %11 : vector<80x32xf32>
    %c0_12 = arith.constant 0 : index
    %c2 = arith.constant 2 : index
    %c0_13 = arith.constant 0 : index
    %13 = vector.load %arg1[%c0_12, %c2, %c0_13] : memref<1x102x16xbf16, #tpu.memory_space<vmem>>, vector<1x80x16xbf16>
    %14 = vector.shape_cast %13 : vector<1x80x16xbf16> to vector<80x16xbf16>
    %c2_14 = arith.constant 2 : index
    %c0_15 = arith.constant 0 : index
    %c0_16 = arith.constant 0 : index
    %15 = vector.load %arg2[%c2_14, %c0_15, %c0_16] : memref<9x16x32xbf16, #tpu.memory_space<vmem>>, vector<1x16x32xbf16>
    %16 = vector.shape_cast %15 : vector<1x16x32xbf16> to vector<16x32xbf16>
    %cst_17 = arith.constant dense<0.000000e+00> : vector<80x32xf32>
    %17 = tpu.matmul %14, %16, %cst_17 {dimension_numbers = #tpu.dot_dimension_numbers<[1], [0], [0], [1], [0, 0, 1, 1], [], []>} : vector<80x16xbf16>, vector<16x32xbf16>, vector<80x32xf32> -> vector<80x32xf32>
    %18 = arith.addf %12, %17 : vector<80x32xf32>
    %c0_18 = arith.constant 0 : index
    %c10 = arith.constant 10 : index
    %c0_19 = arith.constant 0 : index
    %19 = vector.load %arg1[%c0_18, %c10, %c0_19] : memref<1x102x16xbf16, #tpu.memory_space<vmem>>, vector<1x80x16xbf16>
    %20 = vector.shape_cast %19 : vector<1x80x16xbf16> to vector<80x16xbf16>
    %c3 = arith.constant 3 : index
    %c0_20 = arith.constant 0 : index
    %c0_21 = arith.constant 0 : index
    %21 = vector.load %arg2[%c3, %c0_20, %c0_21] : memref<9x16x32xbf16, #tpu.memory_space<vmem>>, vector<1x16x32xbf16>
    %22 = vector.shape_cast %21 : vector<1x16x32xbf16> to vector<16x32xbf16>
    %cst_22 = arith.constant dense<0.000000e+00> : vector<80x32xf32>
    %23 = tpu.matmul %20, %22, %cst_22 {dimension_numbers = #tpu.dot_dimension_numbers<[1], [0], [0], [1], [0, 0, 1, 1], [], []>} : vector<80x16xbf16>, vector<16x32xbf16>, vector<80x32xf32> -> vector<80x32xf32>
    %24 = arith.addf %18, %23 : vector<80x32xf32>
    %c0_23 = arith.constant 0 : index
    %c11 = arith.constant 11 : index
    %c0_24 = arith.constant 0 : index
    %25 = vector.load %arg1[%c0_23, %c11, %c0_24] : memref<1x102x16xbf16, #tpu.memory_space<vmem>>, vector<1x80x16xbf16>
    %26 = vector.shape_cast %25 : vector<1x80x16xbf16> to vector<80x16xbf16>
    %c4 = arith.constant 4 : index
    %c0_25 = arith.constant 0 : index
    %c0_26 = arith.constant 0 : index
    %27 = vector.load %arg2[%c4, %c0_25, %c0_26] : memref<9x16x32xbf16, #tpu.memory_space<vmem>>, vector<1x16x32xbf16>
    %28 = vector.shape_cast %27 : vector<1x16x32xbf16> to vector<16x32xbf16>
    %cst_27 = arith.constant dense<0.000000e+00> : vector<80x32xf32>
    %29 = tpu.matmul %26, %28, %cst_27 {dimension_numbers = #tpu.dot_dimension_numbers<[1], [0], [0], [1], [0, 0, 1, 1], [], []>} : vector<80x16xbf16>, vector<16x32xbf16>, vector<80x32xf32> -> vector<80x32xf32>
    %30 = arith.addf %24, %29 : vector<80x32xf32>
    %c0_28 = arith.constant 0 : index
    %c12 = arith.constant 12 : index
    %c0_29 = arith.constant 0 : index
    %31 = vector.load %arg1[%c0_28, %c12, %c0_29] : memref<1x102x16xbf16, #tpu.memory_space<vmem>>, vector<1x80x16xbf16>
    %32 = vector.shape_cast %31 : vector<1x80x16xbf16> to vector<80x16xbf16>
    %c5 = arith.constant 5 : index
    %c0_30 = arith.constant 0 : index
    %c0_31 = arith.constant 0 : index
    %33 = vector.load %arg2[%c5, %c0_30, %c0_31] : memref<9x16x32xbf16, #tpu.memory_space<vmem>>, vector<1x16x32xbf16>
    %34 = vector.shape_cast %33 : vector<1x16x32xbf16> to vector<16x32xbf16>
    %cst_32 = arith.constant dense<0.000000e+00> : vector<80x32xf32>
    %35 = tpu.matmul %32, %34, %cst_32 {dimension_numbers = #tpu.dot_dimension_numbers<[1], [0], [0], [1], [0, 0, 1, 1], [], []>} : vector<80x16xbf16>, vector<16x32xbf16>, vector<80x32xf32> -> vector<80x32xf32>
    %36 = arith.addf %30, %35 : vector<80x32xf32>
    %c0_33 = arith.constant 0 : index
    %c20 = arith.constant 20 : index
    %c0_34 = arith.constant 0 : index
    %37 = vector.load %arg1[%c0_33, %c20, %c0_34] : memref<1x102x16xbf16, #tpu.memory_space<vmem>>, vector<1x80x16xbf16>
    %38 = vector.shape_cast %37 : vector<1x80x16xbf16> to vector<80x16xbf16>
    %c6 = arith.constant 6 : index
    %c0_35 = arith.constant 0 : index
    %c0_36 = arith.constant 0 : index
    %39 = vector.load %arg2[%c6, %c0_35, %c0_36] : memref<9x16x32xbf16, #tpu.memory_space<vmem>>, vector<1x16x32xbf16>
    %40 = vector.shape_cast %39 : vector<1x16x32xbf16> to vector<16x32xbf16>
    %cst_37 = arith.constant dense<0.000000e+00> : vector<80x32xf32>
    %41 = tpu.matmul %38, %40, %cst_37 {dimension_numbers = #tpu.dot_dimension_numbers<[1], [0], [0], [1], [0, 0, 1, 1], [], []>} : vector<80x16xbf16>, vector<16x32xbf16>, vector<80x32xf32> -> vector<80x32xf32>
    %42 = arith.addf %36, %41 : vector<80x32xf32>
    %c0_38 = arith.constant 0 : index
    %c21 = arith.constant 21 : index
    %c0_39 = arith.constant 0 : index
    %43 = vector.load %arg1[%c0_38, %c21, %c0_39] : memref<1x102x16xbf16, #tpu.memory_space<vmem>>, vector<1x80x16xbf16>
    %44 = vector.shape_cast %43 : vector<1x80x16xbf16> to vector<80x16xbf16>
    %c7 = arith.constant 7 : index
    %c0_40 = arith.constant 0 : index
    %c0_41 = arith.constant 0 : index
    %45 = vector.load %arg2[%c7, %c0_40, %c0_41] : memref<9x16x32xbf16, #tpu.memory_space<vmem>>, vector<1x16x32xbf16>
    %46 = vector.shape_cast %45 : vector<1x16x32xbf16> to vector<16x32xbf16>
    %cst_42 = arith.constant dense<0.000000e+00> : vector<80x32xf32>
    %47 = tpu.matmul %44, %46, %cst_42 {dimension_numbers = #tpu.dot_dimension_numbers<[1], [0], [0], [1], [0, 0, 1, 1], [], []>} : vector<80x16xbf16>, vector<16x32xbf16>, vector<80x32xf32> -> vector<80x32xf32>
    %48 = arith.addf %42, %47 : vector<80x32xf32>
    %c0_43 = arith.constant 0 : index
    %c22 = arith.constant 22 : index
    %c0_44 = arith.constant 0 : index
    %49 = vector.load %arg1[%c0_43, %c22, %c0_44] : memref<1x102x16xbf16, #tpu.memory_space<vmem>>, vector<1x80x16xbf16>
    %50 = vector.shape_cast %49 : vector<1x80x16xbf16> to vector<80x16xbf16>
    %c8 = arith.constant 8 : index
    %c0_45 = arith.constant 0 : index
    %c0_46 = arith.constant 0 : index
    %51 = vector.load %arg2[%c8, %c0_45, %c0_46] : memref<9x16x32xbf16, #tpu.memory_space<vmem>>, vector<1x16x32xbf16>
    %52 = vector.shape_cast %51 : vector<1x16x32xbf16> to vector<16x32xbf16>
    %cst_47 = arith.constant dense<0.000000e+00> : vector<80x32xf32>
    %53 = tpu.matmul %50, %52, %cst_47 {dimension_numbers = #tpu.dot_dimension_numbers<[1], [0], [0], [1], [0, 0, 1, 1], [], []>} : vector<80x16xbf16>, vector<16x32xbf16>, vector<80x32xf32> -> vector<80x32xf32>
    %54 = arith.addf %48, %53 : vector<80x32xf32>
    %55 = tpu.iota {dimensions = array<i32: 0>} : vector<80x32xi32>
    %c10_i32 = arith.constant 10 : i32
    %c0_i32 = arith.constant 0 : i32
    %56 = arith.cmpi eq, %c10_i32, %c0_i32 : i32
    %c1_i32 = arith.constant 1 : i32
    %57 = arith.select %56, %c1_i32, %c10_i32 : i32
    %58 = vector.broadcast %57 : i32 to vector<80x32xi32>
    %59 = arith.remsi %55, %58 : vector<80x32xi32>
    %c0_i32_48 = arith.constant 0 : i32
    %60 = vector.broadcast %c0_i32_48 : i32 to vector<80x32xi32>
    %61 = arith.cmpi ne, %59, %60 : vector<80x32xi32>
    %c0_i32_49 = arith.constant 0 : i32
    %62 = vector.broadcast %c0_i32_49 : i32 to vector<80x32xi32>
    %63 = arith.cmpi slt, %59, %62 : vector<80x32xi32>
    %c0_i32_50 = arith.constant 0 : i32
    %64 = arith.cmpi slt, %57, %c0_i32_50 : i32
    %65 = vector.broadcast %64 : i1 to vector<80x32xi1>
    %66 = vector.broadcast %65 : vector<80x32xi1> to vector<80x32xi1>
    %67 = arith.xori %63, %66 : vector<80x32xi1>
    %68 = arith.andi %67, %61 : vector<80x32xi1>
    %69 = vector.broadcast %57 : i32 to vector<80x32xi32>
    %70 = arith.addi %59, %69 : vector<80x32xi32>
    %71 = arith.select %68, %70, %59 : vector<80x32xi1>, vector<80x32xi32>
    %c8_i32 = arith.constant 8 : i32
    %72 = vector.broadcast %c8_i32 : i32 to vector<80x32xi32>
    %73 = arith.cmpi slt, %71, %72 : vector<80x32xi32>
    %cst_51 = arith.constant 1.000000e+00 : f32
    %cst_52 = arith.constant 0.000000e+00 : f32
    %74 = vector.broadcast %cst_51 : f32 to vector<80x32xf32>
    %75 = vector.broadcast %cst_52 : f32 to vector<80x32xf32>
    %76 = arith.select %73, %74, %75 : vector<80x32xi1>, vector<80x32xf32>
    %77 = arith.mulf %54, %76 : vector<80x32xf32>
    %cst_53 = arith.constant dense<0.000000e+00> : vector<32xf32>
    %78 = vector.multi_reduction <add>, %77, %cst_53 [0] : vector<80x32xf32> to vector<32xf32>
    %79 = vector.shape_cast %78 : vector<32xf32> to vector<1x32xf32>
    %cst_54 = arith.constant 1.562500e-02 : f32
    %80 = vector.broadcast %cst_54 : f32 to vector<1x32xf32>
    %81 = arith.mulf %79, %80 : vector<1x32xf32>
    %82 = vector.extract_strided_slice %81 {offsets = [0, 0], sizes = [1, 8], strides = [1, 1]} : vector<1x32xf32> to vector<1x8xf32>
    %83 = vector.extract_strided_slice %81 {offsets = [0, 8], sizes = [1, 8], strides = [1, 1]} : vector<1x32xf32> to vector<1x8xf32>
    %84 = arith.addf %82, %83 : vector<1x8xf32>
    %85 = vector.extract_strided_slice %81 {offsets = [0, 16], sizes = [1, 8], strides = [1, 1]} : vector<1x32xf32> to vector<1x8xf32>
    %86 = arith.addf %84, %85 : vector<1x8xf32>
    %87 = vector.extract_strided_slice %81 {offsets = [0, 24], sizes = [1, 8], strides = [1, 1]} : vector<1x32xf32> to vector<1x8xf32>
    %88 = arith.addf %86, %87 : vector<1x8xf32>
    %cst_55 = arith.constant 2.500000e-01 : f32
    %89 = vector.broadcast %cst_55 : f32 to vector<1x8xf32>
    %90 = arith.mulf %88, %89 : vector<1x8xf32>
    %91 = tpu.concatenate %90, %90, %90, %90 in 1 : vector<1x8xf32>, vector<1x8xf32>, vector<1x8xf32>, vector<1x8xf32> -> vector<1x32xf32>
    %92 = vector.broadcast %91 : vector<1x32xf32> to vector<80x32xf32>
    %93 = arith.subf %54, %92 : vector<80x32xf32>
    %94 = arith.mulf %93, %93 : vector<80x32xf32>
    %95 = arith.mulf %94, %76 : vector<80x32xf32>
    %cst_56 = arith.constant dense<0.000000e+00> : vector<32xf32>
    %96 = vector.multi_reduction <add>, %95, %cst_56 [0] : vector<80x32xf32> to vector<32xf32>
    %97 = vector.shape_cast %96 : vector<32xf32> to vector<1x32xf32>
    %cst_57 = arith.constant 1.562500e-02 : f32
    %98 = vector.broadcast %cst_57 : f32 to vector<1x32xf32>
    %99 = arith.mulf %97, %98 : vector<1x32xf32>
    %100 = vector.extract_strided_slice %99 {offsets = [0, 0], sizes = [1, 8], strides = [1, 1]} : vector<1x32xf32> to vector<1x8xf32>
    %101 = vector.extract_strided_slice %99 {offsets = [0, 8], sizes = [1, 8], strides = [1, 1]} : vector<1x32xf32> to vector<1x8xf32>
    %102 = arith.addf %100, %101 : vector<1x8xf32>
    %103 = vector.extract_strided_slice %99 {offsets = [0, 16], sizes = [1, 8], strides = [1, 1]} : vector<1x32xf32> to vector<1x8xf32>
    %104 = arith.addf %102, %103 : vector<1x8xf32>
    %105 = vector.extract_strided_slice %99 {offsets = [0, 24], sizes = [1, 8], strides = [1, 1]} : vector<1x32xf32> to vector<1x8xf32>
    %106 = arith.addf %104, %105 : vector<1x8xf32>
    %cst_58 = arith.constant 2.500000e-01 : f32
    %107 = vector.broadcast %cst_58 : f32 to vector<1x8xf32>
    %108 = arith.mulf %106, %107 : vector<1x8xf32>
    %109 = tpu.concatenate %108, %108, %108, %108 in 1 : vector<1x8xf32>, vector<1x8xf32>, vector<1x8xf32>, vector<1x8xf32> -> vector<1x32xf32>
    %c0_59 = arith.constant 0 : index
    %c0_60 = arith.constant 0 : index
    %110 = vector.load %arg3[%c0_59, %c0_60] : memref<1x8xf32, #tpu.memory_space<vmem>>, vector<1x8xf32>
    %c0_61 = arith.constant 0 : index
    %c0_62 = arith.constant 0 : index
    %111 = vector.load %arg4[%c0_61, %c0_62] : memref<1x8xf32, #tpu.memory_space<vmem>>, vector<1x8xf32>
    %112 = tpu.concatenate %110, %110, %110, %110 in 1 : vector<1x8xf32>, vector<1x8xf32>, vector<1x8xf32>, vector<1x8xf32> -> vector<1x32xf32>
    %113 = tpu.concatenate %111, %111, %111, %111 in 1 : vector<1x8xf32>, vector<1x8xf32>, vector<1x8xf32>, vector<1x8xf32> -> vector<1x32xf32>
    %cst_63 = arith.constant 9.99999974E-6 : f32
    %114 = vector.broadcast %cst_63 : f32 to vector<1x32xf32>
    %115 = arith.addf %109, %114 : vector<1x32xf32>
    %116 = math.rsqrt %115 : vector<1x32xf32>
    %117 = vector.broadcast %116 : vector<1x32xf32> to vector<80x32xf32>
    %118 = arith.mulf %93, %117 : vector<80x32xf32>
    %119 = vector.broadcast %112 : vector<1x32xf32> to vector<80x32xf32>
    %120 = arith.mulf %118, %119 : vector<80x32xf32>
    %121 = vector.broadcast %113 : vector<1x32xf32> to vector<80x32xf32>
    %122 = arith.addf %120, %121 : vector<80x32xf32>
    %cst_64 = arith.constant 0.000000e+00 : f32
    %123 = vector.broadcast %cst_64 : f32 to vector<80x32xf32>
    %124 = arith.maximumf %122, %123 : vector<80x32xf32>
    %125 = arith.truncf %124 : vector<80x32xf32> to vector<80x32xbf16>
    %c0_65 = arith.constant 0 : index
    %c0_66 = arith.constant 0 : index
    %c0_67 = arith.constant 0 : index
    %126 = vector.load %arg5[%c0_65, %c0_66, %c0_67] : memref<1x80x32xbf16, #tpu.memory_space<vmem>>, vector<1x80x32xbf16>
    %127 = vector.shape_cast %126 : vector<1x80x32xbf16> to vector<80x32xbf16>
    %128 = vector.shape_cast %125 : vector<80x32xbf16> to vector<1x80x32xbf16>
    tpu.vector_store %arg5[%c0_65, %c0_66, %c0_67], %128 {strides = array<i32>} : memref<1x80x32xbf16, #tpu.memory_space<vmem>>, vector<1x80x32xbf16>,
    return
  }
  func.func @transform_0(%arg0: i32) -> (i32, i32, i32) {
    %c0_i32 = arith.constant 0 : i32
    %c0_i32_0 = arith.constant 0 : i32
    %c0_i32_1 = arith.constant 0 : i32
    return %arg0, %c0_i32, %c0_i32_0 : i32, i32, i32
  }
  func.func @transform_1(%arg0: i32) -> (i32, i32, i32) {
    %c0_i32 = arith.constant 0 : i32
    %c0_i32_0 = arith.constant 0 : i32
    %c0_i32_1 = arith.constant 0 : i32
    %c0_i32_2 = arith.constant 0 : i32
    return %c0_i32, %c0_i32_0, %c0_i32_1 : i32, i32, i32
  }
  func.func @transform_2(%arg0: i32) -> (i32, i32) {
    %c0_i32 = arith.constant 0 : i32
    %c0_i32_0 = arith.constant 0 : i32
    %c0_i32_1 = arith.constant 0 : i32
    return %c0_i32, %c0_i32_0 : i32, i32
  }
  func.func @transform_3(%arg0: i32) -> (i32, i32) {
    %c0_i32 = arith.constant 0 : i32
    %c0_i32_0 = arith.constant 0 : i32
    %c0_i32_1 = arith.constant 0 : i32
    return %c0_i32, %c0_i32_0 : i32, i32
  }
  func.func @transform_4(%arg0: i32) -> (i32, i32, i32) {
    %c0_i32 = arith.constant 0 : i32
    %c0_i32_0 = arith.constant 0 : i32
    %c0_i32_1 = arith.constant 0 : i32
    return %arg0, %c0_i32, %c0_i32_0 : i32, i32, i32
  }
}

module attributes {stable_mosaic.version = 11 : i64} {
  func.func @kernel(%arg0: i32, %arg1: memref<1x326x8xbf16, #tpu.memory_space<vmem>>, %arg2: memref<9x8x3xbf16, #tpu.memory_space<vmem>>, %arg3: memref<1x288x3xf32, #tpu.memory_space<vmem>>) attributes {dimension_semantics = [#tpu.dimension_semantics<parallel>], iteration_bounds = array<i64: 2>, scalar_prefetch = 0 : i64, scratch_operands = 0 : i64, tpu.core_type = #tpu.core_type<tc>, window_params = [{transform_indices = @transform_0, window_bounds = array<i64: 1, 326, 8>}, {pipeline_mode = #tpu.pipeline_mode<synchronous>, transform_indices = @transform_1, window_bounds = array<i64: 9, 8, 3>}, {transform_indices = @transform_2, window_bounds = array<i64: 1, 288, 3>}]} {
    %cst = arith.constant 0.000000e+00 : f32
    %0 = vector.broadcast %cst : f32 to vector<288x3xf32>
    %c0 = arith.constant 0 : index
    %c0_0 = arith.constant 0 : index
    %c0_1 = arith.constant 0 : index
    %1 = vector.load %arg1[%c0, %c0_0, %c0_1] : memref<1x326x8xbf16, #tpu.memory_space<vmem>>, vector<1x288x8xbf16>
    %2 = vector.shape_cast %1 : vector<1x288x8xbf16> to vector<288x8xbf16>
    %c0_2 = arith.constant 0 : index
    %c0_3 = arith.constant 0 : index
    %c0_4 = arith.constant 0 : index
    %3 = vector.load %arg2[%c0_2, %c0_3, %c0_4] : memref<9x8x3xbf16, #tpu.memory_space<vmem>>, vector<1x8x3xbf16>
    %4 = vector.shape_cast %3 : vector<1x8x3xbf16> to vector<8x3xbf16>
    %cst_5 = arith.constant dense<0.000000e+00> : vector<288x3xf32>
    %5 = tpu.matmul %2, %4, %cst_5 {dimension_numbers = #tpu.dot_dimension_numbers<[1], [0], [0], [1], [0, 0, 1, 1], [], []>} : vector<288x8xbf16>, vector<8x3xbf16>, vector<288x3xf32> -> vector<288x3xf32>
    %6 = arith.addf %0, %5 : vector<288x3xf32>
    %c0_6 = arith.constant 0 : index
    %c1 = arith.constant 1 : index
    %c0_7 = arith.constant 0 : index
    %7 = vector.load %arg1[%c0_6, %c1, %c0_7] : memref<1x326x8xbf16, #tpu.memory_space<vmem>>, vector<1x288x8xbf16>
    %8 = vector.shape_cast %7 : vector<1x288x8xbf16> to vector<288x8xbf16>
    %c1_8 = arith.constant 1 : index
    %c0_9 = arith.constant 0 : index
    %c0_10 = arith.constant 0 : index
    %9 = vector.load %arg2[%c1_8, %c0_9, %c0_10] : memref<9x8x3xbf16, #tpu.memory_space<vmem>>, vector<1x8x3xbf16>
    %10 = vector.shape_cast %9 : vector<1x8x3xbf16> to vector<8x3xbf16>
    %cst_11 = arith.constant dense<0.000000e+00> : vector<288x3xf32>
    %11 = tpu.matmul %8, %10, %cst_11 {dimension_numbers = #tpu.dot_dimension_numbers<[1], [0], [0], [1], [0, 0, 1, 1], [], []>} : vector<288x8xbf16>, vector<8x3xbf16>, vector<288x3xf32> -> vector<288x3xf32>
    %12 = arith.addf %6, %11 : vector<288x3xf32>
    %c0_12 = arith.constant 0 : index
    %c2 = arith.constant 2 : index
    %c0_13 = arith.constant 0 : index
    %13 = vector.load %arg1[%c0_12, %c2, %c0_13] : memref<1x326x8xbf16, #tpu.memory_space<vmem>>, vector<1x288x8xbf16>
    %14 = vector.shape_cast %13 : vector<1x288x8xbf16> to vector<288x8xbf16>
    %c2_14 = arith.constant 2 : index
    %c0_15 = arith.constant 0 : index
    %c0_16 = arith.constant 0 : index
    %15 = vector.load %arg2[%c2_14, %c0_15, %c0_16] : memref<9x8x3xbf16, #tpu.memory_space<vmem>>, vector<1x8x3xbf16>
    %16 = vector.shape_cast %15 : vector<1x8x3xbf16> to vector<8x3xbf16>
    %cst_17 = arith.constant dense<0.000000e+00> : vector<288x3xf32>
    %17 = tpu.matmul %14, %16, %cst_17 {dimension_numbers = #tpu.dot_dimension_numbers<[1], [0], [0], [1], [0, 0, 1, 1], [], []>} : vector<288x8xbf16>, vector<8x3xbf16>, vector<288x3xf32> -> vector<288x3xf32>
    %18 = arith.addf %12, %17 : vector<288x3xf32>
    %c0_18 = arith.constant 0 : index
    %c18 = arith.constant 18 : index
    %c0_19 = arith.constant 0 : index
    %19 = vector.load %arg1[%c0_18, %c18, %c0_19] : memref<1x326x8xbf16, #tpu.memory_space<vmem>>, vector<1x288x8xbf16>
    %20 = vector.shape_cast %19 : vector<1x288x8xbf16> to vector<288x8xbf16>
    %c3 = arith.constant 3 : index
    %c0_20 = arith.constant 0 : index
    %c0_21 = arith.constant 0 : index
    %21 = vector.load %arg2[%c3, %c0_20, %c0_21] : memref<9x8x3xbf16, #tpu.memory_space<vmem>>, vector<1x8x3xbf16>
    %22 = vector.shape_cast %21 : vector<1x8x3xbf16> to vector<8x3xbf16>
    %cst_22 = arith.constant dense<0.000000e+00> : vector<288x3xf32>
    %23 = tpu.matmul %20, %22, %cst_22 {dimension_numbers = #tpu.dot_dimension_numbers<[1], [0], [0], [1], [0, 0, 1, 1], [], []>} : vector<288x8xbf16>, vector<8x3xbf16>, vector<288x3xf32> -> vector<288x3xf32>
    %24 = arith.addf %18, %23 : vector<288x3xf32>
    %c0_23 = arith.constant 0 : index
    %c19 = arith.constant 19 : index
    %c0_24 = arith.constant 0 : index
    %25 = vector.load %arg1[%c0_23, %c19, %c0_24] : memref<1x326x8xbf16, #tpu.memory_space<vmem>>, vector<1x288x8xbf16>
    %26 = vector.shape_cast %25 : vector<1x288x8xbf16> to vector<288x8xbf16>
    %c4 = arith.constant 4 : index
    %c0_25 = arith.constant 0 : index
    %c0_26 = arith.constant 0 : index
    %27 = vector.load %arg2[%c4, %c0_25, %c0_26] : memref<9x8x3xbf16, #tpu.memory_space<vmem>>, vector<1x8x3xbf16>
    %28 = vector.shape_cast %27 : vector<1x8x3xbf16> to vector<8x3xbf16>
    %cst_27 = arith.constant dense<0.000000e+00> : vector<288x3xf32>
    %29 = tpu.matmul %26, %28, %cst_27 {dimension_numbers = #tpu.dot_dimension_numbers<[1], [0], [0], [1], [0, 0, 1, 1], [], []>} : vector<288x8xbf16>, vector<8x3xbf16>, vector<288x3xf32> -> vector<288x3xf32>
    %30 = arith.addf %24, %29 : vector<288x3xf32>
    %c0_28 = arith.constant 0 : index
    %c20 = arith.constant 20 : index
    %c0_29 = arith.constant 0 : index
    %31 = vector.load %arg1[%c0_28, %c20, %c0_29] : memref<1x326x8xbf16, #tpu.memory_space<vmem>>, vector<1x288x8xbf16>
    %32 = vector.shape_cast %31 : vector<1x288x8xbf16> to vector<288x8xbf16>
    %c5 = arith.constant 5 : index
    %c0_30 = arith.constant 0 : index
    %c0_31 = arith.constant 0 : index
    %33 = vector.load %arg2[%c5, %c0_30, %c0_31] : memref<9x8x3xbf16, #tpu.memory_space<vmem>>, vector<1x8x3xbf16>
    %34 = vector.shape_cast %33 : vector<1x8x3xbf16> to vector<8x3xbf16>
    %cst_32 = arith.constant dense<0.000000e+00> : vector<288x3xf32>
    %35 = tpu.matmul %32, %34, %cst_32 {dimension_numbers = #tpu.dot_dimension_numbers<[1], [0], [0], [1], [0, 0, 1, 1], [], []>} : vector<288x8xbf16>, vector<8x3xbf16>, vector<288x3xf32> -> vector<288x3xf32>
    %36 = arith.addf %30, %35 : vector<288x3xf32>
    %c0_33 = arith.constant 0 : index
    %c36 = arith.constant 36 : index
    %c0_34 = arith.constant 0 : index
    %37 = vector.load %arg1[%c0_33, %c36, %c0_34] : memref<1x326x8xbf16, #tpu.memory_space<vmem>>, vector<1x288x8xbf16>
    %38 = vector.shape_cast %37 : vector<1x288x8xbf16> to vector<288x8xbf16>
    %c6 = arith.constant 6 : index
    %c0_35 = arith.constant 0 : index
    %c0_36 = arith.constant 0 : index
    %39 = vector.load %arg2[%c6, %c0_35, %c0_36] : memref<9x8x3xbf16, #tpu.memory_space<vmem>>, vector<1x8x3xbf16>
    %40 = vector.shape_cast %39 : vector<1x8x3xbf16> to vector<8x3xbf16>
    %cst_37 = arith.constant dense<0.000000e+00> : vector<288x3xf32>
    %41 = tpu.matmul %38, %40, %cst_37 {dimension_numbers = #tpu.dot_dimension_numbers<[1], [0], [0], [1], [0, 0, 1, 1], [], []>} : vector<288x8xbf16>, vector<8x3xbf16>, vector<288x3xf32> -> vector<288x3xf32>
    %42 = arith.addf %36, %41 : vector<288x3xf32>
    %c0_38 = arith.constant 0 : index
    %c37 = arith.constant 37 : index
    %c0_39 = arith.constant 0 : index
    %43 = vector.load %arg1[%c0_38, %c37, %c0_39] : memref<1x326x8xbf16, #tpu.memory_space<vmem>>, vector<1x288x8xbf16>
    %44 = vector.shape_cast %43 : vector<1x288x8xbf16> to vector<288x8xbf16>
    %c7 = arith.constant 7 : index
    %c0_40 = arith.constant 0 : index
    %c0_41 = arith.constant 0 : index
    %45 = vector.load %arg2[%c7, %c0_40, %c0_41] : memref<9x8x3xbf16, #tpu.memory_space<vmem>>, vector<1x8x3xbf16>
    %46 = vector.shape_cast %45 : vector<1x8x3xbf16> to vector<8x3xbf16>
    %cst_42 = arith.constant dense<0.000000e+00> : vector<288x3xf32>
    %47 = tpu.matmul %44, %46, %cst_42 {dimension_numbers = #tpu.dot_dimension_numbers<[1], [0], [0], [1], [0, 0, 1, 1], [], []>} : vector<288x8xbf16>, vector<8x3xbf16>, vector<288x3xf32> -> vector<288x3xf32>
    %48 = arith.addf %42, %47 : vector<288x3xf32>
    %c0_43 = arith.constant 0 : index
    %c38 = arith.constant 38 : index
    %c0_44 = arith.constant 0 : index
    %49 = vector.load %arg1[%c0_43, %c38, %c0_44] : memref<1x326x8xbf16, #tpu.memory_space<vmem>>, vector<1x288x8xbf16>
    %50 = vector.shape_cast %49 : vector<1x288x8xbf16> to vector<288x8xbf16>
    %c8 = arith.constant 8 : index
    %c0_45 = arith.constant 0 : index
    %c0_46 = arith.constant 0 : index
    %51 = vector.load %arg2[%c8, %c0_45, %c0_46] : memref<9x8x3xbf16, #tpu.memory_space<vmem>>, vector<1x8x3xbf16>
    %52 = vector.shape_cast %51 : vector<1x8x3xbf16> to vector<8x3xbf16>
    %cst_47 = arith.constant dense<0.000000e+00> : vector<288x3xf32>
    %53 = tpu.matmul %50, %52, %cst_47 {dimension_numbers = #tpu.dot_dimension_numbers<[1], [0], [0], [1], [0, 0, 1, 1], [], []>} : vector<288x8xbf16>, vector<8x3xbf16>, vector<288x3xf32> -> vector<288x3xf32>
    %54 = arith.addf %48, %53 : vector<288x3xf32>
    %55 = math.tanh %54 : vector<288x3xf32>
    %c0_48 = arith.constant 0 : index
    %c0_49 = arith.constant 0 : index
    %c0_50 = arith.constant 0 : index
    %56 = vector.load %arg3[%c0_48, %c0_49, %c0_50] : memref<1x288x3xf32, #tpu.memory_space<vmem>>, vector<1x288x3xf32>
    %57 = vector.shape_cast %56 : vector<1x288x3xf32> to vector<288x3xf32>
    %58 = vector.shape_cast %55 : vector<288x3xf32> to vector<1x288x3xf32>
    tpu.vector_store %arg3[%c0_48, %c0_49, %c0_50], %58 {strides = array<i32>} : memref<1x288x3xf32, #tpu.memory_space<vmem>>, vector<1x288x3xf32>,
    return
  }
  func.func @transform_0(%arg0: i32) -> (i32, i32, i32) {
    %c0_i32 = arith.constant 0 : i32
    %c0_i32_0 = arith.constant 0 : i32
    %c0_i32_1 = arith.constant 0 : i32
    return %arg0, %c0_i32, %c0_i32_0 : i32, i32, i32
  }
  func.func @transform_1(%arg0: i32) -> (i32, i32, i32) {
    %c0_i32 = arith.constant 0 : i32
    %c0_i32_0 = arith.constant 0 : i32
    %c0_i32_1 = arith.constant 0 : i32
    %c0_i32_2 = arith.constant 0 : i32
    return %c0_i32, %c0_i32_0, %c0_i32_1 : i32, i32, i32
  }
  func.func @transform_2(%arg0: i32) -> (i32, i32, i32) {
    %c0_i32 = arith.constant 0 : i32
    %c0_i32_0 = arith.constant 0 : i32
    %c0_i32_1 = arith.constant 0 : i32
    return %arg0, %c0_i32, %c0_i32_0 : i32, i32, i32
  }
}

</mosaic_0001>

<bundles_post_ra>
// kernel: forward.10
= control target key start
LH: loop header
LB: loop body
LE: loop exit
PB: predicated region body
PF: predicated region fallthrough
CT: control target
= control target key end

     0   :  { %s6349_s15 = smov 0   ;;  %s9047_s0 = inlined_call_operand.vmem [shape: bf16[2,326,4], index: 0, kind: input, shape index: {}]   ;;  %s9048_s1 = inlined_call_operand.vmem [shape: bf16[9,4,8], index: 1, kind: input, shape index: {}]   ;;  %s9049_s2 = inlined_call_operand.vmem [shape: f32[1,8], index: 2, kind: input, shape index: {}]   ;;  %s9050_s3 = inlined_call_operand.vmem [shape: f32[1,8], index: 3, kind: input, shape index: {}]   ;;  %s9051_s4 = inlined_call_operand.vmem [shape: bf16[2,288,8], index: 4, kind: output, shape index: {}]  }
   0x1 LB: > { %s5029_s16 = sadd.s32 4294967295, %s6321_s15   ;;  %p5033_p0 = scmp.ge.s32.totalorder %s6321_s15, 1  ;;  %s6321_s15 = sphi %s6349_s15, %s14_s15  }
   0x2   : > { %p162_p1 = scmp.lt.s32.totalorder %s6321_s15, 3 }
   0x4   : > { %p163_p2 = pnand %p5033_p0, %p162_p1 }
   0x6   : > { %166 = sbr.rel (%p163_p2) target bundleno = 763 (0x2fb), region = 36 }
   0xd   : > { %vm536_vm0 = vcmask 1041408   ;;  %v5150_v0 = vld [vmem:[%s9048_s1 + $0x8] sm:$0x3]  ;;  %v5036_v1 = vld [vmem:[%s9048_s1 + $0x2] sm:$0x3]  ;;  %p188_p3 = scmp.lt.s32.totalorder %s5029_s16, 1 }
   0xe   : > { %6151 = vmatprep.subr.msk.bf16.mxu0 %vm536_vm0, %v5150_v0  ;;  %6147 = vmatprep.subr.msk.bf16.mxu1 %vm536_vm0, %v5036_v1  ;;  %v6366_v2 = vsel %vm536_vm0, %v5150_v0, 0  ;;  %v538_v3 = vsel %vm536_vm0, %v5036_v1, 0  ;;  %v5170_v4 = vld [vmem:[%s9048_s1 + $0xa] sm:$0x3]  ;;  %v235_v5 = vld [vmem:[%s9048_s1] sm:$0x3] }
   0xf   : > { %5668 = vmatpush3.bf16.msra.mxu0 %v6366_v2  ;;  %5516 = vmatpush3.bf16.msra.mxu1 %v538_v3  ;;  %s9292_s16 = smov (!%p188_p3, %s5029_s16), 1  ;;  %vm332_vm1 = vsmask.f32 7424  ;;  %vm481_vm2 = vcmask 31744   ;;  %v6387_v6 = vsel %vm536_vm0, %v5170_v4, 0  ;;  %v754_v12 = vsel %vm536_vm0, %v235_v5, 0 }
  0x10   : > { %6153 = vmatprep.subr.msk.bf16.mxu0 %vm536_vm0, %v5170_v4  ;;  %s6157_s25 = smul.u32 164, %s9292_s16  ;;  %6148 = vmatprep.subr.msk.bf16.mxu1 %vm536_vm0, %v235_v5  ;;  %vm1692_vm3 = vsmask.f32 6400  ;;  %v6435_v39 = vld [vmem:[%s9048_s1 + $0x4] sm:$0x3]  ;;  %vm2139_vm4 = vcmask 1045504  }
  0x11   : > { %v6469_v1 = vld [vmem:[%s9048_s1 + $0xc] sm:$0x3]  ;;  %vm939_vm5 = vcmask 1046528   ;;  %vm2892_vm6 = vsmask.f32 5376  ;;  %vm3339_vm7 = vcmask 1044480  }
  0x12   : > { %s6384_s28 = scalar_lea.vmem %s9047_s0, %s6157_s25  ;;  %s6158_s21 = smul.u32 144, %s9292_s16 }
  0x13   : > { %v199_v7 = vld [vmem:[%s6384_s28] sm:$0xf]  ;;  %v6391_v8 = vld [vmem:[%s6384_s28 + $0x4] sm:$0xf]  ;;  %v6397_v10 = vld [vmem:[%s6384_s28 + $0x8] sm:$0xff]  }
  0x14   : > { %v6394_v9 = vcombine.low %v199_v7, %v6391_v8  ;;  %v1247_v11 = vld [vmem:[%s6384_s28 + $0x8] sm:$0xe]  ;;  %v6402_v13 = vld [vmem:[%s6384_s28 + $0xc] sm:$0xf]  ;;  %v341_v16 = vshll.u32 %v6397_v10, 16  ;;  %v345_v17 = vshrl.u32 %v6397_v10, 16  ;;  %s8966_s23 = scalar_lea.vmem %s9051_s4, %s6158_s21 }
  0x15   : > { %v6409_v18 = vld [vmem:[%s6384_s28 + $0x10] sm:$0xff]   ;;  %v6415_v20 = vcombine.low %v1247_v11, %v6402_v13  ;;  %v6423_v28 = vld [vmem:[%s6384_s28 + $0x18] sm:$0xff]   ;;  %v6429_v34 = vld [vmem:[%s6384_s28 + $0x20] sm:$0xff]  }
  0x16   : > { %v334_v14 = vshrl.u32 %v6394_v9, 16  ;;  %v336_v15 = vshll.u32 %v6394_v9, 16  ;;  %v6412_v19 = vld [vmem:[%s6384_s28 + $0x10] sm:$0xff]   ;;  %v343_v22 = vrot.slane %v341_v16, 1  ;;  %v1702_v23 = vshrl.u32 %v6409_v18, 16  ;;  %v6426_v33 = vld [vmem:[%s6384_s28 + $0x18] sm:$0xff]  }
  0x17   : > { %v1705_v24 = vshll.u32 %v6409_v18, 16  ;;  %v1694_v25 = vshrl.u32 %v6415_v20, 16  ;;  %v1697_v26 = vshll.u32 %v6415_v20, 16  ;;  %v349_v27 = vshll.u32 %v6412_v19, 16  ;;  %v6444_v48 = vld [vmem:[%s6384_s28 + $0x20] sm:$0xff]   ;;  %v6447_v49 = vld [vmem:[%s6384_s28 + $0x28] sm:$0xff]  }
  0x18   : > { %v338_v21 = vrot.slane %v336_v15, 1  ;;  %v347_v30 = vor.u32 %v345_v17, %v343_v22  ;;  %v1704_v31 = vrot.slane %v1702_v23, 1  ;;  %v1711_v38 = vshrl.u32 %v6423_v28, 16  ;;  %v6453_v54 = vld [vmem:[%s6384_s28 + $0x28] sm:$0xff]   ;;  %v6459_v59 = vld [vmem:[%s6384_s28 + $0x30] sm:$0xff]   ;;  %v6483_v23 = vld [vmem:[%s6384_s28 + $0x38] sm:$0xff]  }
  0x19   : > { %v1707_v32 = vrot.slane %v1705_v24, 2  ;;  %v1696_v35 = vrot.slane %v1694_v25, 1  ;;  %v1699_v36 = vrot.slane %v1697_v26, 2  ;;  %v351_v37 = vrot.slane %v349_v27, 1  ;;  %v6464_v0 = vld [vmem:[%s6384_s28 + $0x30] sm:$0xff]  }
  0x1a   : > { %v339_v29 = vor.u32 %v338_v21, %v334_v14  ;;  %v1714_v42 = vshll.u32 %v6423_v28, 16  ;;  %v353_v43 = vshrl.u32 %v6412_v19, 16  ;;  %v1713_v46 = vrot.slane %v1711_v38, 1 }
  0x1b   : > { %v1708_v41 = vor.u32 %v1707_v32, %v1704_v31  ;;  %v1700_v44 = vor.u32 %v1699_v36, %v1696_v35  ;;  %v352_v45 = vsel %vm332_vm1, %v347_v30, %v351_v37  ;;  %v357_v47 = vshll.u32 %v6426_v33, 16  ;;  %v6492_v35 = vld [vmem:[%s6384_s28 + $0x38] sm:$0xff]  }
  0x1c   : > { %v344_v40 = vsel %vm332_vm1, %v339_v29, %v343_v22  ;;  %v1716_v50 = vrot.slane %v1714_v42, 2  ;;  %v355_v51 = vor.u32 %v353_v43, %v351_v37  ;;  %v1720_v52 = vshrl.u32 %v6429_v34, 16 }
  0x1d   : > { %5517 = vmatprep.mubr.msk.bf16.mxu1 %vm481_vm2, %v344_v40  ;;  %v1723_v53 = vshll.u32 %v6429_v34, 16  ;;  %v1709_v55 = vsel %vm1692_vm3, %v1700_v44, %v1708_v41  ;;  %v359_v56 = vrot.slane %v357_v47, 1  ;;  %v361_v57 = vshrl.u32 %v6426_v33, 16  ;;  %v6503_v44 = vld [vmem:[%s6384_s28 + $0x40] sm:$0xff]  }
  0x1e   : > { %5518 = vmatmul.mubr.msk.bf16.vlgmr.msra.gmra.mrb[0].mxu1 %vm481_vm2, %v352_v45  ;;  %v365_v58 = vshll.u32 %v6444_v48, 16  ;;  %5669 = vmatprep.mubr.msk.bf16.mxu0 %vm481_vm2, %v1709_v55  ;;  %v1717_v60 = vor.u32 %v1716_v50, %v1713_v46  ;;  %v1722_v61 = vrot.slane %v1720_v52, 1  ;;  %v1729_v63 = vshrl.u32 %v6447_v49, 16 }
  0x1f   : > { %5554 = vmatpush3.bf16.msra.mxu1 %v754_v12  ;;  %v1725_v62 = vrot.slane %v1723_v53, 2  ;;  %v360_v3 = vsel %vm332_vm1, %v355_v51, %v359_v56  ;;  %v363_v4 = vor.u32 %v361_v57, %v359_v56  ;;  %v1732_v7 = vshll.u32 %v6447_v49, 16  ;;  %v6508_v51 = vld [vmem:[%s6384_s28 + $0x40] sm:$0xff]  }
  0x20   : > { %6149 = vmatprep.subr.msk.bf16.mxu1 %vm536_vm0, %v6435_v39  ;;  %v367_v5 = vrot.slane %v365_v58, 1  ;;  %v1718_v11 = vsel %vm1692_vm3, %v1708_v41, %v1717_v60  ;;  %5521 = vmatprep.mubr.msk.bf16.mxu1 %vm481_vm2, %v360_v3  ;;  %v1731_v14 = vrot.slane %v1729_v63, 1  ;;  %v369_v15 = vshrl.u32 %v6444_v48, 16  ;;  %v6519_v63 = vld [vmem:[%s6384_s28 + $0x48] sm:$0xff]  }
  0x21   : > { %v1726_v12 = vor.u32 %v1725_v62, %v1722_v61  ;;  %5670 = vmatmul.mubr.msk.bf16.vlgmr.msra.gmra.mrb[0].mxu0 %vm481_vm2, %v1718_v11  ;;  %v1734_v17 = vrot.slane %v1732_v7, 2  ;;  %v373_v21 = vshll.u32 %v6453_v54, 16  ;;  %v1738_v22 = vshrl.u32 %v6459_v59, 16  ;;  %v6516_v62 = vld [vmem:[%s6384_s28 + $0x48] sm:$0xff]  }
  0x22   : > { %v368_v16 = vsel %vm332_vm1, %v363_v4, %v367_v5  ;;  %5706 = vmatpush3.bf16.msra.mxu0 %v6387_v6  ;;  %v371_v25 = vor.u32 %v369_v15, %v367_v5  ;;  %v1741_v26 = vshll.u32 %v6459_v59, 16  ;;  %v377_v27 = vshrl.u32 %v6453_v54, 16 }
  0x23   : > { %v1727_v24 = vsel %vm1692_vm3, %v1717_v60, %v1726_v12  ;;  %v1735_v29 = vor.u32 %v1734_v17, %v1731_v14  ;;  %v375_v30 = vrot.slane %v373_v21, 1  ;;  %v1740_v31 = vrot.slane %v1738_v22, 1  ;;  %6154 = vmatprep.subr.msk.bf16.mxu0 %vm536_vm0, %v6469_v1  ;;  %v6528_v14 = vld [vmem:[%s6384_s28 + $0x50] sm:$0xff]  }
  0x24   : > { %5673 = vmatprep.mubr.msk.bf16.mxu0 %vm481_vm2, %v1727_v24  ;;  %v381_v32 = vshll.u32 %v6464_v0, 16  ;;  %v1743_v6 = vrot.slane %v1741_v26, 2  ;;  %v1747_v36 = vshrl.u32 %v6483_v23, 16  ;;  %v1750_v37 = vshll.u32 %v6483_v23, 16 }
  0x25   : > { %v385_v38 = vshrl.u32 %v6464_v0, 16  ;;  %v1736_v40 = vsel %vm1692_vm3, %v1726_v12, %v1735_v29  ;;  %v376_v41 = vsel %vm332_vm1, %v371_v25, %v375_v30  ;;  %v379_v42 = vor.u32 %v377_v27, %v375_v30  ;;  %v6536_v25 = vld [vmem:[%s6384_s28 + $0x50] sm:$0xff]  }
  0x26   : > { %5522 = vmatmul.mubr.msk.bf16.gmra.mrb[4].mxu1 %vm481_vm2, %v368_v16  ;;  %v383_v43 = vrot.slane %v381_v32, 1  ;;  %v1744_v45 = vor.u32 %v1743_v6, %v1740_v31  ;;  %v1749_v46 = vrot.slane %v1747_v36, 1  ;;  %v1752_v47 = vrot.slane %v1750_v37, 2 }
  0x27   : > { %5525 = vmatprep.mubr.msk.bf16.mxu1 %vm481_vm2, %v376_v41  ;;  %v389_v50 = vshll.u32 %v6492_v35, 16  ;;  %v1756_v55 = vshrl.u32 %v6503_v44, 16  ;;  %v1759_v56 = vshll.u32 %v6503_v44, 16  ;;  %v393_v61 = vshrl.u32 %v6492_v35, 16  ;;  %v6546_v41 = vld [vmem:[%s6384_s28 + $0x58] sm:$0xff]  }
  0x28   : > { %v384_v52 = vsel %vm332_vm1, %v379_v42, %v383_v43  ;;  %v387_v53 = vor.u32 %v385_v38, %v383_v43  ;;  %v1745_v57 = vsel %vm1692_vm3, %v1735_v29, %v1744_v45  ;;  %v1753_v58 = vor.u32 %v1752_v47, %v1749_v46  ;;  %v6541_v29 = vld [vmem:[%s6384_s28 + $0x58] sm:$0xff]  }
  0x29   : > { %v391_v60 = vrot.slane %v389_v50, 1  ;;  %5674 = vmatmul.mubr.msk.bf16.gmra.mrb[4].mxu0 %vm481_vm2, %v1736_v40  ;;  %v1758_v3 = vrot.slane %v1756_v55, 1  ;;  %v1761_v4 = vrot.slane %v1759_v56, 2  ;;  %v397_v5 = vshll.u32 %v6508_v51, 16 }
  0x2a   : > { %v401_v7 = vshrl.u32 %v6508_v51, 16  ;;  %5677 = vmatprep.mubr.msk.bf16.mxu0 %vm481_vm2, %v1745_v57  ;;  %v1765_v12 = vshrl.u32 %v6516_v62, 16  ;;  %v1768_v16 = vshll.u32 %v6516_v62, 16  ;;  %v405_v17 = vshll.u32 %v6519_v63, 16  ;;  %v2133_v57 = vld [vmem:[%s6384_s28 + $0x8] sm:$0xc] }
  0x2b   : > { %v392_v11 = vsel %vm332_vm1, %v387_v53, %v391_v60  ;;  %v1762_v15 = vor.u32 %v1761_v4, %v1758_v3  ;;  %v399_v21 = vrot.slane %v397_v5, 1  ;;  %v1774_v22 = vshrl.u32 %v6528_v14, 16 }
  0x2c   : > { %v1777_v24 = vshll.u32 %v6528_v14, 16  ;;  %v1754_v26 = vsel %vm1692_vm3, %v1744_v45, %v1753_v58  ;;  %v395_v27 = vor.u32 %v393_v61, %v391_v60  ;;  %v1767_v30 = vrot.slane %v1765_v12, 1 }
  0x2d   : > { %v1770_v31 = vrot.slane %v1768_v16, 2  ;;  %v403_v32 = vor.u32 %v401_v7, %v399_v21  ;;  %v407_v6 = vrot.slane %v405_v17, 1  ;;  %v1763_v36 = vsel %vm1692_vm3, %v1753_v58, %v1762_v15  ;;  %v6560_v58 = vld [vmem:[%s6384_s28 + $0x60] sm:$0xff]  }
  0x2e   : > { %5526 = vmatmul.mubr.msk.bf16.gmra.mrb[8].mxu1 %vm481_vm2, %v384_v52  ;;  %v1776_v37 = vrot.slane %v1774_v22, 1  ;;  %v1779_v38 = vrot.slane %v1777_v24, 2  ;;  %v413_v40 = vshll.u32 %v6536_v25, 16  ;;  %v400_v42 = vsel %vm332_vm1, %v395_v27, %v399_v21 }
  0x2f   : > { %5529 = vmatprep.mubr.msk.bf16.mxu1 %vm481_vm2, %v392_v11  ;;  %v409_v43 = vshrl.u32 %v6519_v63, 16  ;;  %v1783_v45 = vshrl.u32 %v6541_v29, 16  ;;  %v1786_v46 = vshll.u32 %v6541_v29, 16  ;;  %v1771_v47 = vor.u32 %v1770_v31, %v1767_v30  ;;  %v6565_v11 = vld [vmem:[%s6384_s28 + $0x68] sm:$0xff]  }
  0x30   : > { %v408_v50 = vsel %vm332_vm1, %v403_v32, %v407_v6  ;;  %v417_v52 = vshrl.u32 %v6536_v25, 16  ;;  %v421_v53 = vshll.u32 %v6546_v41, 16  ;;  %v1780_v55 = vor.u32 %v1779_v38, %v1776_v37  ;;  %v6582_v32 = vld [vmem:[%s6384_s28 + $0x70] sm:$0xff]  }
  0x31   : > { %5678 = vmatmul.mubr.msk.bf16.gmra.mrb[8].mxu0 %vm481_vm2, %v1754_v26  ;;  %v415_v56 = vrot.slane %v413_v40, 1  ;;  %v411_v60 = vor.u32 %v409_v43, %v407_v6  ;;  %v1785_v61 = vrot.slane %v1783_v45, 1  ;;  %v1788_v3 = vrot.slane %v1786_v46, 2  ;;  %v6588_v40 = vld [vmem:[%s6384_s28 + $0x78] sm:$0xff]  }
  0x32   : > { %5681 = vmatprep.mubr.msk.bf16.mxu0 %vm481_vm2, %v1763_v36  ;;  %v1772_v4 = vsel %vm1692_vm3, %v1762_v15, %v1771_v47  ;;  %v423_v7 = vrot.slane %v421_v53, 1  ;;  %v1781_v12 = vsel %vm1692_vm3, %v1771_v47, %v1780_v55  ;;  %v5171_v16 = vcombine.low %v2133_v57, %v6402_v13 }
  0x33   : > { %v419_v5 = vor.u32 %v417_v52, %v415_v56  ;;  %v429_v17 = vshll.u32 %v6560_v58, 16  ;;  %v416_v21 = vsel %vm332_vm1, %v411_v60, %v415_v56  ;;  %v425_v22 = vshrl.u32 %v6546_v41, 16  ;;  %v6603_v56 = vld [vmem:[%s6384_s28 + $0x80] sm:$0xff]  }
  0x34   : > { %v6574_v15 = vor.u32 %v1788_v3, %v1785_v61  ;;  %v433_v26 = vshrl.u32 %v6560_v58, 16  ;;  %v437_v27 = vshll.u32 %v6565_v11, 16  ;;  %v2140_v13 = vrot.slane %v5171_v16, 2 }
  0x35   : > { %v424_v24 = vsel %vm332_vm1, %v419_v5, %v423_v7  ;;  %v2141_v30 = vrot.slane %v6409_v18, 2  ;;  %v431_v31 = vrot.slane %v429_v17, 1  ;;  %v427_v6 = vor.u32 %v425_v22, %v423_v7 }
  0x36   : > { %5530 = vmatmul.mubr.msk.bf16.gmra.mrb[12].mxu1 %vm481_vm2, %v400_v42  ;;  %v1790_v36 = vsel %vm1692_vm3, %v1780_v55, %v6574_v15  ;;  %v439_v38 = vrot.slane %v437_v27, 1  ;;  %v445_v18 = vshll.u32 %v6582_v32, 16  ;;  %v2143_v45 = vrot.slane %v6423_v28, 2  ;;  %v6633_v27 = vld [vmem:[%s6384_s28 + $0x90] ss:$0 sps:$4 sm:$0x11]  }
  0x37   : > { %5533 = vmatprep.mubr.msk.bf16.mxu1 %vm481_vm2, %v408_v50  ;;  %v435_v37 = vor.u32 %v433_v26, %v431_v31  ;;  %v2142_v42 = vsel %vm2139_vm4, %v2140_v13, %v2141_v30  ;;  %v432_v43 = vsel %vm332_vm1, %v427_v6, %v431_v31  ;;  %v441_v46 = vshrl.u32 %v6565_v11, 16 }
  0x38   : > { %v449_v50 = vshrl.u32 %v6582_v32, 16  ;;  %v453_v52 = vshll.u32 %v6588_v40, 16  ;;  %v2145_v53 = vrot.slane %v6429_v34, 2  ;;  %v447_v55 = vrot.slane %v445_v18, 1  ;;  %v6616_v34 = vld [vmem:[%s9048_s1 + $0xe] sm:$0x3] }
  0x39   : > { %5682 = vmatmul.mubr.msk.bf16.gmra.mrb[12].mxu0 %vm481_vm2, %v1772_v4  ;;  %v440_v47 = vsel %vm332_vm1, %v435_v37, %v439_v38  ;;  %v2671_v28 = vsel %vm536_vm0, %v6469_v1, 0  ;;  %v443_v57 = vor.u32 %v441_v46, %v439_v38  ;;  %v2144_v60 = vsel %vm2139_vm4, %v2141_v30, %v2143_v45  ;;  %v6610_v4 = vld [vmem:[%s6384_s28 + $0x88] sm:$0xff]  }
  0x3a   : > { %5685 = vmatprep.mubr.msk.bf16.mxu0 %vm481_vm2, %v1781_v12  ;;  %v451_v61 = vor.u32 %v449_v50, %v447_v55  ;;  %v455_v3 = vrot.slane %v453_v52, 1  ;;  %v2146_v5 = vsel %vm2139_vm4, %v2143_v45, %v2145_v53  ;;  %v461_v7 = vshll.u32 %v6603_v56, 16 }
  0x3b   : > { %v448_v1 = vsel %vm332_vm1, %v443_v57, %v447_v55  ;;  %v2147_v12 = vrot.slane %v6447_v49, 2  ;;  %v457_v16 = vshrl.u32 %v6588_v40, 16  ;;  %v469_v22 = vshll.u32 %v6610_v4, 16  ;;  %v6660_v55 = vld [vmem:[%s6384_s28 + $0x60] sm:$0xff]   ;;  %v6679_v57 = vld [vmem:[%s6384_s28 + $0x68] sm:$0xff]  }
  0x3c   : > { %v456_v17 = vsel %vm332_vm1, %v451_v61, %v455_v3  ;;  %v463_v26 = vrot.slane %v461_v7, 1  ;;  %v477_v37 = vshll.u32 %v6633_v27, 16  ;;  %v2151_v38 = vrot.slane %v6483_v23, 2  ;;  %v6697_v7 = vld [vmem:[%s6384_s28 + $0x78] sm:$0xff]  }
  0x3d   : > { %v459_v49 = vor.u32 %v457_v16, %v455_v3  ;;  %v2148_v13 = vsel %vm2139_vm4, %v2145_v53, %v2147_v12  ;;  %v471_v31 = vrot.slane %v469_v22, 1  ;;  %v2153_v18 = vrot.slane %v6503_v44, 2  ;;  %v6713_v22 = vld [vmem:[%s6384_s28 + $0x88] sm:$0xff]  }
  0x3e   : > { %5534 = vmatmul.mubr.msk.bf16.gmra.mrb[16].mxu1 %vm481_vm2, %v416_v21  ;;  %v465_v21 = vshrl.u32 %v6603_v56, 16  ;;  %v479_v45 = vrot.slane %v477_v37, 1  ;;  %v2155_v23 = vrot.slane %v6516_v62, 2  ;;  %v2157_v44 = vrot.slane %v6528_v14, 2 }
  0x3f   : > { %5537 = vmatprep.mubr.msk.bf16.mxu1 %vm481_vm2, %v424_v24  ;;  %v2149_v24 = vrot.slane %v6459_v59, 2  ;;  %v464_v59 = vsel %vm332_vm1, %v459_v49, %v463_v26  ;;  %v2159_v62 = vrot.slane %v6541_v29, 2  ;;  %v1032_v14 = vsel %vm536_vm0, %v6435_v39, 0 }
  0x40   : > { %v467_v30 = vor.u32 %v465_v21, %v463_v26  ;;  %v2156_v52 = vsel %vm2139_vm4, %v2153_v18, %v2155_v23  ;;  %v2158_v53 = vsel %vm2139_vm4, %v2155_v23, %v2157_v44  ;;  %v2163_v61 = vrot.slane %v6679_v57, 2  ;;  %v6717_v26 = vld [vmem:[%s6384_s28 + $0x90] sm:$0xff]  }
  0x41   : > { %5686 = vmatmul.mubr.msk.bf16.gmra.mrb[16].mxu0 %vm481_vm2, %v1790_v36  ;;  %v2150_v6 = vsel %vm2139_vm4, %v2147_v12, %v2149_v24  ;;  %v473_v36 = vshrl.u32 %v6610_v4, 16  ;;  %v2152_v46 = vsel %vm2139_vm4, %v2149_v24, %v2151_v38  ;;  %v2160_v29 = vsel %vm2139_vm4, %v2157_v44, %v2159_v62  ;;  %v6701_v12 = vld [vmem:[%s6384_s28 + $0x80] sm:$0xff]  }
  0x42   : > { %5707 = vmatprep.mubr.msk.bf16.mxu0 %vm481_vm2, %v2142_v42  ;;  %v472_v42 = vsel %vm332_vm1, %v467_v30, %v471_v31  ;;  %v2167_v16 = vrot.slane %v6697_v7, 2  ;;  %v2171_v49 = vrot.slane %v6713_v22, 2  ;;  %v2447_v30 = vld [vmem:[%s6384_s28 + $0x10] sm:$0xc] }
  0x46   : > { %5538 = vmatmul.mubr.msk.bf16.gmra.mrb[20].mxu1 %vm481_vm2, %v432_v43  ;;  %v475_v43 = vor.u32 %v473_v36, %v471_v31  ;;  %v6727_v31 = vld [vmem:[%s6384_s28 + $0x14] sm:$0xf] }
  0x47   : > { %5541 = vmatprep.mubr.msk.bf16.mxu1 %vm481_vm2, %v440_v47  ;;  %v2154_v47 = vsel %vm2139_vm4, %v2151_v38, %v2153_v18  ;;  %v6737_v37 = vcombine.low %v2447_v30, %v6727_v31  ;;  %v6740_v38 = vld [vmem:[%s6384_s28 + $0x18] sm:$0xff]  }
  0x48   : > { %v480_v50 = vsel %vm332_vm1, %v475_v43, %v479_v45  ;;  %v2580_v43 = vrot.slane %v6740_v38, 2 }
  0x49   : > { %5708 = vmatmul.mubr.msk.bf16.vlgmr.msra.gmra.mrb[0].mxu0 %vm481_vm2, %v2144_v60  ;;  %v6685_v60 = vld [vmem:[%s6384_s28 + $0x70] sm:$0xff]   ;;  %v2579_v18 = vrot.slane %v6737_v37, 2 }
  0x4a   : > { %5744 = vmatpush3.bf16.msra.mxu0 %v2671_v28  ;;  %5711 = vmatprep.mubr.msk.bf16.mxu0 %vm481_vm2, %v2146_v5  ;;  %v2161_v28 = vrot.slane %v6660_v55, 2  ;;  %v2165_v3 = vrot.slane %v6685_v60, 2 }
  0x4b   : > { %6155 = vmatprep.subr.msk.bf16.mxu0 %vm536_vm0, %v6616_v34 }
  0x4c   : > { %v2162_v39 = vsel %vm2139_vm4, %v2159_v62, %v2161_v28  ;;  %v2164_v5 = vsel %vm2139_vm4, %v2161_v28, %v2163_v61  ;;  %v2168_v21 = vsel %vm2139_vm4, %v2165_v3, %v2167_v16  ;;  %v3118_v62 = vsel %vm536_vm0, %v6616_v34, 0  ;;  %v6775_v28 = vld [vmem:[%s6384_s28 + $0x38] sm:$0xff]  }
  0x4e   : > { %5542 = vmatmul.mubr.msk.bf16.gmra.mrb[24].mxu1 %vm481_vm2, %v448_v1  ;;  %v2166_v1 = vsel %vm2139_vm4, %v2163_v61, %v2165_v3  ;;  %v2588_v61 = vrot.slane %v6775_v28, 2  ;;  %v6794_v3 = vld [vmem:[%s6384_s28 + $0x40] sm:$0xff]  }
  0x4f   : > { %5545 = vmatprep.mubr.msk.bf16.mxu1 %vm481_vm2, %v456_v17  ;;  %v2169_v17 = vrot.slane %v6701_v12, 2 }
  0x51   : > { %5712 = vmatmul.mubr.msk.bf16.gmra.mrb[4].mxu0 %vm481_vm2, %v2148_v13  ;;  %v2170_v24 = vsel %vm2139_vm4, %v2167_v16, %v2169_v17  ;;  %v2173_v13 = vrot.slane %v6717_v26, 2  ;;  %v933_v16 = vld [vmem:[%s6384_s28] sm:$0xe] }
  0x52   : > { %5715 = vmatprep.mubr.msk.bf16.mxu0 %vm481_vm2, %v2150_v6  ;;  %v2172_v6 = vsel %vm2139_vm4, %v2169_v17, %v2171_v49  ;;  %v2590_v17 = vrot.slane %v6794_v3, 2 }
  0x53   : > { %v2174_v36 = vsel %vm2139_vm4, %v2171_v49, %v2173_v13 }
  0x54   : > { %v2591_v49 = vsel %vm2139_vm4, %v2588_v61, %v2590_v17 }
  0x56   : > { %5546 = vmatmul.mubr.msk.bf16.gmra.mrb[28].mxu1 %vm481_vm2, %v464_v59  ;;  %v6733_v59 = vld [vmem:[%s6384_s28 + $0x98] ss:$0 sps:$4 sm:$0x33]  }
  0x57   : > { %5549 = vmatprep.mubr.msk.bf16.mxu1 %vm481_vm2, %v472_v42  ;;  %v2175_v42 = vrot.slane %v6733_v59, 2 }
  0x59   : > { %5716 = vmatmul.mubr.msk.bf16.gmra.mrb[8].mxu0 %vm481_vm2, %v2152_v46  ;;  %v2176_v45 = vsel %vm2139_vm4, %v2173_v13, %v2175_v42  ;;  %v6753_v46 = vld [vmem:[%s6384_s28 + $0x20] sm:$0xff]   ;;  %v6812_v13 = vld [vmem:[%s6384_s28 + $0x50] sm:$0xff]  }
  0x5a   : > { %5719 = vmatprep.mubr.msk.bf16.mxu0 %vm481_vm2, %v2154_v47  ;;  %v2581_v47 = vsel %vm2139_vm4, %v2579_v18, %v2580_v43  ;;  %v2582_v23 = vrot.slane %v6753_v46, 2  ;;  %v2594_v42 = vrot.slane %v6812_v13, 2 }
  0x5e   : > { %5550 = vmatmul.mubr.msk.bf16.gmra.mrb[32].mxu1 %vm481_vm2, %v480_v50  ;;  %v6757_v50 = vld [vmem:[%s6384_s28 + $0x28] sm:$0xff]  }
  0x5f   : > { %5555 = vmatprep.mubr.msk.bf16.mxu1 %vm481_vm2, %v6394_v9  ;;  %v6671_v9 = vld [vmem:[%s9048_s1 + $0x6] sm:$0x3]  ;;  %v2584_v44 = vrot.slane %v6757_v50, 2 }
  0x61   : > { %5720 = vmatmul.mubr.msk.bf16.gmra.mrb[12].mxu0 %vm481_vm2, %v2156_v52  ;;  %v2583_v52 = vsel %vm2139_vm4, %v2580_v43, %v2582_v23 }
  0x62   : > { %5723 = vmatprep.mubr.msk.bf16.mxu0 %vm481_vm2, %v2158_v53  ;;  %v6769_v53 = vld [vmem:[%s6384_s28 + $0x30] sm:$0xff]  }
  0x66   : > { %5556 = vmatmul.mubr.msk.bf16.vlgmr.msra.gmra.mrb[0].mxu1 %vm481_vm2, %v6397_v10 }
  0x67   : > { %5559 = vmatprep.mubr.msk.bf16.mxu1 %vm481_vm2, %v6412_v19  ;;  %5592 = vmatpush3.bf16.msra.mxu1 %v1032_v14  ;;  %v2585_v14 = vsel %vm2139_vm4, %v2582_v23, %v2584_v44  ;;  %v945_v23 = vrot.slane %v6426_v33, 1 }
  0x68   : > { %6150 = vmatprep.subr.msk.bf16.mxu1 %vm536_vm0, %v6671_v9 }
  0x69   : > { %5724 = vmatmul.mubr.msk.bf16.gmra.mrb[16].mxu0 %vm481_vm2, %v2160_v29  ;;  %v6780_v29 = vld [vmem:[%s9048_s1 + $0x10] sm:$0x3] }
  0x6a   : > { %5727 = vmatprep.mubr.msk.bf16.mxu0 %vm481_vm2, %v2162_v39  ;;  %v2586_v39 = vrot.slane %v6769_v53, 2 }
  0x6c   : > { %v2587_v34 = vsel %vm2139_vm4, %v2584_v44, %v2586_v39 }
  0x6e   : > { %5560 = vmatmul.mubr.msk.bf16.gmra.mrb[4].mxu1 %vm481_vm2, %v6426_v33 }
  0x6f   : > { %5563 = vmatprep.mubr.msk.bf16.mxu1 %vm481_vm2, %v6444_v48 }
  0x71   : > { %5728 = vmatmul.mubr.msk.bf16.gmra.mrb[20].mxu0 %vm481_vm2, %v2164_v5  ;;  %v2589_v5 = vsel %vm2139_vm4, %v2586_v39, %v2588_v61  ;;  %v1471_v39 = vsel %vm536_vm0, %v6671_v9, 0  ;;  %v947_v61 = vrot.slane %v6444_v48, 1  ;;  %v6304_v9 = vld [vmem:[%s9048_s1 + $0x8] sm:$0x3] }
  0x72   : > { %5731 = vmatprep.mubr.msk.bf16.mxu0 %vm481_vm2, %v2166_v1  ;;  %v6798_v1 = vld [vmem:[%s6384_s28 + $0x48] sm:$0xff]  }
  0x73   : > { %v948_v48 = vsel %vm939_vm5, %v945_v23, %v947_v61 }
  0x76   : > { %5564 = vmatmul.mubr.msk.bf16.gmra.mrb[8].mxu1 %vm481_vm2, %v6453_v54 }
  0x77   : > { %5567 = vmatprep.mubr.msk.bf16.mxu1 %vm481_vm2, %v6464_v0 }
  0x79   : > { %5732 = vmatmul.mubr.msk.bf16.gmra.mrb[24].mxu0 %vm481_vm2, %v2168_v21  ;;  %v5093_v21 = vcombine.low %v933_v16, %v6391_v8  ;;  %v6817_v8 = vld [vmem:[%s6384_s28 + $0x58] sm:$0xff]   ;;  %v949_v16 = vrot.slane %v6453_v54, 1 }
  0x7a   : > { %5735 = vmatprep.mubr.msk.bf16.mxu0 %vm481_vm2, %v2170_v24  ;;  %v2592_v24 = vrot.slane %v6798_v1, 2  ;;  %v2596_v43 = vrot.slane %v6817_v8, 2 }
  0x7b   : > { %v940_v30 = vrot.slane %v5093_v21, 1  ;;  %v6859_v21 = vld [vmem:[%s6384_s28 + $0x78] sm:$0xff]   ;;  %v950_v54 = vsel %vm939_vm5, %v947_v61, %v949_v16 }
  0x7c   : > { %v2597_v44 = vsel %vm2139_vm4, %v2594_v42, %v2596_v43 }
  0x7e   : > { %5568 = vmatmul.mubr.msk.bf16.gmra.mrb[12].mxu1 %vm481_vm2, %v6492_v35 }
  0x7f   : > { %5571 = vmatprep.mubr.msk.bf16.mxu1 %vm481_vm2, %v6508_v51 }
  0x81   : > { %5736 = vmatmul.mubr.msk.bf16.gmra.mrb[28].mxu0 %vm481_vm2, %v2172_v6  ;;  %v941_v6 = vrot.slane %v6397_v10, 1  ;;  %v943_v10 = vrot.slane %v6412_v19, 1 }
  0x82   : > { %5739 = vmatprep.mubr.msk.bf16.mxu0 %vm481_vm2, %v2174_v36  ;;  %v2593_v36 = vsel %vm2139_vm4, %v2590_v17, %v2592_v24 }
  0x83   : > { %v942_v18 = vsel %vm939_vm5, %v940_v30, %v941_v6  ;;  %v951_v30 = vrot.slane %v6464_v0, 1 }
  0x86   : > { %5572 = vmatmul.mubr.msk.bf16.gmra.mrb[16].mxu1 %vm481_vm2, %v6519_v63 }
  0x87   : > { %5575 = vmatprep.mubr.msk.bf16.mxu1 %vm481_vm2, %v6536_v25 }
  0x89   : > { %5740 = vmatmul.mubr.msk.bf16.gmra.mrb[32].mxu0 %vm481_vm2, %v2176_v45  ;;  %v2595_v45 = vsel %vm2139_vm4, %v2592_v24, %v2594_v42  ;;  %v953_v42 = vrot.slane %v6492_v35, 1  ;;  %v955_v35 = vrot.slane %v6508_v51, 1 }
  0x8a   : > { %5745 = vmatprep.mubr.msk.bf16.mxu0 %vm481_vm2, %v2581_v47  ;;  %v6830_v47 = vld [vmem:[%s6384_s28 + $0x60] sm:$0xff]  }
  0x8b   : > { %v2598_v19 = vrot.slane %v6830_v47, 2 }
  0x8e   : > { %5576 = vmatmul.mubr.msk.bf16.gmra.mrb[20].mxu1 %vm481_vm2, %v6546_v41 }
  0x8f   : > { %5579 = vmatprep.mubr.msk.bf16.mxu1 %vm481_vm2, %v6560_v58 }
  0x91   : > { %5746 = vmatmul.mubr.msk.bf16.vlgmr.msra.gmra.mrb[0].mxu0 %vm481_vm2, %v2583_v52  ;;  %v6835_v52 = vld [vmem:[%s6384_s28 + $0x68] sm:$0xff]  }
  0x92   : > { %5782 = vmatpush3.bf16.msra.mxu0 %v3118_v62  ;;  %5749 = vmatprep.mubr.msk.bf16.mxu0 %vm481_vm2, %v2585_v14  ;;  %v944_v62 = vsel %vm939_vm5, %v941_v6, %v943_v10  ;;  %v946_v14 = vsel %vm939_vm5, %v943_v10, %v945_v23  ;;  %v2600_v33 = vrot.slane %v6835_v52, 2  ;;  %v952_v10 = vsel %vm939_vm5, %v949_v16, %v951_v30 }
  0x93   : > { %6156 = vmatprep.subr.msk.bf16.mxu0 %vm536_vm0, %v6780_v29  ;;  %v2894_v16 = vshrl.u32 %v6737_v37, 16 }
  0x94   : > { %v2601_v17 = vsel %vm2139_vm4, %v2598_v19, %v2600_v33 }
  0x96   : > { %5580 = vmatmul.mubr.msk.bf16.gmra.mrb[24].mxu1 %vm481_vm2, %v6565_v11 }
  0x97   : > { %5583 = vmatprep.mubr.msk.bf16.mxu1 %vm481_vm2, %v6582_v32 }
  0x99   : > { %5750 = vmatmul.mubr.msk.bf16.gmra.mrb[4].mxu0 %vm481_vm2, %v2587_v34  ;;  %v2599_v34 = vsel %vm2139_vm4, %v2596_v43, %v2598_v19  ;;  %v6877_v43 = vld [vmem:[%s6384_s28 + $0x88] sm:$0xff]   ;;  %v957_v19 = vrot.slane %v6519_v63, 1  ;;  %v2897_v63 = vshll.u32 %v6737_v37, 16 }
  0x9a   : > { %5753 = vmatprep.mubr.msk.bf16.mxu0 %vm481_vm2, %v2589_v5  ;;  %v6850_v5 = vld [vmem:[%s6384_s28 + $0x70] sm:$0xff]   ;;  %v2608_v23 = vrot.slane %v6877_v43, 2 }
  0x9b   : > { %v2602_v24 = vrot.slane %v6850_v5, 2  ;;  %v958_v51 = vsel %vm939_vm5, %v955_v35, %v957_v19 }
  0x9d   : > { %v2603_v6 = vsel %vm2139_vm4, %v2600_v33, %v2602_v24  ;;  %v956_v33 = vsel %vm939_vm5, %v953_v42, %v955_v35 }
  0x9e   : > { %5584 = vmatmul.mubr.msk.bf16.gmra.mrb[28].mxu1 %vm481_vm2, %v6588_v40 }
  0x9f   : > { %5587 = vmatprep.mubr.msk.bf16.mxu1 %vm481_vm2, %v6603_v56 }
  0xa1   : > { %5754 = vmatmul.mubr.msk.bf16.gmra.mrb[8].mxu0 %vm481_vm2, %v2591_v49  ;;  %v2604_v49 = vrot.slane %v6859_v21, 2 }
  0xa2   : > { %5757 = vmatprep.mubr.msk.bf16.mxu0 %vm481_vm2, %v2593_v36  ;;  %v6872_v36 = vld [vmem:[%s6384_s28 + $0x80] sm:$0xff]  }
  0xa3   : > { %v2606_v0 = vrot.slane %v6872_v36, 2 }
  0xa6   : > { %5588 = vmatmul.mubr.msk.bf16.gmra.mrb[32].mxu1 %vm481_vm2, %v6610_v4 }
  0xa7   : > { %5593 = vmatprep.mubr.msk.bf16.mxu1 %vm481_vm2, %v942_v18  ;;  %v2605_v18 = vsel %vm2139_vm4, %v2602_v24, %v2604_v49 }
  0xa9   : > { %5758 = vmatmul.mubr.msk.bf16.gmra.mrb[12].mxu0 %vm481_vm2, %v2595_v45  ;;  %v954_v45 = vsel %vm939_vm5, %v951_v30, %v953_v42  ;;  %v961_v30 = vrot.slane %v6546_v41, 1  ;;  %v2899_v42 = vrot.slane %v2897_v63, 3  ;;  %v2920_v41 = vshrl.u32 %v6757_v50, 16 }
  0xaa   : > { %5761 = vmatprep.mubr.msk.bf16.mxu0 %vm481_vm2, %v2597_v44  ;;  %v2607_v44 = vsel %vm2139_vm4, %v2604_v49, %v2606_v0  ;;  %v6298_v49 = vld [vmem:[%s6384_s28 + $0xa0] ss:$0 sps:$4 sm:$0x33]  }
  0xae   : > { %5594 = vmatmul.mubr.msk.bf16.vlgmr.msra.gmra.mrb[0].mxu1 %vm481_vm2, %v944_v62  ;;  %v6890_v62 = vld [vmem:[%s6384_s28 + $0x90] sm:$0xff]  }
  0xaf   : > { %5597 = vmatprep.mubr.msk.bf16.mxu1 %vm481_vm2, %v946_v14  ;;  %5630 = vmatpush3.bf16.msra.mxu1 %v1471_v39  ;;  %v6894_v14 = vld [vmem:[%s6384_s28 + $0x98] sm:$0xff]   ;;  %v2609_v39 = vsel %vm2139_vm4, %v2606_v0, %v2608_v23  ;;  %v2610_v61 = vrot.slane %v6890_v62, 2  ;;  %v2614_v0 = vrot.slane %v6298_v49, 2 }
  0xb0   : > { %6152 = vmatprep.subr.msk.bf16.mxu1 %vm536_vm0, %v6304_v9  ;;  %v2902_v9 = vshrl.u32 %v6740_v38, 16 }
  0xb1   : > { %5762 = vmatmul.mubr.msk.bf16.gmra.mrb[16].mxu0 %vm481_vm2, %v2599_v34  ;;  %v2612_v34 = vrot.slane %v6894_v14, 2  ;;  %v2611_v24 = vsel %vm2139_vm4, %v2608_v23, %v2610_v61  ;;  %v2914_v23 = vshll.u32 %v6753_v46, 16 }
  0xb2   : > { %5765 = vmatprep.mubr.msk.bf16.mxu0 %vm481_vm2, %v2601_v17  ;;  %v2905_v17 = vshll.u32 %v6740_v38, 16  ;;  %v2904_v37 = vrot.slane %v2902_v9, 2  ;;  %v2922_v9 = vrot.slane %v2920_v41, 2  ;;  %v2947_v41 = vshrl.u32 %v6794_v3, 16 }
  0xb6   : > { %5598 = vmatmul.mubr.msk.bf16.gmra.mrb[4].mxu1 %vm481_vm2, %v948_v48  ;;  %v959_v48 = vrot.slane %v6536_v25, 1 }
  0xb7   : > { %5601 = vmatprep.mubr.msk.bf16.mxu1 %vm481_vm2, %v950_v54  ;;  %v2613_v54 = vsel %vm2139_vm4, %v2610_v61, %v2612_v34 }
  0xb8   : > { %v962_v25 = vsel %vm939_vm5, %v959_v48, %v961_v30 }
  0xb9   : > { %5766 = vmatmul.mubr.msk.bf16.gmra.mrb[20].mxu0 %vm481_vm2, %v2603_v6  ;;  %v2896_v6 = vrot.slane %v2894_v16, 2  ;;  %v965_v16 = vrot.slane %v6565_v11, 1  ;;  %v2938_v11 = vshrl.u32 %v6775_v28, 16 }
  0xba   : > { %5769 = vmatprep.mubr.msk.bf16.mxu0 %vm481_vm2, %v2605_v18  ;;  %v2907_v18 = vrot.slane %v2905_v17, 3 }
  0xbb   : > { %v2900_v35 = vor.u32 %v2899_v42, %v2896_v6  ;;  %v2941_v6 = vshll.u32 %v6775_v28, 16 }
  0xbe   : > { %5602 = vmatmul.mubr.msk.bf16.gmra.mrb[8].mxu1 %vm481_vm2, %v952_v10  ;;  %v960_v10 = vsel %vm939_vm5, %v957_v19, %v959_v48  ;;  %v963_v19 = vrot.slane %v6560_v58, 1  ;;  %v2929_v58 = vshrl.u32 %v6769_v53, 16 }
  0xbf   : > { %5605 = vmatprep.mubr.msk.bf16.mxu1 %vm481_vm2, %v954_v45  ;;  %v2911_v45 = vshrl.u32 %v6753_v46, 16 }
  0xc0   : > { %v964_v48 = vsel %vm939_vm5, %v961_v30, %v963_v19  ;;  %v967_v30 = vrot.slane %v6582_v32, 1  ;;  %v2950_v32 = vshll.u32 %v6794_v3, 16 }
  0xc1   : > { %5770 = vmatmul.mubr.msk.bf16.gmra.mrb[24].mxu0 %vm481_vm2, %v2607_v44  ;;  %v2908_v44 = vor.u32 %v2907_v18, %v2904_v37  ;;  %v2913_v61 = vrot.slane %v2911_v45, 2  ;;  %v2931_v37 = vrot.slane %v2929_v58, 2  ;;  %v2940_v45 = vrot.slane %v2938_v11, 2 }
  0xc2   : > { %5773 = vmatprep.mubr.msk.bf16.mxu0 %vm481_vm2, %v2609_v39  ;;  %v2923_v39 = vshll.u32 %v6757_v50, 16  ;;  %v2965_v58 = vshrl.u32 %v6812_v13, 16  ;;  %v2977_v11 = vshll.u32 %v6817_v8, 16 }
  0xc3   : > { %v2909_v63 = vsel %vm2892_vm6, %v2900_v35, %v2908_v44  ;;  %v968_v35 = vsel %vm939_vm5, %v965_v16, %v967_v30 }
  0xc4   : > { %v2925_v17 = vrot.slane %v2923_v39, 3 }
  0xc6   : > { %5606 = vmatmul.mubr.msk.bf16.gmra.mrb[12].mxu1 %vm481_vm2, %v956_v33  ;;  %v2615_v33 = vsel %vm2139_vm4, %v2612_v34, %v2614_v0  ;;  %v2932_v34 = vshll.u32 %v6769_v53, 16  ;;  %v2926_v49 = vor.u32 %v2925_v17, %v2922_v9  ;;  %v3432_v0 = vsel %vm536_vm0, %v6780_v29, 0 }
  0xc7   : > { %5609 = vmatprep.mubr.msk.bf16.mxu1 %vm481_vm2, %v958_v51  ;;  %v2916_v51 = vrot.slane %v2914_v23, 3  ;;  %v2943_v23 = vrot.slane %v2941_v6, 3  ;;  %v2956_v29 = vshrl.u32 %v6798_v1, 16 }
  0xc8   : > { %v2934_v18 = vrot.slane %v2932_v34, 3  ;;  %v2968_v34 = vshll.u32 %v6812_v13, 16 }
  0xc9   : > { %5774 = vmatmul.mubr.msk.bf16.gmra.mrb[28].mxu0 %vm481_vm2, %v2611_v24  ;;  %v2917_v24 = vor.u32 %v2916_v51, %v2913_v61  ;;  %v2944_v39 = vor.u32 %v2943_v23, %v2940_v45  ;;  %v2949_v61 = vrot.slane %v2947_v41, 2  ;;  %v2952_v51 = vrot.slane %v2950_v32, 3 }
  0xca   : > { %5777 = vmatprep.mubr.msk.bf16.mxu0 %vm481_vm2, %v2613_v54  ;;  %v966_v54 = vsel %vm939_vm5, %v963_v19, %v965_v16  ;;  %v2959_v19 = vshll.u32 %v6798_v1, 16  ;;  %v2958_v17 = vrot.slane %v2956_v29, 2  ;;  %v2979_v23 = vrot.slane %v2977_v11, 3  ;;  %v6306_v29 = vld [vmem:[%s6384_s28 + $0x18] sm:$0xff]  }
  0xcb   : > { %v2918_v42 = vsel %vm2892_vm6, %v2908_v44, %v2917_v24  ;;  %v2935_v44 = vor.u32 %v2934_v18, %v2931_v37  ;;  %v2970_v37 = vrot.slane %v2968_v34, 3  ;;  %v1379_v18 = vrot.slane %v6415_v20, 1 }
  0xcc   : > { %v2983_v32 = vshrl.u32 %v6830_v47, 16  ;;  %v2986_v20 = vshll.u32 %v6830_v47, 16  ;;  %v3004_v34 = vshll.u32 %v6850_v5, 16  ;;  %v3013_v11 = vshll.u32 %v6859_v21, 16 }
  0xcd   : > { %v2936_v16 = vsel %vm2892_vm6, %v2926_v49, %v2935_v44  ;;  %v2945_v9 = vsel %vm2892_vm6, %v2935_v44, %v2944_v39 }
  0xce   : > { %5610 = vmatmul.mubr.msk.bf16.gmra.mrb[16].mxu1 %vm481_vm2, %v960_v10  ;;  %v969_v10 = vrot.slane %v6588_v40, 1 }
  0xcf   : > { %5613 = vmatprep.mubr.msk.bf16.mxu1 %vm481_vm2, %v962_v25  ;;  %v2927_v25 = vsel %vm2892_vm6, %v2917_v24, %v2926_v49 }
  0xd0   : > { %v970_v40 = vsel %vm939_vm5, %v967_v30, %v969_v10  ;;  %v975_v30 = vrot.slane %v6633_v27, 1 }
  0xd1   : > { %5778 = vmatmul.mubr.msk.bf16.gmra.mrb[32].mxu0 %vm481_vm2, %v2615_v33  ;;  %v971_v33 = vrot.slane %v6603_v56, 1 }
  0xd2   : > { %5783 = vmatprep.mubr.msk.bf16.mxu0 %vm481_vm2, %v2909_v63  ;;  %v973_v63 = vrot.slane %v6610_v4, 1  ;;  %v2974_v4 = vshrl.u32 %v6817_v8, 16 }
  0xd3   : > { %v972_v24 = vsel %vm939_vm5, %v969_v10, %v971_v33  ;;  %v6305_v10 = vld [vmem:[%s6384_s28 + $0x10] sm:$0xff]  }
  0xd4   : > { %v974_v56 = vsel %vm939_vm5, %v971_v33, %v973_v63  ;;  %v2976_v45 = vrot.slane %v2974_v4, 2  ;;  %v3010_v4 = vshrl.u32 %v6859_v21, 16 }
  0xd6   : > { %5614 = vmatmul.mubr.msk.bf16.gmra.mrb[20].mxu1 %vm481_vm2, %v964_v48  ;;  %v2961_v48 = vrot.slane %v2959_v19, 3  ;;  %v2980_v44 = vor.u32 %v2979_v23, %v2976_v45  ;;  %v1382_v19 = vrot.slane %v6306_v29, 1  ;;  %v3012_v45 = vrot.slane %v3010_v4, 2 }
  0xd7   : > { %5617 = vmatprep.mubr.msk.bf16.mxu1 %vm481_vm2, %v966_v54  ;;  %v2953_v54 = vor.u32 %v2952_v51, %v2949_v61  ;;  %v2985_v61 = vrot.slane %v2983_v32, 2  ;;  %v2988_v51 = vrot.slane %v2986_v20, 3  ;;  %v3015_v23 = vrot.slane %v3013_v11, 3  ;;  %v6312_v11 = vld [vmem:[%s6384_s28 + $0x48] sm:$0xff]  }
  0xd8   : > { %v2962_v49 = vor.u32 %v2961_v48, %v2958_v17  ;;  %v3022_v32 = vshll.u32 %v6872_v36, 16  ;;  %v3049_v4 = vshll.u32 %v6894_v14, 16 }
  0xd9   : > { %5784 = vmatmul.mubr.msk.bf16.vlgmr.msra.gmra.mrb[0].mxu0 %vm481_vm2, %v2918_v42  ;;  %v2954_v6 = vsel %vm2892_vm6, %v2944_v39, %v2953_v54  ;;  %v2967_v42 = vrot.slane %v2965_v58, 2  ;;  %v2995_v39 = vshll.u32 %v6835_v52, 16  ;;  %v3001_v58 = vshrl.u32 %v6850_v5, 16 }
  0xda   : > { %5820 = vmatpush3.bf16.msra.mxu0 %v3432_v0  ;;  %5787 = vmatprep.mubr.msk.bf16.mxu0 %vm481_vm2, %v2927_v25  ;;  %v1380_v0 = vrot.slane %v6305_v10, 1  ;;  %v2963_v25 = vsel %vm2892_vm6, %v2953_v54, %v2962_v49  ;;  %v2989_v54 = vor.u32 %v2988_v51, %v2985_v61  ;;  %v6309_v10 = vld [vmem:[%s6384_s28 + $0x30] sm:$0xff]   ;;  %v3016_v20 = vor.u32 %v3015_v23, %v3012_v45  ;;  %v6311_v51 = vld [vmem:[%s6384_s28 + $0x40] sm:$0xff]  }
  0xdb   : > { %v2971_v41 = vor.u32 %v2970_v37, %v2967_v42  ;;  %v2997_v48 = vrot.slane %v2995_v39, 3  ;;  %v3003_v37 = vrot.slane %v3001_v58, 2  ;;  %v6310_v39 = vld [vmem:[%s6384_s28 + $0x38] sm:$0xff]   ;;  %v3024_v61 = vrot.slane %v3022_v32, 3 }
  0xdc   : > { %v1381_v27 = vsel %vm939_vm5, %v1379_v18, %v1380_v0  ;;  %v2990_v42 = vsel %vm2892_vm6, %v2980_v44, %v2989_v54  ;;  %v3006_v18 = vrot.slane %v3004_v34, 3  ;;  %v1390_v29 = vrot.slane %v6310_v39, 1 }
  0xdd   : > { %v2972_v33 = vsel %vm2892_vm6, %v2962_v49, %v2971_v41  ;;  %v3040_v58 = vshll.u32 %v6890_v62, 16  ;;  %v3051_v23 = vrot.slane %v3049_v4, 3  ;;  %v3345_v4 = vrot.slane %v6757_v50, 3 }
  0xde   : > { %5618 = vmatmul.mubr.msk.bf16.gmra.mrb[24].mxu1 %vm481_vm2, %v968_v35  ;;  %v976_v35 = vsel %vm939_vm5, %v973_v63, %v975_v30  ;;  %v3347_v50 = vrot.slane %v6769_v53, 3 }
  0xdf   : > { %5621 = vmatprep.mubr.msk.bf16.mxu1 %vm481_vm2, %v970_v40  ;;  %v2992_v40 = vshrl.u32 %v6835_v52, 16 }
  0xe1   : > { %5788 = vmatmul.mubr.msk.bf16.gmra.mrb[4].mxu0 %vm481_vm2, %v2936_v16  ;;  %v6307_v16 = vld [vmem:[%s6384_s28 + $0x20] sm:$0xff]   ;;  %v2994_v17 = vrot.slane %v2992_v40, 2  ;;  %v3031_v40 = vshll.u32 %v6877_v43, 16 }
  0xe2   : > { %5791 = vmatprep.mubr.msk.bf16.mxu0 %vm481_vm2, %v2945_v9  ;;  %v1384_v63 = vrot.slane %v6307_v16, 1  ;;  %v2981_v9 = vsel %vm2892_vm6, %v2971_v41, %v2980_v44  ;;  %v3007_v41 = vor.u32 %v3006_v18, %v3003_v37  ;;  %v3028_v44 = vshrl.u32 %v6877_v43, 16  ;;  %v6313_v18 = vld [vmem:[%s6384_s28 + $0x50] sm:$0xff]  }
  0xe3   : > { %v2998_v49 = vor.u32 %v2997_v48, %v2994_v17  ;;  %v1392_v16 = vrot.slane %v6311_v51, 1  ;;  %v3033_v17 = vrot.slane %v3031_v40, 3  ;;  %v3042_v37 = vrot.slane %v3040_v58, 3  ;;  %v6314_v40 = vld [vmem:[%s6384_s28 + $0x58] sm:$0xff]  }
  0xe4   : > { %v1398_v39 = vrot.slane %v6314_v40, 1  ;;  %v1801_v40 = vshrl.u32 %v6679_v57, 16 }
  0xe6   : > { %5622 = vmatmul.mubr.msk.bf16.gmra.mrb[28].mxu1 %vm481_vm2, %v972_v24  ;;  %v1383_v24 = vsel %vm939_vm5, %v1380_v0, %v1382_v19  ;;  %v1388_v0 = vrot.slane %v6309_v10, 1  ;;  %v1396_v10 = vrot.slane %v6313_v18, 1  ;;  %v3349_v18 = vrot.slane %v6775_v28, 3 }
  0xe7   : > { %5625 = vmatprep.mubr.msk.bf16.mxu1 %vm481_vm2, %v974_v56  ;;  %v1385_v56 = vsel %vm939_vm5, %v1382_v19, %v1384_v63  ;;  %v3008_v19 = vsel %vm2892_vm6, %v2998_v49, %v3007_v41 }
  0xe8   : > { %v1391_v48 = vsel %vm939_vm5, %v1388_v0, %v1390_v29  ;;  %v3350_v53 = vsel %vm3339_vm7, %v3347_v50, %v3349_v18 }
  0xe9   : > { %5792 = vmatmul.mubr.msk.bf16.gmra.mrb[8].mxu0 %vm481_vm2, %v2954_v6  ;;  %v6308_v6 = vld [vmem:[%s6384_s28 + $0x28] sm:$0xff]  }
  0xea   : > { %5795 = vmatprep.mubr.msk.bf16.mxu0 %vm481_vm2, %v2963_v25  ;;  %v1386_v30 = vrot.slane %v6308_v6, 1  ;;  %v2999_v25 = vsel %vm2892_vm6, %v2989_v54, %v2998_v49  ;;  %v1393_v54 = vsel %vm939_vm5, %v1390_v29, %v1392_v16  ;;  %v3046_v49 = vshrl.u32 %v6894_v14, 16 }
  0xeb   : > { %v1394_v6 = vrot.slane %v6312_v11, 1  ;;  %v1406_v11 = vrot.slane %v6697_v7, 1 }
  0xec   : > { %v3048_v45 = vrot.slane %v3046_v49, 2 }
  0xee   : > { %5626 = vmatmul.mubr.msk.bf16.gmra.mrb[32].mxu1 %vm481_vm2, %v976_v35  ;;  %v1387_v35 = vsel %vm939_vm5, %v1384_v63, %v1386_v30  ;;  %v3017_v63 = vsel %vm2892_vm6, %v3007_v41, %v3016_v20 }
  0xef   : > { %5631 = vmatprep.mubr.msk.bf16.mxu1 %vm481_vm2, %v1381_v27  ;;  %v3019_v27 = vshrl.u32 %v6872_v36, 16 }
  0xf1   : > { %5796 = vmatmul.mubr.msk.bf16.gmra.mrb[12].mxu0 %vm481_vm2, %v2972_v33  ;;  %v3021_v33 = vrot.slane %v3019_v27, 2 }
  0xf2   : > { %5799 = vmatprep.mubr.msk.bf16.mxu0 %vm481_vm2, %v2981_v9  ;;  %v3030_v9 = vrot.slane %v3028_v44, 2  ;;  %v3333_v44 = vld [vmem:[%s6384_s28 + $0x10] sm:$0x8] }
  0xf4   : > { %v3034_v34 = vor.u32 %v3033_v17, %v3030_v9 }
  0xf6   : > { %5632 = vmatmul.mubr.msk.bf16.vlgmr.msra.gmra.mrb[0].mxu1 %vm481_vm2, %v1383_v24  ;;  %v3025_v24 = vor.u32 %v3024_v61, %v3021_v33  ;;  %v1400_v61 = vrot.slane %v6660_v55, 1 }
  0xf7   : > { %5635 = vmatprep.mubr.msk.bf16.mxu1 %vm481_vm2, %v1385_v56  ;;  %5858 = vmatpush3.bf16.msra.mxu1 %v6366_v2  ;;  %v1389_v2 = vsel %vm939_vm5, %v1386_v30, %v1388_v0  ;;  %v3037_v56 = vshrl.u32 %v6890_v62, 16  ;;  %v7030_v0 = vld [vmem:[%s6384_s28 + $0xa0] ss:$0 sps:$4 sm:$0x77]  }
  0xf8   : > { %v3026_v30 = vsel %vm2892_vm6, %v3016_v20, %v3025_v24  ;;  %v3055_v27 = vshrl.u32 %v7030_v0, 16  ;;  %v3058_v32 = vshll.u32 %v7030_v0, 16  ;;  %v3052_v20 = vor.u32 %v3051_v23, %v3048_v45 }
  0xf9   : > { %5800 = vmatmul.mubr.msk.bf16.gmra.mrb[16].mxu0 %vm481_vm2, %v2990_v42  ;;  %v3039_v42 = vrot.slane %v3037_v56, 2  ;;  %v1401_v17 = vsel %vm939_vm5, %v1398_v39, %v1400_v61  ;;  %v1404_v56 = vrot.slane %v6685_v60, 1  ;;  %v1412_v45 = vrot.slane %v6717_v26, 1 }
  0xfa   : > { %5803 = vmatprep.mubr.msk.bf16.mxu0 %vm481_vm2, %v2999_v25  ;;  %v3035_v25 = vsel %vm2892_vm6, %v3025_v24, %v3034_v34  ;;  %v3060_v33 = vrot.slane %v3058_v32, 3  ;;  %v3341_v24 = vrot.slane %v6740_v38, 3  ;;  %v3343_v38 = vrot.slane %v6753_v46, 3 }
  0xfb   : > { %v3043_v41 = vor.u32 %v3042_v37, %v3039_v42  ;;  %v1407_v46 = vsel %vm939_vm5, %v1404_v56, %v1406_v11  ;;  %v1792_v23 = vshrl.u32 %v6660_v55, 16 }
  0xfc   : > { %v3346_v42 = vsel %vm3339_vm7, %v3343_v38, %v3345_v4 }
  0xfd   : > { %v3044_v29 = vsel %vm2892_vm6, %v3034_v34, %v3043_v41  ;;  %v3053_v51 = vsel %vm2892_vm6, %v3043_v41, %v3052_v20  ;;  %v6301_v41 = vld [vmem:[%s6384_s28 + $0x98] ss:$0 sps:$4 sm:$0x11]   ;;  %v1794_v32 = vrot.slane %v1792_v23, 1 }
  0xfe   : > { %5636 = vmatmul.mubr.msk.bf16.gmra.mrb[4].mxu1 %vm481_vm2, %v1387_v35  ;;  %v1395_v35 = vsel %vm939_vm5, %v1392_v16, %v1394_v6  ;;  %v5249_v16 = vcombine.low %v3333_v44, %v6727_v31  ;;  %v3353_v44 = vrot.slane %v6798_v1, 3 }
  0xff   : > { %5639 = vmatprep.mubr.msk.bf16.mxu1 %vm481_vm2, %v1389_v2  ;;  %v1397_v2 = vsel %vm939_vm5, %v1394_v6, %v1396_v10  ;;  %v3344_v6 = vsel %vm3339_vm7, %v3341_v24, %v3343_v38 }
 0x101   : > { %5804 = vmatmul.mubr.msk.bf16.gmra.mrb[20].mxu0 %vm481_vm2, %v3008_v19  ;;  %v3057_v19 = vrot.slane %v3055_v27, 2 }
 0x102   : > { %5807 = vmatprep.mubr.msk.bf16.mxu0 %vm481_vm2, %v3017_v63  ;;  %v1399_v63 = vsel %vm939_vm5, %v1396_v10, %v1398_v39  ;;  %v1410_v10 = vrot.slane %v6713_v22, 1  ;;  %v1804_v39 = vshll.u32 %v6679_v57, 16 }
 0x103   : > { %v3061_v9 = vor.u32 %v3060_v33, %v3057_v19  ;;  %v1813_v33 = vshll.u32 %v6685_v60, 16 }
 0x104   : > { %v1413_v27 = vsel %vm939_vm5, %v1410_v10, %v1412_v45 }
 0x105   : > { %v3062_v31 = vsel %vm2892_vm6, %v3052_v20, %v3061_v9 }
 0x106   : > { %5640 = vmatmul.mubr.msk.bf16.gmra.mrb[8].mxu1 %vm481_vm2, %v1391_v48  ;;  %v3340_v48 = vrot.slane %v5249_v16, 3  ;;  %v1806_v16 = vrot.slane %v1804_v39, 2 }
 0x107   : > { %5643 = vmatprep.mubr.msk.bf16.mxu1 %vm481_vm2, %v1393_v54  ;;  %v1402_v54 = vrot.slane %v6679_v57, 1 }
 0x108   : > { %v3342_v58 = vsel %vm3339_vm7, %v3340_v48, %v3341_v24  ;;  %v3357_v48 = vrot.slane %v6817_v8, 3  ;;  %v1819_v24 = vshrl.u32 %v6697_v7, 16 }
 0x109   : > { %5808 = vmatmul.mubr.msk.bf16.gmra.mrb[24].mxu0 %vm481_vm2, %v3026_v30  ;;  %v1403_v34 = vsel %vm939_vm5, %v1400_v61, %v1402_v54  ;;  %v1405_v49 = vsel %vm939_vm5, %v1402_v54, %v1404_v56  ;;  %v1408_v30 = vrot.slane %v6701_v12, 1  ;;  %v1822_v54 = vshll.u32 %v6697_v7, 16 }
 0x10a   : > { %5811 = vmatprep.mubr.msk.bf16.mxu0 %vm481_vm2, %v3035_v25  ;;  %v3348_v25 = vsel %vm3339_vm7, %v3345_v4, %v3347_v50 }
 0x10b   : > { %v1409_v37 = vsel %vm939_vm5, %v1406_v11, %v1408_v30  ;;  %v1411_v28 = vsel %vm939_vm5, %v1408_v30, %v1410_v10  ;;  %v1824_v38 = vrot.slane %v1822_v54, 2  ;;  %v1837_v30 = vshrl.u32 %v6713_v22, 16 }
 0x10d   : > { %v1839_v10 = vrot.slane %v1837_v30, 1 }
 0x10e   : > { %5644 = vmatmul.mubr.msk.bf16.gmra.mrb[12].mxu1 %vm481_vm2, %v1395_v35  ;;  %v1795_v35 = vshll.u32 %v6660_v55, 16  ;;  %v1414_v55 = vrot.slane %v6301_v41, 1  ;;  %v1858_v41 = vshll.u32 %v6733_v59, 16 }
 0x10f   : > { %5647 = vmatprep.mubr.msk.bf16.mxu1 %vm481_vm2, %v1397_v2  ;;  %v3351_v2 = vrot.slane %v6794_v3, 3  ;;  %v1810_v3 = vshrl.u32 %v6685_v60, 16 }
 0x110   : > { %v1797_v20 = vrot.slane %v1795_v35, 2  ;;  %v1415_v1 = vsel %vm939_vm5, %v1412_v45, %v1414_v55  ;;  %v3363_v45 = vrot.slane %v6850_v5, 3 }
 0x111   : > { %5812 = vmatmul.mubr.msk.bf16.gmra.mrb[28].mxu0 %vm481_vm2, %v3044_v29  ;;  %v3352_v29 = vsel %vm3339_vm7, %v3349_v18, %v3351_v2  ;;  %v3354_v61 = vsel %vm3339_vm7, %v3351_v2, %v3353_v44  ;;  %v1812_v9 = vrot.slane %v1810_v3, 1  ;;  %v3373_v3 = vrot.slane %v6894_v14, 3 }
 0x112   : > { %5815 = vmatprep.mubr.msk.bf16.mxu0 %vm481_vm2, %v3053_v51  ;;  %v1798_v19 = vor.u32 %v1797_v20, %v1794_v32  ;;  %v1803_v51 = vrot.slane %v1801_v40, 1  ;;  %v3369_v40 = vrot.slane %v6877_v43, 3 }
 0x114   : > { %v1799_v57 = vsel %vm1692_vm3, %v6574_v15, %v1798_v19  ;;  %v1807_v60 = vor.u32 %v1806_v16, %v1803_v51  ;;  %v1831_v15 = vshll.u32 %v6701_v12, 16  ;;  %v3647_v51 = vlaneseq }
 0x116   : > { %5648 = vmatmul.mubr.msk.bf16.gmra.mrb[16].mxu1 %vm481_vm2, %v1399_v63  ;;  %v3355_v63 = vrot.slane %v6812_v13, 3  ;;  %v1828_v13 = vshrl.u32 %v6701_v12, 16  ;;  %v1808_v8 = vsel %vm1692_vm3, %v1798_v19, %v1807_v60  ;;  %v1833_v11 = vrot.slane %v1831_v15, 2 }
 0x117   : > { %5651 = vmatprep.mubr.msk.bf16.mxu1 %vm481_vm2, %v1401_v17  ;;  %v1815_v17 = vrot.slane %v1813_v33, 2 }
 0x118   : > { %v1830_v4 = vrot.slane %v1828_v13, 1 }
 0x119   : > { %5816 = vmatmul.mubr.msk.bf16.gmra.mrb[32].mxu0 %vm481_vm2, %v3062_v31  ;;  %v3356_v31 = vsel %vm3339_vm7, %v3353_v44, %v3355_v63  ;;  %v1816_v56 = vor.u32 %v1815_v17, %v1812_v9  ;;  %v3367_v44 = vrot.slane %v6872_v36, 3  ;;  %v3371_v36 = vrot.slane %v6890_v62, 3 }
 0x11a   : > { %5821 = vmatprep.mubr.msk.bf16.mxu0 %vm481_vm2, %v3342_v58  ;;  %v3358_v58 = vsel %vm3339_vm7, %v3355_v63, %v3357_v48  ;;  %v1834_v50 = vor.u32 %v1833_v11, %v1830_v4  ;;  %v7163_v62 = vshrl.u32 %v3647_v51, 7 }
 0x11b   : > { %v1817_v7 = vsel %vm1692_vm3, %v1807_v60, %v1816_v56  ;;  %v3372_v43 = vsel %vm3339_vm7, %v3369_v40, %v3371_v36  ;;  %v3374_v33 = vsel %vm3339_vm7, %v3371_v36, %v3373_v3 }
 0x11c   : > { %v3650_v14 = vadd.s32 16, %v7163_v62  ;;  %v3651_v16 = vadd.s32 24, %v7163_v62  ;;  %v7171_v9 = vmul.u32.u64.low 3817748708, %v7163_v62  ;;  %v7172_v17 = vmul.u32.u64.high 3817748708, %v7163_v62, %v7171_v9 }
 0x11d   : > { %v3652_v54 = vadd.s32 32, %v7163_v62  ;;  %v7196_v4 = vadd.s32 40, %v7163_v62  ;;  %v7251_v36 = vadd.s32 72, %v7163_v62 }
 0x11e   : > { %5652 = vmatmul.mubr.msk.bf16.gmra.mrb[20].mxu1 %vm481_vm2, %v1403_v34  ;;  %v1821_v34 = vrot.slane %v1819_v24, 1  ;;  %v7176_v60 = vmul.u32.u64.low 3817748708, %v3651_v16  ;;  %v7177_v24 = vmul.u32.u64.high 3817748708, %v3651_v16, %v7176_v60 }
 0x11f   : > { %5655 = vmatprep.mubr.msk.bf16.mxu1 %vm481_vm2, %v1405_v49  ;;  %v3359_v49 = vrot.slane %v6830_v47, 3  ;;  %v1846_v47 = vshrl.u32 %v6717_v26, 16 }
 0x120   : > { %v1825_v12 = vor.u32 %v1824_v38, %v1821_v34  ;;  %v3690_v38 = vshrl.u32 %v7172_v17, 4 }
 0x121   : > { %5822 = vmatmul.mubr.msk.bf16.vlgmr.msra.gmra.mrb[0].mxu0 %vm481_vm2, %v3344_v6  ;;  %v3361_v6 = vrot.slane %v6835_v52, 3  ;;  %v1848_v23 = vrot.slane %v1846_v47, 1 }
 0x122   : > { %5825 = vmatprep.mubr.msk.bf16.mxu0 %vm481_vm2, %v3346_v42  ;;  %v1840_v42 = vshll.u32 %v6713_v22, 16  ;;  %v1826_v52 = vsel %vm1692_vm3, %v1816_v56, %v1825_v12  ;;  %v1835_v22 = vsel %vm1692_vm3, %v1825_v12, %v1834_v50 }
 0x123   : > { %v3362_v18 = vsel %vm3339_vm7, %v3359_v49, %v3361_v6  ;;  %v3364_v2 = vsel %vm3339_vm7, %v3361_v6, %v3363_v45  ;;  %v3691_v6 = vmul.u32 18, %v3690_v38 }
 0x126   : > { %5656 = vmatmul.mubr.msk.bf16.gmra.mrb[24].mxu1 %vm481_vm2, %v1407_v46  ;;  %v3360_v46 = vsel %vm3339_vm7, %v3357_v48, %v3359_v49  ;;  %v3654_v48 = vadd.s32 48, %v7163_v62  ;;  %v3723_v49 = vshrl.u32 %v7177_v24, 4 }
 0x127   : > { %5659 = vmatprep.mubr.msk.bf16.mxu1 %vm481_vm2, %v1409_v37  ;;  %v1849_v37 = vshll.u32 %v6717_v26, 16 }
 0x128   : > { %v7183_v13 = vmul.u32.u64.low 3817748708, %v3654_v48  ;;  %v7184_v15 = vmul.u32.u64.high 3817748708, %v3654_v48, %v7183_v13 }
 0x129   : > { %5826 = vmatmul.mubr.msk.bf16.gmra.mrb[4].mxu0 %vm481_vm2, %v3348_v25  ;;  %v1842_v25 = vrot.slane %v1840_v42, 2  ;;  %v1851_v35 = vrot.slane %v1849_v37, 2  ;;  %v3724_v42 = vmul.u32 18, %v3723_v49 }
 0x12a   : > { %5829 = vmatprep.mubr.msk.bf16.mxu0 %vm481_vm2, %v3350_v53  ;;  %v3365_v53 = vrot.slane %v6859_v21, 3  ;;  %v1860_v21 = vrot.slane %v1858_v41, 2  ;;  %v3756_v30 = vshrl.u32 %v7184_v15, 4 }
 0x12b   : > { %v1843_v26 = vor.u32 %v1842_v25, %v1839_v10  ;;  %v3692_v25 = vsub.s32 %v7163_v62, %v3691_v6  ;;  %v7320_v6 = vadd.s32 120, %v7163_v62 }
 0x12c   : > { %v3366_v5 = vsel %vm3339_vm7, %v3363_v45, %v3365_v53  ;;  %v3368_v39 = vsel %vm3339_vm7, %v3365_v53, %v3367_v44 }
 0x12d   : > { %v1844_v32 = vsel %vm1692_vm3, %v1834_v50, %v1843_v26  ;;  %vm4080_vm10 = vcmp.ne.s32.totalorder %v3692_v25, 0  ;;  %vm4116_vm11 = vcmp.lt.s32.totalorder %v3692_v25, 0 }
 0x12e   : > { %5660 = vmatmul.mubr.msk.bf16.gmra.mrb[28].mxu1 %vm481_vm2, %v1411_v28  ;;  %v1855_v28 = vshrl.u32 %v6733_v59, 16  ;;  %vm7235_vm15 = vmand %vm4116_vm11, %vm4080_vm10 }
 0x12f   : > { %5663 = vmatprep.mubr.msk.bf16.mxu1 %vm481_vm2, %v1413_v27  ;;  %v1852_v27 = vor.u32 %v1851_v35, %v1848_v23  ;;  %v3725_v23 = vsub.s32 %v3651_v16, %v3724_v42 }
 0x130   : > { %v1857_v20 = vrot.slane %v1855_v28, 1  ;;  %v7218_v28 = vadd.s32 64, %v7163_v62 }
 0x131   : > { %5830 = vmatmul.mubr.msk.bf16.gmra.mrb[8].mxu0 %vm481_vm2, %v3352_v29  ;;  %v1853_v55 = vsel %vm1692_vm3, %v1843_v26, %v1852_v27  ;;  %v3370_v29 = vsel %vm3339_vm7, %v3367_v44, %v3369_v40  ;;  %vm4083_vm12 = vcmp.ne.s32.totalorder %v3725_v23, 0  ;;  %vm4119_vm13 = vcmp.lt.s32.totalorder %v3725_v23, 0 }
 0x132   : > { %5833 = vmatprep.mubr.msk.bf16.mxu0 %vm481_vm2, %v3354_v61  ;;  %v1861_v59 = vor.u32 %v1860_v21, %v1857_v20  ;;  %v3375_v61 = vrot.slane %v7030_v0, 3  ;;  %v3649_v0 = vadd.s32 8, %v7163_v62  ;;  %v4188_v40 = vadd.s32 18, %v3692_v25  ;;  %vm7243_vm0 = vmand %vm4119_vm13, %vm4083_vm12 }
 0x134   : > { %v1862_v19 = vsel %vm1692_vm3, %v1852_v27, %v1861_v59  ;;  %v4191_v59 = vadd.s32 18, %v3725_v23 }
 0x136   : > { %5664 = vmatmul.mubr.msk.bf16.gmra.mrb[32].mxu1 %vm481_vm2, %v1415_v1  ;;  %v3376_v1 = vsel %vm3339_vm7, %v3373_v3, %v3375_v61  ;;  %v4227_v16 = vsel %vm7243_vm0, %v4191_v59, %v3725_v23  ;;  %v9052_v59 = vmov 0.0   ;;  %v7506_v23 = vadd.s32 160, %v7163_v62 }
 0x137   : > { %5689 = vmatprep.mubr.msk.bf16.mxu1 %vm481_vm2, %v1799_v57  ;;  %v7167_v63 = vmul.u32.u64.low 3817748708, %v3650_v14  ;;  %v7168_v57 = vmul.u32.u64.high 3817748708, %v3650_v14, %v7167_v63  ;;  %vm7298_vm12 = vcmp.lt.s32.totalorder %v4227_v16, 16 }
 0x138   : > { %v7429_v63 = vadd.s32 144, %v7163_v62 }
 0x139   : > { %5834 = vmatmul.mubr.msk.bf16.gmra.mrb[12].mxu0 %vm481_vm2, %v3356_v31  ;;  %v7180_v31 = vmul.u32.u64.low 3817748708, %v3649_v0  ;;  %v7181_v56 = vmul.u32.u64.high 3817748708, %v3649_v0, %v7180_v31  ;;  %v3712_v34 = vshrl.u32 %v7168_v57, 4 }
 0x13a   : > { %5837 = vmatprep.mubr.msk.bf16.mxu0 %vm481_vm2, %v3358_v58  ;;  %v7456_v31 = vadd.s32 152, %v7163_v62 }
 0x13b   : > { %v3713_v11 = vmul.u32 18, %v3712_v34  ;;  %v3701_v12 = vshrl.u32 %v7181_v56, 4  ;;  %v7304_v34 = vadd.s32 112, %v7163_v62 }
 0x13d   : > { %v3714_v10 = vsub.s32 %v3650_v14, %v3713_v11  ;;  %v3702_v45 = vmul.u32 18, %v3701_v12  ;;  %v4224_v14 = vsel %vm7235_vm15, %v4188_v40, %v3692_v25 }
 0x13e   : > { %5690 = vmatmul.mubr.msk.bf16.vlgmr.msra.gmra.mrb[20].mxu1 %vm481_vm2, %v1808_v8  ;;  %v7186_v58 = vmul.u32.u64.low 3817748708, %v3652_v54  ;;  %v7187_v8 = vmul.u32.u64.high 3817748708, %v3652_v54, %v7186_v58  ;;  %vm7294_vm11 = vcmp.lt.s32.totalorder %v4224_v14, 16 }
 0x13f   : > { %5693 = vmatprep.mubr.msk.bf16.mxu1 %vm481_vm2, %v1817_v7  ;;  %v7193_v7 = vadd.s32 56, %v7163_v62  ;;  %vm4082_vm8 = vcmp.ne.s32.totalorder %v3714_v10, 0  ;;  %vm4118_vm9 = vcmp.lt.s32.totalorder %v3714_v10, 0  ;;  %v7220_v41 = vsub.s32 %v3649_v0, %v3702_v45 }
 0x140   : > { %v3734_v47 = vshrl.u32 %v7187_v8, 4  ;;  %vm7228_vm14 = vmand %vm4118_vm9, %vm4082_vm8  ;;  %v4190_v20 = vadd.s32 18, %v3714_v10  ;;  %v7466_v58 = vadd.s32 136, %v7163_v62 }
 0x141   : > { %5838 = vmatmul.mubr.msk.bf16.gmra.mrb[16].mxu0 %vm481_vm2, %v3360_v46  ;;  %v7201_v46 = vmul.u32.u64.low 3817748708, %v7193_v7  ;;  %v7202_v50 = vmul.u32.u64.high 3817748708, %v7193_v7, %v7201_v46  ;;  %vm4081_vm1 = vcmp.ne.s32.totalorder %v7220_v41, 0  ;;  %v4189_v57 = vadd.s32 18, %v7220_v41 }
 0x142   : > { %5841 = vmatprep.mubr.msk.bf16.mxu0 %vm481_vm2, %v3362_v18  ;;  %v7206_v37 = vmul.u32.u64.low 3817748708, %v7196_v4  ;;  %v7207_v18 = vmul.u32.u64.high 3817748708, %v7196_v4, %v7206_v37  ;;  %v3735_v35 = vmul.u32 18, %v3734_v47  ;;  %v4226_v51 = vsel %vm7228_vm14, %v4190_v20, %v3714_v10 }
 0x143   : > { %v3767_v27 = vshrl.u32 %v7202_v50, 4  ;;  %vm7289_vm10 = vcmp.lt.s32.totalorder %v4226_v51, 16  ;;  %v7329_v50 = vmul.u32.u64.low 3817748708, %v7304_v34  ;;  %v7330_v47 = vmul.u32.u64.high 3817748708, %v7304_v34, %v7329_v50 }
 0x144   : > { %v7232_v21 = vsub.s32 %v3652_v54, %v3735_v35  ;;  %v3745_v44 = vshrl.u32 %v7207_v18, 4 }
 0x145   : > { %v3768_v3 = vmul.u32 18, %v3767_v27 }
 0x146   : > { %5694 = vmatmul.mubr.msk.bf16.gmra.mrb[24].mxu1 %vm481_vm2, %v1826_v52  ;;  %v7210_v52 = vadd.s32 80, %v7163_v62  ;;  %vm4084_vm5 = vcmp.ne.s32.totalorder %v7232_v21, 0  ;;  %vm4120_vm6 = vcmp.lt.s32.totalorder %v7232_v21, 0  ;;  %v3746_v61 = vmul.u32 18, %v3745_v44 }
 0x147   : > { %5697 = vmatprep.mubr.msk.bf16.mxu1 %vm481_vm2, %v1835_v22  ;;  %v3757_v22 = vmul.u32 18, %v3756_v30  ;;  %v4192_v0 = vadd.s32 18, %v7232_v21  ;;  %vm7284_vm9 = vmand %vm4120_vm6, %vm4084_vm5  ;;  %v3769_v54 = vsub.s32 %v7193_v7, %v3768_v3  ;;  %v7326_v30 = vadd.s32 104, %v7163_v62 }
 0x148   : > { %v7214_v53 = vmul.u32.u64.low 3817748708, %v7210_v52  ;;  %v7215_v26 = vmul.u32.u64.high 3817748708, %v7210_v52, %v7214_v53  ;;  %v3747_v56 = vsub.s32 %v7196_v4, %v3746_v61  ;;  %v7316_v4 = vadd.s32 96, %v7163_v62 }
 0x149   : > { %5842 = vmatmul.mubr.msk.bf16.gmra.mrb[20].mxu0 %vm481_vm2, %v3364_v2  ;;  %v7222_v2 = vsub.s32 %v3654_v48, %v3757_v22  ;;  %v7281_v48 = vmul.u32.u64.low 3817748708, %v7251_v36  ;;  %v7282_v60 = vmul.u32.u64.high 3817748708, %v7251_v36, %v7281_v48  ;;  %v4228_v7 = vsel %vm7284_vm9, %v4192_v0, %v7232_v21 }
 0x14a   : > { %5845 = vmatprep.mubr.msk.bf16.mxu0 %vm481_vm2, %v3366_v5  ;;  %v7226_v5 = vadd.s32 88, %v7163_v62  ;;  %vm4087_vm13 = vcmp.ne.s32.totalorder %v3769_v54, 0  ;;  %vm4123_vm14 = vcmp.lt.s32.totalorder %v3769_v54, 0  ;;  %vm4085_vm15 = vcmp.ne.s32.totalorder %v3747_v56, 0 }
 0x14b   : > { %vm4086_vm3 = vcmp.ne.s32.totalorder %v7222_v2, 0  ;;  %vm4122_vm4 = vcmp.lt.s32.totalorder %v7222_v2, 0  ;;  %v4194_v17 = vadd.s32 18, %v7222_v2  ;;  %vm4121_vm0 = vcmp.lt.s32.totalorder %v3747_v56, 0 }
 0x14c   : > { %vm7274_vm8 = vmand %vm4122_vm4, %vm4086_vm3  ;;  %v4195_v42 = vadd.s32 18, %v3769_v54  ;;  %v4193_v18 = vadd.s32 18, %v3747_v56  ;;  %v3789_v10 = vshrl.u32 %v7282_v60, 4  ;;  %v7446_v48 = vadd.s32 128, %v7163_v62 }
 0x14d   : > { %v4230_v49 = vsel %vm7274_vm8, %v4194_v17, %v7222_v2  ;;  %vm7347_vm3 = vmand %vm4121_vm0, %vm4085_vm15  ;;  %v7360_v2 = vmul.u32.u64.low 3817748708, %v7326_v30  ;;  %v7361_v27 = vmul.u32.u64.high 3817748708, %v7326_v30, %v7360_v2 }
 0x14e   : > { %5698 = vmatmul.mubr.msk.bf16.gmra.mrb[28].mxu1 %vm481_vm2, %v1844_v32  ;;  %vm7365_vm6 = vcmp.lt.s32.totalorder %v4230_v49, 16  ;;  %v3790_v3 = vmul.u32 18, %v3789_v10  ;;  %v7516_v2 = vadd.s32 184, %v7163_v62 }
 0x14f   : > { %5701 = vmatprep.mubr.msk.bf16.mxu1 %vm481_vm2, %v1853_v55  ;;  %v7417_v51 = vsel %vm7365_vm6, 1.0, %v9052_v59 }
 0x150   : > { %9124 = vst [vmem:[#allocation6_spill] sm:$0xff] %v7417_v51  ;;  %v7442_v17 = vsub.s32 %v7251_v36, %v3790_v3  ;;  %v3833_v36 = vshrl.u32 %v7361_v27, 4 }
 0x151   : > { %5846 = vmatmul.mubr.msk.bf16.gmra.mrb[24].mxu0 %vm481_vm2, %v3368_v39 }
 0x152   : > { %5849 = vmatprep.mubr.msk.bf16.mxu0 %vm481_vm2, %v3370_v29  ;;  %v7240_v39 = vmul.u32.u64.low 3817748708, %v7218_v28  ;;  %v7241_v29 = vmul.u32.u64.high 3817748708, %v7218_v28, %v7240_v39  ;;  %vm4089_vm15 = vcmp.ne.s32.totalorder %v7442_v17, 0  ;;  %v4197_v21 = vadd.s32 18, %v7442_v17 }
 0x153   : > { %v7383_v39 = vsel %vm7289_vm10, 1.0, %v9052_v59 }
 0x154   : > { %v3778_v8 = vshrl.u32 %v7241_v29, 4  ;;  %9118 = vst [vmem:[#allocation2_spill] sm:$0xff] %v7383_v39  ;;  %v4229_v29 = vsel %vm7347_vm3, %v4193_v18, %v3747_v56  ;;  %v7492_v37 = vmul.u32.u64.low 3817748708, %v7456_v31  ;;  %v7493_v18 = vmul.u32.u64.high 3817748708, %v7456_v31, %v7492_v37 }
 0x155   : > { %vm7431_vm10 = vcmp.lt.s32.totalorder %v4229_v29, 16 }
 0x156   : > { %5702 = vmatmul.mubr.msk.bf16.gmra.mrb[32].mxu1 %vm481_vm2, %v1862_v19  ;;  %v3779_v46 = vmul.u32 18, %v3778_v8  ;;  %v7526_v20 = vsel %vm7431_vm10, 1.0, %v9052_v59 }
 0x157   : > { %9135 = vst [vmem:[#allocation9_spill] sm:$0xff] %v7526_v20 }
 0x158   : > { %v7376_v55 = vsub.s32 %v7218_v28, %v3779_v46  ;;  %v7396_v28 = vsel %vm7298_vm12, 1.0, %v9052_v59 }
 0x159   : > { %5850 = vmatmul.mubr.msk.bf16.gmra.mrb[28].mxu0 %vm481_vm2, %v3372_v43  ;;  %9120 = vst [vmem:[#allocation4_spill] sm:$0xff] %v7396_v28 }
 0x15a   : > { %5853 = vmatprep.mubr.msk.bf16.mxu0 %vm481_vm2, %v3374_v33  ;;  %v7255_v43 = vmul.u32.u64.low 3817748708, %v7226_v5  ;;  %v7256_v33 = vmul.u32.u64.high 3817748708, %v7226_v5, %v7255_v43  ;;  %vm4124_vm12 = vcmp.lt.s32.totalorder %v7376_v55, 0  ;;  %v7451_v24 = vadd.s32 18, %v7376_v55 }
 0x15b   : > { %v7391_v43 = vsel %vm7294_vm11, 1.0, %v9052_v59  ;;  %vm4088_vm11 = vcmp.ne.s32.totalorder %v7376_v55, 0 }
 0x15c   : > { %v3811_v11 = vshrl.u32 %v7256_v33, 4  ;;  %9119 = vst [vmem:[#allocation3_spill] sm:$0xff] %v7391_v43  ;;  %vm7486_vm0 = vmand %vm4124_vm12, %vm4088_vm11 }
 0x15d   : > { %v4232_v29 = vsel %vm7486_vm0, %v7451_v24, %v7376_v55 }
 0x15e   : > { %v3812_v35 = vmul.u32 18, %v3811_v11 }
 0x161   : > { %5854 = vmatmul.mubr.msk.bf16.gmra.mrb[32].mxu0 %vm481_vm2, %v3376_v1  ;;  %vm4117_vm2 = vcmp.lt.s32.totalorder %v7220_v41, 0  ;;  %v3800_v1 = vshrl.u32 %v7215_v26, 4  ;;  %v7352_v53 = vmul.u32.u64.low 3817748708, %v7320_v6  ;;  %v7353_v26 = vmul.u32.u64.high 3817748708, %v7320_v6, %v7352_v53 }
 0x162   : > { %vm7267_vm7 = vmand %vm4117_vm2, %vm4081_vm1 }
 0x163   : > { %v3801_v13 = vmul.u32 18, %v3800_v1  ;;  %v4225_v38 = vsel %vm7267_vm7, %v4189_v57, %v7220_v41  ;;  %vm7332_vm1 = vmand %vm4123_vm14, %vm4087_vm13  ;;  %vm7369_vm7 = vcmp.lt.s32.totalorder %v4228_v7, 16  ;;  %v7412_v1 = vsub.s32 %v7226_v5, %v3812_v35 }
 0x164   : > { %vm7343_vm2 = vcmp.lt.s32.totalorder %v4225_v38, 16  ;;  %v4231_v44 = vsel %vm7332_vm1, %v4195_v42, %v3769_v54  ;;  %v7422_v14 = vsel %vm7369_vm7, 1.0, %v9052_v59  ;;  %v3844_v57 = vshrl.u32 %v7330_v47, 4 }
 0x165   : > { %v7323_v12 = vsub.s32 %v7210_v52, %v3801_v13  ;;  %v7338_v25 = vmul.u32.u64.low 3817748708, %v7316_v4  ;;  %v7339_v52 = vmul.u32.u64.high 3817748708, %v7316_v4, %v7338_v25  ;;  %v7401_v33 = vsel %vm7343_vm2, 1.0, %v9052_v59  ;;  %9125 = vst [vmem:[#allocation7_spill] sm:$0xff] %v7422_v14 }
 0x166   : > { %9121 = vst [vmem:[#allocation5_spill] sm:$0xff] %v7401_v33  ;;  %vm7424_vm9 = vcmp.lt.s32.totalorder %v4231_v44, 16  ;;  %vm4091_vm13 = vcmp.ne.s32.totalorder %v7412_v1, 0  ;;  %v3855_v54 = vshrl.u32 %v7353_v26, 4  ;;  %vm4127_vm14 = vcmp.lt.s32.totalorder %v7412_v1, 0 }
 0x167   : > { %vm4090_vm4 = vcmp.ne.s32.totalorder %v7323_v12, 0  ;;  %vm4126_vm5 = vcmp.lt.s32.totalorder %v7323_v12, 0  ;;  %v4198_v19 = vadd.s32 18, %v7323_v12  ;;  %v3822_v0 = vshrl.u32 %v7339_v52, 4  ;;  %vm7497_vm2 = vmand %vm4127_vm14, %vm4091_vm13 }
 0x168   : > { %vm7407_vm8 = vmand %vm4126_vm5, %vm4090_vm4  ;;  %v7462_v13 = vmul.u32.u64.low 3817748708, %v7429_v63  ;;  %v7463_v15 = vmul.u32.u64.high 3817748708, %v7429_v63, %v7462_v13  ;;  %v4199_v38 = vadd.s32 18, %v7412_v1  ;;  %v3845_v49 = vmul.u32 18, %v3844_v57 }
 0x169   : > { %v4234_v9 = vsel %vm7407_vm8, %v4198_v19, %v7323_v12  ;;  %v7473_v7 = vadd.s32 176, %v7163_v62  ;;  %v3823_v12 = vmul.u32 18, %v3822_v0  ;;  %vm4125_vm1 = vcmp.lt.s32.totalorder %v7442_v17, 0 }
 0x16a   : > { %v7479_v42 = vmul.u32.u64.low 3817748708, %v7446_v48  ;;  %v7480_v46 = vmul.u32.u64.high 3817748708, %v7446_v48, %v7479_v42  ;;  %v3856_v47 = vmul.u32 18, %v3855_v54  ;;  %v7509_v35 = vsub.s32 %v7304_v34, %v3845_v49  ;;  %vm7546_vm4 = vmand %vm4125_vm1, %vm4089_vm15 }
 0x16b   : > { %v3834_v25 = vmul.u32 18, %v3833_v36  ;;  %v7502_v52 = vmul.u32.u64.low 3817748708, %v7466_v58  ;;  %v7503_v22 = vmul.u32.u64.high 3817748708, %v7466_v58, %v7502_v52  ;;  %v7521_v27 = vsel %vm7424_vm9, 1.0, %v9052_v59 }
 0x16c   : > { %v7512_v53 = vmul.u32.u64.low 3817748708, %v7473_v7  ;;  %v7513_v26 = vmul.u32.u64.high 3817748708, %v7473_v7, %v7512_v53  ;;  %9134 = vst [vmem:[#allocation8_spill] sm:$0xff] %v7521_v27  ;;  %vm7528_vm3 = vcmp.lt.s32.totalorder %v4234_v9, 16  ;;  %v4235_v19 = vsel %vm7497_vm2, %v4199_v38, %v7412_v1 }
 0x16d   : > { %v7551_v61 = vsub.s32 %v7316_v4, %v3823_v12  ;;  %v7554_v16 = vsub.s32 %v7320_v6, %v3856_v47  ;;  %v7559_v55 = vsub.s32 %v7326_v30, %v3834_v25  ;;  %v3888_v1 = vshrl.u32 %v7463_v15, 4 }
 0x16e   : > { %v7563_v57 = vmul.u32.u64.low 3817748708, %v7506_v23  ;;  %v7564_v9 = vmul.u32.u64.high 3817748708, %v7506_v23, %v7563_v57  ;;  %vm4094_vm5 = vcmp.ne.s32.totalorder %v7509_v35, 0  ;;  %v7574_v6 = vadd.s32 168, %v7163_v62 }
 0x16f   : > { %v7570_v4 = vmul.u32.u64.low 3817748708, %v7516_v2  ;;  %v7571_v24 = vmul.u32.u64.high 3817748708, %v7516_v2, %v7570_v4  ;;  %v4233_v30 = vsel %vm7546_vm4, %v4197_v21, %v7442_v17  ;;  %vm4130_vm6 = vcmp.lt.s32.totalorder %v7509_v35, 0 }
 0x170   : > { %v4202_v36 = vadd.s32 18, %v7509_v35  ;;  %v3866_v13 = vshrl.u32 %v7480_v46, 4  ;;  %vm4092_vm7 = vcmp.ne.s32.totalorder %v7551_v61, 0  ;;  %vm4128_vm8 = vcmp.lt.s32.totalorder %v7551_v61, 0  ;;  %vm7593_vm12 = vmand %vm4130_vm6, %vm4094_vm5 }
 0x171   : > { %vm4095_vm9 = vcmp.ne.s32.totalorder %v7554_v16, 0  ;;  %v3899_v15 = vshrl.u32 %v7493_v18, 4  ;;  %vm4131_vm10 = vcmp.lt.s32.totalorder %v7554_v16, 0  ;;  %vm4093_vm11 = vcmp.ne.s32.totalorder %v7559_v55, 0  ;;  %vm7615_vm0 = vmand %vm4128_vm8, %vm4092_vm7 }
 0x172   : > { %v3889_v38 = vmul.u32 18, %v3888_v1  ;;  %v3877_v17 = vshrl.u32 %v7503_v22, 4  ;;  %vm4129_vm13 = vcmp.lt.s32.totalorder %v7559_v55, 0  ;;  %v3932_v12 = vshrl.u32 %v7513_v26, 4  ;;  %vm7630_vm2 = vmand %vm4131_vm10, %vm4095_vm9 }
 0x173   : > { %v7600_v42 = vmul.u32.u64.low 3817748708, %v7574_v6  ;;  %v7601_v46 = vmul.u32.u64.high 3817748708, %v7574_v6, %v7600_v42  ;;  %vm7603_vm14 = vcmp.lt.s32.totalorder %v4232_v29, 16  ;;  %vm7607_vm15 = vcmp.lt.s32.totalorder %v4235_v19, 16  ;;  %vm7645_vm4 = vmand %vm4129_vm13, %vm4093_vm11 }
 0x174   : > { %v4200_v18 = vadd.s32 18, %v7551_v61  ;;  %v3867_v10 = vmul.u32 18, %v3866_v13  ;;  %vm7622_vm1 = vcmp.lt.s32.totalorder %v4233_v30, 16  ;;  %v4203_v53 = vadd.s32 18, %v7554_v16 }
 0x175   : > { %v4201_v26 = vadd.s32 18, %v7559_v55  ;;  %v3900_v21 = vmul.u32 18, %v3899_v15  ;;  %v4238_v19 = vsel %vm7593_vm12, %v4202_v36, %v7509_v35  ;;  %v7650_v1 = vsub.s32 %v7429_v63, %v3889_v38 }
 0x176   : > { %v3878_v57 = vmul.u32 18, %v3877_v17  ;;  %v3910_v4 = vshrl.u32 %v7564_v9, 4  ;;  %v7658_v35 = vsel %vm7528_vm3, 1.0, %v9052_v59  ;;  %v7663_v36 = vsel %vm7603_vm14, 1.0, %v9052_v59 }
 0x177   : > { %9154 = vst [vmem:[#allocation10_spill] sm:$0xff] %v7658_v35  ;;  %v3933_v13 = vmul.u32 18, %v3932_v12  ;;  %v3943_v15 = vshrl.u32 %v7571_v24, 4  ;;  %v7671_v9 = vsel %vm7607_vm15, 1.0, %v9052_v59  ;;  %v7676_v34 = vsel %vm7622_vm1, 1.0, %v9052_v59 }
 0x178   : > { %9155 = vst [vmem:[#allocation11_spill] sm:$0xff] %v7671_v9  ;;  %9156 = vst [vmem:[#allocation12_spill] sm:$0xff] %v7676_v34  ;;  %v4236_v38 = vsel %vm7615_vm0, %v4200_v18, %v7551_v61  ;;  %v7682_v17 = vsub.s32 %v7446_v48, %v3867_v10  ;;  %vm7684_vm3 = vcmp.lt.s32.totalorder %v4238_v19, 16  ;;  %v4239_v49 = vsel %vm7630_vm2, %v4203_v53, %v7554_v16 }
 0x179   : > { %v4237_v12 = vsel %vm7645_vm4, %v4201_v26, %v7559_v55  ;;  %v7695_v42 = vsub.s32 %v7456_v31, %v3900_v21  ;;  %v7698_v61 = vadd.s32 208, %v7163_v62  ;;  %vm4098_vm5 = vcmp.ne.s32.totalorder %v7650_v1, 0 }
 0x17a   : > { %vm4134_vm6 = vcmp.lt.s32.totalorder %v7650_v1, 0  ;;  %v7703_v48 = vsub.s32 %v7466_v58, %v3878_v57  ;;  %v3911_v50 = vmul.u32 18, %v3910_v4  ;;  %vm7705_vm7 = vcmp.lt.s32.totalorder %v4236_v38, 16 }
 0x17b   : > { %v4206_v55 = vadd.s32 18, %v7650_v1  ;;  %v7711_v31 = vsub.s32 %v7473_v7, %v3933_v13  ;;  %v3944_v47 = vmul.u32 18, %v3943_v15  ;;  %v3921_v37 = vshrl.u32 %v7601_v46, 4  ;;  %vm7734_vm12 = vmand %vm4134_vm6, %vm4098_vm5 }
 0x17c   : > { %vm4096_vm8 = vcmp.ne.s32.totalorder %v7682_v17, 0  ;;  %vm4132_vm9 = vcmp.lt.s32.totalorder %v7682_v17, 0  ;;  %v4204_v58 = vadd.s32 18, %v7682_v17  ;;  %v7718_v18 = vadd.s32 192, %v7163_v62 }
 0x17d   : > { %vm4099_vm10 = vcmp.ne.s32.totalorder %v7695_v42, 0  ;;  %vm4135_vm11 = vcmp.lt.s32.totalorder %v7695_v42, 0  ;;  %v7725_v7 = vmul.u32.u64.low 3817748708, %v7698_v61  ;;  %v7726_v52 = vmul.u32.u64.high 3817748708, %v7698_v61, %v7725_v7  ;;  %vm7750_vm15 = vmand %vm4132_vm9, %vm4096_vm8 }
 0x17e   : > { %vm4097_vm13 = vcmp.ne.s32.totalorder %v7703_v48, 0  ;;  %vm4133_vm14 = vcmp.lt.s32.totalorder %v7703_v48, 0  ;;  %v7741_v53 = vsub.s32 %v7506_v23, %v3911_v50  ;;  %v7744_v26 = vadd.s32 216, %v7163_v62  ;;  %vm7773_vm5 = vmand %vm4135_vm11, %vm4099_vm10 }
 0x17f   : > { %vm4102_vm0 = vcmp.ne.s32.totalorder %v7711_v31, 0  ;;  %vm4138_vm1 = vcmp.lt.s32.totalorder %v7711_v31, 0  ;;  %v7757_v3 = vsub.s32 %v7516_v2, %v3944_v47  ;;  %v3922_v23 = vmul.u32 18, %v3921_v37  ;;  %vm7786_vm6 = vmand %vm4133_vm14, %vm4097_vm13 }
 0x180   : > { %vm7761_vm2 = vcmp.lt.s32.totalorder %v4239_v49, 16  ;;  %vm7765_vm4 = vcmp.lt.s32.totalorder %v4237_v12, 16  ;;  %v4207_v2 = vadd.s32 18, %v7695_v42  ;;  %v4205_v38 = vadd.s32 18, %v7703_v48  ;;  %vm7797_vm8 = vmand %vm4138_vm1, %vm4102_vm0 }
 0x181   : > { %v4242_v49 = vsel %vm7734_vm12, %v4206_v55, %v7650_v1  ;;  %v4210_v50 = vadd.s32 18, %v7711_v31  ;;  %v7792_v47 = vmul.u32.u64.low 3817748708, %v7718_v18  ;;  %v7793_v37 = vmul.u32.u64.high 3817748708, %v7718_v18, %v7792_v47 }
 0x182   : > { %vm4100_vm9 = vcmp.ne.s32.totalorder %v7741_v53, 0  ;;  %vm4136_vm10 = vcmp.lt.s32.totalorder %v7741_v53, 0  ;;  %v7804_v1 = vmul.u32.u64.low 3817748708, %v7744_v26  ;;  %v7805_v55 = vmul.u32.u64.high 3817748708, %v7744_v26, %v7804_v1 }
 0x183   : > { %v4240_v22 = vsel %vm7750_vm15, %v4204_v58, %v7682_v17  ;;  %vm4103_vm11 = vcmp.ne.s32.totalorder %v7757_v3, 0  ;;  %vm4139_vm12 = vcmp.lt.s32.totalorder %v7757_v3, 0  ;;  %v3923_v47 = vsub.s32 %v7574_v6, %v3922_v23 }
 0x184   : > { %v4241_v19 = vsel %vm7786_vm6, %v4205_v38, %v7703_v48  ;;  %v4208_v17 = vadd.s32 18, %v7741_v53  ;;  %vm7825_vm13 = vcmp.lt.s32.totalorder %v4242_v49, 16  ;;  %v4246_v6 = vsel %vm7797_vm8, %v4210_v50, %v7711_v31 }
 0x185   : > { %v3976_v23 = vshrl.u32 %v7726_v52, 4  ;;  %v7841_v48 = vsel %vm7705_vm7, 1.0, %v9052_v59  ;;  %v7846_v15 = vsel %vm7761_vm2, 1.0, %v9052_v59  ;;  %v7851_v31 = vsel %vm7765_vm4, 1.0, %v9052_v59  ;;  %vm7861_vm7 = vmand %vm4139_vm12, %vm4103_vm11 }
 0x186   : > { %9182 = vst [vmem:[#allocation16_spill] sm:$0xff] %v7841_v48  ;;  %9183 = vst [vmem:[#allocation17_spill] sm:$0xff] %v7846_v15  ;;  %vm7853_vm14 = vcmp.lt.s32.totalorder %v4240_v22, 16  ;;  %vm4368_vm15 = vcmask 64512   ;;  %vm4277_vm1 = vcmp.lt.s32.totalorder %v4241_v19, 16  ;;  %vm4101_vm2 = vcmp.ne.s32.totalorder %v3923_v47, 0 }
 0x187   : > { %9184 = vst [vmem:[#allocation18_spill] sm:$0xff] %v7851_v31  ;;  %v7868_v52 = vsel %vm7825_vm13, 1.0, %v9052_v59  ;;  %vm4282_vm4 = vcmp.lt.s32.totalorder %v4246_v6, 16  ;;  %v7874_v13 = vadd.s32 200, %v7163_v62  ;;  %v4209_v38 = vadd.s32 18, %v3923_v47 }
 0x188   : > { %9189 = vst [vmem:[#allocation19_spill] sm:$0xff] %v7868_v52  ;;  %v3977_v49 = vmul.u32 18, %v3976_v23  ;;  %v3954_v12 = vshrl.u32 %v7793_v37, 4  ;;  %v7883_v7 = vsel %vm7853_vm14, 1.0, %v9052_v59  ;;  %v3987_v58 = vshrl.u32 %v7805_v55, 4 }
 0x189   : > { %9190 = vst [vmem:[#allocation20_spill] sm:$0xff] %v7883_v7 }
 0x18a   : > { %v7923_v55 = vsub.s32 %v7698_v61, %v3977_v49  ;;  %v7941_v61 = vadd.s32 248, %v7163_v62 }
 0x18c   : > { %vm4106_vm11 = vcmp.ne.s32.totalorder %v7923_v55, 0  ;;  %vm4142_vm12 = vcmp.lt.s32.totalorder %v7923_v55, 0 }
 0x18d   : > { %vm8000_vm14 = vmand %vm4142_vm12, %vm4106_vm11 }
 0x1c9   : > { %v7341_v45 = vpop.f32.mrb[0].mxu1 }
 0x1ca   : > { %v7355_v41 = vpop.f32.mrb[1].mxu1 }
 0x1cb   : > { %v7363_v32 = vpop.f32.mrb[2].mxu1 }
 0x1cc   : > { %v7378_v40 = vpop.f32.mrb[3].mxu1 }
 0x1d1   : > { %v7448_v60 = vpop.f32.mrb[4].mxu1 }
 0x1d2   : > { %v7458_v56 = vpop.f32.mrb[5].mxu1 }
 0x1d3   : > { %v7468_v8 = vpop.f32.mrb[6].mxu1 }
 0x1d4   : > { %v7475_v11 = vpop.f32.mrb[7].mxu1 }
 0x1d9   : > { %v7533_v44 = vpop.f32.mrb[8].mxu1 }
 0x1da   : > { %v7556_v5 = vpop.f32.mrb[9].mxu1 }
 0x1db   : > { %v7566_v0 = vpop.f32.mrb[10].mxu1 }
 0x1dc   : > { %v7576_v54 = vpop.f32.mrb[11].mxu1 }
 0x1e1   : > { %v7620_v25 = vpop.f32.mrb[12].mxu1 }
 0x1e2   : > { %v7636_v29 = vpop.f32.mrb[13].mxu1 }
 0x1e3   : > { %v7653_v30 = vpop.f32.mrb[14].mxu1 }
 0x1e4   : > { %v7666_v63 = vpop.f32.mrb[15].mxu1 }
 0x1e9   : > { %v7720_v10 = vpop.f32.mrb[16].mxu1 }
 0x1ea   : > { %v7728_v46 = vpop.f32.mrb[17].mxu1 }
 0x1eb   : > { %v7746_v21 = vpop.f32.mrb[18].mxu1 }
 0x1ec   : > { %9163 = vst [vmem:[#allocation13_spill] sm:$0xff] %v7746_v21  ;;  %v7759_v57 = vpop.f32.mrb[19].mxu1  ;;  %v4243_v21 = vsel %vm7773_vm5, %v4207_v2, %v7695_v42  ;;  %v4211_v42 = vadd.s32 18, %v7757_v3  ;;  %vm4137_vm5 = vcmp.lt.s32.totalorder %v3923_v47, 0 }
 0x1ed   : > { %9166 = vst [vmem:[#allocation14_spill] sm:$0xff] %v7759_v57  ;;  %v7816_v57 = vsel %vm7684_vm3, 1.0, %v9052_v59  ;;  %vm7832_vm3 = vmand %vm4136_vm10, %vm4100_vm9  ;;  %vm4279_vm0 = vcmp.lt.s32.totalorder %v4243_v21, 16  ;;  %v7914_v23 = vmul.u32.u64.low 3817748708, %v7874_v13  ;;  %v7915_v2 = vmul.u32.u64.high 3817748708, %v7874_v13, %v7914_v23 }
 0x1ee   : > { %9177 = vst [vmem:[#allocation15_spill] sm:$0xff] %v7816_v57  ;;  %v4244_v4 = vsel %vm7832_vm3, %v4208_v17, %v7741_v53  ;;  %v4247_v21 = vsel %vm7861_vm7, %v4211_v42, %v7757_v3  ;;  %v7886_v1 = vsel %vm4279_vm0, 1.0, %v9052_v59  ;;  %v7889_v53 = vsel %vm4277_vm1, 1.0, %v9052_v59  ;;  %vm7892_vm6 = vmand %vm4137_vm5, %vm4101_vm2 }
 0x1ef   : > { %9191 = vst [vmem:[#allocation21_spill] sm:$0xff] %v7886_v1  ;;  %9192 = vst [vmem:[#allocation22_spill] sm:$0xff] %v7889_v53  ;;  %v7897_v3 = vadd.s32 240, %v7163_v62  ;;  %v7903_v17 = vsel %vm4282_vm4, 1.0, %v9052_v59  ;;  %vm4280_vm8 = vcmp.lt.s32.totalorder %v4244_v4, 16  ;;  %vm7909_vm9 = vcmp.lt.s32.totalorder %v4247_v21, 16 }
 0x1f0   : > { %9196 = vst [vmem:[#allocation24_spill] sm:$0xff] %v7903_v17  ;;  %v4245_v4 = vsel %vm7892_vm6, %v4209_v38, %v3923_v47  ;;  %v7950_v49 = vsel %vm7909_vm9, 1.0, %v9052_v59 }
 0x1f1   : > { %v7937_v22 = vmul.u32.u64.low 3817748708, %v7897_v3  ;;  %v7938_v47 = vmul.u32.u64.high 3817748708, %v7897_v3, %v7937_v22  ;;  %9201 = vst [vmem:[#allocation27_spill] sm:$0xff] %v7950_v49  ;;  %vm4281_vm10 = vcmp.lt.s32.totalorder %v4245_v4, 16  ;;  %v7965_v4 = vadd.s32 18, %v7923_v55 }
 0x1f4   : > { %v5823_v50 = vpop.f32.mrb[0].mxu0 }
 0x1f5   : > { %v7900_v37 = vadd.f32 %v5823_v50, %v7341_v45  ;;  %v3468_v19 = vpop.f32.mrb[1].mxu0 }
 0x1f6   : > { %v7907_v6 = vadd.f32 %v3468_v19, %v7355_v41  ;;  %v5824_v24 = vpop.f32.mrb[2].mxu0  ;;  %v3955_v41 = vmul.u32 18, %v3954_v12  ;;  %v7931_v19 = vsel %vm4280_vm8, 1.0, %v9052_v59 }
 0x1f7   : > { %9195 = vst [vmem:[#allocation23_spill] sm:$0xff] %v7900_v37  ;;  %v7918_v45 = vadd.f32 %v5824_v24, %v7363_v32  ;;  %v3471_v16 = vpop.f32.mrb[3].mxu0  ;;  %9200 = vst [vmem:[#allocation26_spill] sm:$0xff] %v7931_v19  ;;  %v7934_v32 = vadd.s32 224, %v7163_v62  ;;  %v3988_v24 = vmul.u32 18, %v3987_v58  ;;  %v4334_v38 = vmul.f32 %v7900_v37, %v7383_v39 }
 0x1f8   : > { %v4332_v21 = vmul.f32 %v7907_v6, %v7391_v43  ;;  %v7928_v50 = vadd.f32 %v3471_v16, %v7378_v40  ;;  %v7955_v12 = vsub.s32 %v7718_v18, %v3955_v41  ;;  %v7958_v58 = vadd.s32 232, %v7163_v62 }
 0x1f9   : > { %9199 = vst [vmem:[#allocation25_spill] sm:$0xff] %v7918_v45  ;;  %v4335_v16 = vmul.f32 %v7918_v45, %v7396_v28  ;;  %v9202_v41 = vmov 0.0   ;;  %v7974_v43 = vsub.s32 %v7744_v26, %v3988_v24  ;;  %v3965_v26 = vshrl.u32 %v7915_v2, 4 }
 0x1fa   : > { %v4333_v40 = vmul.f32 %v7928_v50, %v7401_v33  ;;  %v4369_v23 = vsel %vm4368_vm15, %v4332_v21, 0.0  ;;  %v7971_v33 = vsel %vm4281_vm10, 1.0, %v9202_v41  ;;  %v4372_v21 = vsel %vm4368_vm15, %v4334_v38, 0.0 }
 0x1fb   : > { %9203 = vst [vmem:[#allocation28_spill] sm:$0xff] %v7971_v33  ;;  %v7981_v45 = vmul.u32.u64.low 3817748708, %v7934_v32  ;;  %v7982_v37 = vmul.u32.u64.high 3817748708, %v7934_v32, %v7981_v45  ;;  %vm4104_vm13 = vcmp.ne.s32.totalorder %v7955_v12, 0  ;;  %v4374_v24 = vsel %vm4368_vm15, %v4335_v16, 0.0 }
 0x1fc   : > { %v4370_v42 = vsel %vm4368_vm15, %v4333_v40, 0.0  ;;  %v5827_v22 = vpop.f32.mrb[4].mxu0  ;;  %vm4140_vm3 = vcmp.lt.s32.totalorder %v7955_v12, 0  ;;  %vm4107_vm7 = vcmp.ne.s32.totalorder %v7974_v43, 0  ;;  %v4020_v2 = vshrl.u32 %v7938_v47, 4 }
 0x1fd   : > { %v4371_v59 = vadd.f32 %v4370_v42, %v4369_v23  ;;  %v7968_v39 = vadd.f32 %v5827_v22, %v7448_v60  ;;  %v3484_v18 = vpop.f32.mrb[5].mxu0  ;;  %vm4143_vm0 = vcmp.lt.s32.totalorder %v7974_v43, 0  ;;  %vm8017_vm1 = vmand %vm4140_vm3, %vm4104_vm13 }
 0x1fe   : > { %v7978_v28 = vadd.f32 %v3484_v18, %v7458_v56  ;;  %v5828_v40 = vpop.f32.mrb[6].mxu0  ;;  %vm8038_vm2 = vmand %vm4143_vm0, %vm4107_vm7 }
 0x1ff   : > { %v4373_v23 = vadd.f32 %v4372_v21, %v4371_v59  ;;  %v7985_v60 = vadd.f32 %v5828_v40, %v7468_v8  ;;  %v3487_v42 = vpop.f32.mrb[7].mxu0  ;;  %v8005_v8 = vadd.s32 18, %v7955_v12  ;;  %v3966_v40 = vmul.u32 18, %v3965_v26 }
 0x200   : > { %v4336_v56 = vmul.f32 %v7978_v28, %v7422_v14  ;;  %v7993_v38 = vadd.f32 %v3487_v42, %v7475_v11  ;;  %v4338_v11 = vmul.f32 %v7968_v39, %v7417_v51 }
 0x201   : > { %v4375_v45 = vadd.f32 %v4374_v24, %v4373_v23  ;;  %v8022_v47 = vmul.u32.u64.low 3817748708, %v7941_v61  ;;  %v8023_v23 = vmul.u32.u64.high 3817748708, %v7941_v61, %v8022_v47  ;;  %v4339_v42 = vmul.f32 %v7985_v60, %v7521_v27 }
 0x202   : > { %v4376_v16 = vsel %vm4368_vm15, %v4336_v56, 0.0  ;;  %v4337_v22 = vmul.f32 %v7993_v38, %v7526_v20  ;;  %v8043_v27 = vadd.s32 272, %v7163_v62  ;;  %v4380_v59 = vsel %vm4368_vm15, %v4338_v11, 0.0 }
 0x203   : > { %v4377_v18 = vadd.f32 %v4376_v16, %v4375_v45  ;;  %v4250_v45 = vsel %vm8000_vm14, %v7965_v4, %v7923_v55  ;;  %v4215_v16 = vadd.s32 18, %v7974_v43  ;;  %v8060_v14 = vsub.s32 %v7874_v13, %v3966_v40 }
 0x204   : > { %v4378_v24 = vsel %vm4368_vm15, %v4337_v22, 0.0  ;;  %v5831_v56 = vpop.f32.mrb[8].mxu0  ;;  %v4021_v22 = vmul.u32 18, %v4020_v2  ;;  %v8076_v13 = vmul.u32.u64.low 3817748708, %v7958_v58  ;;  %v8077_v21 = vmul.u32.u64.high 3817748708, %v7958_v58, %v8076_v13 }
 0x205   : > { %v4379_v51 = vadd.f32 %v4378_v24, %v4377_v18  ;;  %v8034_v26 = vadd.f32 %v5831_v56, %v7533_v44  ;;  %v3500_v20 = vpop.f32.mrb[9].mxu0  ;;  %v4248_v44 = vsel %vm8017_vm1, %v8005_v8, %v7955_v12  ;;  %v8054_v18 = vadd.s32 256, %v7163_v62 }
 0x206   : > { %v8047_v55 = vadd.f32 %v3500_v20, %v7556_v5  ;;  %v5832_v4 = vpop.f32.mrb[10].mxu0  ;;  %v3998_v20 = vshrl.u32 %v7982_v37, 4  ;;  %v4382_v5 = vsel %vm4368_vm15, %v4339_v42, 0.0  ;;  %v8073_v8 = vsub.s32 %v7897_v3, %v4021_v22 }
 0x207   : > { %v4381_v24 = vadd.f32 %v4380_v59, %v4379_v51  ;;  %v8057_v2 = vadd.f32 %v5832_v4, %v7566_v0  ;;  %v3503_v56 = vpop.f32.mrb[11].mxu0  ;;  %v4251_v51 = vsel %vm8038_vm2, %v4215_v16, %v7974_v43  ;;  %v4342_v37 = vmul.f32 %v8034_v26, %v7658_v35 }
 0x208   : > { %v4340_v11 = vmul.f32 %v8047_v55, %v7663_v36  ;;  %v8067_v12 = vadd.f32 %v3503_v56, %v7576_v54  ;;  %v8085_v42 = vadd.s32 280, %v7163_v62  ;;  %vm4105_vm5 = vcmp.ne.s32.totalorder %v8060_v14, 0 }
 0x209   : > { %v4383_v0 = vadd.f32 %v4382_v5, %v4381_v24  ;;  %vm4141_vm4 = vcmp.lt.s32.totalorder %v8060_v14, 0  ;;  %v8090_v3 = vadd.s32 18, %v8060_v14  ;;  %v4343_v16 = vmul.f32 %v8057_v2, %v7671_v9 }
 0x20a   : > { %v4384_v40 = vsel %vm4368_vm15, %v4340_v11, 0.0  ;;  %v4341_v54 = vmul.f32 %v8067_v12, %v7676_v34  ;;  %v3999_v59 = vmul.u32 18, %v3998_v20  ;;  %v4031_v4 = vshrl.u32 %v8023_v23, 4  ;;  %vm8117_vm11 = vmand %vm4141_vm4, %vm4105_vm5 }
 0x20b   : > { %v4385_v43 = vadd.f32 %v4384_v40, %v4383_v0  ;;  %vm4110_vm6 = vcmp.ne.s32.totalorder %v8073_v8, 0  ;;  %vm4146_vm8 = vcmp.lt.s32.totalorder %v8073_v8, 0  ;;  %v4388_v11 = vsel %vm4368_vm15, %v4342_v37, 0.0 }
 0x20c   : > { %v4386_v47 = vsel %vm4368_vm15, %v4341_v54, 0.0  ;;  %v5835_v22 = vpop.f32.mrb[12].mxu0  ;;  %vm8105_vm9 = vcmp.lt.s32.totalorder %v4250_v45, 16  ;;  %vm8109_vm10 = vcmp.lt.s32.totalorder %v4248_v44, 16  ;;  %vm8130_vm12 = vcmp.lt.s32.totalorder %v4251_v51, 16  ;;  %vm8147_vm13 = vmand %vm4146_vm8, %vm4110_vm6 }
 0x20d   : > { %v4387_v24 = vadd.f32 %v4386_v47, %v4385_v43  ;;  %v8097_v56 = vadd.f32 %v5835_v22, %v7620_v25  ;;  %v3516_v5 = vpop.f32.mrb[13].mxu0  ;;  %v4218_v47 = vadd.s32 18, %v8073_v8  ;;  %v4390_v22 = vsel %vm4368_vm15, %v4343_v16, 0.0 }
 0x20e   : > { %v8103_v0 = vadd.f32 %v3516_v5, %v7636_v29  ;;  %v5836_v13 = vpop.f32.mrb[14].mxu0  ;;  %v8122_v29 = vmul.u32.u64.low 3817748708, %v8043_v27  ;;  %v8123_v20 = vmul.u32.u64.high 3817748708, %v8043_v27, %v8122_v29  ;;  %v8152_v51 = vsub.s32 %v7934_v32, %v3999_v59 }
 0x20f   : > { %9210 = vst [vmem:[#allocation29_spill] sm:$0xff] %v8097_v56  ;;  %v4389_v45 = vadd.f32 %v4388_v11, %v4387_v24  ;;  %v8126_v37 = vadd.f32 %v5836_v13, %v7653_v30  ;;  %v3519_v44 = vpop.f32.mrb[15].mxu0  ;;  %v4009_v13 = vshrl.u32 %v8077_v21, 4 }
 0x210   : > { %v4344_v5 = vmul.f32 %v8103_v0, %v7841_v48  ;;  %v8139_v29 = vadd.f32 %v3519_v44, %v7666_v63  ;;  %v4249_v63 = vsel %vm8117_vm11, %v8090_v3, %v8060_v14  ;;  %v8162_v44 = vadd.s32 264, %v7163_v62 }
 0x211   : > { %9217 = vst [vmem:[#allocation30_spill] sm:$0xff] %v8126_v37  ;;  %v8128_v54 = vpop.f32.mrb[20].mxu1  ;;  %v4391_v16 = vadd.f32 %v4390_v22, %v4389_v45  ;;  %v4346_v48 = vmul.f32 %v8097_v56, %v7816_v57  ;;  %v4032_v45 = vmul.u32 18, %v4031_v4  ;;  %v4254_v14 = vsel %vm8147_vm13, %v4218_v47, %v8073_v8 }
 0x212   : > { %9220 = vst [vmem:[#allocation31_spill] sm:$0xff] %v8139_v29  ;;  %v8141_v24 = vpop.f32.mrb[21].mxu1  ;;  %v4392_v9 = vsel %vm4368_vm15, %v4344_v5, 0.0  ;;  %v4345_v32 = vmul.f32 %v8139_v29, %v7851_v31  ;;  %v8175_v21 = vmul.u32.u64.low 3817748708, %v8054_v18  ;;  %v8176_v62 = vmul.u32.u64.high 3817748708, %v8054_v18, %v8175_v21 }
 0x213   : > { %v8154_v11 = vpop.f32.mrb[22].mxu1  ;;  %v4393_v22 = vadd.f32 %v4392_v9, %v4391_v16  ;;  %v4347_v3 = vmul.f32 %v8126_v37, %v7846_v15  ;;  %vm4108_vm3 = vcmp.ne.s32.totalorder %v8152_v51, 0  ;;  %vm4144_vm14 = vcmp.lt.s32.totalorder %v8152_v51, 0 }
 0x214   : > { %v8169_v59 = vpop.f32.mrb[23].mxu1  ;;  %v4394_v25 = vsel %vm4368_vm15, %v4345_v32, 0.0  ;;  %v5839_v5 = vpop.f32.mrb[16].mxu0  ;;  %v8187_v8 = vadd.s32 18, %v8152_v51  ;;  %v4010_v47 = vmul.u32 18, %v4009_v13  ;;  %v4396_v16 = vsel %vm4368_vm15, %v4346_v48, 0.0  ;;  %vm8238_vm7 = vmand %vm4144_vm14, %vm4108_vm3 }
 0x215   : > { %v4395_v4 = vadd.f32 %v4394_v25, %v4393_v22  ;;  %v8184_v9 = vadd.f32 %v5839_v5, %v7720_v10  ;;  %v3532_v30 = vpop.f32.mrb[17].mxu0  ;;  %v8194_v15 = vmul.u32.u64.low 3817748708, %v8085_v42  ;;  %v8195_v57 = vmul.u32.u64.high 3817748708, %v8085_v42, %v8194_v15  ;;  %v9223_v22 = vld [vmem:[#allocation13_spill] sm:$0xff] }
 0x216   : > { %v8191_v21 = vadd.f32 %v3532_v30, %v7728_v46  ;;  %v5840_v32 = vpop.f32.mrb[18].mxu0  ;;  %v8203_v37 = vmul.u32.u64.low 3817748708, %v8162_v44  ;;  %v8204_v13 = vmul.u32.u64.high 3817748708, %v8162_v44, %v8203_v37  ;;  %v4398_v48 = vsel %vm4368_vm15, %v4347_v3, 0.0  ;;  %v9224_v30 = vld [vmem:[#allocation14_spill] sm:$0xff] }
 0x217   : > { %v4397_v31 = vadd.f32 %v4396_v16, %v4395_v4  ;;  %v8198_v25 = vadd.f32 %v5840_v32, %v9223_v22  ;;  %v3535_v10 = vpop.f32.mrb[19].mxu0  ;;  %v8215_v4 = vsub.s32 %v7941_v61, %v4032_v45  ;;  %v8222_v37 = vsel %vm8105_vm9, 1.0, %v9202_v41 }
 0x218   : > { %v4348_v46 = vmul.f32 %v8191_v21, %v7883_v7  ;;  %v8210_v35 = vadd.f32 %v3535_v10, %v9224_v30  ;;  %v8227_v3 = vsel %vm8109_vm10, 1.0, %v9202_v41  ;;  %v8232_v22 = vsel %vm8130_vm12, 1.0, %v9202_v41 }
 0x219   : > { %v8200_v5 = vpop.f32.mrb[24].mxu1  ;;  %v4399_v16 = vadd.f32 %v4398_v48, %v4397_v31  ;;  %v4350_v61 = vmul.f32 %v8184_v9, %v7868_v52  ;;  %v8250_v43 = vsub.s32 %v7958_v58, %v4010_v47  ;;  %vm8252_vm0 = vcmp.lt.s32.totalorder %v4249_v63, 16 }
 0x21a   : > { %v8212_v15 = vpop.f32.mrb[25].mxu1  ;;  %v4400_v40 = vsel %vm4368_vm15, %v4348_v46, 0.0  ;;  %v4349_v23 = vmul.f32 %v8210_v35, %v7889_v53  ;;  %vm8256_vm1 = vcmp.lt.s32.totalorder %v4254_v14, 16  ;;  %v4064_v52 = vshrl.u32 %v8123_v20, 4 }
 0x21b   : > { %v8217_v32 = vpop.f32.mrb[26].mxu1  ;;  %v4401_v10 = vadd.f32 %v4400_v40, %v4399_v16  ;;  %v4351_v46 = vmul.f32 %v8198_v25, %v7886_v1  ;;  %v4252_v58 = vsel %vm8238_vm7, %v8187_v8, %v8152_v51  ;;  %vm4111_vm2 = vcmp.ne.s32.totalorder %v8215_v4, 0 }
 0x21c   : > { %v8247_v45 = vpop.f32.mrb[27].mxu1  ;;  %v4402_v53 = vsel %vm4368_vm15, %v4349_v23, 0.0  ;;  %v5843_v7 = vpop.f32.mrb[20].mxu0  ;;  %vm4147_vm5 = vcmp.lt.s32.totalorder %v8215_v4, 0  ;;  %v4042_v20 = vshrl.u32 %v8176_v62, 4  ;;  %v4404_v16 = vsel %vm4368_vm15, %v4350_v61, 0.0 }
 0x21d   : > { %v4403_v63 = vadd.f32 %v4402_v53, %v4401_v10  ;;  %v8270_v14 = vadd.f32 %v5843_v7, %v8128_v54  ;;  %v3548_v47 = vpop.f32.mrb[21].mxu0  ;;  %vm4109_vm4 = vcmp.ne.s32.totalorder %v8250_v43, 0  ;;  %vm4145_vm6 = vcmp.lt.s32.totalorder %v8250_v43, 0  ;;  %vm8332_vm10 = vmand %vm4147_vm5, %vm4111_vm2 }
 0x21e   : > { %v8276_v40 = vadd.f32 %v3548_v47, %v8141_v24  ;;  %v5844_v23 = vpop.f32.mrb[22].mxu0  ;;  %v4217_v8 = vadd.s32 18, %v8250_v43  ;;  %v4053_v62 = vshrl.u32 %v8204_v13, 4  ;;  %v4406_v31 = vsel %vm4368_vm15, %v4351_v46, 0.0  ;;  %vm8307_vm8 = vmand %vm4145_vm6, %vm4109_vm4 }
 0x21f   : > { %v4405_v51 = vadd.f32 %v4404_v16, %v4403_v63  ;;  %v8281_v53 = vadd.f32 %v5844_v23, %v8154_v11  ;;  %v3551_v7 = vpop.f32.mrb[23].mxu0  ;;  %v4075_v11 = vshrl.u32 %v8195_v57, 4  ;;  %v8301_v16 = vsel %vm8252_vm0, 1.0, %v9202_v41 }
 0x220   : > { %v4352_v24 = vmul.f32 %v8276_v40, %v7931_v19  ;;  %v8291_v61 = vadd.f32 %v3551_v7, %v8169_v59  ;;  %v4065_v59 = vmul.u32 18, %v4064_v52  ;;  %v4043_v46 = vmul.u32 18, %v4042_v20 }
 0x221   : > { %v8283_v54 = vpop.f32.mrb[28].mxu1  ;;  %v4407_v63 = vadd.f32 %v4406_v31, %v4405_v51  ;;  %v4354_v57 = vmul.f32 %v8270_v14, %v7903_v17  ;;  %v4219_v7 = vadd.s32 18, %v8215_v4  ;;  %v8322_v19 = vsel %vm8256_vm1, 1.0, %v9202_v41 }
 0x222   : > { %v8293_v10 = vpop.f32.mrb[29].mxu1  ;;  %v4408_v23 = vsel %vm4368_vm15, %v4352_v24, 0.0  ;;  %v4353_v48 = vmul.f32 %v8291_v61, %v7971_v33  ;;  %vm8324_vm9 = vcmp.lt.s32.totalorder %v4252_v58, 16  ;;  %v4054_v24 = vmul.u32 18, %v4053_v62 }
 0x223   : > { %v8296_v47 = vpop.f32.mrb[30].mxu1  ;;  %v4409_v31 = vadd.f32 %v4408_v23, %v4407_v63  ;;  %v4355_v63 = vmul.f32 %v8281_v53, %v7950_v49  ;;  %v4253_v58 = vsel %vm8307_vm8, %v4217_v8, %v8250_v43  ;;  %v4076_v17 = vmul.u32 18, %v4075_v11 }
 0x224   : > { %v8316_v51 = vpop.f32.mrb[31].mxu1  ;;  %v4410_v30 = vsel %vm4368_vm15, %v4353_v48, 0.0  ;;  %v5847_v23 = vpop.f32.mrb[24].mxu0  ;;  %v8346_v34 = vsub.s32 %v8043_v27, %v4065_v59  ;;  %v8349_v62 = vsub.s32 %v8054_v18, %v4043_v46  ;;  %v4412_v49 = vsel %vm4368_vm15, %v4354_v57, 0.0 }
 0x225   : > { %v4411_v33 = vadd.f32 %v4410_v30, %v4409_v31  ;;  %v8343_v1 = vadd.f32 %v5847_v23, %v8200_v5  ;;  %v3564_v56 = vpop.f32.mrb[25].mxu0  ;;  %v8358_v43 = vsel %vm8324_vm9, 1.0, %v9202_v41  ;;  %v4255_v5 = vsel %vm8332_vm10, %v4219_v7, %v8215_v4 }
 0x226   : > { %v8353_v48 = vadd.f32 %v3564_v56, %v8212_v15  ;;  %v5848_v29 = vpop.f32.mrb[26].mxu0  ;;  %vm8368_vm11 = vcmp.lt.s32.totalorder %v4253_v58, 16  ;;  %v4055_v15 = vsub.s32 %v8162_v44, %v4054_v24  ;;  %v4414_v13 = vsel %vm4368_vm15, %v4355_v63, 0.0 }
 0x227   : > { %v4413_v27 = vadd.f32 %v4412_v49, %v4411_v33  ;;  %v8364_v8 = vadd.f32 %v5848_v29, %v8217_v32  ;;  %v3567_v18 = vpop.f32.mrb[27].mxu0  ;;  %v8382_v49 = vsub.s32 %v8085_v42, %v4076_v17  ;;  %vm4114_vm12 = vcmp.ne.s32.totalorder %v8346_v34, 0 }
 0x228   : > { %v4356_v59 = vmul.f32 %v8353_v48, %v8227_v3  ;;  %v8377_v4 = vadd.f32 %v3567_v18, %v8247_v45  ;;  %vm4112_vm13 = vcmp.ne.s32.totalorder %v8349_v62, 0  ;;  %vm4148_vm3 = vcmp.lt.s32.totalorder %v8349_v62, 0 }
 0x229   : > { %v8366_v11 = vpop.f32.mrb[32].mxu1  ;;  %v4415_v29 = vadd.f32 %v4414_v13, %v4413_v27  ;;  %v4358_v44 = vmul.f32 %v8343_v1, %v8222_v37  ;;  %vm4150_vm14 = vcmp.lt.s32.totalorder %v8346_v34, 0  ;;  %v4220_v42 = vadd.s32 18, %v8349_v62  ;;  %vm8404_vm1 = vmand %vm4148_vm3, %vm4112_vm13 }
 0x22a   : > { %v8379_v33 = vpop.f32.mrb[33].mxu1  ;;  %v4416_v45 = vsel %vm4368_vm15, %v4356_v59, 0.0  ;;  %v4357_v46 = vmul.f32 %v8377_v4, %v8301_v16  ;;  %vm4113_vm7 = vcmp.ne.s32.totalorder %v4055_v15, 0  ;;  %vm4149_vm0 = vcmp.lt.s32.totalorder %v4055_v15, 0  ;;  %vm8414_vm5 = vmand %vm4150_vm14, %vm4114_vm12 }
 0x22b   : > { %v8384_v32 = vpop.f32.mrb[34].mxu1  ;;  %v4417_v17 = vadd.f32 %v4416_v45, %v4415_v29  ;;  %v4359_v7 = vmul.f32 %v8364_v8, %v8232_v22  ;;  %v4222_v20 = vadd.s32 18, %v8346_v34  ;;  %vm4115_vm2 = vcmp.ne.s32.totalorder %v8382_v49, 0  ;;  %vm8430_vm8 = vmand %vm4149_vm0, %vm4113_vm7 }
 0x22c   : > { %v8394_v57 = vpop.f32.mrb[35].mxu1  ;;  %v4418_v31 = vsel %vm4368_vm15, %v4357_v46, 0.0  ;;  %v5851_v52 = vpop.f32.mrb[28].mxu0  ;;  %vm4151_vm4 = vcmp.lt.s32.totalorder %v8382_v49, 0  ;;  %v4221_v27 = vadd.s32 18, %v4055_v15  ;;  %v4420_v18 = vsel %vm4368_vm15, %v4358_v44, 0.0 }
 0x22d   : > { %v4419_v63 = vadd.f32 %v4418_v31, %v4417_v17  ;;  %v8410_v30 = vadd.f32 %v5851_v52, %v8283_v54  ;;  %v3580_v23 = vpop.f32.mrb[29].mxu0  ;;  %vm4291_vm6 = vcmp.lt.s32.totalorder %v4255_v5, 16  ;;  %v8426_v54 = vsel %vm8368_vm11, 1.0, %v9202_v41  ;;  %vm8451_vm9 = vmand %vm4151_vm4, %vm4115_vm2 }
 0x22e   : > { %v8421_v13 = vadd.f32 %v3580_v23, %v8293_v10  ;;  %v5852_v59 = vpop.f32.mrb[30].mxu0  ;;  %v4256_v10 = vsel %vm8404_vm1, %v4220_v42, %v8349_v62  ;;  %v4223_v5 = vadd.s32 18, %v8382_v49  ;;  %v4422_v56 = vsel %vm4368_vm15, %v4359_v7, 0.0 }
 0x22f   : > { %v4421_v45 = vadd.f32 %v4420_v18, %v4419_v63  ;;  %v8435_v46 = vadd.f32 %v5852_v59, %v8296_v47  ;;  %v3583_v44 = vpop.f32.mrb[31].mxu0  ;;  %v8456_v62 = vsel %vm4291_vm6, 1.0, %v9202_v41  ;;  %v4258_v42 = vsel %vm8414_vm5, %v4222_v20, %v8346_v34 }
 0x230   : > { %v4360_v17 = vmul.f32 %v8421_v13, %v8358_v43  ;;  %v8445_v31 = vadd.f32 %v3583_v44, %v8316_v51  ;;  %v4257_v51 = vsel %vm8430_vm8, %v4221_v27, %v4055_v15  ;;  %v4362_v7 = vmul.f32 %v8410_v30, %v8322_v19 }
 0x231   : > { %v4423_v52 = vadd.f32 %v4422_v56, %v4421_v45  ;;  %vm4292_vm10 = vcmp.lt.s32.totalorder %v4256_v10, 16  ;;  %v4259_v18 = vsel %vm8451_vm9, %v4223_v5, %v8382_v49  ;;  %v4363_v34 = vmul.f32 %v8435_v46, %v8456_v62 }
 0x232   : > { %v4424_v24 = vsel %vm4368_vm15, %v4360_v17, 0.0  ;;  %v4361_v63 = vmul.f32 %v8445_v31, %v8426_v54  ;;  %vm4294_vm11 = vcmp.lt.s32.totalorder %v4258_v42, 16  ;;  %vm4293_vm12 = vcmp.lt.s32.totalorder %v4257_v51, 16 }
 0x233   : > { %v4425_v23 = vadd.f32 %v4424_v24, %v4423_v52  ;;  %v8476_v29 = vsel %vm4292_vm10, 1.0, %v9202_v41  ;;  %v4428_v45 = vsel %vm4368_vm15, %v4362_v7, 0.0  ;;  %vm4295_vm13 = vcmp.lt.s32.totalorder %v4259_v18, 16 }
 0x234   : > { %v4426_v20 = vsel %vm4368_vm15, %v4361_v63, 0.0  ;;  %v5855_v15 = vpop.f32.mrb[32].mxu0  ;;  %v8481_v5 = vsel %vm4294_vm11, 1.0, %v9202_v41  ;;  %v8485_v47 = vsel %vm4293_vm12, 1.0, %v9202_v41 }
 0x235   : > { %v4427_v58 = vadd.f32 %v4426_v20, %v4425_v23  ;;  %v5891_v27 = vadd.f32 %v5855_v15, %v8366_v11  ;;  %v3596_v59 = vpop.f32.mrb[33].mxu0  ;;  %v4430_v11 = vsel %vm4368_vm15, %v4363_v34, 0.0 }
 0x236   : > { %v5892_v44 = vadd.f32 %v3596_v59, %v8379_v33  ;;  %v5856_v49 = vpop.f32.mrb[34].mxu0  ;;  %v8491_v33 = vsel %vm4295_vm13, 1.0, %v9202_v41 }
 0x237   : > { %v4429_v10 = vadd.f32 %v4428_v45, %v4427_v58  ;;  %v5893_v56 = vadd.f32 %v5856_v49, %v8384_v32  ;;  %v3599_v17 = vpop.f32.mrb[35].mxu0  ;;  %v4366_v7 = vmul.f32 %v5891_v27, %v8481_v5 }
 0x238   : > { %v4364_v52 = vmul.f32 %v5892_v44, %v8476_v29  ;;  %v5894_v42 = vadd.f32 %v3599_v17, %v8394_v57 }
 0x239   : > { %v4431_v51 = vadd.f32 %v4430_v11, %v4429_v10  ;;  %v4367_v23 = vmul.f32 %v5893_v56, %v8491_v33  ;;  %v4436_v20 = vsel %vm4368_vm15, %v4366_v7, 0.0 }
 0x23a   : > { %v4432_v24 = vsel %vm4368_vm15, %v4364_v52, 0.0  ;;  %v4365_v32 = vmul.f32 %v5894_v42, %v8485_v47 }
 0x23b   : > { %v4433_v63 = vadd.f32 %v4432_v24, %v4431_v51  ;;  %v4438_v57 = vsel %vm4368_vm15, %v4367_v23, 0.0 }
 0x23c   : > { %v4434_v18 = vsel %vm4368_vm15, %v4365_v32, 0.0 }
 0x23d   : > { %v4435_v34 = vadd.f32 %v4434_v18, %v4433_v63 }
 0x23f   : > { %v4437_v15 = vadd.f32 %v4436_v20, %v4435_v34 }
 0x241   : > { %v4439_v58 = vadd.f32 %v4438_v57, %v4437_v15 }
 0x243   : > { %v4440_v41 = vrot.slane %v4439_v58, 4 }
 0x245   : > { %v4441_v59 = vadd.f32 %v4440_v41, %v4439_v58 }
 0x247   : > { %v4442_v45 = vrot.slane %v4441_v59, 2 }
 0x249   : > { %v4443_v49 = vadd.f32 %v4442_v45, %v4441_v59 }
 0x24b   : > { %v4444_v10 = vrot.slane %v4443_v49, 1 }
 0x24d   : > { %v4445_v17 = vadd.f32 %v4444_v10, %v4443_v49 }
 0x24f   : > { %v8500_v11 = vmul.f32 0.00390625, %v4445_v17 }
 0x251   : > { %v8504_v52 = vsub.f32 %v8191_v21, %v8500_v11  ;;  %v8508_v51 = vsub.f32 %v8210_v35, %v8500_v11  ;;  %v8512_v7 = vsub.f32 %v8184_v9, %v8500_v11  ;;  %v8516_v24 = vsub.f32 %v8198_v25, %v8500_v11 }
 0x252   : > { %v8520_v32 = vsub.f32 %v8276_v40, %v8500_v11  ;;  %v8524_v21 = vsub.f32 %v8291_v61, %v8500_v11  ;;  %v8528_v35 = vsub.f32 %v8270_v14, %v8500_v11  ;;  %v8532_v9 = vsub.f32 %v8281_v53, %v8500_v11 }
 0x253   : > { %v8536_v25 = vsub.f32 %v8353_v48, %v8500_v11  ;;  %v8540_v40 = vsub.f32 %v8377_v4, %v8500_v11  ;;  %v8544_v61 = vsub.f32 %v8343_v1, %v8500_v11  ;;  %v8548_v14 = vsub.f32 %v8364_v8, %v8500_v11 }
 0x254   : > { %v8552_v53 = vsub.f32 %v8421_v13, %v8500_v11  ;;  %v8556_v48 = vsub.f32 %v8445_v31, %v8500_v11  ;;  %v8560_v4 = vsub.f32 %v8410_v30, %v8500_v11  ;;  %v8564_v1 = vsub.f32 %v8435_v46, %v8500_v11 }
 0x255   : > { %v8567_v63 = vsub.f32 %v5892_v44, %v8500_v11  ;;  %v8570_v8 = vsub.f32 %v5894_v42, %v8500_v11  ;;  %v8573_v13 = vsub.f32 %v5891_v27, %v8500_v11  ;;  %v8576_v31 = vsub.f32 %v5893_v56, %v8500_v11  ;;  %v9255_v44 = vld [vmem:[#allocation23_spill] sm:$0xff]  ;;  %v9256_v42 = vld [vmem:[#allocation25_spill] sm:$0xff] }
 0x256   : > { %9247 = vst [vmem:[#allocation13_spill] sm:$0xff] %v8552_v53  ;;  %9248 = vst [vmem:[#allocation14_spill] sm:$0xff] %v8556_v48  ;;  %v8580_v30 = vsub.f32 %v7907_v6, %v8500_v11  ;;  %v8584_v46 = vsub.f32 %v7928_v50, %v8500_v11  ;;  %v8588_v23 = vsub.f32 %v9255_v44, %v8500_v11  ;;  %v9257_v44 = vld [vmem:[#allocation3_spill] sm:$0xff] }
 0x257   : > { %9249 = vst [vmem:[#allocation32_spill] sm:$0xff] %v8560_v4  ;;  %9250 = vst [vmem:[#allocation33_spill] sm:$0xff] %v8564_v1  ;;  %v8592_v18 = vsub.f32 %v9256_v42, %v8500_v11  ;;  %v8596_v27 = vsub.f32 %v7978_v28, %v8500_v11  ;;  %v8600_v6 = vsub.f32 %v7993_v38, %v8500_v11 }
 0x258   : > { %9251 = vst [vmem:[#allocation34_spill] sm:$0xff] %v8567_v63  ;;  %9252 = vst [vmem:[#allocation35_spill] sm:$0xff] %v8570_v8  ;;  %v4483_v50 = vmul.f32 %v8580_v30, %v8580_v30  ;;  %v4484_v56 = vmul.f32 %v8584_v46, %v8584_v46  ;;  %v8608_v34 = vsub.f32 %v7968_v39, %v8500_v11 }
 0x259   : > { %9253 = vst [vmem:[#allocation36_spill] sm:$0xff] %v8573_v13  ;;  %9254 = vst [vmem:[#allocation37_spill] sm:$0xff] %v8576_v31  ;;  %v4485_v20 = vmul.f32 %v8588_v23, %v8588_v23  ;;  %v4508_v28 = vmul.f32 %v8540_v40, %v8540_v40  ;;  %v4510_v38 = vmul.f32 %v8548_v14, %v8548_v14 }
 0x25a   : > { %v4511_v15 = vmul.f32 %v8552_v53, %v8552_v53  ;;  %v4512_v57 = vmul.f32 %v8556_v48, %v8556_v48  ;;  %v4513_v58 = vmul.f32 %v8560_v4, %v8560_v4  ;;  %v4514_v39 = vmul.f32 %v8564_v1, %v8564_v1  ;;  %v9258_v1 = vld [vmem:[#allocation5_spill] sm:$0xff]  ;;  %v9259_v4 = vld [vmem:[#allocation2_spill] sm:$0xff] }
 0x25b   : > { %v4515_v41 = vmul.f32 %v8567_v63, %v8567_v63  ;;  %v4516_v59 = vmul.f32 %v8570_v8, %v8570_v8  ;;  %v4517_v45 = vmul.f32 %v8573_v13, %v8573_v13  ;;  %v4518_v49 = vmul.f32 %v8576_v31, %v8576_v31 }
 0x25c   : > { %v8634_v10 = vsub.f32 %v7985_v60, %v8500_v11  ;;  %v4486_v17 = vmul.f32 %v8592_v18, %v8592_v18  ;;  %v4519_v42 = vmul.f32 %v4483_v50, %v9257_v44  ;;  %v4520_v63 = vmul.f32 %v4484_v56, %v9258_v1 }
 0x25d   : > { %v4487_v8 = vmul.f32 %v8596_v27, %v8596_v27  ;;  %v4521_v48 = vmul.f32 %v4485_v20, %v9259_v4  ;;  %v8644_v13 = vmul.f32 %v4508_v28, %v8301_v16  ;;  %v8647_v31 = vmul.f32 %v4510_v38, %v8232_v22  ;;  %v9261_v28 = vld [vmem:[#allocation7_spill] sm:$0xff] }
 0x25e   : > { %v8650_v60 = vmul.f32 %v4511_v15, %v8358_v43  ;;  %v8653_v53 = vmul.f32 %v4512_v57, %v8426_v54  ;;  %v8656_v50 = vmul.f32 %v4513_v58, %v8322_v19  ;;  %v8659_v1 = vmul.f32 %v4514_v39, %v8456_v62  ;;  %v9260_v19 = vld [vmem:[#allocation4_spill] sm:$0xff]  ;;  %v9262_v58 = vld [vmem:[#allocation9_spill] sm:$0xff] }
 0x25f   : > { %v8662_v4 = vmul.f32 %v4515_v41, %v8476_v29  ;;  %v8665_v16 = vmul.f32 %v4516_v59, %v8485_v47  ;;  %v8668_v22 = vmul.f32 %v4517_v45, %v8481_v5  ;;  %v8671_v43 = vmul.f32 %v4518_v49, %v8491_v33 }
 0x260   : > { %v4488_v54 = vmul.f32 %v8600_v6, %v8600_v6  ;;  %v4522_v56 = vmul.f32 %v4486_v17, %v9260_v19  ;;  %v4555_v62 = vsel %vm4368_vm15, %v4519_v42, 0.0  ;;  %v4556_v20 = vsel %vm4368_vm15, %v4520_v63, 0.0  ;;  %v9264_v42 = vld [vmem:[#allocation8_spill] sm:$0xff] }
 0x261   : > { %v4557_v29 = vadd.f32 %v4556_v20, %v4555_v62  ;;  %v8680_v47 = vsub.f32 %v8047_v55, %v8500_v11  ;;  %v4489_v5 = vmul.f32 %v8608_v34, %v8608_v34  ;;  %v4523_v33 = vmul.f32 %v4487_v8, %v9261_v28  ;;  %v9263_v8 = vld [vmem:[#allocation6_spill] sm:$0xff] }
 0x262   : > { %v4558_v38 = vsel %vm4368_vm15, %v4521_v48, 0.0  ;;  %v8688_v57 = vsub.f32 %v8067_v12, %v8500_v11  ;;  %v4490_v63 = vmul.f32 %v8634_v10, %v8634_v10  ;;  %v4524_v39 = vmul.f32 %v4488_v54, %v9262_v58  ;;  %v9267_v58 = vld [vmem:[#allocation29_spill] sm:$0xff] }
 0x263   : > { %v4559_v15 = vadd.f32 %v4558_v38, %v4557_v29  ;;  %v4560_v55 = vsel %vm4368_vm15, %v4522_v56, 0.0  ;;  %v8696_v59 = vsub.f32 %v8034_v26, %v8500_v11  ;;  %v4491_v48 = vmul.f32 %v8680_v47, %v8680_v47  ;;  %v9266_v38 = vld [vmem:[#allocation12_spill] sm:$0xff] }
 0x264   : > { %v4525_v45 = vmul.f32 %v4489_v5, %v9263_v8  ;;  %v4562_v12 = vsel %vm4368_vm15, %v4523_v33, 0.0  ;;  %v8704_v17 = vsub.f32 %v8057_v2, %v8500_v11  ;;  %v4492_v44 = vmul.f32 %v8688_v57, %v8688_v57  ;;  %v9265_v5 = vld [vmem:[#allocation31_spill] sm:$0xff] }
 0x265   : > { %v4561_v41 = vadd.f32 %v4560_v55, %v4559_v15  ;;  %v4526_v54 = vmul.f32 %v4490_v63, %v9264_v42  ;;  %v4564_v26 = vsel %vm4368_vm15, %v4524_v39, 0.0  ;;  %v8712_v56 = vsub.f32 %v8103_v0, %v8500_v11  ;;  %v9268_v55 = vld [vmem:[#allocation10_spill] sm:$0xff] }
 0x266   : > { %v4493_v62 = vmul.f32 %v8696_v59, %v8696_v59  ;;  %v4527_v20 = vmul.f32 %v4491_v48, %v7663_v36  ;;  %v4566_v2 = vsel %vm4368_vm15, %v4525_v45, 0.0  ;;  %v8720_v28 = vsub.f32 %v9265_v5, %v8500_v11  ;;  %v9269_v45 = vld [vmem:[#allocation30_spill] sm:$0xff] }
 0x267   : > { %v4563_v49 = vadd.f32 %v4562_v12, %v4561_v41  ;;  %v4494_v33 = vmul.f32 %v8704_v17, %v8704_v17  ;;  %v4528_v15 = vmul.f32 %v4492_v44, %v9266_v38  ;;  %v4568_v0 = vsel %vm4368_vm15, %v4526_v54, 0.0  ;;  %v9270_v44 = vld [vmem:[#allocation11_spill] sm:$0xff]  ;;  %v9272_v5 = vld [vmem:[#allocation18_spill] sm:$0xff] }
 0x268   : > { %v8728_v39 = vsub.f32 %v9267_v58, %v8500_v11  ;;  %v4495_v36 = vmul.f32 %v8712_v56, %v8712_v56  ;;  %v4529_v41 = vmul.f32 %v4493_v62, %v9268_v55  ;;  %v4570_v48 = vsel %vm4368_vm15, %v4527_v20, 0.0 }
 0x269   : > { %v4565_v19 = vadd.f32 %v4564_v26, %v4563_v49  ;;  %v8736_v12 = vsub.f32 %v9269_v45, %v8500_v11  ;;  %v4496_v49 = vmul.f32 %v8720_v28, %v8720_v28  ;;  %v4530_v42 = vmul.f32 %v4494_v33, %v9270_v44 }
 0x26a   : > { %v4572_v54 = vsel %vm4368_vm15, %v4528_v15, 0.0  ;;  %v4574_v20 = vsel %vm4368_vm15, %v4529_v41, 0.0  ;;  %v4499_v33 = vmul.f32 %v8504_v52, %v8504_v52  ;;  %v9273_v15 = vld [vmem:[#allocation15_spill] sm:$0xff]  ;;  %v9274_v41 = vld [vmem:[#allocation17_spill] sm:$0xff] }
 0x26b   : > { %v4567_v29 = vadd.f32 %v4566_v2, %v4565_v19  ;;  %v4497_v19 = vmul.f32 %v8728_v39, %v8728_v39  ;;  %v9271_v2 = vld [vmem:[#allocation16_spill] sm:$0xff]  ;;  %v4498_v11 = vmul.f32 %v8736_v12, %v8736_v12  ;;  %v4532_v38 = vmul.f32 %v4496_v49, %v9272_v5 }
 0x26c   : > { %v4531_v62 = vmul.f32 %v4495_v36, %v9271_v2  ;;  %v4500_v36 = vmul.f32 %v8508_v51, %v8508_v51  ;;  %v4501_v49 = vmul.f32 %v8512_v7, %v8512_v7 }
 0x26d   : > { %v4569_v63 = vadd.f32 %v4568_v0, %v4567_v29  ;;  %v4576_v0 = vsel %vm4368_vm15, %v4530_v42, 0.0  ;;  %v4533_v58 = vmul.f32 %v4497_v19, %v9273_v15  ;;  %v4580_v45 = vsel %vm4368_vm15, %v4532_v38, 0.0  ;;  %v9275_v42 = vld [vmem:[#allocation20_spill] sm:$0xff]  ;;  %v9277_v38 = vld [vmem:[#allocation19_spill] sm:$0xff] }
 0x26e   : > { %v4578_v55 = vsel %vm4368_vm15, %v4531_v62, 0.0  ;;  %v4502_v19 = vmul.f32 %v8516_v24, %v8516_v24  ;;  %v9276_v62 = vld [vmem:[#allocation22_spill] sm:$0xff] }
 0x26f   : > { %v4571_v8 = vadd.f32 %v4570_v48, %v4569_v63 }
 0x271   : > { %v4573_v26 = vadd.f32 %v4572_v54, %v4571_v8  ;;  %v4534_v8 = vmul.f32 %v4498_v11, %v9274_v41  ;;  %v4535_v54 = vmul.f32 %v4499_v33, %v9275_v42  ;;  %v4503_v11 = vmul.f32 %v8520_v32, %v8520_v32 }
 0x272   : > { %v4504_v33 = vmul.f32 %v8524_v21, %v8524_v21 }
 0x273   : > { %v4575_v29 = vadd.f32 %v4574_v20, %v4573_v26  ;;  %v4582_v26 = vsel %vm4368_vm15, %v4533_v58, 0.0  ;;  %v4536_v20 = vmul.f32 %v4500_v36, %v9276_v62  ;;  %v9278_v58 = vld [vmem:[#allocation21_spill] sm:$0xff]  ;;  %v4505_v36 = vmul.f32 %v8528_v35, %v8528_v35 }
 0x275   : > { %v4577_v63 = vadd.f32 %v4576_v0, %v4575_v29  ;;  %v4584_v29 = vsel %vm4368_vm15, %v4534_v8, 0.0  ;;  %v4537_v0 = vmul.f32 %v4501_v49, %v9277_v38  ;;  %v9279_v8 = vld [vmem:[#allocation26_spill] sm:$0xff]  ;;  %v4506_v49 = vmul.f32 %v8532_v9, %v8532_v9 }
 0x277   : > { %v4579_v48 = vadd.f32 %v4578_v55, %v4577_v63  ;;  %v4586_v63 = vsel %vm4368_vm15, %v4535_v54, 0.0  ;;  %v4538_v55 = vmul.f32 %v4502_v19, %v9278_v58  ;;  %v9280_v54 = vld [vmem:[#allocation28_spill] sm:$0xff]  ;;  %v4507_v19 = vmul.f32 %v8536_v25, %v8536_v25 }
 0x278   : > { %v4509_v58 = vmul.f32 %v8544_v61, %v8544_v61 }
 0x279   : > { %v4581_v44 = vadd.f32 %v4580_v45, %v4579_v48  ;;  %v4588_v48 = vsel %vm4368_vm15, %v4536_v20, 0.0  ;;  %v4539_v45 = vmul.f32 %v4503_v11, %v9279_v8  ;;  %v9281_v20 = vld [vmem:[#allocation24_spill] sm:$0xff]  ;;  %v9282_v11 = vld [vmem:[#allocation27_spill] sm:$0xff] }
 0x27b   : > { %v4583_v2 = vadd.f32 %v4582_v26, %v4581_v44  ;;  %v4590_v44 = vsel %vm4368_vm15, %v4537_v0, 0.0  ;;  %v4540_v26 = vmul.f32 %v4504_v33, %v9280_v54  ;;  %v4543_v33 = vmul.f32 %v4507_v19, %v8227_v3 }
 0x27c   : > { %v4608_v3 = vsel %vm4368_vm15, %v8647_v31, 0.0  ;;  %v4618_v31 = vsel %vm4368_vm15, %v8662_v4, 0.0 }
 0x27d   : > { %v4585_v5 = vadd.f32 %v4584_v29, %v4583_v2  ;;  %v4592_v2 = vsel %vm4368_vm15, %v4538_v55, 0.0  ;;  %v4541_v29 = vmul.f32 %v4505_v36, %v9281_v20  ;;  %v4596_v0 = vsel %vm4368_vm15, %v4540_v26, 0.0 }
 0x27e   : > { %v4545_v36 = vmul.f32 %v4509_v58, %v8222_v37  ;;  %v4612_v37 = vsel %vm4368_vm15, %v8653_v53, 0.0  ;;  %v4622_v53 = vsel %vm4368_vm15, %v8668_v22, 0.0 }
 0x27f   : > { %v4587_v15 = vadd.f32 %v4586_v63, %v4585_v5  ;;  %v4594_v5 = vsel %vm4368_vm15, %v4539_v45, 0.0  ;;  %v4542_v63 = vmul.f32 %v4506_v49, %v9282_v11  ;;  %v4598_v55 = vsel %vm4368_vm15, %v4541_v29, 0.0 }
 0x280   : > { %v4602_v45 = vsel %vm4368_vm15, %v4543_v33, 0.0  ;;  %v4606_v54 = vsel %vm4368_vm15, %v4545_v36, 0.0  ;;  %v4614_v29 = vsel %vm4368_vm15, %v8656_v50, 0.0  ;;  %v4624_v50 = vsel %vm4368_vm15, %v8671_v43, 0.0 }
 0x281   : > { %v4589_v41 = vadd.f32 %v4588_v48, %v4587_v15 }
 0x283   : > { %v4591_v42 = vadd.f32 %v4590_v44, %v4589_v41  ;;  %v4600_v41 = vsel %vm4368_vm15, %v4542_v63, 0.0 }
 0x285   : > { %v4593_v62 = vadd.f32 %v4592_v2, %v4591_v42  ;;  %v4604_v42 = vsel %vm4368_vm15, %v8644_v13, 0.0 }
 0x287   : > { %v4595_v38 = vadd.f32 %v4594_v5, %v4593_v62  ;;  %v4610_v62 = vsel %vm4368_vm15, %v8650_v60, 0.0  ;;  %v4616_v5 = vsel %vm4368_vm15, %v8659_v1, 0.0  ;;  %v4620_v60 = vsel %vm4368_vm15, %v8665_v16, 0.0 }
 0x288   : > { %vm4937_vm15 = vcmask 60416  }
 0x289   : > { %v4597_v15 = vadd.f32 %v4596_v0, %v4595_v38 }
 0x28b   : > { %v4599_v48 = vadd.f32 %v4598_v55, %v4597_v15 }
 0x28d   : > { %v4601_v8 = vadd.f32 %v4600_v41, %v4599_v48 }
 0x28f   : > { %v4603_v44 = vadd.f32 %v4602_v45, %v4601_v8 }
 0x291   : > { %v4605_v49 = vadd.f32 %v4604_v42, %v4603_v44 }
 0x293   : > { %v4607_v26 = vadd.f32 %v4606_v54, %v4605_v49 }
 0x295   : > { %v4609_v2 = vadd.f32 %v4608_v3, %v4607_v26 }
 0x297   : > { %v4611_v19 = vadd.f32 %v4610_v62, %v4609_v2  ;;  %v9284_v2 = vld [vmem:[#allocation14_spill] sm:$0xff]  ;;  %v9285_v62 = vld [vmem:[#allocation32_spill] sm:$0xff] }
 0x299   : > { %v4613_v20 = vadd.f32 %v4612_v37, %v4611_v19  ;;  %v9286_v19 = vld [vmem:[#allocation33_spill] sm:$0xff]  ;;  %v9287_v37 = vld [vmem:[#allocation34_spill] sm:$0xff] }
 0x29b   : > { %v4615_v13 = vadd.f32 %v4614_v29, %v4613_v20  ;;  %v9288_v29 = vld [vmem:[#allocation35_spill] sm:$0xff] }
 0x29d   : > { %v4617_v38 = vadd.f32 %v4616_v5, %v4615_v13  ;;  %v9289_v5 = vld [vmem:[#allocation36_spill] sm:$0xff] }
 0x29f   : > { %v4619_v11 = vadd.f32 %v4618_v31, %v4617_v38  ;;  %v9290_v38 = vld [vmem:[#allocation37_spill] sm:$0xff] }
 0x2a1   : > { %v4621_v63 = vadd.f32 %v4620_v60, %v4619_v11 }
 0x2a3   : > { %v4623_v0 = vadd.f32 %v4622_v53, %v4621_v63 }
 0x2a5   : > { %v4625_v15 = vadd.f32 %v4624_v50, %v4623_v0 }
 0x2a7   : > { %v4626_v58 = vrot.slane %v4625_v15, 4 }
 0x2a9   : > { %v4627_v33 = vadd.f32 %v4626_v58, %v4625_v15 }
 0x2ab   : > { %v4628_v1 = vrot.slane %v4627_v33, 2 }
 0x2ad   : > { %v4629_v55 = vadd.f32 %v4628_v1, %v4627_v33 }
 0x2af   : > { %v4630_v48 = vrot.slane %v4629_v55, 1 }
 0x2b1   : > { %v4631_v41 = vadd.f32 %v4630_v48, %v4629_v55 }
 0x2b3   : > { %v4632_v4 = vmul.f32 0.00390625, %v4631_v41 }
 0x2b5   : > { %v4635_v8 = vadd.f32 1e-05, %v4632_v4 }
 0x2b7   : > { %6302 = vrsqrt.f32 %v4635_v8 }
 0x2c1   : > { %v6303_v36 = vpop.eup %6302 }
 0x2c2   : > { %v4637_v16 = vmul.f32 %v6303_v36, %v8580_v30  ;;  %v4638_v45 = vmul.f32 %v6303_v36, %v8584_v46  ;;  %v4639_v22 = vmul.f32 %v6303_v36, %v8588_v23  ;;  %v4640_v44 = vmul.f32 %v6303_v36, %v8592_v18 }
 0x2c3   : > { %v4641_v43 = vmul.f32 %v6303_v36, %v8596_v27  ;;  %v4642_v42 = vmul.f32 %v6303_v36, %v8600_v6  ;;  %v4643_v49 = vmul.f32 %v6303_v36, %v8608_v34  ;;  %v4644_v54 = vmul.f32 %v6303_v36, %v8634_v10 }
 0x2c4   : > { %v4645_v26 = vmul.f32 %v6303_v36, %v8680_v47  ;;  %v4646_v3 = vmul.f32 %v6303_v36, %v8688_v57  ;;  %v4647_v30 = vmul.f32 %v6303_v36, %v8696_v59  ;;  %v4648_v46 = vmul.f32 %v6303_v36, %v8704_v17 }
 0x2c5   : > { %v4649_v23 = vmul.f32 %v6303_v36, %v8712_v56  ;;  %v4650_v18 = vmul.f32 %v6303_v36, %v8720_v28  ;;  %v4651_v27 = vmul.f32 %v6303_v36, %v8728_v39  ;;  %v4652_v6 = vmul.f32 %v6303_v36, %v8736_v12  ;;  %v5268_v39 = vld [vmem:[%s9049_s2] ss:$0 sm:$0xff]  ;;  %v9283_v12 = vld [vmem:[#allocation13_spill] sm:$0xff] }
 0x2c6   : > { %v4653_v34 = vmul.f32 %v6303_v36, %v8504_v52  ;;  %v4654_v10 = vmul.f32 %v6303_v36, %v8508_v51  ;;  %v4655_v47 = vmul.f32 %v6303_v36, %v8512_v7  ;;  %v4656_v57 = vmul.f32 %v6303_v36, %v8516_v24 }
 0x2c7   : > { %v4657_v59 = vmul.f32 %v6303_v36, %v8520_v32  ;;  %v4658_v17 = vmul.f32 %v6303_v36, %v8524_v21  ;;  %v4659_v56 = vmul.f32 %v6303_v36, %v8528_v35  ;;  %v4660_v28 = vmul.f32 %v6303_v36, %v8532_v9 }
 0x2c8   : > { %v4661_v52 = vmul.f32 %v6303_v36, %v8536_v25  ;;  %v4662_v51 = vmul.f32 %v6303_v36, %v8540_v40  ;;  %v4663_v7 = vmul.f32 %v6303_v36, %v8544_v61  ;;  %v4664_v24 = vmul.f32 %v6303_v36, %v8548_v14 }
 0x2c9   : > { %v4665_v32 = vmul.f32 %v6303_v36, %v9283_v12  ;;  %v4666_v21 = vmul.f32 %v6303_v36, %v9284_v2  ;;  %v4667_v35 = vmul.f32 %v6303_v36, %v9285_v62  ;;  %v4668_v9 = vmul.f32 %v6303_v36, %v9286_v19 }
 0x2ca   : > { %v4669_v20 = vmul.f32 %v6303_v36, %v9287_v37  ;;  %v4670_v13 = vmul.f32 %v6303_v36, %v9288_v29  ;;  %v4671_v25 = vmul.f32 %v6303_v36, %v9289_v5  ;;  %v4672_v40 = vmul.f32 %v6303_v36, %v9290_v38 }
 0x2cb   : > { %v4679_v31 = vmul.f32 %v5268_v39, %v4637_v16  ;;  %v4680_v61 = vmul.f32 %v5268_v39, %v4638_v45  ;;  %v4681_v11 = vmul.f32 %v5268_v39, %v4639_v22  ;;  %v4682_v14 = vmul.f32 %v5268_v39, %v4640_v44 }
 0x2cc   : > { %v4683_v60 = vmul.f32 %v5268_v39, %v4641_v43  ;;  %v4684_v63 = vmul.f32 %v5268_v39, %v4642_v42  ;;  %v4685_v53 = vmul.f32 %v5268_v39, %v4643_v49  ;;  %v4686_v0 = vmul.f32 %v5268_v39, %v4644_v54  ;;  %v5269_v43 = vld [vmem:[%s9050_s3] ss:$0 sm:$0xff] }
 0x2cd   : > { %v4687_v50 = vmul.f32 %v5268_v39, %v4645_v26  ;;  %v4688_v15 = vmul.f32 %v5268_v39, %v4646_v3  ;;  %v4689_v58 = vmul.f32 %v5268_v39, %v4647_v30  ;;  %v4690_v33 = vmul.f32 %v5268_v39, %v4648_v46 }
 0x2ce   : > { %v4691_v1 = vmul.f32 %v5268_v39, %v4649_v23  ;;  %v4692_v55 = vmul.f32 %v5268_v39, %v4650_v18  ;;  %v4693_v48 = vmul.f32 %v5268_v39, %v4651_v27  ;;  %v4694_v41 = vmul.f32 %v5268_v39, %v4652_v6 }
 0x2cf   : > { %v4695_v4 = vmul.f32 %v5268_v39, %v4653_v34  ;;  %v4696_v8 = vmul.f32 %v5268_v39, %v4654_v10  ;;  %v4697_v12 = vmul.f32 %v5268_v39, %v4655_v47  ;;  %v4698_v36 = vmul.f32 %v5268_v39, %v4656_v57 }
 0x2d0   : > { %v4699_v16 = vmul.f32 %v5268_v39, %v4657_v59  ;;  %v4700_v45 = vmul.f32 %v5268_v39, %v4658_v17  ;;  %v4701_v22 = vmul.f32 %v5268_v39, %v4659_v56  ;;  %v4702_v44 = vmul.f32 %v5268_v39, %v4660_v28 }
 0x2d1   : > { %v4703_v42 = vmul.f32 %v5268_v39, %v4661_v52  ;;  %v4704_v49 = vmul.f32 %v5268_v39, %v4662_v51  ;;  %v4705_v54 = vmul.f32 %v5268_v39, %v4663_v7  ;;  %v4706_v26 = vmul.f32 %v5268_v39, %v4664_v24 }
 0x2d2   : > { %v4707_v3 = vmul.f32 %v5268_v39, %v4665_v32  ;;  %v4708_v30 = vmul.f32 %v5268_v39, %v4666_v21  ;;  %v4709_v46 = vmul.f32 %v5268_v39, %v4667_v35  ;;  %v4710_v23 = vmul.f32 %v5268_v39, %v4668_v9 }
 0x2d3   : > { %v4711_v18 = vmul.f32 %v5268_v39, %v4669_v20  ;;  %v4712_v27 = vmul.f32 %v5268_v39, %v4670_v13  ;;  %v4713_v6 = vmul.f32 %v5268_v39, %v4671_v25  ;;  %v4714_v34 = vmul.f32 %v5268_v39, %v4672_v40 }
 0x2d4   : > { %v8858_v10 = vadd.f32 %v5269_v43, %v4679_v31  ;;  %v8860_v47 = vadd.f32 %v5269_v43, %v4680_v61  ;;  %v8862_v57 = vadd.f32 %v5269_v43, %v4681_v11  ;;  %v8864_v59 = vadd.f32 %v5269_v43, %v4682_v14 }
 0x2d5   : > { %v8866_v17 = vadd.f32 %v5269_v43, %v4683_v60  ;;  %v8868_v56 = vadd.f32 %v5269_v43, %v4684_v63  ;;  %v8870_v28 = vadd.f32 %v5269_v43, %v4685_v53  ;;  %v8872_v52 = vadd.f32 %v5269_v43, %v4686_v0 }
 0x2d6   : > { %v8874_v51 = vadd.f32 %v5269_v43, %v4687_v50  ;;  %v8876_v7 = vadd.f32 %v5269_v43, %v4688_v15  ;;  %v8878_v39 = vadd.f32 %v5269_v43, %v4689_v58  ;;  %v8880_v24 = vadd.f32 %v5269_v43, %v4690_v33 }
 0x2d7   : > { %v8882_v32 = vadd.f32 %v5269_v43, %v4691_v1  ;;  %v8884_v2 = vadd.f32 %v5269_v43, %v4692_v55  ;;  %v8886_v21 = vadd.f32 %v5269_v43, %v4693_v48  ;;  %v8888_v62 = vadd.f32 %v5269_v43, %v4694_v41 }
 0x2d8   : > { %v8890_v35 = vadd.f32 %v5269_v43, %v4695_v4  ;;  %v8892_v19 = vadd.f32 %v5269_v43, %v4696_v8  ;;  %v8894_v9 = vadd.f32 %v5269_v43, %v4697_v12  ;;  %v8896_v37 = vadd.f32 %v5269_v43, %v4698_v36 }
 0x2d9   : > { %v8898_v20 = vadd.f32 %v5269_v43, %v4699_v16  ;;  %v8900_v29 = vadd.f32 %v5269_v43, %v4700_v45  ;;  %v8902_v13 = vadd.f32 %v5269_v43, %v4701_v22  ;;  %v8904_v5 = vadd.f32 %v5269_v43, %v4702_v44 }
 0x2da   : > { %v8906_v25 = vadd.f32 %v5269_v43, %v4703_v42  ;;  %v8908_v38 = vadd.f32 %v5269_v43, %v4704_v49  ;;  %v8910_v40 = vadd.f32 %v5269_v43, %v4705_v54  ;;  %v8912_v31 = vadd.f32 %v5269_v43, %v4706_v26 }
 0x2db   : > { %v8914_v61 = vadd.f32 %v5269_v43, %v4707_v3  ;;  %v8916_v11 = vadd.f32 %v5269_v43, %v4708_v30  ;;  %v8918_v14 = vadd.f32 %v5269_v43, %v4709_v46  ;;  %v8920_v60 = vadd.f32 %v5269_v43, %v4710_v23 }
 0x2dc   : > { %v8922_v63 = vadd.f32 %v5269_v43, %v4711_v18  ;;  %v8924_v53 = vadd.f32 %v5269_v43, %v4712_v27  ;;  %v8926_v0 = vadd.f32 %v5269_v43, %v4713_v6  ;;  %v8928_v50 = vadd.f32 %v5269_v43, %v4714_v34 }
 0x2dd   : > { %v4757_v15 = vmax.f32 %v8858_v10, 0.0  ;;  %v4758_v58 = vmax.f32 %v8860_v47, 0.0  ;;  %v4759_v33 = vmax.f32 %v8862_v57, 0.0  ;;  %v4760_v1 = vmax.f32 %v8864_v59, 0.0 }
 0x2de   : > { %v4761_v55 = vmax.f32 %v8866_v17, 0.0  ;;  %v4762_v48 = vmax.f32 %v8868_v56, 0.0  ;;  %v4763_v41 = vmax.f32 %v8870_v28, 0.0  ;;  %v4764_v4 = vmax.f32 %v8872_v52, 0.0 }
 0x2df   : > { %v4765_v8 = vmax.f32 %v8874_v51, 0.0  ;;  %v4766_v12 = vmax.f32 %v8876_v7, 0.0  ;;  %v4767_v36 = vmax.f32 %v8878_v39, 0.0  ;;  %v4768_v16 = vmax.f32 %v8880_v24, 0.0 }
 0x2e0   : > { %v4769_v45 = vmax.f32 %v8882_v32, 0.0  ;;  %v4770_v22 = vmax.f32 %v8884_v2, 0.0  ;;  %v4771_v44 = vmax.f32 %v8886_v21, 0.0  ;;  %v4772_v43 = vmax.f32 %v8888_v62, 0.0 }
 0x2e1   : > { %v4773_v42 = vmax.f32 %v8890_v35, 0.0  ;;  %v4774_v49 = vmax.f32 %v8892_v19, 0.0  ;;  %v4775_v54 = vmax.f32 %v8894_v9, 0.0  ;;  %v4776_v26 = vmax.f32 %v8896_v37, 0.0 }
 0x2e2   : > { %v4777_v3 = vmax.f32 %v8898_v20, 0.0  ;;  %v4778_v30 = vmax.f32 %v8900_v29, 0.0  ;;  %v4779_v46 = vmax.f32 %v8902_v13, 0.0  ;;  %v4780_v23 = vmax.f32 %v8904_v5, 0.0 }
 0x2e3   : > { %v4781_v18 = vmax.f32 %v8906_v25, 0.0  ;;  %v4782_v27 = vmax.f32 %v8908_v38, 0.0  ;;  %v4783_v6 = vmax.f32 %v8910_v40, 0.0  ;;  %v4784_v34 = vmax.f32 %v8912_v31, 0.0 }
 0x2e4   : > { %v4785_v10 = vmax.f32 %v8914_v61, 0.0  ;;  %v4786_v47 = vmax.f32 %v8916_v11, 0.0  ;;  %v4787_v57 = vmax.f32 %v8918_v14, 0.0  ;;  %v4788_v59 = vmax.f32 %v8920_v60, 0.0 }
 0x2e5   : > { %v4789_v17 = vmax.f32 %v8922_v63, 0.0  ;;  %v4790_v56 = vmax.f32 %v8924_v53, 0.0  ;;  %v4791_v28 = vmax.f32 %v8926_v0, 0.0  ;;  %v4792_v52 = vmax.f32 %v8928_v50, 0.0 }
 0x2e6   : > { %v5308_v51 = vpack.c.bf16 %v4757_v15, %v4757_v15  ;;  %v5309_v7 = vpack.c.bf16 %v4758_v58, %v4758_v58  ;;  %v5310_v39 = vpack.c.bf16 %v4759_v33, %v4759_v33  ;;  %v5311_v24 = vpack.c.bf16 %v4760_v1, %v4760_v1 }
 0x2e7   : > { %v5312_v32 = vpack.c.bf16 %v4761_v55, %v4761_v55  ;;  %v5313_v2 = vpack.c.bf16 %v4762_v48, %v4762_v48  ;;  %v5314_v21 = vpack.c.bf16 %v4763_v41, %v4763_v41  ;;  %v5315_v62 = vpack.c.bf16 %v4764_v4, %v4764_v4 }
 0x2e8   : > { %v5316_v35 = vpack.c.bf16 %v4765_v8, %v4765_v8  ;;  %v5317_v19 = vpack.c.bf16 %v4766_v12, %v4766_v12  ;;  %v5318_v9 = vpack.c.bf16 %v4767_v36, %v4767_v36  ;;  %v5319_v37 = vpack.c.bf16 %v4768_v16, %v4768_v16  ;;  %4938 = vst.msk [vmem:[%s8966_s23] sm:$0xf] %vm4937_vm15, %v5308_v51 }
 0x2e9   : > { %4939 = vst.msk [vmem:[%s8966_s23 + $0x4] sm:$0xf] %vm4937_vm15, %v5309_v7  ;;  %4940 = vst.msk [vmem:[%s8966_s23 + $0x8] sm:$0xf] %vm4937_vm15, %v5310_v39  ;;  %v5320_v20 = vpack.c.bf16 %v4769_v45, %v4769_v45  ;;  %v5321_v29 = vpack.c.bf16 %v4770_v22, %v4770_v22  ;;  %v5322_v13 = vpack.c.bf16 %v4771_v44, %v4771_v44 }
 0x2ea   : > { %4941 = vst.msk [vmem:[%s8966_s23 + $0xc] sm:$0xf] %vm4937_vm15, %v5311_v24  ;;  %v5323_v5 = vpack.c.bf16 %v4772_v43, %v4772_v43  ;;  %4942 = vst.msk [vmem:[%s8966_s23 + $0x10] sm:$0xf] %vm4937_vm15, %v5312_v32  ;;  %v5324_v25 = vpack.c.bf16 %v4773_v42, %v4773_v42  ;;  %v5325_v38 = vpack.c.bf16 %v4774_v49, %v4774_v49 }
 0x2eb   : > { %4943 = vst.msk [vmem:[%s8966_s23 + $0x14] sm:$0xf] %vm4937_vm15, %v5313_v2  ;;  %4944 = vst.msk [vmem:[%s8966_s23 + $0x18] sm:$0xf] %vm4937_vm15, %v5314_v21  ;;  %v5326_v40 = vpack.c.bf16 %v4775_v54, %v4775_v54  ;;  %v5327_v31 = vpack.c.bf16 %v4776_v26, %v4776_v26  ;;  %v5328_v61 = vpack.c.bf16 %v4777_v3, %v4777_v3 }
 0x2ec   : > { %4945 = vst.msk [vmem:[%s8966_s23 + $0x1c] sm:$0xf] %vm4937_vm15, %v5315_v62  ;;  %4946 = vst.msk [vmem:[%s8966_s23 + $0x20] sm:$0xf] %vm4937_vm15, %v5316_v35  ;;  %v5329_v11 = vpack.c.bf16 %v4778_v30, %v4778_v30  ;;  %v5330_v14 = vpack.c.bf16 %v4779_v46, %v4779_v46  ;;  %v5331_v60 = vpack.c.bf16 %v4780_v23, %v4780_v23 }
 0x2ed   : > { %4947 = vst.msk [vmem:[%s8966_s23 + $0x24] sm:$0xf] %vm4937_vm15, %v5317_v19  ;;  %4948 = vst.msk [vmem:[%s8966_s23 + $0x28] sm:$0xf] %vm4937_vm15, %v5318_v9  ;;  %v5332_v63 = vpack.c.bf16 %v4781_v18, %v4781_v18  ;;  %v5333_v53 = vpack.c.bf16 %v4782_v27, %v4782_v27  ;;  %v5334_v0 = vpack.c.bf16 %v4783_v6, %v4783_v6 }
 0x2ee   : > { %4949 = vst.msk [vmem:[%s8966_s23 + $0x2c] sm:$0xf] %vm4937_vm15, %v5319_v37  ;;  %4950 = vst.msk [vmem:[%s8966_s23 + $0x30] sm:$0xf] %vm4937_vm15, %v5320_v20  ;;  %v5335_v50 = vpack.c.bf16 %v4784_v34, %v4784_v34  ;;  %v5336_v15 = vpack.c.bf16 %v4785_v10, %v4785_v10  ;;  %v5337_v58 = vpack.c.bf16 %v4786_v47, %v4786_v47 }
 0x2ef   : > { %4951 = vst.msk [vmem:[%s8966_s23 + $0x34] sm:$0xf] %vm4937_vm15, %v5321_v29  ;;  %4952 = vst.msk [vmem:[%s8966_s23 + $0x38] sm:$0xf] %vm4937_vm15, %v5322_v13  ;;  %v5338_v33 = vpack.c.bf16 %v4787_v57, %v4787_v57  ;;  %v5339_v1 = vpack.c.bf16 %v4788_v59, %v4788_v59  ;;  %v5340_v55 = vpack.c.bf16 %v4789_v17, %v4789_v17 }
 0x2f0   : > { %4953 = vst.msk [vmem:[%s8966_s23 + $0x3c] sm:$0xf] %vm4937_vm15, %v5323_v5  ;;  %4954 = vst.msk [vmem:[%s8966_s23 + $0x40] sm:$0xf] %vm4937_vm15, %v5324_v25  ;;  %v5341_v48 = vpack.c.bf16 %v4790_v56, %v4790_v56  ;;  %v5342_v41 = vpack.c.bf16 %v4791_v28, %v4791_v28  ;;  %v5343_v4 = vpack.c.bf16 %v4792_v52, %v4792_v52 }
 0x2f1   : > { %4955 = vst.msk [vmem:[%s8966_s23 + $0x44] sm:$0xf] %vm4937_vm15, %v5325_v38  ;;  %4956 = vst.msk [vmem:[%s8966_s23 + $0x48] sm:$0xf] %vm4937_vm15, %v5326_v40 }
 0x2f2   : > { %4957 = vst.msk [vmem:[%s8966_s23 + $0x4c] sm:$0xf] %vm4937_vm15, %v5327_v31  ;;  %4958 = vst.msk [vmem:[%s8966_s23 + $0x50] sm:$0xf] %vm4937_vm15, %v5328_v61 }
 0x2f3   : > { %4959 = vst.msk [vmem:[%s8966_s23 + $0x54] sm:$0xf] %vm4937_vm15, %v5329_v11  ;;  %4960 = vst.msk [vmem:[%s8966_s23 + $0x58] sm:$0xf] %vm4937_vm15, %v5330_v14 }
 0x2f4   : > { %4961 = vst.msk [vmem:[%s8966_s23 + $0x5c] sm:$0xf] %vm4937_vm15, %v5331_v60  ;;  %4962 = vst.msk [vmem:[%s8966_s23 + $0x60] sm:$0xf] %vm4937_vm15, %v5332_v63 }
 0x2f5   : > { %4963 = vst.msk [vmem:[%s8966_s23 + $0x64] sm:$0xf] %vm4937_vm15, %v5333_v53  ;;  %4964 = vst.msk [vmem:[%s8966_s23 + $0x68] sm:$0xf] %vm4937_vm15, %v5334_v0 }
 0x2f6   : > { %4965 = vst.msk [vmem:[%s8966_s23 + $0x6c] sm:$0xf] %vm4937_vm15, %v5335_v50  ;;  %4966 = vst.msk [vmem:[%s8966_s23 + $0x70] sm:$0xf] %vm4937_vm15, %v5336_v15 }
 0x2f7   : > { %4967 = vst.msk [vmem:[%s8966_s23 + $0x74] sm:$0xf] %vm4937_vm15, %v5337_v58  ;;  %4968 = vst.msk [vmem:[%s8966_s23 + $0x78] sm:$0xf] %vm4937_vm15, %v5338_v33 }
 0x2f8   : > { %4969 = vst.msk [vmem:[%s8966_s23 + $0x7c] sm:$0xf] %vm4937_vm15, %v5339_v1  ;;  %4970 = vst.msk [vmem:[%s8966_s23 + $0x80] sm:$0xf] %vm4937_vm15, %v5340_v55 }
 0x2f9   : > { %4971 = vst.msk [vmem:[%s8966_s23 + $0x84] sm:$0xf] %vm4937_vm15, %v5341_v48  ;;  %4972 = vst.msk [vmem:[%s8966_s23 + $0x88] sm:$0xf] %vm4937_vm15, %v5342_v41 }
 0x2fa   : > { %4973 = vst.msk [vmem:[%s8966_s23 + $0x8c] sm:$0xf] %vm4937_vm15, %v5343_v4 }
 0x2fb PF: > { %s14_s15 = sadd.s32 1, %s6321_s15  }
 0x2fc   : > { %p11_p4 = scmp.ge.s32.totalorder %s14_s15, 4  }
 0x2fe   :  { %13 = sbr.rel (!%p11_p4) target bundleno = 1 (0x1), region = 74 }

// kernel: forward.11
= control target key start
LH: loop header
LB: loop body
LE: loop exit
PB: predicated region body
PF: predicated region fallthrough
CT: control target
= control target key end

     0   :  { %s1545_s15 = smov 0   ;;  %s1931_s0 = inlined_call_operand.vmem [shape: bf16[2,82,32], index: 0, kind: input, shape index: {}]   ;;  %s1932_s1 = inlined_call_operand.vmem [shape: bf16[4,32,16], index: 1, kind: input, shape index: {}]   ;;  %s1933_s2 = inlined_call_operand.vmem [shape: f32[1,16], index: 2, kind: input, shape index: {}]   ;;  %s1934_s3 = inlined_call_operand.vmem [shape: f32[1,16], index: 3, kind: input, shape index: {}]   ;;  %s1935_s4 = inlined_call_operand.vmem [shape: bf16[2,72,16], index: 4, kind: output, shape index: {}]  }
   0x1 LB: > { %s1204_s16 = sadd.s32 4294967295, %s1516_s15   ;;  %p1208_p0 = scmp.ge.s32.totalorder %s1516_s15, 1  ;;  %s1516_s15 = sphi %s1545_s15, %s14_s15  }
   0x2   : > { %p162_p1 = scmp.lt.s32.totalorder %s1516_s15, 3 }
   0x4   : > { %p163_p2 = pnand %p1208_p0, %p162_p1 }
   0x5   : > { %v1488_v0 = vld [vmem:[%s1932_s1 + $0x10] sm:$0xff] (!%p163_p2)   ;;  %v1518_v1 = vmov (!%p163_p2), 0.0   ;;  %v1489_v2 = vld [vmem:[%s1932_s1 + $0x20] sm:$0xff] (!%p163_p2)   ;;  %v1490_v3 = vld [vmem:[%s1932_s1 + $0x18] sm:$0xff] (!%p163_p2)   ;;  %vm1519_vm0 = vmmov (!%p163_p2), 0   ;;  %p188_p3 = scmp.lt.s32.totalorder (!%p163_p2), %s1204_s16, 1 }
   0x6   : > { %166 = sbr.rel (%p163_p2) target bundleno = 399 (0x18f), region = 36  ;;  %1313 = vmatprep.subr.bf16.mxu1 (!%p163_p2), %v1518_v1  ;;  %1361 = vmatprep.subr.bf16.mxu0 (!%p163_p2), %v1518_v1  ;;  %v1491_v4 = vld [vmem:[%s1932_s1 + $0x28] sm:$0xff] (!%p163_p2)   ;;  %vm243_vm1 = vsmask.f32 (!%p163_p2), 7424  ;;  %vm295_vm2 = vcmask (!%p163_p2), 261120   ;;  %v1494_v19 = vld [vmem:[%s1932_s1] sm:$0xff] (!%p163_p2)  }
   0x7   : > { %1314 = vmatpush3.bf16.msra.mxu1 (!%p163_p2), %v1488_v0  ;;  %1317 = vmatprep.mubr.msk.bf16.mxu1 (!%p163_p2), %vm1519_vm0, %v1518_v1  ;;  %v1497_v29 = vld [vmem:[%s1932_s1 + $0x30] sm:$0xff] (!%p163_p2)   ;;  %v1502_v32 = vld [vmem:[%s1932_s1 + $0x8] sm:$0xff] (!%p163_p2)   ;;  %v1503_v40 = vld [vmem:[%s1932_s1 + $0x38] sm:$0xff] (!%p163_p2)   ;;  %vm675_vm3 = vcmask (!%p163_p2), 1046528  }
   0x8   : > { %1362 = vmatpush3.bf16.msra.mxu0 (!%p163_p2), %v1489_v2  ;;  %1315 = vmatprep.subr.bf16.mxu1 (!%p163_p2), %v1518_v1 }
   0x9   : > { %1363 = vmatprep.subr.bf16.mxu0 (!%p163_p2), %v1518_v1  ;;  %1365 = vmatprep.mubr.msk.bf16.mxu0 (!%p163_p2), %vm1519_vm0, %v1518_v1 }
   0xb   : > { %1316 = vmatpush3.bf16.msra.mxu1 (!%p163_p2), %v1490_v3 }
   0xc   : > { %1364 = vmatpush3.bf16.msra.mxu0 (!%p163_p2), %v1491_v4  ;;  %1337 = vmatprep.subr.bf16.mxu1 (!%p163_p2), %v1518_v1 }
   0xd   : > { %s1955_s16 = smov (!%p188_p3, %s1204_s16), 1  ;;  %1385 = vmatprep.subr.bf16.mxu0 %v1518_v1 }
   0xe   : > { %s1458_s25 = smul.u32 44, %s1955_s16 }
   0xf   : > { %s1459_s17 = smul.u32 36, %s1955_s16 }
  0x10   : > { %s1581_s28 = scalar_lea.vmem %s1931_s0, %s1458_s25 }
  0x11   : > { %v1584_v5 = vld [vmem:[%s1581_s28] sm:$0xff]   ;;  %v1587_v6 = vld [vmem:[%s1581_s28 + $0x8] sm:$0xff]   ;;  %v1601_v14 = vld [vmem:[%s1581_s28 + $0x10] sm:$0xff]   ;;  %s197_s16 = scalar_lea.vmem %s1935_s4, %s1459_s17 }
  0x12   : > { %v479_v7 = vld [vmem:[%s1581_s28 + $0x4] sm:$0xf]  ;;  %v1591_v8 = vld [vmem:[%s1581_s28 + $0x8] sm:$0xf]  ;;  %v245_v9 = vshrl.u32 %v1584_v5, 16  ;;  %v247_v10 = vshll.u32 %v1584_v5, 16 }
  0x13   : > { %v252_v11 = vshll.u32 %v1587_v6, 16  ;;  %v1239_v12 = vcombine.low %v479_v7, %v1591_v8  ;;  %v1598_v13 = vld [vmem:[%s1581_s28 + $0xc] sm:$0xff]   ;;  %v256_v21 = vshrl.u32 %v1587_v6, 16  ;;  %v1609_v22 = vld [vmem:[%s1581_s28 + $0x14] sm:$0xff]   ;;  %v260_v25 = vshll.u32 %v1601_v14, 16  ;;  %v1633_v39 = vld [vmem:[%s1581_s28 + $0x1c] sm:$0xff]  }
  0x14   : > { %v249_v15 = vrot.slane %v247_v10, 1  ;;  %v527_v20 = vshll.u32 %v1598_v13, 16  ;;  %v531_v30 = vshrl.u32 %v1598_v13, 16  ;;  %v535_v31 = vshll.u32 %v1609_v22, 16  ;;  %v1626_v36 = vld [vmem:[%s1581_s28 + $0x18] sm:$0xff]  }
  0x15   : > { %v254_v16 = vrot.slane %v252_v11, 1  ;;  %v520_v17 = vshrl.u32 %v1239_v12, 16  ;;  %v522_v18 = vshll.u32 %v1239_v12, 16  ;;  %v262_v35 = vrot.slane %v260_v25, 1  ;;  %v1643_v44 = vld [vmem:[%s1581_s28 + $0x20] sm:$0xf] }
  0x16   : > { %v250_v23 = vor.u32 %v249_v15, %v245_v9  ;;  %v529_v26 = vrot.slane %v527_v20, 1  ;;  %v537_v38 = vrot.slane %v535_v31, 1  ;;  %v264_v42 = vshrl.u32 %v1601_v14, 16  ;;  %v212_v45 = vld [vmem:[%s1581_s28 + $0x24] sm:$0x1] }
  0x17   : > { %v524_v24 = vrot.slane %v522_v18, 1  ;;  %v258_v34 = vor.u32 %v256_v21, %v254_v16  ;;  %v268_v43 = vshll.u32 %v1626_v36, 16  ;;  %v539_v47 = vshrl.u32 %v1609_v22, 16  ;;  %v1505_v54 = vld [vmem:[%s1581_s28 + $0x24] sm:$0x1f]  }
  0x18   : > { %v255_v27 = vsel %vm243_vm1, %v250_v23, %v254_v16  ;;  %v533_v37 = vor.u32 %v531_v30, %v529_v26  ;;  %v543_v48 = vshll.u32 %v1633_v39, 16  ;;  %v266_v49 = vor.u32 %v264_v42, %v262_v35  ;;  %v666_v10 = vld [vmem:[%s1581_s28 + $0x4] sm:$0xe] }
  0x19   : > { %v525_v28 = vor.u32 %v524_v24, %v520_v17  ;;  %1318 = vmatmul.mubr.msk.bf16.vlgmr.msra.gmra.mrb[0].mxu1 %vm295_vm2, %v255_v27  ;;  %v263_v41 = vsel %vm243_vm1, %v258_v34, %v262_v35  ;;  %v270_v50 = vrot.slane %v268_v43, 1  ;;  %v1219_v51 = vcombine.low %v1643_v44, %v212_v45 }
  0x1a   : > { %1338 = vmatpush3.bf16.msra.mxu1 %v1494_v19  ;;  %1321 = vmatprep.mubr.msk.bf16.mxu1 %vm1519_vm0, %v1518_v1  ;;  %v538_v46 = vsel %vm243_vm1, %v533_v37, %v537_v38  ;;  %v541_v52 = vor.u32 %v539_v47, %v537_v38  ;;  %v545_v53 = vrot.slane %v543_v48, 1  ;;  %v272_v56 = vshrl.u32 %v1626_v36, 16 }
  0x1b   : > { %v530_v33 = vsel %vm243_vm1, %v525_v28, %v529_v26  ;;  %1339 = vmatprep.subr.bf16.mxu1 %v1518_v1  ;;  %v271_v55 = vsel %vm243_vm1, %v266_v49, %v270_v50  ;;  %v276_v57 = vshll.u32 %v1219_v51, 16  ;;  %v547_v59 = vshrl.u32 %v1633_v39, 16 }
  0x1c   : > { %1366 = vmatmul.mubr.msk.bf16.vlgmr.msra.gmra.mrb[0].mxu0 %vm295_vm2, %v530_v33  ;;  %v546_v58 = vsel %vm243_vm1, %v541_v52, %v545_v53  ;;  %v551_v60 = vshll.u32 %v1505_v54, 16  ;;  %v274_v61 = vor.u32 %v272_v56, %v270_v50  ;;  %v280_v4 = vshrl.u32 %v1219_v51, 16 }
  0x1d   : > { %1386 = vmatpush3.bf16.msra.mxu0 %v1497_v29  ;;  %1369 = vmatprep.mubr.msk.bf16.mxu0 %vm1519_vm0, %v1518_v1  ;;  %v278_v62 = vrot.slane %v276_v57, 1  ;;  %v549_v63 = vor.u32 %v547_v59, %v545_v53  ;;  %v555_v7 = vshrl.u32 %v1505_v54, 16  ;;  %v1255_v12 = vcombine.low %v666_v10, %v1591_v8 }
  0x1e   : > { %1387 = vmatprep.subr.bf16.mxu0 %v1518_v1  ;;  %1340 = vmatpush3.bf16.msra.mxu1 %v1502_v32  ;;  %v553_v0 = vrot.slane %v551_v60, 1  ;;  %v677_v16 = vrot.slane %v1598_v13, 1  ;;  %v679_v8 = vrot.slane %v1609_v22, 1  ;;  %v793_v20 = vlaneseq }
  0x1f   : > { %v279_v2 = vsel %vm243_vm1, %v274_v61, %v278_v62  ;;  %v282_v9 = vor.u32 %v280_v4, %v278_v62  ;;  %v676_v15 = vrot.slane %v1255_v12, 1 }
  0x20   : > { %v554_v3 = vsel %vm243_vm1, %v549_v63, %v553_v0  ;;  %v557_v11 = vor.u32 %v555_v7, %v553_v0  ;;  %v680_v18 = vsel %vm675_vm3, %v677_v16, %v679_v8  ;;  %v794_v21 = vshrl.u32 %v793_v20, 7 }
  0x21   : > { %1388 = vmatpush3.bf16.msra.mxu0 %v1503_v40  ;;  %1322 = vmatmul.mubr.msk.bf16.gmra.mrb[4].mxu1 %vm295_vm2, %v263_v41  ;;  %v678_v17 = vsel %vm675_vm3, %v676_v15, %v677_v16 }
  0x22   : > { %1325 = vmatprep.mubr.msk.bf16.mxu1 %vm1519_vm0, %v1518_v1  ;;  %v795_v22 = vadd.s32 8, %v794_v21  ;;  %v1722_v23 = vmul.u32.u64.low 3817748708, %v794_v21  ;;  %v1723_v24 = vmul.u32.u64.high 3817748708, %v794_v21, %v1722_v23  ;;  %v796_v25 = vadd.s32 16, %v794_v21 }
  0x23   : > { %v797_v30 = vadd.s32 24, %v794_v21  ;;  %v1744_v48 = vadd.s32 48, %v794_v21  ;;  %v1750_v53 = vadd.s32 56, %v794_v21  ;;  %v1774_v7 = vadd.s32 64, %v794_v21 }
  0x24   : > { %1370 = vmatmul.mubr.msk.bf16.gmra.mrb[4].mxu0 %vm295_vm2, %v538_v46  ;;  %v1725_v26 = vmul.u32.u64.low 3817748708, %v795_v22  ;;  %v1726_v27 = vmul.u32.u64.high 3817748708, %v795_v22, %v1725_v26  ;;  %v1728_v28 = vmul.u32.u64.low 3817748708, %v796_v25  ;;  %v1729_v29 = vmul.u32.u64.high 3817748708, %v796_v25, %v1728_v28 }
  0x25   : > { %1373 = vmatprep.mubr.msk.bf16.mxu0 %vm1519_vm0, %v1518_v1  ;;  %v809_v31 = vshrl.u32 %v1723_v24, 3  ;;  %v1733_v33 = vmul.u32.u64.low 3817748708, %v797_v30  ;;  %v1734_v34 = vmul.u32.u64.high 3817748708, %v797_v30, %v1733_v33 }
  0x26   : > { %v820_v32 = vshrl.u32 %v1726_v27, 3  ;;  %v831_v37 = vshrl.u32 %v1729_v29, 3  ;;  %v1754_v56 = vmul.u32.u64.low 3817748708, %v1744_v48  ;;  %v1755_v57 = vmul.u32.u64.high 3817748708, %v1744_v48, %v1754_v56 }
  0x27   : > { %v810_v35 = vmul.u32 9, %v809_v31  ;;  %v842_v45 = vshrl.u32 %v1734_v34, 3  ;;  %v1765_v62 = vmul.u32.u64.low 3817748708, %v1750_v53  ;;  %v1766_v63 = vmul.u32.u64.high 3817748708, %v1750_v53, %v1765_v62 }
  0x28   : > { %v821_v38 = vmul.u32 9, %v820_v32  ;;  %v832_v43 = vmul.u32 9, %v831_v37 }
  0x29   : > { %1326 = vmatmul.mubr.msk.bf16.gmra.mrb[8].mxu1 %vm295_vm2, %v271_v55  ;;  %v811_v40 = vsub.s32 %v794_v21, %v810_v35  ;;  %v843_v52 = vmul.u32 9, %v842_v45 }
  0x2a   : > { %1329 = vmatprep.mubr.msk.bf16.mxu1 %vm1519_vm0, %v1518_v1  ;;  %v833_v50 = vsub.s32 %v796_v25, %v832_v43  ;;  %v886_v25 = vshrl.u32 %v1766_v63, 3 }
  0x2b   : > { %vm902_vm4 = vcmp.ne.s32.totalorder %v811_v40, 0  ;;  %vm911_vm5 = vcmp.lt.s32.totalorder %v811_v40, 0  ;;  %v929_v49 = vadd.s32 9, %v811_v40  ;;  %v844_v60 = vsub.s32 %v797_v30, %v843_v52 }
  0x2c   : > { %1374 = vmatmul.mubr.msk.bf16.gmra.mrb[8].mxu0 %vm295_vm2, %v546_v58  ;;  %vm1746_vm6 = vmand %vm911_vm5, %vm902_vm4  ;;  %vm904_vm10 = vcmp.ne.s32.totalorder %v833_v50, 0  ;;  %vm913_vm11 = vcmp.lt.s32.totalorder %v833_v50, 0  ;;  %v931_v0 = vadd.s32 9, %v833_v50  ;;  %v887_v34 = vmul.u32 9, %v886_v25 }
  0x2d   : > { %1377 = vmatprep.mubr.msk.bf16.mxu0 %vm1519_vm0, %v1518_v1  ;;  %v938_v58 = vsel %vm1746_vm6, %v929_v49, %v811_v40  ;;  %vm1770_vm13 = vmand %vm913_vm11, %vm904_vm10  ;;  %vm905_vm14 = vcmp.ne.s32.totalorder %v844_v60, 0  ;;  %vm914_vm15 = vcmp.lt.s32.totalorder %v844_v60, 0  ;;  %v932_v16 = vadd.s32 9, %v844_v60 }
  0x2e   : > { %vm947_vm12 = vcmp.lt.s32.totalorder %v938_v58, 8  ;;  %v940_v15 = vsel %vm1770_vm13, %v931_v0, %v833_v50  ;;  %vm1790_vm1 = vmand %vm914_vm15, %vm905_vm14 }
  0x2f   : > { %v941_v29 = vsel %vm1790_vm1, %v932_v16, %v844_v60 }
  0x31   : > { %1330 = vmatmul.mubr.msk.bf16.gmra.mrb[12].mxu1 %vm295_vm2, %v279_v2 }
  0x32   : > { %1333 = vmatprep.mubr.msk.bf16.mxu1 %vm1519_vm0, %v1518_v1 }
  0x34   : > { %1378 = vmatmul.mubr.msk.bf16.gmra.mrb[12].mxu0 %vm295_vm2, %v554_v3 }
  0x35   : > { %1381 = vmatprep.mubr.msk.bf16.mxu0 %vm1519_vm0, %v1518_v1 }
  0x39   : > { %1334 = vmatmul.mubr.msk.bf16.gmra.mrb[16].mxu1 %vm295_vm2, %v282_v9 }
  0x3a   : > { %1341 = vmatprep.mubr.msk.bf16.mxu1 %vm1519_vm0, %v1518_v1 }
  0x3c   : > { %1382 = vmatmul.mubr.msk.bf16.gmra.mrb[16].mxu0 %vm295_vm2, %v557_v11  ;;  %v1777_v11 = vsel %vm947_vm12, 1.0, %v1518_v1 }
  0x3d   : > { %1389 = vmatprep.mubr.msk.bf16.mxu0 %vm1519_vm0, %v1518_v1 }
  0x41   : > { %1342 = vmatmul.mubr.msk.bf16.vlgmr.msra.gmra.mrb[0].mxu1 %vm295_vm2, %v1584_v5  ;;  %v681_v5 = vrot.slane %v1633_v39, 1  ;;  %v799_v39 = vadd.s32 40, %v794_v21 }
  0x42   : > { %1345 = vmatprep.mubr.msk.bf16.mxu1 %vm1519_vm0, %v1518_v1 }
  0x43   : > { %v682_v13 = vsel %vm675_vm3, %v679_v8, %v681_v5  ;;  %v1741_v46 = vmul.u32.u64.low 3817748708, %v799_v39  ;;  %v1742_v47 = vmul.u32.u64.high 3817748708, %v799_v39, %v1741_v46 }
  0x44   : > { %1390 = vmatmul.mubr.msk.bf16.vlgmr.msra.gmra.mrb[0].mxu0 %vm295_vm2, %v678_v17 }
  0x45   : > { %1393 = vmatprep.mubr.msk.bf16.mxu0 %vm1519_vm0, %v1518_v1  ;;  %v864_v61 = vshrl.u32 %v1742_v47, 3 }
  0x47   : > { %v865_v10 = vmul.u32 9, %v864_v61 }
  0x49   : > { %1346 = vmatmul.mubr.msk.bf16.gmra.mrb[4].mxu1 %vm295_vm2, %v1587_v6  ;;  %v683_v6 = vrot.slane %v1505_v54, 1  ;;  %v866_v24 = vsub.s32 %v799_v39, %v865_v10 }
  0x4a   : > { %1349 = vmatprep.mubr.msk.bf16.mxu1 %vm1519_vm0, %v1518_v1 }
  0x4b   : > { %v684_v19 = vsel %vm675_vm3, %v681_v5, %v683_v6  ;;  %v875_v5 = vshrl.u32 %v1755_v57, 3  ;;  %vm949_vm3 = vcmp.lt.s32.totalorder %v940_v15, 8  ;;  %vm907_vm6 = vcmp.ne.s32.totalorder %v866_v24, 0 }
  0x4c   : > { %1394 = vmatmul.mubr.msk.bf16.gmra.mrb[4].mxu0 %vm295_vm2, %v680_v18  ;;  %v1809_v37 = vsel %vm949_vm3, 1.0, %v1518_v1  ;;  %v934_v43 = vadd.s32 9, %v866_v24 }
  0x4d   : > { %1397 = vmatprep.mubr.msk.bf16.mxu0 %vm1519_vm0, %v1518_v1  ;;  %v876_v30 = vmul.u32 9, %v875_v5 }
  0x51   : > { %1350 = vmatmul.mubr.msk.bf16.gmra.mrb[8].mxu1 %vm295_vm2, %v1601_v14  ;;  %v1227_v14 = vcombine.low %v1643_v44, %v1643_v44  ;;  %v822_v44 = vsub.s32 %v795_v22, %v821_v38 }
  0x52   : > { %1353 = vmatprep.mubr.msk.bf16.mxu1 %vm1519_vm0, %v1518_v1 }
  0x53   : > { %vm903_vm7 = vcmp.ne.s32.totalorder %v822_v44, 0  ;;  %vm912_vm8 = vcmp.lt.s32.totalorder %v822_v44, 0  ;;  %v930_v54 = vadd.s32 9, %v822_v44 }
  0x54   : > { %1398 = vmatmul.mubr.msk.bf16.gmra.mrb[8].mxu0 %vm295_vm2, %v682_v13  ;;  %vm1759_vm9 = vmand %vm912_vm8, %vm903_vm7  ;;  %vm916_vm7 = vcmp.lt.s32.totalorder %v866_v24, 0  ;;  %vm950_vm8 = vcmp.lt.s32.totalorder %v941_v29, 8 }
  0x55   : > { %1401 = vmatprep.mubr.msk.bf16.mxu0 %vm1519_vm0, %v1518_v1  ;;  %v939_v2 = vsel %vm1759_vm9, %v930_v54, %v822_v44  ;;  %v877_v44 = vsub.s32 %v1744_v48, %v876_v30  ;;  %vm1822_vm10 = vmand %vm916_vm7, %vm907_vm6  ;;  %v1827_v52 = vsel %vm950_vm8, 1.0, %v1518_v1  ;;  %v888_v48 = vsub.s32 %v1750_v53, %v887_v34 }
  0x56   : > { %v943_v58 = vsel %vm1822_vm10, %v934_v43, %v866_v24 }
  0x57   : > { %vm908_vm11 = vcmp.ne.s32.totalorder %v877_v44, 0  ;;  %vm917_vm12 = vcmp.lt.s32.totalorder %v877_v44, 0  ;;  %v935_v63 = vadd.s32 9, %v877_v44  ;;  %vm909_vm14 = vcmp.ne.s32.totalorder %v888_v48, 0 }
  0x58   : > { %vm918_vm15 = vcmp.lt.s32.totalorder %v888_v48, 0  ;;  %vm1842_vm1 = vmand %vm917_vm12, %vm908_vm11  ;;  %v936_v15 = vadd.s32 9, %v888_v48 }
  0x59   : > { %1354 = vmatmul.mubr.msk.bf16.gmra.mrb[12].mxu1 %vm295_vm2, %v1626_v36  ;;  %v798_v36 = vadd.s32 32, %v794_v21  ;;  %vm1853_vm3 = vmand %vm918_vm15, %vm909_vm14 }
  0x5a   : > { %1357 = vmatprep.mubr.msk.bf16.mxu1 %vm1519_vm0, %v1518_v1 }
  0x5b   : > { %v1737_v41 = vmul.u32.u64.low 3817748708, %v798_v36  ;;  %v1738_v42 = vmul.u32.u64.high 3817748708, %v798_v36, %v1737_v41 }
  0x5c   : > { %1402 = vmatmul.mubr.msk.bf16.gmra.mrb[12].mxu0 %vm295_vm2, %v684_v19 }
  0x5d   : > { %1405 = vmatprep.mubr.msk.bf16.mxu0 %vm1519_vm0, %v1518_v1  ;;  %v853_v55 = vshrl.u32 %v1738_v42, 3  ;;  %vm948_vm0 = vcmp.lt.s32.totalorder %v939_v2, 8 }
  0x5e   : > { %v1795_v23 = vsel %vm948_vm0, 1.0, %v1518_v1  ;;  %vm952_vm0 = vcmp.lt.s32.totalorder %v943_v58, 8 }
  0x5f   : > { %v854_v4 = vmul.u32 9, %v853_v55 }
  0x61   : > { %1358 = vmatmul.mubr.msk.bf16.gmra.mrb[16].mxu1 %vm295_vm2, %v1227_v14  ;;  %v855_v18 = vsub.s32 %v798_v36, %v854_v4 }
  0x63   : > { %vm906_vm4 = vcmp.ne.s32.totalorder %v855_v18, 0  ;;  %vm915_vm5 = vcmp.lt.s32.totalorder %v855_v18, 0  ;;  %v933_v33 = vadd.s32 9, %v855_v18 }
  0x64   : > { %1406 = vmatmul.mubr.msk.bf16.gmra.mrb[16].mxu0 %vm295_vm2, %v683_v6  ;;  %v1783_v13 = vmul.u32.u64.low 3817748708, %v1774_v7  ;;  %v1784_v6 = vmul.u32.u64.high 3817748708, %v1774_v7, %v1783_v13  ;;  %vm974_vm2 = vcmask 130048   ;;  %vm1812_vm9 = vmand %vm915_vm5, %vm906_vm4 }
  0x65   : > { %v942_v54 = vsel %vm1812_vm9, %v933_v33, %v855_v18 }
  0x66   : > { %v897_v45 = vshrl.u32 %v1784_v6, 3  ;;  %vm951_vm13 = vcmp.lt.s32.totalorder %v942_v54, 8  ;;  %v1858_v6 = vsel %vm952_vm0, 1.0, %v1518_v1 }
  0x67   : > { %v1847_v10 = vsel %vm951_vm13, 1.0, %v1518_v1 }
  0x68   : > { %v898_v59 = vmul.u32 9, %v897_v45 }
  0x6a   : > { %v899_v16 = vsub.s32 %v1774_v7, %v898_v59 }
  0x6c   : > { %vm910_vm4 = vcmp.ne.s32.totalorder %v899_v16, 0  ;;  %vm919_vm5 = vcmp.lt.s32.totalorder %v899_v16, 0  ;;  %v937_v29 = vadd.s32 9, %v899_v16 }
  0x6d   : > { %vm1869_vm8 = vmand %vm919_vm5, %vm910_vm4 }
  0x6e   : > { %v946_v43 = vsel %vm1869_vm8, %v937_v29, %v899_v16 }
  0x6f   : > { %vm955_vm9 = vcmp.lt.s32.totalorder %v946_v43, 8 }
  0x70   : > { %v964_v59 = vsel %vm955_vm9, 1.0, %v1518_v1 }
 0x114   : > { %v441_v9 = vpop.f32.mrb[0].mxu1 }
 0x115   : > { %v1343_v12 = vpop.f32.mrb[1].mxu1 }
 0x116   : > { %v444_v8 = vpop.f32.mrb[2].mxu1 }
 0x117   : > { %v746_v17 = vpop.f32.mrb[0].mxu0  ;;  %v1344_v20 = vpop.f32.mrb[3].mxu1 }
 0x118   : > { %v1786_v19 = vadd.f32 %v746_v17, %v441_v9  ;;  %v1391_v14 = vpop.f32.mrb[1].mxu0 }
 0x119   : > { %v749_v22 = vpop.f32.mrb[2].mxu0  ;;  %v944_v14 = vsel %vm1842_vm1, %v935_v63, %v877_v44 }
 0x11a   : > { %v965_v26 = vmul.f32 %v1786_v19, %v1777_v11  ;;  %v1800_v27 = vadd.f32 %v749_v22, %v444_v8  ;;  %v1392_v28 = vpop.f32.mrb[3].mxu0  ;;  %v945_v22 = vsel %vm1853_vm3, %v936_v15, %v888_v48  ;;  %vm953_vm6 = vcmp.lt.s32.totalorder %v944_v14, 8 }
 0x11b   : > { %vm954_vm7 = vcmp.lt.s32.totalorder %v945_v22, 8 }
 0x11c   : > { %v966_v31 = vmul.f32 %v1800_v27, %v1795_v23  ;;  %v449_v32 = vpop.f32.mrb[4].mxu1  ;;  %v975_v35 = vsel %vm974_vm2, %v965_v26, 0.0 }
 0x11d   : > { %v1347_v38 = vpop.f32.mrb[5].mxu1 }
 0x11e   : > { %v976_v36 = vsel %vm974_vm2, %v966_v31, 0.0  ;;  %v452_v42 = vpop.f32.mrb[6].mxu1 }
 0x11f   : > { %v977_v40 = vadd.f32 %v976_v36, %v975_v35  ;;  %v754_v41 = vpop.f32.mrb[4].mxu0  ;;  %v1348_v49 = vpop.f32.mrb[7].mxu1  ;;  %v1874_v35 = vsel %vm953_vm6, 1.0, %v1518_v1 }
 0x120   : > { %v1818_v46 = vadd.f32 %v754_v41, %v449_v32  ;;  %v1395_v47 = vpop.f32.mrb[5].mxu0 }
 0x121   : > { %v757_v51 = vpop.f32.mrb[6].mxu0 }
 0x122   : > { %v967_v55 = vmul.f32 %v1818_v46, %v1809_v37  ;;  %v1834_v56 = vadd.f32 %v757_v51, %v452_v42  ;;  %v1396_v57 = vpop.f32.mrb[7].mxu0  ;;  %v1877_v42 = vsel %vm954_vm7, 1.0, %v1518_v1 }
 0x124   : > { %v978_v60 = vsel %vm974_vm2, %v967_v55, 0.0  ;;  %v968_v61 = vmul.f32 %v1834_v56, %v1827_v52  ;;  %v457_v53 = vpop.f32.mrb[8].mxu1 }
 0x125   : > { %v979_v62 = vadd.f32 %v978_v60, %v977_v40  ;;  %v1351_v2 = vpop.f32.mrb[9].mxu1 }
 0x126   : > { %v980_v0 = vsel %vm974_vm2, %v968_v61, 0.0  ;;  %v460_v12 = vpop.f32.mrb[10].mxu1 }
 0x127   : > { %v981_v4 = vadd.f32 %v980_v0, %v979_v62  ;;  %v762_v9 = vpop.f32.mrb[8].mxu0  ;;  %v1352_v18 = vpop.f32.mrb[11].mxu1 }
 0x128   : > { %v1850_v17 = vadd.f32 %v762_v9, %v457_v53  ;;  %v1399_v8 = vpop.f32.mrb[9].mxu0 }
 0x129   : > { %v765_v13 = vpop.f32.mrb[10].mxu0 }
 0x12a   : > { %v969_v20 = vmul.f32 %v1850_v17, %v1847_v10  ;;  %v1414_v7 = vadd.f32 %v765_v13, %v460_v12  ;;  %v1400_v21 = vpop.f32.mrb[11].mxu0 }
 0x12c   : > { %v982_v24 = vsel %vm974_vm2, %v969_v20, 0.0  ;;  %v970_v25 = vmul.f32 %v1414_v7, %v1858_v6  ;;  %v465_v28 = vpop.f32.mrb[12].mxu1 }
 0x12d   : > { %v983_v26 = vadd.f32 %v982_v24, %v981_v4  ;;  %v1355_v31 = vpop.f32.mrb[13].mxu1 }
 0x12e   : > { %v984_v30 = vsel %vm974_vm2, %v970_v25, 0.0  ;;  %v468_v36 = vpop.f32.mrb[14].mxu1 }
 0x12f   : > { %v985_v33 = vadd.f32 %v984_v30, %v983_v26  ;;  %v770_v34 = vpop.f32.mrb[12].mxu0  ;;  %v1356_v40 = vpop.f32.mrb[15].mxu1 }
 0x130   : > { %v1415_v38 = vadd.f32 %v770_v34, %v465_v28  ;;  %v1403_v39 = vpop.f32.mrb[13].mxu0 }
 0x131   : > { %v773_v41 = vpop.f32.mrb[14].mxu0 }
 0x132   : > { %v971_v44 = vmul.f32 %v1415_v38, %v1874_v35  ;;  %v1416_v45 = vadd.f32 %v773_v41, %v468_v36  ;;  %v1404_v47 = vpop.f32.mrb[15].mxu0 }
 0x134   : > { %v986_v49 = vsel %vm974_vm2, %v971_v44, 0.0  ;;  %v972_v50 = vmul.f32 %v1416_v45, %v1877_v42  ;;  %v473_v54 = vpop.f32.mrb[16].mxu1 }
 0x135   : > { %v987_v51 = vadd.f32 %v986_v49, %v985_v33  ;;  %v1359_v55 = vpop.f32.mrb[17].mxu1 }
 0x136   : > { %v988_v48 = vsel %vm974_vm2, %v972_v50, 0.0  ;;  %v476_v60 = vpop.f32.mrb[18].mxu1 }
 0x137   : > { %v989_v57 = vadd.f32 %v988_v48, %v987_v51  ;;  %v778_v58 = vpop.f32.mrb[16].mxu0  ;;  %v1360_v53 = vpop.f32.mrb[19].mxu1 }
 0x138   : > { %v1417_v61 = vadd.f32 %v778_v58, %v473_v54  ;;  %v1407_v62 = vpop.f32.mrb[17].mxu0 }
 0x139   : > { %v781_v63 = vpop.f32.mrb[18].mxu0 }
 0x13a   : > { %v973_v0 = vmul.f32 %v1417_v61, %v964_v59  ;;  %v1408_v2 = vpop.f32.mrb[19].mxu0 }
 0x13c   : > { %v990_v3 = vsel %vm974_vm2, %v973_v0, 0.0 }
 0x13d   : > { %v991_v4 = vadd.f32 %v990_v3, %v989_v57 }
 0x13f   : > { %v992_v9 = vrot.slane %v991_v4, 4 }
 0x141   : > { %v993_v12 = vadd.f32 %v992_v9, %v991_v4 }
 0x143   : > { %v994_v15 = vrot.slane %v993_v12, 2 }
 0x145   : > { %v995_v16 = vadd.f32 %v994_v15, %v993_v12  ;;  %v1264_v12 = vld [vmem:[%s1934_s3] ss:$0 sm:$0xff] }
 0x147   : > { %v996_v8 = vrot.slane %v995_v16, 1 }
 0x149   : > { %v997_v18 = vadd.f32 %v996_v8, %v995_v16 }
 0x14b   : > { %v998_v5 = vmul.f32 0.015625, %v997_v18 }
 0x14d   : > { %v999_v13 = vsub.f32 %v1786_v19, %v998_v5  ;;  %v1000_v1 = vsub.f32 %v1800_v27, %v998_v5  ;;  %v1001_v14 = vsub.f32 %v1818_v46, %v998_v5  ;;  %v1002_v20 = vsub.f32 %v1834_v56, %v998_v5 }
 0x14e   : > { %v1003_v21 = vsub.f32 %v1850_v17, %v998_v5  ;;  %v1004_v22 = vsub.f32 %v1414_v7, %v998_v5  ;;  %v1005_v24 = vsub.f32 %v1415_v38, %v998_v5  ;;  %v1006_v25 = vsub.f32 %v1416_v45, %v998_v5 }
 0x14f   : > { %v1007_v26 = vsub.f32 %v1417_v61, %v998_v5  ;;  %v1008_v28 = vmul.f32 %v999_v13, %v999_v13  ;;  %v1009_v29 = vmul.f32 %v1000_v1, %v1000_v1  ;;  %v1010_v30 = vmul.f32 %v1001_v14, %v1001_v14 }
 0x150   : > { %v1011_v31 = vmul.f32 %v1002_v20, %v1002_v20  ;;  %v1012_v33 = vmul.f32 %v1003_v21, %v1003_v21  ;;  %v1013_v56 = vmul.f32 %v1004_v22, %v1004_v22  ;;  %v1014_v36 = vmul.f32 %v1005_v24, %v1005_v24 }
 0x151   : > { %v1017_v32 = vmul.f32 %v1008_v28, %v1777_v11  ;;  %v1018_v19 = vmul.f32 %v1009_v29, %v1795_v23  ;;  %v1019_v27 = vmul.f32 %v1010_v30, %v1809_v37  ;;  %v1015_v11 = vmul.f32 %v1006_v25, %v1006_v25 }
 0x152   : > { %v1020_v17 = vmul.f32 %v1011_v31, %v1827_v52  ;;  %v1021_v38 = vmul.f32 %v1012_v33, %v1847_v10  ;;  %v1022_v23 = vmul.f32 %v1013_v56, %v1858_v6  ;;  %v1016_v43 = vmul.f32 %v1007_v26, %v1007_v26 }
 0x153   : > { %v1026_v46 = vsel %vm974_vm2, %v1017_v32, 0.0  ;;  %v1027_v7 = vsel %vm974_vm2, %v1018_v19, 0.0  ;;  %v1029_v39 = vsel %vm974_vm2, %v1019_v27, 0.0  ;;  %v1023_v44 = vmul.f32 %v1014_v36, %v1874_v35 }
 0x154   : > { %v1028_v34 = vadd.f32 %v1027_v7, %v1026_v46  ;;  %v1031_v41 = vsel %vm974_vm2, %v1020_v17, 0.0  ;;  %v1033_v52 = vsel %vm974_vm2, %v1021_v38, 0.0  ;;  %v1024_v47 = vmul.f32 %v1015_v11, %v1877_v42 }
 0x155   : > { %v1035_v49 = vsel %vm974_vm2, %v1022_v23, 0.0  ;;  %v1025_v50 = vmul.f32 %v1016_v43, %v964_v59  ;;  %v1037_v51 = vsel %vm974_vm2, %v1023_v44, 0.0  ;;  %v1263_v59 = vld [vmem:[%s1933_s2] ss:$0 sm:$0xff] }
 0x156   : > { %v1030_v40 = vadd.f32 %v1029_v39, %v1028_v34  ;;  %v1039_v6 = vsel %vm974_vm2, %v1024_v47, 0.0 }
 0x157   : > { %v1041_v55 = vsel %vm974_vm2, %v1025_v50, 0.0  ;;  %vm1139_vm2 = vcmask 125952  }
 0x158   : > { %v1032_v37 = vadd.f32 %v1031_v41, %v1030_v40 }
 0x15a   : > { %v1034_v45 = vadd.f32 %v1033_v52, %v1032_v37 }
 0x15c   : > { %v1036_v10 = vadd.f32 %v1035_v49, %v1034_v45 }
 0x15e   : > { %v1038_v54 = vadd.f32 %v1037_v51, %v1036_v10 }
 0x160   : > { %v1040_v48 = vadd.f32 %v1039_v6, %v1038_v54 }
 0x162   : > { %v1042_v57 = vadd.f32 %v1041_v55, %v1040_v48 }
 0x164   : > { %v1043_v58 = vrot.slane %v1042_v57, 4 }
 0x166   : > { %v1044_v35 = vadd.f32 %v1043_v58, %v1042_v57 }
 0x168   : > { %v1045_v60 = vrot.slane %v1044_v35, 2 }
 0x16a   : > { %v1046_v61 = vadd.f32 %v1045_v60, %v1044_v35 }
 0x16c   : > { %v1047_v62 = vrot.slane %v1046_v61, 1 }
 0x16e   : > { %v1048_v53 = vadd.f32 %v1047_v62, %v1046_v61 }
 0x170   : > { %v1049_v42 = vmul.f32 0.015625, %v1048_v53 }
 0x172   : > { %v1052_v63 = vadd.f32 1e-05, %v1049_v42 }
 0x174   : > { %1508 = vrsqrt.f32 %v1052_v63 }
 0x17e   : > { %v1509_v0 = vpop.eup %1508 }
 0x17f   : > { %v1054_v2 = vmul.f32 %v1509_v0, %v999_v13  ;;  %v1055_v3 = vmul.f32 %v1509_v0, %v1000_v1  ;;  %v1056_v4 = vmul.f32 %v1509_v0, %v1001_v14  ;;  %v1057_v9 = vmul.f32 %v1509_v0, %v1002_v20 }
 0x180   : > { %v1058_v15 = vmul.f32 %v1509_v0, %v1003_v21  ;;  %v1059_v16 = vmul.f32 %v1509_v0, %v1004_v22  ;;  %v1060_v8 = vmul.f32 %v1509_v0, %v1005_v24  ;;  %v1061_v18 = vmul.f32 %v1509_v0, %v1006_v25 }
 0x181   : > { %v1062_v5 = vmul.f32 %v1509_v0, %v1007_v26  ;;  %v1069_v28 = vmul.f32 %v1263_v59, %v1054_v2  ;;  %v1070_v29 = vmul.f32 %v1263_v59, %v1055_v3  ;;  %v1071_v30 = vmul.f32 %v1263_v59, %v1056_v4 }
 0x182   : > { %v1072_v31 = vmul.f32 %v1263_v59, %v1057_v9  ;;  %v1073_v32 = vmul.f32 %v1263_v59, %v1058_v15  ;;  %v1074_v13 = vmul.f32 %v1263_v59, %v1059_v16  ;;  %v1075_v1 = vmul.f32 %v1263_v59, %v1060_v8 }
 0x183   : > { %v1076_v14 = vmul.f32 %v1263_v59, %v1061_v18  ;;  %v1077_v20 = vmul.f32 %v1263_v59, %v1062_v5  ;;  %v1084_v19 = vadd.f32 %v1264_v12, %v1069_v28  ;;  %v1085_v33 = vadd.f32 %v1264_v12, %v1070_v29 }
 0x184   : > { %v1086_v27 = vadd.f32 %v1264_v12, %v1071_v30  ;;  %v1087_v46 = vadd.f32 %v1264_v12, %v1072_v31  ;;  %v1088_v56 = vadd.f32 %v1264_v12, %v1073_v32  ;;  %v1089_v21 = vadd.f32 %v1264_v12, %v1074_v13 }
 0x185   : > { %v1090_v22 = vadd.f32 %v1264_v12, %v1075_v1  ;;  %v1091_v24 = vadd.f32 %v1264_v12, %v1076_v14  ;;  %v1092_v25 = vadd.f32 %v1264_v12, %v1077_v20  ;;  %v1093_v26 = vmax.f32 %v1084_v19, 0.0 }
 0x186   : > { %v1094_v17 = vmax.f32 %v1085_v33, 0.0  ;;  %v1095_v7 = vmax.f32 %v1086_v27, 0.0  ;;  %v1096_v34 = vmax.f32 %v1087_v46, 0.0  ;;  %v1097_v36 = vmax.f32 %v1088_v56, 0.0 }
 0x187   : > { %v1098_v38 = vmax.f32 %v1089_v21, 0.0  ;;  %v1099_v39 = vmax.f32 %v1090_v22, 0.0  ;;  %v1100_v40 = vmax.f32 %v1091_v24, 0.0  ;;  %v1101_v11 = vmax.f32 %v1092_v25, 0.0 }
 0x188   : > { %v1276_v23 = vpack.c.bf16 %v1093_v26, %v1093_v26  ;;  %v1277_v41 = vpack.c.bf16 %v1094_v17, %v1094_v17  ;;  %v1278_v37 = vpack.c.bf16 %v1095_v7, %v1095_v7  ;;  %v1279_v43 = vpack.c.bf16 %v1096_v34, %v1096_v34 }
 0x189   : > { %v1280_v44 = vpack.c.bf16 %v1097_v36, %v1097_v36  ;;  %v1281_v52 = vpack.c.bf16 %v1098_v38, %v1098_v38  ;;  %v1282_v45 = vpack.c.bf16 %v1099_v39, %v1099_v39  ;;  %v1283_v47 = vpack.c.bf16 %v1100_v40, %v1100_v40 }
 0x18a   : > { %v1284_v49 = vpack.c.bf16 %v1101_v11, %v1101_v11  ;;  %1140 = vst.msk [vmem:[%s197_s16] sm:$0xf] %vm1139_vm2, %v1276_v23  ;;  %1141 = vst.msk [vmem:[%s197_s16 + $0x4] sm:$0xf] %vm1139_vm2, %v1277_v41 }
 0x18b   : > { %1142 = vst.msk [vmem:[%s197_s16 + $0x8] sm:$0xf] %vm1139_vm2, %v1278_v37  ;;  %1143 = vst.msk [vmem:[%s197_s16 + $0xc] sm:$0xf] %vm1139_vm2, %v1279_v43 }
 0x18c   : > { %1144 = vst.msk [vmem:[%s197_s16 + $0x10] sm:$0xf] %vm1139_vm2, %v1280_v44  ;;  %1145 = vst.msk [vmem:[%s197_s16 + $0x14] sm:$0xf] %vm1139_vm2, %v1281_v52 }
 0x18d   : > { %1146 = vst.msk [vmem:[%s197_s16 + $0x18] sm:$0xf] %vm1139_vm2, %v1282_v45  ;;  %1147 = vst.msk [vmem:[%s197_s16 + $0x1c] sm:$0xf] %vm1139_vm2, %v1283_v47 }
 0x18e   : > { %1148 = vst.msk [vmem:[%s197_s16 + $0x20] sm:$0xf] %vm1139_vm2, %v1284_v49 }
 0x18f PF: > { %s14_s15 = sadd.s32 1, %s1516_s15  }
 0x190   : > { %p11_p4 = scmp.ge.s32.totalorder %s14_s15, 4  }
 0x192   :  { %13 = sbr.rel (!%p11_p4) target bundleno = 1 (0x1), region = 69 }

// kernel: forward.12
= control target key start
LH: loop header
LB: loop body
LE: loop exit
PB: predicated region body
PF: predicated region fallthrough
CT: control target
= control target key end

     0   :  { %s1049_s15 = smov 0   ;;  %s1162_s0 = inlined_call_operand.vmem [shape: bf16[2,26,64], index: 0, kind: input, shape index: {}]   ;;  %s1163_s1 = inlined_call_operand.vmem [shape: bf16[4,64,32], index: 1, kind: input, shape index: {}]   ;;  %s1164_s2 = inlined_call_operand.vmem [shape: f32[1,32], index: 2, kind: input, shape index: {}]   ;;  %s1165_s3 = inlined_call_operand.vmem [shape: f32[1,32], index: 3, kind: input, shape index: {}]   ;;  %s1166_s4 = inlined_call_operand.vmem [shape: bf16[2,20,32], index: 4, kind: output, shape index: {}]  }
   0x1 LB: > { %s819_s16 = sadd.s32 4294967295, %s1021_s15   ;;  %p823_p0 = scmp.ge.s32.totalorder %s1021_s15, 1  ;;  %s1021_s15 = sphi %s1049_s15, %s14_s15  }
   0x2   : > { %p162_p1 = scmp.lt.s32.totalorder %s1021_s15, 3 }
   0x4   : > { %p163_p2 = pnand %p823_p0, %p162_p1 }
   0x5   : > { %v991_v0 = vld [vmem:[%s1163_s1 + $0x20] sm:$0xff] (!%p163_p2)   ;;  %p188_p3 = scmp.lt.s32.totalorder (!%p163_p2), %s819_s16, 1  ;;  %v993_v2 = vld [vmem:[%s1163_s1 + $0x28] sm:$0xff] (!%p163_p2)   ;;  %v995_v4 = vld [vmem:[%s1163_s1 + $0x30] sm:$0xff] (!%p163_p2)   ;;  %vm228_vm0 = vsmask.f32 (!%p163_p2), 7424  ;;  %v623_v48 = vlaneseq (!%p163_p2) }
   0x6   : > { %166 = sbr.rel (%p163_p2) target bundleno = 333 (0x14d), region = 36  ;;  %v992_v1 = vld [vmem:[%s1163_s1 + $0x40] sm:$0xff] (!%p163_p2)   ;;  %916 = vmatprep.subr.bf16.mxu1 (!%p163_p2), %v991_v0  ;;  %v994_v3 = vld [vmem:[%s1163_s1 + $0x48] sm:$0xff] (!%p163_p2)   ;;  %v996_v5 = vld [vmem:[%s1163_s1 + $0x50] sm:$0xff] (!%p163_p2)   ;;  %vm268_vm1 = vcmask (!%p163_p2), 523264   ;;  %vm538_vm3 = vcmask (!%p163_p2), 1044480  }
   0x7   : > { %940 = vmatprep.subr.bf16.mxu0 (!%p163_p2), %v992_v1  ;;  %917 = vmatpush3.bf16.msra.mxu1 (!%p163_p2), %v991_v0  ;;  %v997_v6 = vld [vmem:[%s1163_s1 + $0x38] sm:$0xff] (!%p163_p2)   ;;  %v1001_v10 = vld [vmem:[%s1163_s1] sm:$0xff] (!%p163_p2)   ;;  %v1005_v28 = vld [vmem:[%s1163_s1 + $0x8] sm:$0xff] (!%p163_p2)   ;;  %vm426_vm2 = vsmask.f32 (!%p163_p2), 5376  ;;  %v624_v49 = vshrl.u32 (!%p163_p2), %v623_v48, 7 }
   0x8   : > { %941 = vmatpush3.bf16.msra.mxu0 (!%p163_p2), %v992_v1  ;;  %918 = vmatprep.subr.bf16.mxu1 (!%p163_p2), %v993_v2  ;;  %v998_v7 = vld [vmem:[%s1163_s1 + $0x58] sm:$0xff] (!%p163_p2)   ;;  %v1004_v21 = vld [vmem:[%s1163_s1 + $0x60] sm:$0xff] (!%p163_p2)   ;;  %v1007_v36 = vld [vmem:[%s1163_s1 + $0x10] sm:$0xff] (!%p163_p2)  }
   0x9   : > { %942 = vmatprep.subr.bf16.mxu0 (!%p163_p2), %v994_v3  ;;  %v1006_v39 = vld [vmem:[%s1163_s1 + $0x68] sm:$0xff] (!%p163_p2)   ;;  %v1009_v43 = vld [vmem:[%s1163_s1 + $0x18] sm:$0xff] (!%p163_p2)   ;;  %v1008_v44 = vld [vmem:[%s1163_s1 + $0x70] sm:$0xff] (!%p163_p2)   ;;  %v626_v50 = vadd.s32 (!%p163_p2), 16, %v624_v49  ;;  %v625_v51 = vadd.s32 (!%p163_p2), 8, %v624_v49 }
   0xa   : > { %v1010_v46 = vld [vmem:[%s1163_s1 + $0x78] sm:$0xff] (!%p163_p2)   ;;  %v1129_v52 = vmul.u32.u64.low (!%p163_p2), 3435973837, %v624_v49  ;;  %v1130_v53 = vmul.u32.u64.high 3435973837, %v624_v49, %v1129_v52 }
   0xb   : > { %919 = vmatpush3.bf16.msra.mxu1 (!%p163_p2), %v993_v2  ;;  %v1132_v54 = vmul.u32.u64.low (!%p163_p2), 3435973837, %v626_v50  ;;  %v1133_v55 = vmul.u32.u64.high 3435973837, %v626_v50, %v1132_v54  ;;  %v1135_v56 = vmul.u32.u64.low (!%p163_p2), 3435973837, %v625_v51  ;;  %v1136_v57 = vmul.u32.u64.high 3435973837, %v625_v51, %v1135_v56 }
   0xc   : > { %943 = vmatpush3.bf16.msra.mxu0 (!%p163_p2), %v994_v3  ;;  %920 = vmatprep.subr.bf16.mxu1 (!%p163_p2), %v995_v4  ;;  %v633_v58 = vshrl.u32 (!%p163_p2), %v1130_v53, 2 }
   0xd   : > { %s1168_s16 = smov (!%p188_p3, %s819_s16), 1  ;;  %944 = vmatprep.subr.bf16.mxu0 %v996_v5  ;;  %v655_v59 = vshrl.u32 %v1133_v55, 2  ;;  %v644_v60 = vshrl.u32 %v1136_v57, 2 }
   0xe   : > { %s888_s27 = sshll.u32 %s1168_s16, 4  ;;  %v634_v61 = vmul.u32 5, %v633_v58  ;;  %s975_s7 = smul.u32 12, %s1168_s16 }
   0xf   : > { %s1081_s6 = scalar_lea.vmem %s1162_s0, %s888_s27  ;;  %921 = vmatpush3.bf16.msra.mxu1 %v995_v4  ;;  %v656_v62 = vmul.u32 5, %v655_v59  ;;  %v645_v63 = vmul.u32 5, %v644_v60 }
  0x10   : > { %v999_v8 = vld [vmem:[%s1081_s6] sm:$0xff]   ;;  %v1000_v9 = vld [vmem:[%s1081_s6 + $0x8] ss:$0 sps:$4 sm:$0x77]   ;;  %945 = vmatpush3.bf16.msra.mxu0 %v996_v5  ;;  %922 = vmatprep.subr.bf16.mxu1 %v997_v6  ;;  %v635_v0 = vsub.s32 %v624_v49, %v634_v61  ;;  %s197_s10 = scalar_lea.vmem %s1166_s4, %s975_s7 }
  0x11   : > { %v230_v11 = vshrl.u32 %v999_v8, 16  ;;  %v232_v12 = vshll.u32 %v999_v8, 16  ;;  %v237_v13 = vshll.u32 %v1000_v9, 16  ;;  %v241_v14 = vshrl.u32 %v1000_v9, 16  ;;  %v403_v15 = vld [vmem:[%s1081_s6] sm:$0xc]  ;;  %946 = vmatprep.subr.bf16.mxu0 %v998_v7 }
  0x12   : > { %v404_v16 = vld [vmem:[%s1081_s6 + $0x4] sm:$0xf]  ;;  %v1003_v20 = vld [vmem:[%s1081_s6 + $0x8] sm:$0x1f]   ;;  %v525_v37 = vld [vmem:[%s1081_s6] sm:$0x8]  ;;  %v657_v1 = vsub.s32 %v626_v50, %v656_v62  ;;  %v646_v2 = vsub.s32 %v625_v51, %v645_v63 }
  0x13   : > { %v234_v17 = vrot.slane %v232_v12, 1  ;;  %v239_v18 = vrot.slane %v237_v13, 1  ;;  %v858_v19 = vcombine.low %v403_v15, %v404_v16  ;;  %923 = vmatpush3.bf16.msra.mxu1 %v997_v6  ;;  %v436_v26 = vshrl.u32 %v1003_v20, 16  ;;  %v1012_v47 = vld [vmem:[%s1081_s6 + $0x8] ss:$0 sps:$4 sm:$0x33]  }
  0x14   : > { %947 = vmatpush3.bf16.msra.mxu0 %v998_v7  ;;  %928 = vmatprep.subr.bf16.mxu1 %v1001_v10  ;;  %v439_v27 = vshll.u32 %v1003_v20, 16  ;;  %v874_v40 = vcombine.low %v525_v37, %v404_v16  ;;  %v540_v41 = vrot.slane %v1003_v20, 3  ;;  %vm660_vm4 = vcmp.ne.s32.totalorder %v635_v0, 0  ;;  %v881_v62 = vld [vmem:[%s1164_s2] ss:$0 sm:$0xff] }
  0x15   : > { %v235_v22 = vor.u32 %v234_v17, %v230_v11  ;;  %v243_v23 = vor.u32 %v241_v14, %v239_v18  ;;  %v428_v24 = vshrl.u32 %v858_v19, 16  ;;  %v431_v25 = vshll.u32 %v858_v19, 16  ;;  %952 = vmatprep.subr.bf16.mxu0 %v1004_v21 }
  0x16   : > { %v438_v32 = vrot.slane %v436_v26, 2  ;;  %v441_v33 = vrot.slane %v439_v27, 3  ;;  %v539_v42 = vrot.slane %v874_v40, 3  ;;  %vm663_vm5 = vcmp.lt.s32.totalorder %v635_v0, 0 }
  0x17   : > { %v240_v29 = vsel %vm228_vm0, %v235_v22, %v239_v18  ;;  %v430_v30 = vrot.slane %v428_v24, 2  ;;  %v433_v31 = vrot.slane %v431_v25, 3  ;;  %vm662_vm6 = vcmp.ne.s32.totalorder %v657_v1, 0  ;;  %vm666_vm10 = vmand %vm663_vm5, %vm660_vm4 }
  0x18   : > { %924 = vmatprep.mubr.msk.bf16.mxu1 %vm268_vm1, %v240_v29  ;;  %v442_v35 = vor.u32 %v441_v33, %v438_v32  ;;  %v541_v45 = vsel %vm538_vm3, %v539_v42, %v540_v41  ;;  %vm665_vm7 = vcmp.lt.s32.totalorder %v657_v1, 0  ;;  %v669_v3 = vadd.s32 5, %v635_v0 }
  0x19   : > { %v434_v34 = vor.u32 %v433_v31, %v430_v30  ;;  %925 = vmatmul.mubr.msk.bf16.vlgmr.msra.gmra.mrb[0].mxu1 %vm268_vm1, %v243_v23  ;;  %vm661_vm8 = vcmp.ne.s32.totalorder %v646_v2, 0  ;;  %vm664_vm9 = vcmp.lt.s32.totalorder %v646_v2, 0  ;;  %vm668_vm11 = vmand %vm665_vm7, %vm662_vm6  ;;  %v671_v4 = vadd.s32 5, %v657_v1 }
  0x1a   : > { %929 = vmatpush3.bf16.msra.mxu1 %v1001_v10  ;;  %936 = vmatprep.mubr.msk.bf16.mxu1 %vm268_vm1, %v999_v8  ;;  %v670_v5 = vadd.s32 5, %v646_v2  ;;  %vm667_vm12 = vmand %vm664_vm9, %vm661_vm8  ;;  %v672_v7 = vsel %vm666_vm10, %v669_v3, %v635_v0  ;;  %v1023_v16 = vmov 0.0   ;;  %vm684_vm0 = vcmask 261120  }
  0x1b   : > { %930 = vmatprep.subr.bf16.mxu1 %v1005_v28  ;;  %v443_v38 = vsel %vm426_vm2, %v434_v34, %v442_v35  ;;  %v674_v9 = vsel %vm668_vm11, %v671_v4, %v657_v1  ;;  %vm675_vm13 = vcmp.lt.s32.totalorder %v672_v7, 4  ;;  %vm762_vm2 = vcmask 254976  }
  0x1c   : > { %948 = vmatprep.mubr.msk.bf16.mxu0 %vm268_vm1, %v443_v38  ;;  %v673_v11 = vsel %vm667_vm12, %v670_v5, %v646_v2  ;;  %vm677_vm14 = vcmp.lt.s32.totalorder %v674_v9, 4  ;;  %v678_v17 = vsel %vm675_vm13, 1.0, %v1023_v16  ;;  %v882_v2 = vld [vmem:[%s1165_s3] ss:$0 sm:$0xff] }
  0x1d   : > { %949 = vmatmul.mubr.msk.bf16.vlgmr.msra.gmra.mrb[0].mxu0 %vm268_vm1, %v442_v35  ;;  %vm676_vm15 = vcmp.lt.s32.totalorder %v673_v11, 4  ;;  %v680_v20 = vsel %vm677_vm14, 1.0, %v1023_v16 }
  0x1e   : > { %931 = vmatpush3.bf16.msra.mxu1 %v1005_v28  ;;  %953 = vmatpush3.bf16.msra.mxu0 %v1004_v21  ;;  %v679_v22 = vsel %vm676_vm15, 1.0, %v1023_v16 }
  0x1f   : > { %932 = vmatprep.subr.bf16.mxu1 %v1007_v36  ;;  %954 = vmatprep.subr.bf16.mxu0 %v1006_v39 }
  0x20   : > { %960 = vmatprep.mubr.msk.bf16.mxu0 %vm268_vm1, %v541_v45 }
  0x22   : > { %933 = vmatpush3.bf16.msra.mxu1 %v1007_v36  ;;  %955 = vmatpush3.bf16.msra.mxu0 %v1006_v39 }
  0x23   : > { %934 = vmatprep.subr.bf16.mxu1 %v1009_v43  ;;  %956 = vmatprep.subr.bf16.mxu0 %v1008_v44 }
  0x26   : > { %935 = vmatpush3.bf16.msra.mxu1 %v1009_v43  ;;  %957 = vmatpush3.bf16.msra.mxu0 %v1008_v44 }
  0x27   : > { %958 = vmatprep.subr.bf16.mxu0 %v1010_v46 }
  0x29   : > { %937 = vmatmul.mubr.msk.bf16.vlgmr.msra.gmra.mrb[0].mxu1 %vm268_vm1, %v1012_v47 }
  0x2a   : > { %959 = vmatpush3.bf16.msra.mxu0 %v1010_v46 }
  0x2d   : > { %961 = vmatmul.mubr.msk.bf16.vlgmr.msra.gmra.mrb[0].mxu0 %vm268_vm1, %v540_v41  ;;  %vm688_vm1 = vcmask 257024  }
  0xfc   : > { %v938_v6 = vpop.f32.mrb[0].mxu1 }
  0xfd   : > { %v389_v8 = vpop.f32.mrb[1].mxu1 }
  0xfe   : > { %v939_v10 = vpop.f32.mrb[2].mxu1 }
  0xff   : > { %v392_v12 = vpop.f32.mrb[3].mxu1 }
 0x100   : > { %v962_v13 = vpop.f32.mrb[0].mxu0 }
 0x101   : > { %v964_v14 = vadd.f32 %v962_v13, %v938_v6  ;;  %v606_v15 = vpop.f32.mrb[1].mxu0 }
 0x102   : > { %v965_v18 = vadd.f32 %v606_v15, %v389_v8  ;;  %v963_v19 = vpop.f32.mrb[2].mxu0 }
 0x103   : > { %v609_v21 = vpop.f32.mrb[3].mxu0  ;;  %v683_v25 = vmul.f32 %v964_v14, %v680_v20 }
 0x104   : > { %v681_v23 = vmul.f32 %v965_v18, %v678_v17  ;;  %v966_v24 = vadd.f32 %v609_v21, %v392_v12 }
 0x105   : > { %v689_v30 = vsel %vm688_vm1, %v683_v25, 0.0 }
 0x106   : > { %v682_v26 = vmul.f32 %v966_v24, %v679_v22  ;;  %v685_v27 = vsel %vm684_vm0, %v681_v23, 0.0 }
 0x108   : > { %v686_v28 = vsel %vm684_vm0, %v682_v26, 0.0 }
 0x109   : > { %v687_v29 = vadd.f32 %v686_v28, %v685_v27 }
 0x10b   : > { %v690_v31 = vadd.f32 %v689_v30, %v687_v29 }
 0x10d   : > { %v691_v32 = vrot.slane %v690_v31, 4 }
 0x10f   : > { %v692_v33 = vadd.f32 %v691_v32, %v690_v31 }
 0x111   : > { %v693_v34 = vrot.slane %v692_v33, 2 }
 0x113   : > { %v694_v35 = vadd.f32 %v693_v34, %v692_v33 }
 0x115   : > { %v695_v36 = vrot.slane %v694_v35, 1 }
 0x117   : > { %v696_v37 = vadd.f32 %v695_v36, %v694_v35 }
 0x119   : > { %v697_v38 = vmul.f32 0.0625, %v696_v37 }
 0x11b   : > { %v698_v39 = vsub.f32 %v965_v18, %v697_v38  ;;  %v699_v40 = vsub.f32 %v966_v24, %v697_v38  ;;  %v700_v41 = vsub.f32 %v964_v14, %v697_v38 }
 0x11d   : > { %v701_v42 = vmul.f32 %v698_v39, %v698_v39  ;;  %v702_v43 = vmul.f32 %v699_v40, %v699_v40  ;;  %v703_v44 = vmul.f32 %v700_v41, %v700_v41 }
 0x11f   : > { %v704_v45 = vmul.f32 %v701_v42, %v678_v17  ;;  %v705_v46 = vmul.f32 %v702_v43, %v679_v22  ;;  %v706_v47 = vmul.f32 %v703_v44, %v680_v20 }
 0x121   : > { %v707_v48 = vsel %vm684_vm0, %v704_v45, 0.0  ;;  %v708_v49 = vsel %vm684_vm0, %v705_v46, 0.0  ;;  %v710_v51 = vsel %vm688_vm1, %v706_v47, 0.0 }
 0x122   : > { %v709_v50 = vadd.f32 %v708_v49, %v707_v48 }
 0x124   : > { %v711_v52 = vadd.f32 %v710_v51, %v709_v50 }
 0x126   : > { %v712_v53 = vrot.slane %v711_v52, 4 }
 0x128   : > { %v713_v54 = vadd.f32 %v712_v53, %v711_v52 }
 0x12a   : > { %v714_v55 = vrot.slane %v713_v54, 2 }
 0x12c   : > { %v715_v56 = vadd.f32 %v714_v55, %v713_v54 }
 0x12e   : > { %v716_v57 = vrot.slane %v715_v56, 1 }
 0x130   : > { %v717_v58 = vadd.f32 %v716_v57, %v715_v56 }
 0x132   : > { %v718_v59 = vmul.f32 0.0625, %v717_v58 }
 0x134   : > { %v721_v60 = vadd.f32 1e-05, %v718_v59 }
 0x136   : > { %1013 = vrsqrt.f32 %v721_v60 }
 0x140   : > { %v1014_v61 = vpop.eup %1013 }
 0x141   : > { %v723_v63 = vmul.f32 %v1014_v61, %v698_v39  ;;  %v724_v0 = vmul.f32 %v1014_v61, %v699_v40  ;;  %v725_v1 = vmul.f32 %v1014_v61, %v700_v41 }
 0x143   : > { %v732_v3 = vmul.f32 %v881_v62, %v723_v63  ;;  %v733_v4 = vmul.f32 %v881_v62, %v724_v0  ;;  %v734_v5 = vmul.f32 %v881_v62, %v725_v1 }
 0x145   : > { %v741_v6 = vadd.f32 %v882_v2, %v732_v3  ;;  %v742_v7 = vadd.f32 %v882_v2, %v733_v4  ;;  %v743_v8 = vadd.f32 %v882_v2, %v734_v5 }
 0x147   : > { %v744_v9 = vmax.f32 %v741_v6, 0.0  ;;  %v745_v10 = vmax.f32 %v742_v7, 0.0  ;;  %v746_v11 = vmax.f32 %v743_v8, 0.0 }
 0x149   : > { %v889_v12 = vpack.c.bf16 %v744_v9, %v744_v9  ;;  %v890_v13 = vpack.c.bf16 %v745_v10, %v745_v10  ;;  %v891_v14 = vpack.c.bf16 %v746_v11, %v746_v11 }
 0x14b   : > { %760 = vst.msk [vmem:[%s197_s10] sm:$0xf] %vm688_vm1, %v889_v12  ;;  %761 = vst.msk [vmem:[%s197_s10 + $0x4] sm:$0xf] %vm688_vm1, %v890_v13 }
 0x14c   : > { %763 = vst.msk [vmem:[%s197_s10 + $0x8] sm:$0x3] %vm762_vm2, %v891_v14 }
 0x14d PF: > { %s14_s15 = sadd.s32 1, %s1021_s15  }
 0x14e   : > { %p11_p4 = scmp.ge.s32.totalorder %s14_s15, 4  }
 0x150   :  { %13 = sbr.rel (!%p11_p4) target bundleno = 1 (0x1), region = 69 }

// kernel: forward.13
= control target key start
LH: loop header
LB: loop body
LE: loop exit
PB: predicated region body
PF: predicated region fallthrough
CT: control target
= control target key end

     0   :  { %s1495_s15 = smov 0   ;;  %s1664_s0 = inlined_call_operand.vmem [shape: bf16[2,38,32], index: 0, kind: input, shape index: {}]   ;;  %s1665_s1 = inlined_call_operand.vmem [shape: bf16[9,32,32], index: 1, kind: input, shape index: {}]   ;;  %s1666_s2 = inlined_call_operand.vmem [shape: f32[1,32], index: 2, kind: input, shape index: {}]   ;;  %s1667_s3 = inlined_call_operand.vmem [shape: f32[1,32], index: 3, kind: input, shape index: {}]   ;;  %s1668_s4 = inlined_call_operand.vmem [shape: bf16[2,24,32], index: 4, kind: output, shape index: {}]  }
   0x1 LB: > { %s1174_s16 = sadd.s32 4294967295, %s1467_s15   ;;  %p1178_p0 = scmp.ge.s32.totalorder %s1467_s15, 1  ;;  %s1467_s15 = sphi %s1495_s15, %s14_s15  }
   0x2   : > { %p162_p1 = scmp.lt.s32.totalorder %s1467_s15, 3 }
   0x4   : > { %p163_p2 = pnand %p1178_p0, %p162_p1 }
   0x5   : > { %v1428_v0 = vld [vmem:[%s1665_s1 + $0x40] sm:$0xff] (!%p163_p2)   ;;  %p188_p3 = scmp.lt.s32.totalorder (!%p163_p2), %s1174_s16, 1  ;;  %v1429_v1 = vld [vmem:[%s1665_s1 + $0x10] sm:$0xff] (!%p163_p2)   ;;  %v1430_v2 = vld [vmem:[%s1665_s1 + $0x48] sm:$0xff] (!%p163_p2)   ;;  %vm222_vm0 = vsmask.f32 (!%p163_p2), 7424 }
   0x6   : > { %166 = sbr.rel (%p163_p2) target bundleno = 366 (0x16e), region = 36  ;;  %1340 = vmatprep.subr.bf16.mxu0 (!%p163_p2), %v1428_v0  ;;  %1308 = vmatprep.subr.bf16.mxu1 (!%p163_p2), %v1429_v1  ;;  %v1431_v3 = vld [vmem:[%s1665_s1 + $0x18] sm:$0xff] (!%p163_p2)   ;;  %v1437_v4 = vld [vmem:[%s1665_s1 + $0x50] sm:$0xff] (!%p163_p2)   ;;  %v1438_v5 = vld [vmem:[%s1665_s1] sm:$0xff] (!%p163_p2)   ;;  %vm548_vm1 = vsmask.f32 (!%p163_p2), 4352 }
   0x7   : > { %1341 = vmatpush3.bf16.msra.mxu0 (!%p163_p2), %v1428_v0  ;;  %1309 = vmatpush3.bf16.msra.mxu1 (!%p163_p2), %v1429_v1  ;;  %vm250_vm2 = vcmask (!%p163_p2), 261120   ;;  %v1439_v35 = vld [vmem:[%s1665_s1 + $0x58] sm:$0xff] (!%p163_p2)   ;;  %v1440_v36 = vld [vmem:[%s1665_s1 + $0x8] sm:$0xff] (!%p163_p2)   ;;  %v1444_v44 = vld [vmem:[%s1665_s1 + $0x20] sm:$0xff] (!%p163_p2)   ;;  %vm380_vm3 = vcmask (!%p163_p2), 1046528   ;;  %vm730_vm4 = vcmask (!%p163_p2), 1045504  }
   0x8   : > { %1342 = vmatprep.subr.bf16.mxu0 (!%p163_p2), %v1430_v2  ;;  %1310 = vmatprep.subr.bf16.mxu1 (!%p163_p2), %v1431_v3  ;;  %v1442_v48 = vld [vmem:[%s1665_s1 + $0x60] sm:$0xff] (!%p163_p2)   ;;  %v1446_v57 = vld [vmem:[%s1665_s1 + $0x28] sm:$0xff] (!%p163_p2)   ;;  %vm466_vm5 = vcmask (!%p163_p2), 1044480   ;;  %vm812_vm6 = vsmask.f32 (!%p163_p2), 5376 }
   0x9   : > { %v1445_v61 = vld [vmem:[%s1665_s1 + $0x68] sm:$0xff] (!%p163_p2)  }
   0xb   : > { %1343 = vmatpush3.bf16.msra.mxu0 (!%p163_p2), %v1430_v2  ;;  %1311 = vmatpush3.bf16.msra.mxu1 (!%p163_p2), %v1431_v3  ;;  %v1452_v2 = vld [vmem:[%s1665_s1 + $0x30] sm:$0xff] (!%p163_p2)  }
   0xc   : > { %1348 = vmatprep.subr.bf16.mxu0 (!%p163_p2), %v1437_v4  ;;  %1316 = vmatprep.subr.bf16.mxu1 (!%p163_p2), %v1438_v5 }
   0xd   : > { %s1670_s16 = smov (!%p188_p3, %s1174_s16), 1 }
   0xe   : > { %s1411_s25 = smul.u32 20, %s1670_s16 }
   0xf   : > { %s1412_s11 = smul.u32 12, %s1670_s16 }
  0x10   : > { %s1524_s30 = scalar_lea.vmem %s1664_s0, %s1411_s25 }
  0x11   : > { %v199_v6 = vld [vmem:[%s1524_s30] sm:$0xf]  ;;  %v200_v7 = vld [vmem:[%s1524_s30 + $0x4] sm:$0xf]  ;;  %v1532_v8 = vld [vmem:[%s1524_s30 + $0x8] sm:$0xf]  ;;  %s197_s14 = scalar_lea.vmem %s1668_s4, %s1412_s11 }
  0x12   : > { %v206_v9 = vld [vmem:[%s1524_s30 + $0xc] sm:$0x1]  ;;  %v1185_v10 = vcombine.low %v199_v6, %v200_v7  ;;  %v453_v11 = vld [vmem:[%s1524_s30] sm:$0x8]  ;;  %v711_v38 = vld [vmem:[%s1524_s30 + $0x4] sm:$0xc]  ;;  %v1228_v42 = vcombine.low %v200_v7, %v1532_v8  ;;  %v1191_v54 = vcombine.low %v1532_v8, %v1532_v8 }
  0x13   : > { %v1537_v12 = vld [vmem:[%s1524_s30 + $0xc] sm:$0xf]  ;;  %v1540_v13 = vcombine.low %v1532_v8, %v206_v9  ;;  %v1542_v14 = vcombine.low %v453_v11, %v200_v7  ;;  %v371_v37 = vld [vmem:[%s1524_s30] sm:$0xe]  ;;  %v1561_v39 = vld [vmem:[%s1524_s30 + $0x8] sm:$0xf] }
  0x14   : > { %v1219_v15 = vcombine.low %v1532_v8, %v1537_v12  ;;  %v224_v16 = vshrl.u32 %v1185_v10, 16  ;;  %v226_v17 = vshll.u32 %v1185_v10, 16  ;;  %v713_v40 = vld [vmem:[%s1524_s30 + $0xc] sm:$0xf]  ;;  %v714_v43 = vld [vmem:[%s1524_s30 + $0x10] sm:$0x3]  ;;  %v1200_v45 = vcombine.low %v371_v37, %v200_v7 }
  0x15   : > { %v231_v18 = vshll.u32 %v1540_v13, 16  ;;  %v235_v19 = vshrl.u32 %v1540_v13, 16  ;;  %v550_v20 = vshrl.u32 %v1542_v14, 16  ;;  %v553_v21 = vshll.u32 %v1542_v14, 16  ;;  %v803_v49 = vld [vmem:[%s1524_s30 + $0x10] sm:$0x7] }
  0x16   : > { %v228_v22 = vrot.slane %v226_v17, 1  ;;  %v558_v23 = vshrl.u32 %v1219_v15, 16  ;;  %v561_v24 = vshll.u32 %v1219_v15, 16  ;;  %v1238_v46 = vcombine.low %v711_v38, %v1561_v39  ;;  %v454_v60 = vld [vmem:[%s1524_s30 + $0xc] sm:$0x7] }
  0x17   : > { %v233_v25 = vrot.slane %v231_v18, 1  ;;  %v552_v26 = vrot.slane %v550_v20, 3  ;;  %v555_v27 = vrot.slane %v553_v21, 4  ;;  %v1239_v47 = vcombine.low %v713_v40, %v714_v43  ;;  %v899_v17 = vld [vmem:[%s1524_s30 + $0x4] sm:$0x8] }
  0x18   : > { %v229_v28 = vor.u32 %v228_v22, %v224_v16  ;;  %v560_v29 = vrot.slane %v558_v23, 3  ;;  %v563_v30 = vrot.slane %v561_v24, 4  ;;  %v381_v50 = vrot.slane %v1200_v45, 1  ;;  %v1453_v16 = vld [vmem:[%s1665_s1 + $0x78] sm:$0xff]   ;;  %v1456_v18 = vld [vmem:[%s1665_s1 + $0x80] sm:$0xff]   ;;  %v1457_v22 = vld [vmem:[%s1665_s1 + $0x88] sm:$0xff]  }
  0x19   : > { %v237_v31 = vor.u32 %v235_v19, %v233_v25  ;;  %v556_v32 = vor.u32 %v555_v27, %v552_v26  ;;  %v382_v51 = vrot.slane %v1540_v13, 1  ;;  %v731_v52 = vrot.slane %v1238_v46, 2  ;;  %v1454_v13 = vld [vmem:[%s1665_s1 + $0x38] sm:$0xff]  }
  0x1a   : > { %v234_v33 = vsel %vm222_vm0, %v229_v28, %v233_v25  ;;  %v564_v34 = vor.u32 %v563_v30, %v560_v29  ;;  %v732_v53 = vrot.slane %v1239_v47, 2  ;;  %v1583_v55 = vcombine.low %v713_v40, %v803_v49 }
  0x1b   : > { %1312 = vmatprep.mubr.msk.bf16.mxu1 %vm250_vm2, %v234_v33  ;;  %v1229_v56 = vcombine.low %v1537_v12, %v1537_v12  ;;  %v383_v58 = vsel %vm380_vm3, %v381_v50, %v382_v51  ;;  %v814_v62 = vshrl.u32 %v1238_v46, 16  ;;  %v817_v63 = vshll.u32 %v1238_v46, 16 }
  0x1c   : > { %v565_v41 = vsel %vm548_vm1, %v556_v32, %v564_v34  ;;  %1313 = vmatmul.mubr.msk.bf16.vlgmr.msra.gmra.mrb[0].mxu1 %vm250_vm2, %v237_v31  ;;  %v733_v59 = vsel %vm730_vm4, %v731_v52, %v732_v53  ;;  %v822_v0 = vshrl.u32 %v1583_v55, 16  ;;  %v825_v1 = vshll.u32 %v1583_v55, 16 }
  0x1d   : > { %1344 = vmatprep.mubr.msk.bf16.mxu0 %vm250_vm2, %v565_v41  ;;  %1317 = vmatpush3.bf16.msra.mxu1 %v1438_v5  ;;  %v1210_v3 = vcombine.low %v1532_v8, %v454_v60  ;;  %v816_v5 = vrot.slane %v814_v62, 2  ;;  %v819_v6 = vrot.slane %v817_v63, 3  ;;  %v1257_v19 = vcombine.low %v899_v17, %v1561_v39 }
  0x1e   : > { %1345 = vmatmul.mubr.msk.bf16.vlgmr.msra.gmra.mrb[0].mxu0 %vm250_vm2, %v564_v34  ;;  %1318 = vmatprep.subr.bf16.mxu1 %v1440_v36  ;;  %v824_v7 = vrot.slane %v822_v0, 2  ;;  %v827_v9 = vrot.slane %v825_v1, 3  ;;  %v909_v21 = vrot.slane %v1583_v55, 3  ;;  %v980_v24 = vlaneseq }
  0x1f   : > { %1349 = vmatpush3.bf16.msra.mxu0 %v1437_v4  ;;  %1320 = vmatprep.mubr.msk.bf16.mxu1 %vm250_vm2, %v1185_v10  ;;  %v1451_v4 = vld [vmem:[%s1665_s1 + $0x70] sm:$0xff]   ;;  %v467_v10 = vrot.slane %v1542_v14, 3  ;;  %v468_v11 = vrot.slane %v1210_v3, 3  ;;  %v820_v8 = vor.u32 %v819_v6, %v816_v5  ;;  %v908_v20 = vrot.slane %v1257_v19, 3 }
  0x20   : > { %1350 = vmatprep.subr.bf16.mxu0 %v1439_v35  ;;  %1352 = vmatprep.mubr.msk.bf16.mxu0 %vm250_vm2, %v1228_v42  ;;  %v828_v12 = vor.u32 %v827_v9, %v824_v7  ;;  %v981_v25 = vshrl.u32 %v980_v24, 7 }
  0x21   : > { %1319 = vmatpush3.bf16.msra.mxu1 %v1440_v36  ;;  %v469_v15 = vsel %vm466_vm5, %v467_v10, %v468_v11  ;;  %v910_v23 = vsel %vm466_vm5, %v908_v20, %v909_v21 }
  0x22   : > { %1324 = vmatprep.subr.bf16.mxu1 %v1444_v44  ;;  %v829_v14 = vsel %vm812_vm6, %v820_v8, %v828_v12  ;;  %v983_v26 = vadd.s32 16, %v981_v25  ;;  %v982_v27 = vadd.s32 8, %v981_v25 }
  0x23   : > { %1351 = vmatpush3.bf16.msra.mxu0 %v1439_v35  ;;  %v1633_v28 = vmul.u32.u64.low 2863311531, %v981_v25  ;;  %v1634_v29 = vmul.u32.u64.high 2863311531, %v981_v25, %v1633_v28 }
  0x24   : > { %1356 = vmatprep.subr.bf16.mxu0 %v1442_v48  ;;  %v1636_v30 = vmul.u32.u64.low 2863311531, %v983_v26  ;;  %v1637_v31 = vmul.u32.u64.high 2863311531, %v983_v26, %v1636_v30  ;;  %v1639_v32 = vmul.u32.u64.low 2863311531, %v982_v27  ;;  %v1640_v33 = vmul.u32.u64.high 2863311531, %v982_v27, %v1639_v32 }
  0x25   : > { %v990_v34 = vshrl.u32 %v1634_v29, 2 }
  0x26   : > { %v1012_v35 = vshrl.u32 %v1637_v31, 2  ;;  %v1001_v36 = vshrl.u32 %v1640_v33, 2 }
  0x27   : > { %v991_v37 = vmul.u32 6, %v990_v34 }
  0x28   : > { %1321 = vmatmul.mubr.msk.bf16.vlgmr.msra.gmra.mrb[0].mxu1 %vm250_vm2, %v1191_v54  ;;  %v1013_v38 = vmul.u32 6, %v1012_v35  ;;  %v1002_v39 = vmul.u32 6, %v1001_v36 }
  0x29   : > { %1325 = vmatpush3.bf16.msra.mxu1 %v1444_v44  ;;  %1328 = vmatprep.mubr.msk.bf16.mxu1 %vm250_vm2, %v383_v58  ;;  %v992_v40 = vsub.s32 %v981_v25, %v991_v37 }
  0x2a   : > { %1353 = vmatmul.mubr.msk.bf16.vlgmr.msra.gmra.mrb[0].mxu0 %vm250_vm2, %v1229_v56  ;;  %1326 = vmatprep.subr.bf16.mxu1 %v1446_v57  ;;  %v1014_v42 = vsub.s32 %v983_v26, %v1013_v38  ;;  %v1003_v44 = vsub.s32 %v982_v27, %v1002_v39  ;;  %v1469_v56 = vmov 0.0   ;;  %v1262_v38 = vld [vmem:[%s1666_s2] ss:$0 sm:$0xff] }
  0x2b   : > { %1357 = vmatpush3.bf16.msra.mxu0 %v1442_v48  ;;  %1360 = vmatprep.mubr.msk.bf16.mxu0 %vm250_vm2, %v733_v59  ;;  %vm1017_vm7 = vcmp.ne.s32.totalorder %v992_v40, 0  ;;  %vm1020_vm8 = vcmp.lt.s32.totalorder %v992_v40, 0  ;;  %v1026_v47 = vadd.s32 6, %v992_v40 }
  0x2c   : > { %1358 = vmatprep.subr.bf16.mxu0 %v1445_v61  ;;  %vm1019_vm9 = vcmp.ne.s32.totalorder %v1014_v42, 0  ;;  %vm1022_vm10 = vcmp.lt.s32.totalorder %v1014_v42, 0  ;;  %vm1018_vm11 = vcmp.ne.s32.totalorder %v1003_v44, 0  ;;  %vm1021_vm12 = vcmp.lt.s32.totalorder %v1003_v44, 0  ;;  %vm1023_vm13 = vmand %vm1020_vm8, %vm1017_vm7 }
  0x2d   : > { %1327 = vmatpush3.bf16.msra.mxu1 %v1446_v57  ;;  %vm1025_vm14 = vmand %vm1022_vm10, %vm1019_vm9  ;;  %v1028_v48 = vadd.s32 6, %v1014_v42  ;;  %v1027_v49 = vadd.s32 6, %v1003_v44  ;;  %v1029_v50 = vsel %vm1023_vm13, %v1026_v47, %v992_v40 }
  0x2e   : > { %1332 = vmatprep.subr.bf16.mxu1 %v1452_v2  ;;  %vm1024_vm15 = vmand %vm1021_vm12, %vm1018_vm11  ;;  %vm1032_vm0 = vcmp.lt.s32.totalorder %v1029_v50, 4 }
  0x2f   : > { %1359 = vmatpush3.bf16.msra.mxu0 %v1445_v61  ;;  %v1030_v52 = vsel %vm1024_vm15, %v1027_v49, %v1003_v44  ;;  %v1035_v57 = vsel %vm1032_vm0, 1.0, %v1469_v56 }
  0x30   : > { %1364 = vmatprep.subr.bf16.mxu0 %v1451_v4  ;;  %vm1033_vm3 = vcmp.lt.s32.totalorder %v1030_v52, 4 }
  0x31   : > { %v1036_v62 = vsel %vm1033_vm3, 1.0, %v1469_v56 }
  0x34   : > { %1329 = vmatmul.mubr.msk.bf16.vlgmr.msra.gmra.mrb[0].mxu1 %vm250_vm2, %v382_v51  ;;  %v1031_v51 = vsel %vm1025_vm14, %v1028_v48, %v1014_v42  ;;  %v1263_v42 = vld [vmem:[%s1667_s3] ss:$0 sm:$0xff] }
  0x35   : > { %1333 = vmatpush3.bf16.msra.mxu1 %v1452_v2  ;;  %1336 = vmatprep.mubr.msk.bf16.mxu1 %vm250_vm2, %v469_v15  ;;  %vm1034_vm1 = vcmp.lt.s32.totalorder %v1031_v51, 4 }
  0x36   : > { %1361 = vmatmul.mubr.msk.bf16.vlgmr.msra.gmra.mrb[0].mxu0 %vm250_vm2, %v732_v53  ;;  %1334 = vmatprep.subr.bf16.mxu1 %v1454_v13  ;;  %v1037_v60 = vsel %vm1034_vm1, 1.0, %v1469_v56 }
  0x37   : > { %1365 = vmatpush3.bf16.msra.mxu0 %v1451_v4  ;;  %1368 = vmatprep.mubr.msk.bf16.mxu0 %vm250_vm2, %v829_v14 }
  0x38   : > { %1366 = vmatprep.subr.bf16.mxu0 %v1453_v16 }
  0x39   : > { %1335 = vmatpush3.bf16.msra.mxu1 %v1454_v13 }
  0x3b   : > { %1367 = vmatpush3.bf16.msra.mxu0 %v1453_v16 }
  0x3c   : > { %1372 = vmatprep.subr.bf16.mxu0 %v1456_v18 }
  0x40   : > { %1337 = vmatmul.mubr.msk.bf16.vlgmr.msra.gmra.mrb[0].mxu1 %vm250_vm2, %v468_v11 }
  0x42   : > { %1369 = vmatmul.mubr.msk.bf16.vlgmr.msra.gmra.mrb[0].mxu0 %vm250_vm2, %v828_v12 }
  0x43   : > { %1373 = vmatpush3.bf16.msra.mxu0 %v1456_v18  ;;  %1376 = vmatprep.mubr.msk.bf16.mxu0 %vm250_vm2, %v910_v23 }
  0x44   : > { %1374 = vmatprep.subr.bf16.mxu0 %v1457_v22 }
  0x47   : > { %1375 = vmatpush3.bf16.msra.mxu0 %v1457_v22 }
  0x4e   : > { %1377 = vmatmul.mubr.msk.bf16.vlgmr.msra.gmra.mrb[0].mxu0 %vm250_vm2, %v909_v21 }
 0x113   : > { %v1338_v41 = vpop.f32.mrb[0].mxu1 }
 0x114   : > { %v522_v43 = vpop.f32.mrb[1].mxu1 }
 0x115   : > { %v1339_v45 = vpop.f32.mrb[2].mxu1 }
 0x116   : > { %v525_v46 = vpop.f32.mrb[3].mxu1 }
 0x121   : > { %v1378_v53 = vpop.f32.mrb[0].mxu0 }
 0x122   : > { %v1380_v54 = vadd.f32 %v1378_v53, %v1338_v41  ;;  %v963_v55 = vpop.f32.mrb[1].mxu0 }
 0x123   : > { %v1381_v58 = vadd.f32 %v963_v55, %v522_v43  ;;  %v1379_v59 = vpop.f32.mrb[2].mxu0 }
 0x124   : > { %v966_v61 = vpop.f32.mrb[3].mxu0  ;;  %v1040_v1 = vmul.f32 %v1380_v54, %v1037_v60 }
 0x125   : > { %v1038_v63 = vmul.f32 %v1381_v58, %v1035_v57  ;;  %v1382_v0 = vadd.f32 %v966_v61, %v525_v46 }
 0x126   : > { %v1044_v6 = vsel %vm250_vm2, %v1040_v1, 0.0 }
 0x127   : > { %v1039_v2 = vmul.f32 %v1382_v0, %v1036_v62  ;;  %v1041_v3 = vsel %vm250_vm2, %v1038_v63, 0.0 }
 0x129   : > { %v1042_v4 = vsel %vm250_vm2, %v1039_v2, 0.0 }
 0x12a   : > { %v1043_v5 = vadd.f32 %v1042_v4, %v1041_v3 }
 0x12c   : > { %v1045_v7 = vadd.f32 %v1044_v6, %v1043_v5 }
 0x12e   : > { %v1046_v9 = vrot.slane %v1045_v7, 4 }
 0x130   : > { %v1047_v10 = vadd.f32 %v1046_v9, %v1045_v7 }
 0x132   : > { %v1048_v11 = vrot.slane %v1047_v10, 2 }
 0x134   : > { %v1049_v8 = vadd.f32 %v1048_v11, %v1047_v10 }
 0x136   : > { %v1050_v12 = vrot.slane %v1049_v8, 1 }
 0x138   : > { %v1051_v13 = vadd.f32 %v1050_v12, %v1049_v8 }
 0x13a   : > { %v1052_v15 = vmul.f32 0.0625, %v1051_v13 }
 0x13c   : > { %v1053_v16 = vsub.f32 %v1381_v58, %v1052_v15  ;;  %v1054_v14 = vsub.f32 %v1382_v0, %v1052_v15  ;;  %v1055_v17 = vsub.f32 %v1380_v54, %v1052_v15 }
 0x13e   : > { %v1056_v18 = vmul.f32 %v1053_v16, %v1053_v16  ;;  %v1057_v19 = vmul.f32 %v1054_v14, %v1054_v14  ;;  %v1058_v20 = vmul.f32 %v1055_v17, %v1055_v17 }
 0x140   : > { %v1059_v21 = vmul.f32 %v1056_v18, %v1035_v57  ;;  %v1060_v22 = vmul.f32 %v1057_v19, %v1036_v62  ;;  %v1061_v23 = vmul.f32 %v1058_v20, %v1037_v60 }
 0x142   : > { %v1062_v24 = vsel %vm250_vm2, %v1059_v21, 0.0  ;;  %v1063_v25 = vsel %vm250_vm2, %v1060_v22, 0.0  ;;  %v1065_v27 = vsel %vm250_vm2, %v1061_v23, 0.0  ;;  %vm1115_vm2 = vcmask 257024  }
 0x143   : > { %v1064_v26 = vadd.f32 %v1063_v25, %v1062_v24 }
 0x145   : > { %v1066_v28 = vadd.f32 %v1065_v27, %v1064_v26 }
 0x147   : > { %v1067_v29 = vrot.slane %v1066_v28, 4 }
 0x149   : > { %v1068_v30 = vadd.f32 %v1067_v29, %v1066_v28 }
 0x14b   : > { %v1069_v31 = vrot.slane %v1068_v30, 2 }
 0x14d   : > { %v1070_v32 = vadd.f32 %v1069_v31, %v1068_v30 }
 0x14f   : > { %v1071_v33 = vrot.slane %v1070_v32, 1 }
 0x151   : > { %v1072_v34 = vadd.f32 %v1071_v33, %v1070_v32 }
 0x153   : > { %v1073_v35 = vmul.f32 0.0625, %v1072_v34 }
 0x155   : > { %v1076_v36 = vadd.f32 1e-05, %v1073_v35 }
 0x157   : > { %1459 = vrsqrt.f32 %v1076_v36 }
 0x161   : > { %v1460_v37 = vpop.eup %1459 }
 0x162   : > { %v1078_v39 = vmul.f32 %v1460_v37, %v1053_v16  ;;  %v1079_v40 = vmul.f32 %v1460_v37, %v1054_v14  ;;  %v1080_v41 = vmul.f32 %v1460_v37, %v1055_v17 }
 0x164   : > { %v1087_v43 = vmul.f32 %v1262_v38, %v1078_v39  ;;  %v1088_v44 = vmul.f32 %v1262_v38, %v1079_v40  ;;  %v1089_v45 = vmul.f32 %v1262_v38, %v1080_v41 }
 0x166   : > { %v1096_v46 = vadd.f32 %v1263_v42, %v1087_v43  ;;  %v1097_v47 = vadd.f32 %v1263_v42, %v1088_v44  ;;  %v1098_v48 = vadd.f32 %v1263_v42, %v1089_v45 }
 0x168   : > { %v1099_v49 = vmax.f32 %v1096_v46, 0.0  ;;  %v1100_v50 = vmax.f32 %v1097_v47, 0.0  ;;  %v1101_v51 = vmax.f32 %v1098_v48, 0.0 }
 0x16a   : > { %v1269_v52 = vpack.c.bf16 %v1099_v49, %v1099_v49  ;;  %v1270_v53 = vpack.c.bf16 %v1100_v50, %v1100_v50  ;;  %v1271_v54 = vpack.c.bf16 %v1101_v51, %v1101_v51 }
 0x16c   : > { %1116 = vst.msk [vmem:[%s197_s14] sm:$0xf] %vm1115_vm2, %v1269_v52  ;;  %1117 = vst.msk [vmem:[%s197_s14 + $0x4] sm:$0xf] %vm1115_vm2, %v1270_v53 }
 0x16d   : > { %1118 = vst.msk [vmem:[%s197_s14 + $0x8] sm:$0xf] %vm1115_vm2, %v1271_v54 }
 0x16e PF: > { %s14_s15 = sadd.s32 1, %s1467_s15  }
 0x16f   : > { %p11_p4 = scmp.ge.s32.totalorder %s14_s15, 4  }
 0x171   :  { %13 = sbr.rel (!%p11_p4) target bundleno = 1 (0x1), region = 74 }

// kernel: forward.14
= control target key start
LH: loop header
LB: loop body
LE: loop exit
PB: predicated region body
PF: predicated region fallthrough
CT: control target
= control target key end

     0   :  { %s1570_s18 = smov 0   ;;  %s1742_s0 = inlined_call_operand.vmem [shape: bf16[2,38,32], index: 0, kind: input, shape index: {}]   ;;  %s1743_s1 = inlined_call_operand.vmem [shape: bf16[9,32,32], index: 1, kind: input, shape index: {}]   ;;  %s1744_s2 = inlined_call_operand.vmem [shape: f32[1,32], index: 2, kind: input, shape index: {}]   ;;  %s1745_s3 = inlined_call_operand.vmem [shape: f32[1,32], index: 3, kind: input, shape index: {}]   ;;  %s1746_s4 = inlined_call_operand.vmem [shape: bf16[2,24,32], index: 4, kind: input, shape index: {}]   ;;  %s1747_s5 = inlined_call_operand.vmem [shape: bf16[2,24,32], index: 5, kind: output, shape index: {}]  }
   0x1 LB: > { %s1239_s19 = sadd.s32 4294967295, %s1537_s18   ;;  %p1243_p0 = scmp.ge.s32.totalorder %s1537_s18, 1  ;;  %s1537_s18 = sphi %s1570_s18, %s15_s18  }
   0x2   : > { %p197_p1 = scmp.lt.s32.totalorder %s1537_s18, 3 }
   0x4   : > { %p198_p2 = pnand %p1243_p0, %p197_p1 }
   0x5   : > { %v1498_v0 = vld [vmem:[%s1743_s1 + $0x40] sm:$0xff] (!%p198_p2)   ;;  %p230_p3 = scmp.lt.s32.totalorder (!%p198_p2), %s1239_s19, 1  ;;  %v1499_v1 = vld [vmem:[%s1743_s1 + $0x10] sm:$0xff] (!%p198_p2)   ;;  %v1500_v2 = vld [vmem:[%s1743_s1 + $0x48] sm:$0xff] (!%p198_p2)   ;;  %vm269_vm0 = vsmask.f32 (!%p198_p2), 7424 }
   0x6   : > { %201 = sbr.rel (%p198_p2) target bundleno = 366 (0x16e), region = 40  ;;  %1410 = vmatprep.subr.bf16.mxu0 (!%p198_p2), %v1498_v0  ;;  %1378 = vmatprep.subr.bf16.mxu1 (!%p198_p2), %v1499_v1  ;;  %v1501_v3 = vld [vmem:[%s1743_s1 + $0x18] sm:$0xff] (!%p198_p2)   ;;  %v1507_v4 = vld [vmem:[%s1743_s1 + $0x50] sm:$0xff] (!%p198_p2)   ;;  %v1508_v5 = vld [vmem:[%s1743_s1] sm:$0xff] (!%p198_p2)   ;;  %vm595_vm1 = vsmask.f32 (!%p198_p2), 4352 }
   0x7   : > { %1411 = vmatpush3.bf16.msra.mxu0 (!%p198_p2), %v1498_v0  ;;  %1379 = vmatpush3.bf16.msra.mxu1 (!%p198_p2), %v1499_v1  ;;  %vm297_vm2 = vcmask (!%p198_p2), 261120   ;;  %v1509_v35 = vld [vmem:[%s1743_s1 + $0x58] sm:$0xff] (!%p198_p2)   ;;  %v1510_v36 = vld [vmem:[%s1743_s1 + $0x8] sm:$0xff] (!%p198_p2)   ;;  %v1514_v44 = vld [vmem:[%s1743_s1 + $0x20] sm:$0xff] (!%p198_p2)   ;;  %vm427_vm3 = vcmask (!%p198_p2), 1046528   ;;  %vm777_vm4 = vcmask (!%p198_p2), 1045504  }
   0x8   : > { %1412 = vmatprep.subr.bf16.mxu0 (!%p198_p2), %v1500_v2  ;;  %1380 = vmatprep.subr.bf16.mxu1 (!%p198_p2), %v1501_v3  ;;  %v1512_v48 = vld [vmem:[%s1743_s1 + $0x60] sm:$0xff] (!%p198_p2)   ;;  %v1516_v57 = vld [vmem:[%s1743_s1 + $0x28] sm:$0xff] (!%p198_p2)   ;;  %vm513_vm5 = vcmask (!%p198_p2), 1044480   ;;  %vm859_vm6 = vsmask.f32 (!%p198_p2), 5376 }
   0x9   : > { %v1515_v61 = vld [vmem:[%s1743_s1 + $0x68] sm:$0xff] (!%p198_p2)  }
   0xb   : > { %1413 = vmatpush3.bf16.msra.mxu0 (!%p198_p2), %v1500_v2  ;;  %1381 = vmatpush3.bf16.msra.mxu1 (!%p198_p2), %v1501_v3  ;;  %v1522_v2 = vld [vmem:[%s1743_s1 + $0x30] sm:$0xff] (!%p198_p2)  }
   0xc   : > { %1418 = vmatprep.subr.bf16.mxu0 (!%p198_p2), %v1507_v4  ;;  %1386 = vmatprep.subr.bf16.mxu1 (!%p198_p2), %v1508_v5 }
   0xd   : > { %s1749_s19 = smov (!%p230_p3, %s1239_s19), 1 }
   0xe   : > { %s1481_s28 = smul.u32 20, %s1749_s19 }
   0xf   : > { %s1482_s12 = smul.u32 12, %s1749_s19 }
  0x10   : > { %s1599_s8 = scalar_lea.vmem %s1742_s0, %s1481_s28 }
  0x11   : > { %v246_v6 = vld [vmem:[%s1599_s8] sm:$0xf]  ;;  %v247_v7 = vld [vmem:[%s1599_s8 + $0x4] sm:$0xf]  ;;  %v1607_v8 = vld [vmem:[%s1599_s8 + $0x8] sm:$0xf]  ;;  %s239_s15 = scalar_lea.vmem %s1746_s4, %s1482_s12  ;;  %s244_s23 = scalar_lea.vmem %s1747_s5, %s1482_s12 }
  0x12   : > { %v253_v9 = vld [vmem:[%s1599_s8 + $0xc] sm:$0x1]  ;;  %v1251_v10 = vcombine.low %v246_v6, %v247_v7  ;;  %v500_v11 = vld [vmem:[%s1599_s8] sm:$0x8]  ;;  %v758_v38 = vld [vmem:[%s1599_s8 + $0x4] sm:$0xc]  ;;  %v1294_v42 = vcombine.low %v247_v7, %v1607_v8  ;;  %v1257_v54 = vcombine.low %v1607_v8, %v1607_v8 }
  0x13   : > { %v1612_v12 = vld [vmem:[%s1599_s8 + $0xc] sm:$0xf]  ;;  %v1615_v13 = vcombine.low %v1607_v8, %v253_v9  ;;  %v1617_v14 = vcombine.low %v500_v11, %v247_v7  ;;  %v418_v37 = vld [vmem:[%s1599_s8] sm:$0xe]  ;;  %v1636_v39 = vld [vmem:[%s1599_s8 + $0x8] sm:$0xf] }
  0x14   : > { %v1285_v15 = vcombine.low %v1607_v8, %v1612_v12  ;;  %v271_v16 = vshrl.u32 %v1251_v10, 16  ;;  %v273_v17 = vshll.u32 %v1251_v10, 16  ;;  %v760_v40 = vld [vmem:[%s1599_s8 + $0xc] sm:$0xf]  ;;  %v761_v43 = vld [vmem:[%s1599_s8 + $0x10] sm:$0x3]  ;;  %v1266_v45 = vcombine.low %v418_v37, %v247_v7 }
  0x15   : > { %v278_v18 = vshll.u32 %v1615_v13, 16  ;;  %v282_v19 = vshrl.u32 %v1615_v13, 16  ;;  %v597_v20 = vshrl.u32 %v1617_v14, 16  ;;  %v600_v21 = vshll.u32 %v1617_v14, 16  ;;  %v850_v49 = vld [vmem:[%s1599_s8 + $0x10] sm:$0x7] }
  0x16   : > { %v275_v22 = vrot.slane %v273_v17, 1  ;;  %v605_v23 = vshrl.u32 %v1285_v15, 16  ;;  %v608_v24 = vshll.u32 %v1285_v15, 16  ;;  %v1304_v46 = vcombine.low %v758_v38, %v1636_v39  ;;  %v501_v60 = vld [vmem:[%s1599_s8 + $0xc] sm:$0x7] }
  0x17   : > { %v280_v25 = vrot.slane %v278_v18, 1  ;;  %v599_v26 = vrot.slane %v597_v20, 3  ;;  %v602_v27 = vrot.slane %v600_v21, 4  ;;  %v1305_v47 = vcombine.low %v760_v40, %v761_v43  ;;  %v946_v17 = vld [vmem:[%s1599_s8 + $0x4] sm:$0x8] }
  0x18   : > { %v276_v28 = vor.u32 %v275_v22, %v271_v16  ;;  %v607_v29 = vrot.slane %v605_v23, 3  ;;  %v610_v30 = vrot.slane %v608_v24, 4  ;;  %v428_v50 = vrot.slane %v1266_v45, 1  ;;  %v1523_v16 = vld [vmem:[%s1743_s1 + $0x78] sm:$0xff]   ;;  %v1526_v18 = vld [vmem:[%s1743_s1 + $0x80] sm:$0xff]   ;;  %v1527_v22 = vld [vmem:[%s1743_s1 + $0x88] sm:$0xff]  }
  0x19   : > { %v284_v31 = vor.u32 %v282_v19, %v280_v25  ;;  %v603_v32 = vor.u32 %v602_v27, %v599_v26  ;;  %v429_v51 = vrot.slane %v1615_v13, 1  ;;  %v778_v52 = vrot.slane %v1304_v46, 2  ;;  %v1524_v13 = vld [vmem:[%s1743_s1 + $0x38] sm:$0xff]  }
  0x1a   : > { %v281_v33 = vsel %vm269_vm0, %v276_v28, %v280_v25  ;;  %v611_v34 = vor.u32 %v610_v30, %v607_v29  ;;  %v779_v53 = vrot.slane %v1305_v47, 2  ;;  %v1658_v55 = vcombine.low %v760_v40, %v850_v49 }
  0x1b   : > { %1382 = vmatprep.mubr.msk.bf16.mxu1 %vm297_vm2, %v281_v33  ;;  %v1295_v56 = vcombine.low %v1612_v12, %v1612_v12  ;;  %v430_v58 = vsel %vm427_vm3, %v428_v50, %v429_v51  ;;  %v861_v62 = vshrl.u32 %v1304_v46, 16  ;;  %v864_v63 = vshll.u32 %v1304_v46, 16 }
  0x1c   : > { %v612_v41 = vsel %vm595_vm1, %v603_v32, %v611_v34  ;;  %1383 = vmatmul.mubr.msk.bf16.vlgmr.msra.gmra.mrb[0].mxu1 %vm297_vm2, %v284_v31  ;;  %v780_v59 = vsel %vm777_vm4, %v778_v52, %v779_v53  ;;  %v869_v0 = vshrl.u32 %v1658_v55, 16  ;;  %v872_v1 = vshll.u32 %v1658_v55, 16 }
  0x1d   : > { %1414 = vmatprep.mubr.msk.bf16.mxu0 %vm297_vm2, %v612_v41  ;;  %1387 = vmatpush3.bf16.msra.mxu1 %v1508_v5  ;;  %v1276_v3 = vcombine.low %v1607_v8, %v501_v60  ;;  %v863_v5 = vrot.slane %v861_v62, 2  ;;  %v866_v6 = vrot.slane %v864_v63, 3  ;;  %v1323_v19 = vcombine.low %v946_v17, %v1636_v39 }
  0x1e   : > { %1415 = vmatmul.mubr.msk.bf16.vlgmr.msra.gmra.mrb[0].mxu0 %vm297_vm2, %v611_v34  ;;  %1388 = vmatprep.subr.bf16.mxu1 %v1510_v36  ;;  %v871_v7 = vrot.slane %v869_v0, 2  ;;  %v874_v9 = vrot.slane %v872_v1, 3  ;;  %v956_v21 = vrot.slane %v1658_v55, 3  ;;  %v1027_v24 = vlaneseq }
  0x1f   : > { %1419 = vmatpush3.bf16.msra.mxu0 %v1507_v4  ;;  %1390 = vmatprep.mubr.msk.bf16.mxu1 %vm297_vm2, %v1251_v10  ;;  %v1521_v4 = vld [vmem:[%s1743_s1 + $0x70] sm:$0xff]   ;;  %v514_v10 = vrot.slane %v1617_v14, 3  ;;  %v515_v11 = vrot.slane %v1276_v3, 3  ;;  %v867_v8 = vor.u32 %v866_v6, %v863_v5  ;;  %v955_v20 = vrot.slane %v1323_v19, 3 }
  0x20   : > { %1420 = vmatprep.subr.bf16.mxu0 %v1509_v35  ;;  %1422 = vmatprep.mubr.msk.bf16.mxu0 %vm297_vm2, %v1294_v42  ;;  %v875_v12 = vor.u32 %v874_v9, %v871_v7  ;;  %v1028_v25 = vshrl.u32 %v1027_v24, 7 }
  0x21   : > { %1389 = vmatpush3.bf16.msra.mxu1 %v1510_v36  ;;  %v516_v15 = vsel %vm513_vm5, %v514_v10, %v515_v11  ;;  %v957_v23 = vsel %vm513_vm5, %v955_v20, %v956_v21 }
  0x22   : > { %1394 = vmatprep.subr.bf16.mxu1 %v1514_v44  ;;  %v876_v14 = vsel %vm859_vm6, %v867_v8, %v875_v12  ;;  %v1030_v26 = vadd.s32 16, %v1028_v25  ;;  %v1029_v27 = vadd.s32 8, %v1028_v25 }
  0x23   : > { %1421 = vmatpush3.bf16.msra.mxu0 %v1509_v35  ;;  %v1708_v28 = vmul.u32.u64.low 2863311531, %v1028_v25  ;;  %v1709_v29 = vmul.u32.u64.high 2863311531, %v1028_v25, %v1708_v28 }
  0x24   : > { %1426 = vmatprep.subr.bf16.mxu0 %v1512_v48  ;;  %v1711_v30 = vmul.u32.u64.low 2863311531, %v1030_v26  ;;  %v1712_v31 = vmul.u32.u64.high 2863311531, %v1030_v26, %v1711_v30  ;;  %v1714_v32 = vmul.u32.u64.low 2863311531, %v1029_v27  ;;  %v1715_v33 = vmul.u32.u64.high 2863311531, %v1029_v27, %v1714_v32 }
  0x25   : > { %v1037_v34 = vshrl.u32 %v1709_v29, 2 }
  0x26   : > { %v1059_v35 = vshrl.u32 %v1712_v31, 2  ;;  %v1048_v36 = vshrl.u32 %v1715_v33, 2 }
  0x27   : > { %v1038_v37 = vmul.u32 6, %v1037_v34 }
  0x28   : > { %1391 = vmatmul.mubr.msk.bf16.vlgmr.msra.gmra.mrb[0].mxu1 %vm297_vm2, %v1257_v54  ;;  %v1060_v38 = vmul.u32 6, %v1059_v35  ;;  %v1049_v39 = vmul.u32 6, %v1048_v36 }
  0x29   : > { %1395 = vmatpush3.bf16.msra.mxu1 %v1514_v44  ;;  %1398 = vmatprep.mubr.msk.bf16.mxu1 %vm297_vm2, %v430_v58  ;;  %v1039_v40 = vsub.s32 %v1028_v25, %v1038_v37  ;;  %v1339_v37 = vld [vmem:[%s239_s15] sm:$0xff]  }
  0x2a   : > { %1423 = vmatmul.mubr.msk.bf16.vlgmr.msra.gmra.mrb[0].mxu0 %vm297_vm2, %v1295_v56  ;;  %1396 = vmatprep.subr.bf16.mxu1 %v1516_v57  ;;  %v1061_v42 = vsub.s32 %v1030_v26, %v1060_v38  ;;  %v1050_v44 = vsub.s32 %v1029_v27, %v1049_v39  ;;  %v1539_v56 = vmov 0.0   ;;  %v1328_v39 = vld [vmem:[%s1744_s2] ss:$0 sm:$0xff] }
  0x2b   : > { %1427 = vmatpush3.bf16.msra.mxu0 %v1512_v48  ;;  %1430 = vmatprep.mubr.msk.bf16.mxu0 %vm297_vm2, %v780_v59  ;;  %vm1064_vm7 = vcmp.ne.s32.totalorder %v1039_v40, 0  ;;  %vm1067_vm8 = vcmp.lt.s32.totalorder %v1039_v40, 0  ;;  %v1073_v47 = vadd.s32 6, %v1039_v40 }
  0x2c   : > { %1428 = vmatprep.subr.bf16.mxu0 %v1515_v61  ;;  %vm1066_vm9 = vcmp.ne.s32.totalorder %v1061_v42, 0  ;;  %vm1069_vm10 = vcmp.lt.s32.totalorder %v1061_v42, 0  ;;  %vm1065_vm11 = vcmp.ne.s32.totalorder %v1050_v44, 0  ;;  %vm1068_vm12 = vcmp.lt.s32.totalorder %v1050_v44, 0  ;;  %vm1070_vm13 = vmand %vm1067_vm8, %vm1064_vm7 }
  0x2d   : > { %1397 = vmatpush3.bf16.msra.mxu1 %v1516_v57  ;;  %vm1072_vm14 = vmand %vm1069_vm10, %vm1066_vm9  ;;  %v1075_v48 = vadd.s32 6, %v1061_v42  ;;  %v1074_v49 = vadd.s32 6, %v1050_v44  ;;  %v1076_v50 = vsel %vm1070_vm13, %v1073_v47, %v1039_v40  ;;  %v1148_v40 = vld [vmem:[%s239_s15 + $0x8] sm:$0xf] }
  0x2e   : > { %1402 = vmatprep.subr.bf16.mxu1 %v1522_v2  ;;  %vm1071_vm15 = vmand %vm1068_vm12, %vm1065_vm11  ;;  %vm1079_vm0 = vcmp.lt.s32.totalorder %v1076_v50, 4  ;;  %v1151_v50 = vunpack.c.l.bf16 %v1148_v40 }
  0x2f   : > { %1429 = vmatpush3.bf16.msra.mxu0 %v1515_v61  ;;  %v1077_v52 = vsel %vm1071_vm15, %v1074_v49, %v1050_v44  ;;  %v1082_v57 = vsel %vm1079_vm0, 1.0, %v1539_v56  ;;  %v1329_v44 = vld [vmem:[%s1745_s3] ss:$0 sm:$0xff] }
  0x30   : > { %1434 = vmatprep.subr.bf16.mxu0 %v1521_v4  ;;  %vm1080_vm3 = vcmp.lt.s32.totalorder %v1077_v52, 4 }
  0x31   : > { %v1083_v62 = vsel %vm1080_vm3, 1.0, %v1539_v56 }
  0x34   : > { %1399 = vmatmul.mubr.msk.bf16.vlgmr.msra.gmra.mrb[0].mxu1 %vm297_vm2, %v429_v51  ;;  %v1078_v51 = vsel %vm1072_vm14, %v1075_v48, %v1061_v42 }
  0x35   : > { %1403 = vmatpush3.bf16.msra.mxu1 %v1522_v2  ;;  %1406 = vmatprep.mubr.msk.bf16.mxu1 %vm297_vm2, %v516_v15  ;;  %vm1081_vm1 = vcmp.lt.s32.totalorder %v1078_v51, 4 }
  0x36   : > { %1431 = vmatmul.mubr.msk.bf16.vlgmr.msra.gmra.mrb[0].mxu0 %vm297_vm2, %v779_v53  ;;  %1404 = vmatprep.subr.bf16.mxu1 %v1524_v13  ;;  %v1084_v60 = vsel %vm1081_vm1, 1.0, %v1539_v56 }
  0x37   : > { %1435 = vmatpush3.bf16.msra.mxu0 %v1521_v4  ;;  %1438 = vmatprep.mubr.msk.bf16.mxu0 %vm297_vm2, %v876_v14 }
  0x38   : > { %1436 = vmatprep.subr.bf16.mxu0 %v1523_v16 }
  0x39   : > { %1405 = vmatpush3.bf16.msra.mxu1 %v1524_v13 }
  0x3b   : > { %1437 = vmatpush3.bf16.msra.mxu0 %v1523_v16 }
  0x3c   : > { %1442 = vmatprep.subr.bf16.mxu0 %v1526_v18 }
  0x40   : > { %1407 = vmatmul.mubr.msk.bf16.vlgmr.msra.gmra.mrb[0].mxu1 %vm297_vm2, %v515_v11 }
  0x42   : > { %1439 = vmatmul.mubr.msk.bf16.vlgmr.msra.gmra.mrb[0].mxu0 %vm297_vm2, %v875_v12 }
  0x43   : > { %1443 = vmatpush3.bf16.msra.mxu0 %v1526_v18  ;;  %1446 = vmatprep.mubr.msk.bf16.mxu0 %vm297_vm2, %v957_v23 }
  0x44   : > { %1444 = vmatprep.subr.bf16.mxu0 %v1527_v22 }
  0x47   : > { %1445 = vmatpush3.bf16.msra.mxu0 %v1527_v22 }
  0x4e   : > { %1447 = vmatmul.mubr.msk.bf16.vlgmr.msra.gmra.mrb[0].mxu0 %vm297_vm2, %v956_v21 }
 0x113   : > { %v1408_v41 = vpop.f32.mrb[0].mxu1 }
 0x114   : > { %v569_v43 = vpop.f32.mrb[1].mxu1 }
 0x115   : > { %v1409_v45 = vpop.f32.mrb[2].mxu1 }
 0x116   : > { %v572_v46 = vpop.f32.mrb[3].mxu1  ;;  %v1340_v45 = vunpack.c.l.bf16 %v1339_v37 }
 0x121   : > { %v1448_v53 = vpop.f32.mrb[0].mxu0 }
 0x122   : > { %v1450_v54 = vadd.f32 %v1448_v53, %v1408_v41  ;;  %v1010_v55 = vpop.f32.mrb[1].mxu0 }
 0x123   : > { %v1451_v58 = vadd.f32 %v1010_v55, %v569_v43  ;;  %v1449_v59 = vpop.f32.mrb[2].mxu0 }
 0x124   : > { %v1013_v61 = vpop.f32.mrb[3].mxu0  ;;  %v1087_v1 = vmul.f32 %v1450_v54, %v1084_v60 }
 0x125   : > { %v1085_v63 = vmul.f32 %v1451_v58, %v1082_v57  ;;  %v1452_v0 = vadd.f32 %v1013_v61, %v572_v46  ;;  %v1341_v46 = vunpack.c.h.bf16 %v1339_v37 }
 0x126   : > { %v1091_v6 = vsel %vm297_vm2, %v1087_v1, 0.0 }
 0x127   : > { %v1086_v2 = vmul.f32 %v1452_v0, %v1083_v62  ;;  %v1088_v3 = vsel %vm297_vm2, %v1085_v63, 0.0 }
 0x129   : > { %v1089_v4 = vsel %vm297_vm2, %v1086_v2, 0.0 }
 0x12a   : > { %v1090_v5 = vadd.f32 %v1089_v4, %v1088_v3 }
 0x12c   : > { %v1092_v7 = vadd.f32 %v1091_v6, %v1090_v5 }
 0x12e   : > { %v1093_v9 = vrot.slane %v1092_v7, 4 }
 0x130   : > { %v1094_v10 = vadd.f32 %v1093_v9, %v1092_v7 }
 0x132   : > { %v1095_v11 = vrot.slane %v1094_v10, 2 }
 0x134   : > { %v1096_v8 = vadd.f32 %v1095_v11, %v1094_v10 }
 0x136   : > { %v1097_v12 = vrot.slane %v1096_v8, 1 }
 0x138   : > { %v1098_v13 = vadd.f32 %v1097_v12, %v1096_v8 }
 0x13a   : > { %v1099_v15 = vmul.f32 0.0625, %v1098_v13 }
 0x13c   : > { %v1100_v16 = vsub.f32 %v1451_v58, %v1099_v15  ;;  %v1101_v14 = vsub.f32 %v1452_v0, %v1099_v15  ;;  %v1102_v17 = vsub.f32 %v1450_v54, %v1099_v15 }
 0x13e   : > { %v1103_v18 = vmul.f32 %v1100_v16, %v1100_v16  ;;  %v1104_v19 = vmul.f32 %v1101_v14, %v1101_v14  ;;  %v1105_v20 = vmul.f32 %v1102_v17, %v1102_v17 }
 0x140   : > { %v1106_v21 = vmul.f32 %v1103_v18, %v1082_v57  ;;  %v1107_v22 = vmul.f32 %v1104_v19, %v1083_v62  ;;  %v1108_v23 = vmul.f32 %v1105_v20, %v1084_v60 }
 0x142   : > { %v1109_v24 = vsel %vm297_vm2, %v1106_v21, 0.0  ;;  %v1110_v25 = vsel %vm297_vm2, %v1107_v22, 0.0  ;;  %v1112_v27 = vsel %vm297_vm2, %v1108_v23, 0.0  ;;  %vm1168_vm2 = vcmask 257024  }
 0x143   : > { %v1111_v26 = vadd.f32 %v1110_v25, %v1109_v24 }
 0x145   : > { %v1113_v28 = vadd.f32 %v1112_v27, %v1111_v26 }
 0x147   : > { %v1114_v29 = vrot.slane %v1113_v28, 4 }
 0x149   : > { %v1115_v30 = vadd.f32 %v1114_v29, %v1113_v28 }
 0x14b   : > { %v1116_v31 = vrot.slane %v1115_v30, 2 }
 0x14d   : > { %v1117_v32 = vadd.f32 %v1116_v31, %v1115_v30 }
 0x14f   : > { %v1118_v33 = vrot.slane %v1117_v32, 1 }
 0x151   : > { %v1119_v34 = vadd.f32 %v1118_v33, %v1117_v32 }
 0x153   : > { %v1120_v35 = vmul.f32 0.0625, %v1119_v34 }
 0x155   : > { %v1123_v36 = vadd.f32 1e-05, %v1120_v35 }
 0x157   : > { %1529 = vrsqrt.f32 %v1123_v36 }
 0x161   : > { %v1530_v38 = vpop.eup %1529 }
 0x162   : > { %v1125_v41 = vmul.f32 %v1530_v38, %v1100_v16  ;;  %v1126_v42 = vmul.f32 %v1530_v38, %v1101_v14  ;;  %v1127_v43 = vmul.f32 %v1530_v38, %v1102_v17 }
 0x164   : > { %v1134_v47 = vmul.f32 %v1328_v39, %v1125_v41  ;;  %v1135_v48 = vmul.f32 %v1328_v39, %v1126_v42  ;;  %v1136_v49 = vmul.f32 %v1328_v39, %v1127_v43 }
 0x166   : > { %v1143_v51 = vadd.f32 %v1329_v44, %v1134_v47  ;;  %v1144_v52 = vadd.f32 %v1329_v44, %v1135_v48  ;;  %v1145_v53 = vadd.f32 %v1329_v44, %v1136_v49 }
 0x168   : > { %v1152_v54 = vadd.f32 %v1340_v45, %v1143_v51  ;;  %v1153_v55 = vadd.f32 %v1341_v46, %v1144_v52  ;;  %v1154_v56 = vadd.f32 %v1151_v50, %v1145_v53 }
 0x16a   : > { %v1335_v57 = vpack.c.bf16 %v1152_v54, %v1152_v54  ;;  %v1336_v58 = vpack.c.bf16 %v1153_v55, %v1153_v55  ;;  %v1337_v59 = vpack.c.bf16 %v1154_v56, %v1154_v56 }
 0x16c   : > { %1169 = vst.msk [vmem:[%s244_s23] sm:$0xf] %vm1168_vm2, %v1335_v57  ;;  %1170 = vst.msk [vmem:[%s244_s23 + $0x4] sm:$0xf] %vm1168_vm2, %v1336_v58 }
 0x16d   : > { %1171 = vst.msk [vmem:[%s244_s23 + $0x8] sm:$0xf] %vm1168_vm2, %v1337_v59 }
 0x16e PF: > { %s15_s18 = sadd.s32 1, %s1537_s18  }
 0x16f   : > { %p12_p4 = scmp.ge.s32.totalorder %s15_s18, 4  }
 0x171   :  { %14 = sbr.rel (!%p12_p4) target bundleno = 1 (0x1), region = 81 }

// kernel: forward.17
= control target key start
LH: loop header
LB: loop body
LE: loop exit
PB: predicated region body
PF: predicated region fallthrough
CT: control target
= control target key end

     0   :  { %s1600_s15 = smov 0   ;;  %s1829_s0 = inlined_call_operand.vmem [shape: bf16[2,38,32], index: 0, kind: input, shape index: {}]   ;;  %s1830_s1 = inlined_call_operand.vmem [shape: bf16[9,32,64], index: 1, kind: input, shape index: {}]   ;;  %s1831_s2 = inlined_call_operand.vmem [shape: f32[1,16], index: 2, kind: input, shape index: {}]   ;;  %s1832_s3 = inlined_call_operand.vmem [shape: f32[1,16], index: 3, kind: input, shape index: {}]   ;;  %s1833_s4 = inlined_call_operand.vmem [shape: bf16[2,24,64], index: 4, kind: output, shape index: {}]  }
   0x1 LB: > { %s1269_s16 = sadd.s32 4294967295, %s1566_s15   ;;  %p1273_p0 = scmp.ge.s32.totalorder %s1566_s15, 1  ;;  %s1566_s15 = sphi %s1600_s15, %s14_s15  }
   0x2   : > { %p162_p1 = scmp.lt.s32.totalorder %s1566_s15, 3 }
   0x4   : > { %p163_p2 = pnand %p1273_p0, %p162_p1 }
   0x5   : > { %v1527_v0 = vld [vmem:[%s1830_s1 + $0x40] sm:$0xff] (!%p163_p2)   ;;  %p188_p3 = scmp.lt.s32.totalorder (!%p163_p2), %s1269_s16, 1  ;;  %v1528_v1 = vld [vmem:[%s1830_s1 + $0x10] sm:$0xff] (!%p163_p2)   ;;  %v1529_v2 = vld [vmem:[%s1830_s1 + $0x48] sm:$0xff] (!%p163_p2)   ;;  %vm222_vm0 = vsmask.f32 (!%p163_p2), 7424 }
   0x6   : > { %166 = sbr.rel (%p163_p2) target bundleno = 858 (0x35a), region = 36  ;;  %1433 = vmatprep.subr.bf16.mxu0 (!%p163_p2), %v1527_v0  ;;  %1401 = vmatprep.subr.bf16.mxu1 (!%p163_p2), %v1528_v1  ;;  %v1530_v3 = vld [vmem:[%s1830_s1 + $0x18] sm:$0xff] (!%p163_p2)   ;;  %v1536_v4 = vld [vmem:[%s1830_s1 + $0x50] sm:$0xff] (!%p163_p2)   ;;  %v1537_v5 = vld [vmem:[%s1830_s1] sm:$0xff] (!%p163_p2)   ;;  %vm548_vm1 = vsmask.f32 (!%p163_p2), 4352 }
   0x7   : > { %1434 = vmatpush3.bf16.msra.mxu0 (!%p163_p2), %v1527_v0  ;;  %1402 = vmatpush3.bf16.msra.mxu1 (!%p163_p2), %v1528_v1  ;;  %vm250_vm2 = vcmask (!%p163_p2), 261120   ;;  %v1538_v35 = vld [vmem:[%s1830_s1 + $0x58] sm:$0xff] (!%p163_p2)   ;;  %v1539_v36 = vld [vmem:[%s1830_s1 + $0x8] sm:$0xff] (!%p163_p2)   ;;  %v1543_v44 = vld [vmem:[%s1830_s1 + $0x20] sm:$0xff] (!%p163_p2)   ;;  %vm380_vm3 = vcmask (!%p163_p2), 1046528   ;;  %vm730_vm4 = vcmask (!%p163_p2), 1045504  }
   0x8   : > { %1435 = vmatprep.subr.bf16.mxu0 (!%p163_p2), %v1529_v2  ;;  %1403 = vmatprep.subr.bf16.mxu1 (!%p163_p2), %v1530_v3  ;;  %v1541_v48 = vld [vmem:[%s1830_s1 + $0x60] sm:$0xff] (!%p163_p2)   ;;  %v1545_v57 = vld [vmem:[%s1830_s1 + $0x28] sm:$0xff] (!%p163_p2)   ;;  %vm466_vm5 = vcmask (!%p163_p2), 1044480   ;;  %vm812_vm6 = vsmask.f32 (!%p163_p2), 5376  ;;  %s1569_s7 = smov (!%p163_p2), 80  }
   0x9   : > { %v1544_v61 = vld [vmem:[%s1830_s1 + $0x68] sm:$0xff] (!%p163_p2)   ;;  %s1570_s8 = smov (!%p163_p2), 112   ;;  %s1571_s9 = smov (!%p163_p2), 96  }
   0xa   : > { %s1572_s10 = smov (!%p163_p2), 32   ;;  %s1573_s11 = smov (!%p163_p2), 16  }
   0xb   : > { %1436 = vmatpush3.bf16.msra.mxu0 (!%p163_p2), %v1529_v2  ;;  %1404 = vmatpush3.bf16.msra.mxu1 (!%p163_p2), %v1530_v3  ;;  %v1551_v2 = vld [vmem:[%s1830_s1 + $0x30] sm:$0xff] (!%p163_p2)   ;;  %s1574_s12 = smov (!%p163_p2), 48  }
   0xc   : > { %1441 = vmatprep.subr.bf16.mxu0 (!%p163_p2), %v1536_v4  ;;  %1409 = vmatprep.subr.bf16.mxu1 (!%p163_p2), %v1537_v5 }
   0xd   : > { %s1835_s16 = smov (!%p188_p3, %s1269_s16), 1 }
   0xe   : > { %s1504_s25 = smul.u32 20, %s1835_s16 }
   0xf   : > { %s1505_s19 = smul.u32 12, %s1835_s16 }
  0x10   : > { %s1629_s30 = scalar_lea.vmem %s1829_s0, %s1504_s25 }
  0x11   : > { %v199_v6 = vld [vmem:[%s1629_s30] sm:$0xf]  ;;  %v200_v7 = vld [vmem:[%s1629_s30 + $0x4] sm:$0xf]  ;;  %v1637_v8 = vld [vmem:[%s1629_s30 + $0x8] sm:$0xf]  ;;  %s197_s22 = scalar_lea.vmem %s1833_s4, %s1505_s19 }
  0x12   : > { %v206_v9 = vld [vmem:[%s1629_s30 + $0xc] sm:$0x1]  ;;  %v1280_v10 = vcombine.low %v199_v6, %v200_v7  ;;  %v453_v11 = vld [vmem:[%s1629_s30] sm:$0x8]  ;;  %v711_v38 = vld [vmem:[%s1629_s30 + $0x4] sm:$0xc]  ;;  %v1323_v42 = vcombine.low %v200_v7, %v1637_v8  ;;  %v1286_v54 = vcombine.low %v1637_v8, %v1637_v8 }
  0x13   : > { %v1642_v12 = vld [vmem:[%s1629_s30 + $0xc] sm:$0xf]  ;;  %v1645_v13 = vcombine.low %v1637_v8, %v206_v9  ;;  %v1647_v14 = vcombine.low %v453_v11, %v200_v7  ;;  %v371_v37 = vld [vmem:[%s1629_s30] sm:$0xe]  ;;  %v1666_v39 = vld [vmem:[%s1629_s30 + $0x8] sm:$0xf] }
  0x14   : > { %v1314_v15 = vcombine.low %v1637_v8, %v1642_v12  ;;  %v224_v16 = vshrl.u32 %v1280_v10, 16  ;;  %v226_v17 = vshll.u32 %v1280_v10, 16  ;;  %v713_v40 = vld [vmem:[%s1629_s30 + $0xc] sm:$0xf]  ;;  %v714_v43 = vld [vmem:[%s1629_s30 + $0x10] sm:$0x3]  ;;  %v1295_v45 = vcombine.low %v371_v37, %v200_v7 }
  0x15   : > { %v231_v18 = vshll.u32 %v1645_v13, 16  ;;  %v235_v19 = vshrl.u32 %v1645_v13, 16  ;;  %v550_v20 = vshrl.u32 %v1647_v14, 16  ;;  %v553_v21 = vshll.u32 %v1647_v14, 16  ;;  %v803_v49 = vld [vmem:[%s1629_s30 + $0x10] sm:$0x7] }
  0x16   : > { %v228_v22 = vrot.slane %v226_v17, 1  ;;  %v558_v23 = vshrl.u32 %v1314_v15, 16  ;;  %v561_v24 = vshll.u32 %v1314_v15, 16  ;;  %v1333_v46 = vcombine.low %v711_v38, %v1666_v39  ;;  %v454_v60 = vld [vmem:[%s1629_s30 + $0xc] sm:$0x7] }
  0x17   : > { %v233_v25 = vrot.slane %v231_v18, 1  ;;  %v552_v26 = vrot.slane %v550_v20, 3  ;;  %v555_v27 = vrot.slane %v553_v21, 4  ;;  %v1334_v47 = vcombine.low %v713_v40, %v714_v43  ;;  %v899_v17 = vld [vmem:[%s1629_s30 + $0x4] sm:$0x8] }
  0x18   : > { %v229_v28 = vor.u32 %v228_v22, %v224_v16  ;;  %v560_v29 = vrot.slane %v558_v23, 3  ;;  %v563_v30 = vrot.slane %v561_v24, 4  ;;  %v381_v50 = vrot.slane %v1295_v45, 1  ;;  %v1552_v16 = vld [vmem:[%s1830_s1 + $0x78] sm:$0xff]   ;;  %v1555_v18 = vld [vmem:[%s1830_s1 + $0x80] sm:$0xff]   ;;  %v1556_v22 = vld [vmem:[%s1830_s1 + $0x88] sm:$0xff]  }
  0x19   : > { %v237_v31 = vor.u32 %v235_v19, %v233_v25  ;;  %v556_v32 = vor.u32 %v555_v27, %v552_v26  ;;  %v382_v51 = vrot.slane %v1645_v13, 1  ;;  %v731_v52 = vrot.slane %v1333_v46, 2  ;;  %v1553_v13 = vld [vmem:[%s1830_s1 + $0x38] sm:$0xff]  }
  0x1a   : > { %v234_v33 = vsel %vm222_vm0, %v229_v28, %v233_v25  ;;  %v564_v34 = vor.u32 %v563_v30, %v560_v29  ;;  %v732_v53 = vrot.slane %v1334_v47, 2  ;;  %v1688_v55 = vcombine.low %v713_v40, %v803_v49 }
  0x1b   : > { %1405 = vmatprep.mubr.msk.bf16.mxu1 %vm250_vm2, %v234_v33  ;;  %v1324_v56 = vcombine.low %v1642_v12, %v1642_v12  ;;  %v383_v58 = vsel %vm380_vm3, %v381_v50, %v382_v51  ;;  %v814_v62 = vshrl.u32 %v1333_v46, 16  ;;  %v817_v63 = vshll.u32 %v1333_v46, 16 }
  0x1c   : > { %v565_v41 = vsel %vm548_vm1, %v556_v32, %v564_v34  ;;  %1406 = vmatmul.mubr.msk.bf16.vlgmr.msra.gmra.mrb[0].mxu1 %vm250_vm2, %v237_v31  ;;  %v733_v59 = vsel %vm730_vm4, %v731_v52, %v732_v53  ;;  %v822_v0 = vshrl.u32 %v1688_v55, 16  ;;  %v825_v1 = vshll.u32 %v1688_v55, 16 }
  0x1d   : > { %1437 = vmatprep.mubr.msk.bf16.mxu0 %vm250_vm2, %v565_v41  ;;  %1410 = vmatpush3.bf16.msra.mxu1 %v1537_v5  ;;  %v1305_v3 = vcombine.low %v1637_v8, %v454_v60  ;;  %v816_v5 = vrot.slane %v814_v62, 2  ;;  %v819_v6 = vrot.slane %v817_v63, 3  ;;  %v1352_v19 = vcombine.low %v899_v17, %v1666_v39 }
  0x1e   : > { %1438 = vmatmul.mubr.msk.bf16.vlgmr.msra.gmra.mrb[0].mxu0 %vm250_vm2, %v564_v34  ;;  %1411 = vmatprep.subr.bf16.mxu1 %v1539_v36  ;;  %v824_v7 = vrot.slane %v822_v0, 2  ;;  %v827_v9 = vrot.slane %v825_v1, 3  ;;  %v909_v21 = vrot.slane %v1688_v55, 3  ;;  %v980_v24 = vlaneseq }
  0x1f   : > { %1442 = vmatpush3.bf16.msra.mxu0 %v1536_v4  ;;  %1413 = vmatprep.mubr.msk.bf16.mxu1 %vm250_vm2, %v1280_v10  ;;  %v1550_v4 = vld [vmem:[%s1830_s1 + $0x70] sm:$0xff]   ;;  %v467_v10 = vrot.slane %v1647_v14, 3  ;;  %v468_v11 = vrot.slane %v1305_v3, 3  ;;  %v820_v8 = vor.u32 %v819_v6, %v816_v5  ;;  %v908_v20 = vrot.slane %v1352_v19, 3 }
  0x20   : > { %1443 = vmatprep.subr.bf16.mxu0 %v1538_v35  ;;  %1445 = vmatprep.mubr.msk.bf16.mxu0 %vm250_vm2, %v1323_v42  ;;  %v828_v12 = vor.u32 %v827_v9, %v824_v7  ;;  %v1738_v25 = vshrl.u32 %v980_v24, 7  ;;  %vm1041_vm4 = vcmask 523264  }
  0x21   : > { %1412 = vmatpush3.bf16.msra.mxu1 %v1539_v36  ;;  %v469_v15 = vsel %vm466_vm5, %v467_v10, %v468_v11  ;;  %v910_v23 = vsel %vm466_vm5, %v908_v20, %v909_v21  ;;  %vm1078_vm5 = vcmask 130048  }
  0x22   : > { %1417 = vmatprep.subr.bf16.mxu1 %v1543_v44  ;;  %v829_v14 = vsel %vm812_vm6, %v820_v8, %v828_v12  ;;  %v983_v26 = vadd.s32 16, %v1738_v25  ;;  %v982_v27 = vadd.s32 8, %v1738_v25  ;;  %vm1081_vm6 = vcmask 392192  }
  0x23   : > { %1444 = vmatpush3.bf16.msra.mxu0 %v1538_v35  ;;  %v1743_v28 = vmul.u32.u64.low 2863311531, %v1738_v25  ;;  %v1744_v29 = vmul.u32.u64.high 2863311531, %v1738_v25, %v1743_v28 }
  0x24   : > { %1449 = vmatprep.subr.bf16.mxu0 %v1541_v48  ;;  %v1746_v30 = vmul.u32.u64.low 2863311531, %v983_v26  ;;  %v1747_v31 = vmul.u32.u64.high 2863311531, %v983_v26, %v1746_v30  ;;  %v1749_v32 = vmul.u32.u64.low 2863311531, %v982_v27  ;;  %v1750_v33 = vmul.u32.u64.high 2863311531, %v982_v27, %v1749_v32 }
  0x25   : > { %v990_v34 = vshrl.u32 %v1744_v29, 2 }
  0x26   : > { %v1012_v35 = vshrl.u32 %v1747_v31, 2  ;;  %v1001_v36 = vshrl.u32 %v1750_v33, 2 }
  0x27   : > { %v991_v37 = vmul.u32 6, %v990_v34 }
  0x28   : > { %1414 = vmatmul.mubr.msk.bf16.vlgmr.msra.gmra.mrb[0].mxu1 %vm250_vm2, %v1286_v54  ;;  %v1013_v38 = vmul.u32 6, %v1012_v35  ;;  %v1002_v39 = vmul.u32 6, %v1001_v36 }
  0x29   : > { %1418 = vmatpush3.bf16.msra.mxu1 %v1543_v44  ;;  %1421 = vmatprep.mubr.msk.bf16.mxu1 %vm250_vm2, %v383_v58  ;;  %v992_v40 = vsub.s32 %v1738_v25, %v991_v37 }
  0x2a   : > { %1446 = vmatmul.mubr.msk.bf16.vlgmr.msra.gmra.mrb[0].mxu0 %vm250_vm2, %v1324_v56  ;;  %1419 = vmatprep.subr.bf16.mxu1 %v1545_v57  ;;  %v1014_v42 = vsub.s32 %v983_v26, %v1013_v38  ;;  %v1003_v44 = vsub.s32 %v982_v27, %v1002_v39  ;;  %v1568_v56 = vmov 0.0   ;;  %v1767_v26 = vsub.s32 0, %v1738_v25 }
  0x2b   : > { %1450 = vmatpush3.bf16.msra.mxu0 %v1541_v48  ;;  %1453 = vmatprep.mubr.msk.bf16.mxu0 %vm250_vm2, %v733_v59  ;;  %vm1017_vm7 = vcmp.ne.s32.totalorder %v992_v40, 0  ;;  %vm1020_vm8 = vcmp.lt.s32.totalorder %v992_v40, 0  ;;  %v1026_v47 = vadd.s32 6, %v992_v40 }
  0x2c   : > { %1451 = vmatprep.subr.bf16.mxu0 %v1544_v61  ;;  %vm1019_vm9 = vcmp.ne.s32.totalorder %v1014_v42, 0  ;;  %vm1022_vm10 = vcmp.lt.s32.totalorder %v1014_v42, 0  ;;  %vm1018_vm11 = vcmp.ne.s32.totalorder %v1003_v44, 0  ;;  %vm1021_vm12 = vcmp.lt.s32.totalorder %v1003_v44, 0  ;;  %vm1023_vm13 = vmand %vm1020_vm8, %vm1017_vm7 }
  0x2d   : > { %1420 = vmatpush3.bf16.msra.mxu1 %v1545_v57  ;;  %vm1025_vm14 = vmand %vm1022_vm10, %vm1019_vm9  ;;  %v1028_v48 = vadd.s32 6, %v1014_v42  ;;  %v1027_v49 = vadd.s32 6, %v1003_v44  ;;  %v1029_v50 = vsel %vm1023_vm13, %v1026_v47, %v992_v40 }
  0x2e   : > { %1425 = vmatprep.subr.bf16.mxu1 %v1551_v2  ;;  %vm1024_vm15 = vmand %vm1021_vm12, %vm1018_vm11  ;;  %vm1032_vm0 = vcmp.lt.s32.totalorder %v1029_v50, 4 }
  0x2f   : > { %1452 = vmatpush3.bf16.msra.mxu0 %v1544_v61  ;;  %v1030_v52 = vsel %vm1024_vm15, %v1027_v49, %v1003_v44  ;;  %v1035_v57 = vsel %vm1032_vm0, 1.0, %v1568_v56 }
  0x30   : > { %1457 = vmatprep.subr.bf16.mxu0 %v1550_v4  ;;  %vm1033_vm3 = vcmp.lt.s32.totalorder %v1030_v52, 4 }
  0x31   : > { %v1036_v62 = vsel %vm1033_vm3, 1.0, %v1568_v56 }
  0x34   : > { %1422 = vmatmul.mubr.msk.bf16.vlgmr.msra.gmra.mrb[0].mxu1 %vm250_vm2, %v382_v51  ;;  %v1031_v51 = vsel %vm1025_vm14, %v1028_v48, %v1014_v42 }
  0x35   : > { %1426 = vmatpush3.bf16.msra.mxu1 %v1551_v2  ;;  %1429 = vmatprep.mubr.msk.bf16.mxu1 %vm250_vm2, %v469_v15  ;;  %vm1034_vm1 = vcmp.lt.s32.totalorder %v1031_v51, 4 }
  0x36   : > { %1454 = vmatmul.mubr.msk.bf16.vlgmr.msra.gmra.mrb[0].mxu0 %vm250_vm2, %v732_v53  ;;  %1427 = vmatprep.subr.bf16.mxu1 %v1553_v13  ;;  %v1037_v60 = vsel %vm1034_vm1, 1.0, %v1568_v56 }
  0x37   : > { %1458 = vmatpush3.bf16.msra.mxu0 %v1550_v4  ;;  %1461 = vmatprep.mubr.msk.bf16.mxu0 %vm250_vm2, %v829_v14 }
  0x38   : > { %1459 = vmatprep.subr.bf16.mxu0 %v1552_v16 }
  0x39   : > { %1428 = vmatpush3.bf16.msra.mxu1 %v1553_v13 }
  0x3b   : > { %1460 = vmatpush3.bf16.msra.mxu0 %v1552_v16 }
  0x3c   : > { %1465 = vmatprep.subr.bf16.mxu0 %v1555_v18 }
  0x40   : > { %1430 = vmatmul.mubr.msk.bf16.vlgmr.msra.gmra.mrb[0].mxu1 %vm250_vm2, %v468_v11 }
  0x42   : > { %1462 = vmatmul.mubr.msk.bf16.vlgmr.msra.gmra.mrb[0].mxu0 %vm250_vm2, %v828_v12 }
  0x43   : > { %1466 = vmatpush3.bf16.msra.mxu0 %v1555_v18  ;;  %1469 = vmatprep.mubr.msk.bf16.mxu0 %vm250_vm2, %v910_v23 }
  0x44   : > { %1467 = vmatprep.subr.bf16.mxu0 %v1556_v22 }
  0x47   : > { %1468 = vmatpush3.bf16.msra.mxu0 %v1556_v22 }
  0x4e   : > { %1470 = vmatmul.mubr.msk.bf16.vlgmr.msra.gmra.mrb[0].mxu0 %vm250_vm2, %v909_v21 }
 0x113   : > { %v1431_v41 = vpop.f32.mrb[0].mxu1 }
 0x114   : > { %v522_v43 = vpop.f32.mrb[1].mxu1 }
 0x115   : > { %v1432_v45 = vpop.f32.mrb[2].mxu1 }
 0x116   : > { %v525_v46 = vpop.f32.mrb[3].mxu1 }
 0x121   : > { %v1471_v53 = vpop.f32.mrb[0].mxu0 }
 0x122   : > { %v1473_v54 = vadd.f32 %v1471_v53, %v1431_v41  ;;  %v963_v55 = vpop.f32.mrb[1].mxu0 }
 0x123   : > { %v1474_v58 = vadd.f32 %v963_v55, %v522_v43  ;;  %v1472_v59 = vpop.f32.mrb[2].mxu0 }
 0x124   : > { %v966_v61 = vpop.f32.mrb[3].mxu0  ;;  %v1040_v1 = vmul.f32 %v1473_v54, %v1037_v60 }
 0x125   : > { %v1038_v63 = vmul.f32 %v1474_v58, %v1035_v57  ;;  %v1475_v0 = vadd.f32 %v966_v61, %v525_v46 }
 0x126   : > { %v1045_v6 = vsel %vm1041_vm4, %v1040_v1, 0.0 }
 0x127   : > { %v1039_v2 = vmul.f32 %v1475_v0, %v1036_v62  ;;  %v1042_v3 = vsel %vm1041_vm4, %v1038_v63, 0.0 }
 0x129   : > { %v1043_v4 = vsel %vm1041_vm4, %v1039_v2, 0.0 }
 0x12a   : > { %v1044_v5 = vadd.f32 %v1043_v4, %v1042_v3 }
 0x12c   : > { %v1046_v7 = vadd.f32 %v1045_v6, %v1044_v5 }
 0x12e   : > { %v1047_v9 = vrot.slane %v1046_v7, 4 }
 0x130   : > { %v1048_v10 = vadd.f32 %v1047_v9, %v1046_v7 }
 0x132   : > { %v1049_v11 = vrot.slane %v1048_v10, 2 }
 0x134   : > { %v1050_v8 = vadd.f32 %v1049_v11, %v1048_v10 }
 0x136   : > { %v1051_v12 = vrot.slane %v1050_v8, 1 }
 0x138   : > { %v1052_v13 = vadd.f32 %v1051_v12, %v1050_v8 }
 0x13a   : > { %v1053_v15 = vmul.f32 0.0625, %v1052_v13 }
 0x13c   : > { %1063 = vrot.lane.b32.xlu1 %v1053_v15, %s1569_s7  ;;  %1055 = vrot.lane.b32.xlu0 %v1053_v15, %s1570_s8 }
 0x140   : > { %1059 = vrot.lane.b32.xlu0 %v1053_v15, %s1571_s9 }
 0x1ae   : > { %v1056_v16 = vpop.permute.xlu0 %1055  ;;  %v1064_v19 = vpop.permute.xlu1 %1063 }
 0x1af   : > { %v1058_v14 = vadd.f32 %v1056_v16, %v1053_v15 }
 0x1b2   : > { %v1060_v17 = vpop.permute.xlu0 %1059 }
 0x1b3   : > { %v1062_v18 = vadd.f32 %v1060_v17, %v1058_v14 }
 0x1b5   : > { %v1066_v20 = vadd.f32 %v1064_v19, %v1062_v18 }
 0x1b7   : > { %v1067_v21 = vmul.f32 0.25, %v1066_v20 }
 0x1b9   : > { %1072 = vrot.lane.b32.xlu0 %v1067_v21, %s1572_s10  ;;  %1069 = vrot.lane.b32.xlu1 %v1067_v21, %s1573_s11 }
 0x1bd   : > { %1075 = vrot.lane.b32.xlu1 %v1067_v21, %s1574_s12 }
 0x22b   : > { %v1070_v22 = vpop.permute.xlu1 %1069  ;;  %v1073_v23 = vpop.permute.xlu0 %1072 }
 0x22c   : > { %v1079_v24 = vsel %vm1078_vm5, %v1067_v21, %v1070_v22 }
 0x22d   : > { %v1080_v27 = vsel %vm250_vm2, %v1079_v24, %v1073_v23 }
 0x22f   : > { %v1076_v28 = vpop.permute.xlu1 %1075 }
 0x230   : > { %v1082_v29 = vsel %vm1081_vm6, %v1080_v27, %v1076_v28 }
 0x231   : > { %v1086_v30 = vrot.slane %v1082_v29, %v1767_v26 }
 0x233   : > { %v1772_v31 = vsub.f32 %v1474_v58, %v1086_v30  ;;  %v1774_v32 = vsub.f32 %v1475_v0, %v1086_v30  ;;  %v1776_v33 = vsub.f32 %v1473_v54, %v1086_v30 }
 0x235   : > { %v1090_v34 = vmul.f32 %v1772_v31, %v1772_v31  ;;  %v1091_v25 = vmul.f32 %v1774_v32, %v1774_v32  ;;  %v1092_v35 = vmul.f32 %v1776_v33, %v1776_v33 }
 0x237   : > { %v1093_v36 = vmul.f32 %v1090_v34, %v1035_v57  ;;  %v1094_v37 = vmul.f32 %v1091_v25, %v1036_v62  ;;  %v1095_v38 = vmul.f32 %v1092_v35, %v1037_v60  ;;  %v1135_v57 = vld [vmem:[%s1831_s2] sm:$0x1] }
 0x238   : > { %v1141_v59 = vrot.slane %v1135_v57, %v1767_v26  ;;  %v1136_v60 = vld [vmem:[%s1832_s3] sm:$0x1] }
 0x239   : > { %v1096_v39 = vsel %vm1041_vm4, %v1093_v36, 0.0  ;;  %v1097_v40 = vsel %vm1041_vm4, %v1094_v37, 0.0  ;;  %v1099_v42 = vsel %vm1041_vm4, %v1095_v38, 0.0  ;;  %v1158_v61 = vrot.slane %v1136_v60, %v1767_v26 }
 0x23a   : > { %v1098_v41 = vadd.f32 %v1097_v40, %v1096_v39 }
 0x23c   : > { %v1100_v43 = vadd.f32 %v1099_v42, %v1098_v41 }
 0x23e   : > { %v1101_v44 = vrot.slane %v1100_v43, 4 }
 0x240   : > { %v1102_v45 = vadd.f32 %v1101_v44, %v1100_v43 }
 0x242   : > { %v1103_v46 = vrot.slane %v1102_v45, 2 }
 0x244   : > { %v1104_v47 = vadd.f32 %v1103_v46, %v1102_v45 }
 0x246   : > { %v1105_v48 = vrot.slane %v1104_v47, 1 }
 0x248   : > { %v1106_v49 = vadd.f32 %v1105_v48, %v1104_v47 }
 0x24a   : > { %v1107_v50 = vmul.f32 0.0625, %v1106_v49 }
 0x24c   : > { %1113 = vrot.lane.b32.xlu1 %v1107_v50, %s1571_s9  ;;  %1109 = vrot.lane.b32.xlu0 %v1107_v50, %s1570_s8 }
 0x250   : > { %1117 = vrot.lane.b32.xlu0 %v1107_v50, %s1569_s7 }
 0x2be   : > { %v1110_v51 = vpop.permute.xlu0 %1109  ;;  %v1114_v53 = vpop.permute.xlu1 %1113 }
 0x2bf   : > { %v1112_v52 = vadd.f32 %v1110_v51, %v1107_v50 }
 0x2c1   : > { %v1116_v54 = vadd.f32 %v1114_v53, %v1112_v52 }
 0x2c2   : > { %v1118_v55 = vpop.permute.xlu0 %1117 }
 0x2c3   : > { %v1120_v56 = vadd.f32 %v1118_v55, %v1116_v54 }
 0x2c5   : > { %v1121_v58 = vmul.f32 0.25, %v1120_v56 }
 0x2c7   : > { %1126 = vrot.lane.b32.xlu0 %v1121_v58, %s1572_s10  ;;  %1123 = vrot.lane.b32.xlu1 %v1121_v58, %s1573_s11 }
 0x2cb   : > { %1129 = vrot.lane.b32.xlu1 %v1121_v58, %s1574_s12  ;;  %1142 = vrot.lane.b32.xlu0 %v1141_v59, %s1573_s11 }
 0x2cf   : > { %1145 = vrot.lane.b32.xlu1 %v1141_v59, %s1572_s10  ;;  %1148 = vrot.lane.b32.xlu0 %v1141_v59, %s1574_s12 }
 0x2d3   : > { %1159 = vrot.lane.b32.xlu1 %v1158_v61, %s1573_s11  ;;  %1162 = vrot.lane.b32.xlu0 %v1158_v61, %s1572_s10 }
 0x2d7   : > { %1165 = vrot.lane.b32.xlu1 %v1158_v61, %s1574_s12 }
 0x339   : > { %v1127_v62 = vpop.permute.xlu0 %1126  ;;  %v1124_v63 = vpop.permute.xlu1 %1123 }
 0x33a   : > { %v1132_v0 = vsel %vm1078_vm5, %v1121_v58, %v1124_v63 }
 0x33b   : > { %v1133_v1 = vsel %vm250_vm2, %v1132_v0, %v1127_v62 }
 0x33d   : > { %v1130_v2 = vpop.permute.xlu1 %1129  ;;  %v1143_v3 = vpop.permute.xlu0 %1142 }
 0x33e   : > { %v1134_v4 = vsel %vm1081_vm6, %v1133_v1, %v1130_v2  ;;  %v1151_v9 = vsel %vm1078_vm5, %v1135_v57, %v1143_v3 }
 0x33f   : > { %v1171_v5 = vadd.f32 1e-05, %v1134_v4 }
 0x341   : > { %1558 = vrsqrt.f32 %v1171_v5  ;;  %v1146_v6 = vpop.permute.xlu1 %1145  ;;  %v1149_v7 = vpop.permute.xlu0 %1148 }
 0x342   : > { %v1152_v12 = vsel %vm250_vm2, %v1151_v9, %v1146_v6 }
 0x343   : > { %v1153_v14 = vsel %vm1081_vm6, %v1152_v12, %v1149_v7 }
 0x344   : > { %v1183_v22 = vrot.slane %v1153_v14, %v1767_v26 }
 0x345   : > { %v1160_v10 = vpop.permute.xlu1 %1159  ;;  %v1163_v8 = vpop.permute.xlu0 %1162 }
 0x346   : > { %v1168_v11 = vsel %vm1078_vm5, %v1136_v60, %v1160_v10 }
 0x347   : > { %v1169_v13 = vsel %vm250_vm2, %v1168_v11, %v1163_v8  ;;  %vm1210_vm2 = vcmask 519168  }
 0x349   : > { %v1166_v15 = vpop.permute.xlu1 %1165 }
 0x34a   : > { %v1170_v18 = vsel %vm1081_vm6, %v1169_v13, %v1166_v15 }
 0x34b   : > { %v1559_v16 = vpop.eup %1558  ;;  %v1190_v28 = vrot.slane %v1170_v18, %v1767_v26 }
 0x34c   : > { %v1176_v17 = vrot.slane %v1559_v16, %v1767_v26 }
 0x34e   : > { %v1177_v19 = vmul.f32 %v1176_v17, %v1772_v31  ;;  %v1178_v20 = vmul.f32 %v1176_v17, %v1774_v32  ;;  %v1179_v21 = vmul.f32 %v1176_v17, %v1776_v33 }
 0x350   : > { %v1184_v23 = vmul.f32 %v1183_v22, %v1177_v19  ;;  %v1185_v24 = vmul.f32 %v1183_v22, %v1178_v20  ;;  %v1186_v27 = vmul.f32 %v1183_v22, %v1179_v21 }
 0x352   : > { %v1191_v29 = vadd.f32 %v1190_v28, %v1184_v23  ;;  %v1192_v30 = vadd.f32 %v1190_v28, %v1185_v24  ;;  %v1193_v34 = vadd.f32 %v1190_v28, %v1186_v27 }
 0x354   : > { %v1194_v25 = vmax.f32 %v1191_v29, 0.0  ;;  %v1195_v35 = vmax.f32 %v1192_v30, 0.0  ;;  %v1196_v36 = vmax.f32 %v1193_v34, 0.0 }
 0x356   : > { %v1362_v31 = vpack.c.bf16 %v1194_v25, %v1194_v25  ;;  %v1363_v32 = vpack.c.bf16 %v1195_v35, %v1195_v35  ;;  %v1364_v33 = vpack.c.bf16 %v1196_v36, %v1196_v36 }
 0x358   : > { %1211 = vst.msk [vmem:[%s197_s22] sm:$0xf] %vm1210_vm2, %v1362_v31  ;;  %1212 = vst.msk [vmem:[%s197_s22 + $0x4] sm:$0xf] %vm1210_vm2, %v1363_v32 }
 0x359   : > { %1213 = vst.msk [vmem:[%s197_s22 + $0x8] sm:$0xf] %vm1210_vm2, %v1364_v33 }
 0x35a PF: > { %s14_s15 = sadd.s32 1, %s1566_s15  }
 0x35b   : > { %p11_p4 = scmp.ge.s32.totalorder %s14_s15, 4  }
 0x35d   :  { %13 = sbr.rel (!%p11_p4) target bundleno = 1 (0x1), region = 74 }

// kernel: forward.18
= control target key start
LH: loop header
LB: loop body
LE: loop exit
PB: predicated region body
PF: predicated region fallthrough
CT: control target
= control target key end

     0   :  { %s2664_s15 = smov 0   ;;  %s3464_s0 = inlined_call_operand.vmem [shape: bf16[2,102,16], index: 0, kind: input, shape index: {}]   ;;  %s3465_s1 = inlined_call_operand.vmem [shape: bf16[9,16,32], index: 1, kind: input, shape index: {}]   ;;  %s3466_s2 = inlined_call_operand.vmem [shape: f32[1,8], index: 2, kind: input, shape index: {}]   ;;  %s3467_s3 = inlined_call_operand.vmem [shape: f32[1,8], index: 3, kind: input, shape index: {}]   ;;  %s3468_s4 = inlined_call_operand.vmem [shape: bf16[2,80,32], index: 4, kind: output, shape index: {}]  }
   0x1 LB: > { %s2025_s16 = sadd.s32 4294967295, %s2629_s15   ;;  %p2029_p0 = scmp.ge.s32.totalorder %s2629_s15, 1  ;;  %s2629_s15 = sphi %s2664_s15, %s14_s15  }
   0x2   : > { %p162_p1 = scmp.lt.s32.totalorder %s2629_s15, 3 }
   0x4   : > { %p163_p2 = pnand %p2029_p0, %p162_p1 }
   0x5   : > { %v2675_v0 = vld [vmem:[%s3465_s1 + $0x20] sm:$0xff] (!%p163_p2)   ;;  %v2631_v1 = vmov (!%p163_p2), 0.0   ;;  %v2590_v2 = vld [vmem:[%s3465_s1 + $0x8] sm:$0xff] (!%p163_p2)   ;;  %vm2632_vm0 = vmmov (!%p163_p2), 0   ;;  %p188_p3 = scmp.lt.s32.totalorder (!%p163_p2), %s2025_s16, 1  ;;  %vm294_vm3 = vcmask (!%p163_p2), 130048  }
   0x6   : > { %166 = sbr.rel (%p163_p2) target bundleno = 1001 (0x3e9), region = 36  ;;  %2289 = vmatprep.subr.bf16.mxu0 (!%p163_p2), %v2631_v1  ;;  %2201 = vmatprep.subr.bf16.mxu1 (!%p163_p2), %v2631_v1  ;;  %vm243_vm1 = vsmask.f32 (!%p163_p2), 7424  ;;  %vm759_vm2 = vsmask.f32 (!%p163_p2), 6400  ;;  %v2597_v27 = vld [vmem:[%s3465_s1] sm:$0xff] (!%p163_p2)  }
   0x7   : > { %2290 = vmatpush3.bf16.msra.mxu0 (!%p163_p2), %v2675_v0  ;;  %2203 = vmatprep.mubr.msk.bf16.mxu1 (!%p163_p2), %vm2632_vm0, %v2631_v1  ;;  %v2595_v36 = vld [vmem:[%s3465_s1 + $0x28] sm:$0xff] (!%p163_p2)   ;;  %vm924_vm4 = vcmask (!%p163_p2), 1045504   ;;  %vm479_vm5 = vcmask (!%p163_p2), 1046528   ;;  %vm1369_vm6 = vcmask (!%p163_p2), 1044480   ;;  %vm1204_vm7 = vsmask.f32 (!%p163_p2), 5376 }
   0x8   : > { %2202 = vmatpush3.bf16.msra.mxu1 (!%p163_p2), %v2590_v2  ;;  %2291 = vmatprep.mubr.msk.bf16.mxu0 (!%p163_p2), %vm2632_vm0, %v2631_v1  ;;  %s2633_s13 = smov (!%p163_p2), 104   ;;  %s2634_s14 = smov (!%p163_p2), 120  }
   0x9   : > { %2311 = vmatprep.subr.bf16.mxu0 (!%p163_p2), %v2631_v1  ;;  %2223 = vmatprep.subr.bf16.mxu1 (!%p163_p2), %v2631_v1  ;;  %s2635_s17 = smov (!%p163_p2), 112   ;;  %s2636_s18 = smov (!%p163_p2), 16  }
   0xa   : > { %s2637_s19 = smov (!%p163_p2), 8   ;;  %s2638_s20 = smov (!%p163_p2), 24  }
   0xd   : > { %s3490_s16 = smov (!%p188_p3, %s2025_s16), 1 }
   0xe   : > { %s2551_s21 = smul.u32 52, %s3490_s16 }
   0xf   : > { %s2552_s25 = smul.u32 40, %s3490_s16 }
  0x10   : > { %s2695_s24 = scalar_lea.vmem %s3464_s0, %s2551_s21 }
  0x11   : > { %v199_v3 = vld [vmem:[%s2695_s24] sm:$0xf]  ;;  %v2699_v4 = vld [vmem:[%s2695_s24 + $0x4] sm:$0xf]  ;;  %v2705_v6 = vld [vmem:[%s2695_s24 + $0x8] sm:$0xff]   ;;  %s197_s16 = scalar_lea.vmem %s3468_s4, %s2552_s25 }
  0x12   : > { %v2702_v5 = vcombine.low %v199_v3, %v2699_v4  ;;  %v595_v7 = vld [vmem:[%s2695_s24 + $0x4] sm:$0xe]  ;;  %v2709_v8 = vld [vmem:[%s2695_s24 + $0x8] sm:$0xf]  ;;  %v252_v11 = vshll.u32 %v2705_v6, 16  ;;  %v2718_v13 = vld [vmem:[%s2695_s24 + $0xc] sm:$0xff]  }
  0x13   : > { %v2715_v12 = vcombine.low %v595_v7, %v2709_v8  ;;  %v2721_v14 = vld [vmem:[%s2695_s24 + $0x10] sm:$0xff]   ;;  %v769_v19 = vshrl.u32 %v2718_v13, 16  ;;  %v772_v20 = vshll.u32 %v2718_v13, 16  ;;  %v256_v21 = vshrl.u32 %v2705_v6, 16  ;;  %v2739_v34 = vld [vmem:[%s2695_s24 + $0x1c] sm:$0xff]   ;;  %v2767_v53 = vld [vmem:[%s2695_s24 + $0x28] sm:$0xff]  }
  0x14   : > { %v245_v9 = vshrl.u32 %v2702_v5, 16  ;;  %v247_v10 = vshll.u32 %v2702_v5, 16  ;;  %v254_v16 = vrot.slane %v252_v11, 1  ;;  %v2729_v22 = vld [vmem:[%s2695_s24 + $0x14] sm:$0xff]   ;;  %v260_v26 = vshll.u32 %v2721_v14, 16  ;;  %v2762_v51 = vld [vmem:[%s2695_s24 + $0x20] sm:$0xff]  }
  0x15   : > { %v761_v17 = vshrl.u32 %v2715_v12, 16  ;;  %v764_v18 = vshll.u32 %v2715_v12, 16  ;;  %v771_v28 = vrot.slane %v769_v19, 1  ;;  %v774_v29 = vrot.slane %v772_v20, 2  ;;  %v2748_v41 = vld [vmem:[%s2695_s24 + $0x18] sm:$0xff]   ;;  %v2772_v56 = vld [vmem:[%s2695_s24 + $0x20] sm:$0xff]  }
  0x16   : > { %v249_v15 = vrot.slane %v247_v10, 1  ;;  %v778_v30 = vshrl.u32 %v2729_v22, 16  ;;  %v781_v33 = vshll.u32 %v2729_v22, 16  ;;  %v258_v38 = vor.u32 %v256_v21, %v254_v16  ;;  %v472_v57 = vld [vmem:[%s2695_s24] sm:$0xe] }
  0x17   : > { %v763_v24 = vrot.slane %v761_v17, 1  ;;  %v766_v25 = vrot.slane %v764_v18, 2  ;;  %v775_v35 = vor.u32 %v774_v29, %v771_v28  ;;  %v262_v39 = vrot.slane %v260_v26, 1  ;;  %v917_v62 = vld [vmem:[%s2695_s24 + $0x4] sm:$0xc] }
  0x18   : > { %v250_v23 = vor.u32 %v249_v15, %v245_v9  ;;  %v780_v37 = vrot.slane %v778_v30, 1  ;;  %v783_v40 = vrot.slane %v781_v33, 2  ;;  %v787_v43 = vshrl.u32 %v2739_v34, 16  ;;  %v2616_v15 = vld [vmem:[%s2695_s24 + $0x30] ss:$0 sps:$4 sm:$0x33]  }
  0x19   : > { %v767_v32 = vor.u32 %v766_v25, %v763_v24  ;;  %v790_v44 = vshll.u32 %v2739_v34, 16  ;;  %v263_v46 = vsel %vm243_vm1, %v258_v38, %v262_v39  ;;  %v264_v47 = vshrl.u32 %v2721_v14, 16  ;;  %v2814_v25 = vld [vmem:[%s2695_s24 + $0x28] ss:$0 sps:$4 sm:$0x11]  }
  0x1a   : > { %v255_v31 = vsel %vm243_vm1, %v250_v23, %v254_v16  ;;  %v784_v45 = vor.u32 %v783_v40, %v780_v37  ;;  %v268_v48 = vshll.u32 %v2748_v41, 16  ;;  %v789_v49 = vrot.slane %v787_v43, 1 }
  0x1b   : > { %2204 = vmatmul.mubr.msk.bf16.vlgmr.msra.gmra.mrb[0].mxu1 %vm294_vm3, %v255_v31  ;;  %v776_v42 = vsel %vm759_vm2, %v767_v32, %v775_v35  ;;  %v792_v50 = vrot.slane %v790_v44, 2  ;;  %v266_v54 = vor.u32 %v264_v47, %v262_v39  ;;  %v2054_v58 = vcombine.low %v472_v57, %v2699_v4  ;;  %v2620_v39 = vld [vmem:[%s2695_s24 + $0x2c] ss:$0 sps:$4 sm:$0x11]   ;;  %v2854_v47 = vld [vmem:[%s2695_s24 + $0x10] sm:$0xff]  }
  0x1c   : > { %2207 = vmatprep.mubr.msk.bf16.mxu1 %vm2632_vm0, %v2631_v1  ;;  %2224 = vmatpush3.bf16.msra.mxu1 %v2597_v27  ;;  %v785_v52 = vsel %vm759_vm2, %v775_v35, %v784_v45  ;;  %v270_v55 = vrot.slane %v268_v48, 1  ;;  %v481_v59 = vrot.slane %v2705_v6, 1  ;;  %v272_v61 = vshrl.u32 %v2748_v41, 16  ;;  %v1362_v35 = vld [vmem:[%s2695_s24 + $0x8] sm:$0x8]  ;;  %v2857_v48 = vld [vmem:[%s2695_s24 + $0x18] sm:$0xff]  }
  0x1d   : > { %2245 = vmatprep.subr.bf16.mxu1 %v2631_v1  ;;  %2292 = vmatmul.mubr.msk.bf16.vlgmr.msra.gmra.mrb[0].mxu0 %vm294_vm3, %v776_v42  ;;  %v2778_v60 = vor.u32 %v792_v50, %v789_v49  ;;  %v483_v63 = vrot.slane %v2721_v14, 1  ;;  %v480_v2 = vrot.slane %v2054_v58, 1  ;;  %v1087_v3 = vrot.slane %v2762_v51, 2  ;;  %v2603_v42 = vld [vmem:[%s3465_s1 + $0x30] sm:$0xff]  }
  0x1e   : > { %2312 = vmatpush3.bf16.msra.mxu0 %v2595_v36  ;;  %2295 = vmatprep.mubr.msk.bf16.mxu0 %vm2632_vm0, %v2631_v1  ;;  %v1089_v4 = vrot.slane %v2767_v53, 2  ;;  %v485_v7 = vrot.slane %v2748_v41, 1  ;;  %v271_v9 = vsel %vm243_vm1, %v266_v54, %v270_v55  ;;  %v276_v10 = vshll.u32 %v2772_v56, 16  ;;  %v2834_v36 = vld [vmem:[%s2695_s24 + $0x24] sm:$0xff]  }
  0x1f   : > { %2333 = vmatprep.subr.bf16.mxu0 %v2631_v1  ;;  %v2791_v11 = vsel %vm479_vm5, %v481_v59, %v483_v63  ;;  %v2795_v16 = vsel %vm479_vm5, %v480_v2, %v481_v59  ;;  %v1091_v19 = vrot.slane %v2616_v15, 2  ;;  %v794_v20 = vsel %vm759_vm2, %v784_v45, %v2778_v60 }
  0x20   : > { %v2800_v17 = vsel %vm924_vm4, %v1087_v3, %v1089_v4  ;;  %v2805_v18 = vsel %vm479_vm5, %v483_v63, %v485_v7  ;;  %v2086_v21 = vcombine.low %v917_v62, %v2709_v8  ;;  %v274_v23 = vor.u32 %v272_v61, %v270_v55 }
  0x21   : > { %v278_v24 = vrot.slane %v276_v10, 1  ;;  %v2817_v26 = vsel %vm924_vm4, %v1089_v4, %v1091_v19  ;;  %v637_v27 = vrot.slane %v2715_v12, 1  ;;  %v638_v8 = vrot.slane %v2718_v13, 1 }
  0x22   : > { %v925_v28 = vrot.slane %v2086_v21, 2  ;;  %v926_v29 = vrot.slane %v2718_v13, 2  ;;  %v640_v30 = vrot.slane %v2729_v22, 1  ;;  %v280_v32 = vshrl.u32 %v2772_v56, 16  ;;  %v2840_v13 = vld [vmem:[%s2695_s24 + $0xc] sm:$0xf] }
  0x23   : > { %2208 = vmatmul.mubr.msk.bf16.gmra.mrb[4].mxu1 %vm294_vm3, %v263_v46  ;;  %v279_v31 = vsel %vm243_vm1, %v274_v23, %v278_v24  ;;  %v284_v33 = vshll.u32 %v2814_v25, 16  ;;  %v2830_v12 = vsel %vm479_vm5, %v637_v27, %v638_v8  ;;  %v642_v38 = vrot.slane %v2739_v34, 1 }
  0x24   : > { %2211 = vmatprep.mubr.msk.bf16.mxu1 %vm2632_vm0, %v2631_v1  ;;  %v2837_v37 = vsel %vm479_vm5, %v638_v8, %v640_v30  ;;  %v927_v40 = vsel %vm924_vm4, %v925_v28, %v926_v29  ;;  %v644_v43 = vrot.slane %v2834_v36, 1  ;;  %v2118_v44 = vcombine.low %v1362_v35, %v2840_v13  ;;  %v2605_v28 = vld [vmem:[%s3465_s1 + $0x10] sm:$0xff]  }
  0x25   : > { %2296 = vmatmul.mubr.msk.bf16.gmra.mrb[4].mxu0 %vm294_vm3, %v785_v52  ;;  %v282_v45 = vor.u32 %v280_v32, %v278_v24  ;;  %v286_v46 = vrot.slane %v284_v33, 1  ;;  %v2860_v49 = vsel %vm479_vm5, %v640_v30, %v642_v38  ;;  %v1371_v54 = vrot.slane %v2854_v47, 3 }
  0x26   : > { %2299 = vmatprep.mubr.msk.bf16.mxu0 %vm2632_vm0, %v2631_v1  ;;  %v2863_v50 = vsel %vm479_vm5, %v642_v38, %v644_v43  ;;  %v1370_v52 = vrot.slane %v2118_v44, 3  ;;  %v646_v55 = vrot.slane %v2620_v39, 1  ;;  %v1373_v57 = vrot.slane %v2857_v48, 3 }
  0x27   : > { %v928_v58 = vrot.slane %v2729_v22, 2  ;;  %v796_v59 = vshrl.u32 %v2834_v36, 16  ;;  %v799_v61 = vshll.u32 %v2834_v36, 16  ;;  %v287_v62 = vsel %vm243_vm1, %v282_v45, %v286_v46 }
  0x28   : > { %v2876_v63 = vsel %vm1369_vm6, %v1370_v52, %v1371_v54  ;;  %v2879_v2 = vsel %vm479_vm5, %v644_v43, %v646_v55  ;;  %v2882_v4 = vsel %vm1369_vm6, %v1371_v54, %v1373_v57  ;;  %v1375_v19 = vrot.slane %v2762_v51, 3  ;;  %v2614_v54 = vld [vmem:[%s3465_s1 + $0x18] sm:$0xff]  }
  0x29   : > { %v801_v10 = vrot.slane %v799_v61, 2  ;;  %v929_v22 = vsel %vm924_vm4, %v926_v29, %v928_v58  ;;  %v930_v24 = vrot.slane %v2739_v34, 2  ;;  %v1377_v32 = vrot.slane %v2767_v53, 3  ;;  %v2912_v34 = vld [vmem:[%s2695_s24 + $0x30] ss:$0 sps:$4 sm:$0x77]  }
  0x2a   : > { %v2895_v23 = vsel %vm1369_vm6, %v1373_v57, %v1375_v19  ;;  %v1379_v38 = vrot.slane %v2912_v34, 3  ;;  %v1083_v45 = vrot.slane %v2854_v47, 2  ;;  %v1085_v46 = vrot.slane %v2857_v48, 2 }
  0x2b   : > { %2212 = vmatmul.mubr.msk.bf16.gmra.mrb[8].mxu1 %vm294_vm3, %v271_v9  ;;  %v798_v9 = vrot.slane %v796_v59, 1  ;;  %v931_v30 = vsel %vm924_vm4, %v928_v58, %v930_v24  ;;  %v2918_v35 = vsel %vm1369_vm6, %v1375_v19, %v1377_v32  ;;  %v1214_v57 = vshrl.u32 %v2854_v47, 16 }
  0x2c   : > { %2215 = vmatprep.mubr.msk.bf16.mxu1 %vm2632_vm0, %v2631_v1  ;;  %v2926_v39 = vsel %vm1369_vm6, %v1377_v32, %v1379_v38  ;;  %v1086_v52 = vsel %vm924_vm4, %v1083_v45, %v1085_v46  ;;  %v1088_v55 = vsel %vm924_vm4, %v1085_v46, %v1087_v3  ;;  %v1217_v58 = vshll.u32 %v2854_v47, 16 }
  0x2d   : > { %2300 = vmatmul.mubr.msk.bf16.gmra.mrb[8].mxu0 %vm294_vm3, %v794_v20  ;;  %v802_v15 = vor.u32 %v801_v10, %v798_v9  ;;  %v2607_v20 = vld [vmem:[%s2695_s24 + $0x2c] ss:$0 sps:$4 sm:$0x33]   ;;  %v1216_v61 = vrot.slane %v1214_v57, 2  ;;  %v1223_v10 = vshrl.u32 %v2857_v48, 16 }
  0x2e   : > { %2313 = vmatprep.mubr.msk.bf16.mxu0 %vm2632_vm0, %v2631_v1  ;;  %v805_v27 = vshrl.u32 %v2607_v20, 16  ;;  %v808_v8 = vshll.u32 %v2607_v20, 16 }
  0x2f   : > { %v2892_v21 = vsel %vm759_vm2, %v2778_v60, %v802_v15 }
  0x30   : > { %v807_v29 = vrot.slane %v805_v27, 1  ;;  %v810_v60 = vrot.slane %v808_v8, 2 }
  0x33   : > { %2216 = vmatmul.mubr.msk.bf16.gmra.mrb[12].mxu1 %vm294_vm3, %v279_v31  ;;  %v811_v31 = vor.u32 %v810_v60, %v807_v29  ;;  %v1241_v29 = vshrl.u32 %v2767_v53, 16 }
  0x34   : > { %2219 = vmatprep.mubr.msk.bf16.mxu1 %vm2632_vm0, %v2631_v1 }
  0x35   : > { %2314 = vmatmul.mubr.msk.bf16.vlgmr.msra.gmra.mrb[0].mxu0 %vm294_vm3, %v927_v40  ;;  %v2915_v33 = vsel %vm759_vm2, %v802_v15, %v811_v31  ;;  %v1225_v15 = vrot.slane %v1223_v10, 2 }
  0x36   : > { %2334 = vmatpush3.bf16.msra.mxu0 %v2603_v42  ;;  %2317 = vmatprep.mubr.msk.bf16.mxu0 %vm2632_vm0, %v2631_v1  ;;  %v934_v42 = vrot.slane %v2607_v20, 2  ;;  %v1235_v20 = vshll.u32 %v2762_v51, 16 }
  0x37   : > { %2355 = vmatprep.subr.bf16.mxu0 %v2631_v1 }
  0x3b   : > { %2220 = vmatmul.mubr.msk.bf16.gmra.mrb[16].mxu1 %vm294_vm3, %v287_v62  ;;  %v1219_v62 = vrot.slane %v1217_v58, 3 }
  0x3c   : > { %2225 = vmatprep.mubr.msk.bf16.mxu1 %vm2632_vm0, %v2631_v1 }
  0x3d   : > { %2318 = vmatmul.mubr.msk.bf16.gmra.mrb[4].mxu0 %vm294_vm3, %v929_v22  ;;  %v1220_v47 = vor.u32 %v1219_v62, %v1216_v61 }
  0x3e   : > { %2321 = vmatprep.mubr.msk.bf16.mxu0 %vm2632_vm0, %v2631_v1 }
  0x43   : > { %2226 = vmatmul.mubr.msk.bf16.vlgmr.msra.gmra.mrb[0].mxu1 %vm294_vm3, %v2702_v5  ;;  %v932_v5 = vrot.slane %v2834_v36, 2  ;;  %v1040_v36 = vld [vmem:[%s2695_s24 + $0x8] sm:$0xc] }
  0x44   : > { %2229 = vmatprep.mubr.msk.bf16.mxu1 %vm2632_vm0, %v2631_v1  ;;  %2246 = vmatpush3.bf16.msra.mxu1 %v2605_v28  ;;  %v2095_v44 = vcombine.low %v1040_v36, %v2840_v13  ;;  %v2610_v13 = vld [vmem:[%s3465_s1 + $0x38] sm:$0xff]   ;;  %v1237_v28 = vrot.slane %v1235_v20, 3 }
  0x45   : > { %2267 = vmatprep.subr.bf16.mxu1 %v2631_v1  ;;  %2322 = vmatmul.mubr.msk.bf16.gmra.mrb[8].mxu0 %vm294_vm3, %v931_v30  ;;  %v933_v40 = vsel %vm924_vm4, %v930_v24, %v932_v5  ;;  %v935_v43 = vsel %vm924_vm4, %v932_v5, %v934_v42  ;;  %v1243_v30 = vrot.slane %v1241_v29, 2  ;;  %v1253_v5 = vshll.u32 %v2912_v34, 16 }
  0x46   : > { %2325 = vmatprep.mubr.msk.bf16.mxu0 %vm2632_vm0, %v2631_v1  ;;  %v1206_v3 = vshrl.u32 %v2095_v44, 16 }
  0x48   : > { %v1208_v59 = vrot.slane %v1206_v3, 2 }
  0x4b   : > { %2230 = vmatmul.mubr.msk.bf16.gmra.mrb[4].mxu1 %vm294_vm3, %v2705_v6  ;;  %v1082_v6 = vrot.slane %v2095_v44, 2 }
  0x4c   : > { %2233 = vmatprep.mubr.msk.bf16.mxu1 %vm2632_vm0, %v2631_v1 }
  0x4d   : > { %2326 = vmatmul.mubr.msk.bf16.gmra.mrb[12].mxu0 %vm294_vm3, %v933_v40  ;;  %v1255_v40 = vrot.slane %v1253_v5, 3 }
  0x4e   : > { %2329 = vmatprep.mubr.msk.bf16.mxu0 %vm2632_vm0, %v2631_v1 }
  0x53   : > { %2234 = vmatmul.mubr.msk.bf16.gmra.mrb[8].mxu1 %vm294_vm3, %v2721_v14  ;;  %v1084_v14 = vsel %vm924_vm4, %v1082_v6, %v1083_v45 }
  0x54   : > { %2237 = vmatprep.mubr.msk.bf16.mxu1 %vm2632_vm0, %v2631_v1 }
  0x55   : > { %2330 = vmatmul.mubr.msk.bf16.gmra.mrb[16].mxu0 %vm294_vm3, %v935_v43 }
  0x56   : > { %2335 = vmatprep.mubr.msk.bf16.mxu0 %vm2632_vm0, %v2631_v1 }
  0x5b   : > { %2238 = vmatmul.mubr.msk.bf16.gmra.mrb[12].mxu1 %vm294_vm3, %v2748_v41 }
  0x5c   : > { %2241 = vmatprep.mubr.msk.bf16.mxu1 %vm2632_vm0, %v2631_v1 }
  0x5d   : > { %2336 = vmatmul.mubr.msk.bf16.vlgmr.msra.gmra.mrb[0].mxu0 %vm294_vm3, %v1084_v14 }
  0x5e   : > { %2356 = vmatpush3.bf16.msra.mxu0 %v2610_v13  ;;  %2339 = vmatprep.mubr.msk.bf16.mxu0 %vm2632_vm0, %v2631_v1 }
  0x5f   : > { %2377 = vmatprep.subr.bf16.mxu0 %v2631_v1 }
  0x63   : > { %2242 = vmatmul.mubr.msk.bf16.gmra.mrb[16].mxu1 %vm294_vm3, %v2772_v56 }
  0x64   : > { %2247 = vmatprep.mubr.msk.bf16.mxu1 %vm2632_vm0, %v2631_v1 }
  0x65   : > { %2340 = vmatmul.mubr.msk.bf16.gmra.mrb[4].mxu0 %vm294_vm3, %v1086_v52 }
  0x66   : > { %2343 = vmatprep.mubr.msk.bf16.mxu0 %vm2632_vm0, %v2631_v1 }
  0x6b   : > { %2248 = vmatmul.mubr.msk.bf16.vlgmr.msra.gmra.mrb[0].mxu1 %vm294_vm3, %v2795_v16  ;;  %v1209_v16 = vshll.u32 %v2095_v44, 16 }
  0x6c   : > { %2251 = vmatprep.mubr.msk.bf16.mxu1 %vm2632_vm0, %v2631_v1  ;;  %2268 = vmatpush3.bf16.msra.mxu1 %v2614_v54 }
  0x6d   : > { %2399 = vmatprep.subr.bf16.mxu1 %v2631_v1  ;;  %2344 = vmatmul.mubr.msk.bf16.gmra.mrb[8].mxu0 %vm294_vm3, %v1088_v55 }
  0x6e   : > { %2347 = vmatprep.mubr.msk.bf16.mxu0 %vm2632_vm0, %v2631_v1 }
  0x73   : > { %2252 = vmatmul.mubr.msk.bf16.gmra.mrb[4].mxu1 %vm294_vm3, %v2791_v11  ;;  %v1211_v11 = vrot.slane %v1209_v16, 3 }
  0x74   : > { %2255 = vmatprep.mubr.msk.bf16.mxu1 %vm2632_vm0, %v2631_v1 }
  0x75   : > { %2348 = vmatmul.mubr.msk.bf16.gmra.mrb[12].mxu0 %vm294_vm3, %v2800_v17  ;;  %v487_v17 = vrot.slane %v2772_v56, 1  ;;  %v1212_v9 = vor.u32 %v1211_v11, %v1208_v59 }
  0x76   : > { %2351 = vmatprep.mubr.msk.bf16.mxu0 %vm2632_vm0, %v2631_v1 }
  0x77   : > { %v488_v22 = vsel %vm479_vm5, %v485_v7, %v487_v17  ;;  %v1221_v56 = vsel %vm1204_vm7, %v1212_v9, %v1220_v47  ;;  %v1232_v7 = vshrl.u32 %v2762_v51, 16  ;;  %v1244_v51 = vshll.u32 %v2767_v53, 16 }
  0x78   : > { %v1250_v53 = vshrl.u32 %v2912_v34, 16 }
  0x79   : > { %v1234_v8 = vrot.slane %v1232_v7, 2  ;;  %v1246_v31 = vrot.slane %v1244_v51, 3 }
  0x7a   : > { %v1252_v38 = vrot.slane %v1250_v53, 2 }
  0x7b   : > { %2256 = vmatmul.mubr.msk.bf16.gmra.mrb[8].mxu1 %vm294_vm3, %v2805_v18  ;;  %v1226_v18 = vshll.u32 %v2857_v48, 16  ;;  %v489_v48 = vrot.slane %v2814_v25, 1  ;;  %v1238_v25 = vor.u32 %v1237_v28, %v1234_v8  ;;  %v1247_v32 = vor.u32 %v1246_v31, %v1243_v30 }
  0x7c   : > { %2259 = vmatprep.mubr.msk.bf16.mxu1 %vm2632_vm0, %v2631_v1 }
  0x7d   : > { %2352 = vmatmul.mubr.msk.bf16.gmra.mrb[16].mxu0 %vm294_vm3, %v2817_v26  ;;  %v2617_v26 = vld [vmem:[%s3465_s1 + $0x40] sm:$0xff]   ;;  %v1228_v19 = vrot.slane %v1226_v18, 3  ;;  %v490_v24 = vsel %vm479_vm5, %v487_v17, %v489_v48 }
  0x7e   : > { %2357 = vmatprep.mubr.msk.bf16.mxu0 %vm2632_vm0, %v2631_v1 }
  0x7f   : > { %v1229_v41 = vor.u32 %v1228_v19, %v1225_v15 }
  0x81   : > { %v1230_v27 = vsel %vm1204_vm7, %v1220_v47, %v1229_v41  ;;  %v1239_v60 = vsel %vm1204_vm7, %v1229_v41, %v1238_v25 }
  0x83   : > { %2260 = vmatmul.mubr.msk.bf16.gmra.mrb[12].mxu1 %vm294_vm3, %v488_v22 }
  0x84   : > { %2263 = vmatprep.mubr.msk.bf16.mxu1 %vm2632_vm0, %v2631_v1 }
  0x85   : > { %2358 = vmatmul.mubr.msk.bf16.vlgmr.msra.gmra.mrb[0].mxu0 %vm294_vm3, %v1221_v56 }
  0x86   : > { %2378 = vmatpush3.bf16.msra.mxu0 %v2617_v26  ;;  %2361 = vmatprep.mubr.msk.bf16.mxu0 %vm2632_vm0, %v2631_v1 }
  0x8b   : > { %2264 = vmatmul.mubr.msk.bf16.gmra.mrb[16].mxu1 %vm294_vm3, %v490_v24 }
  0x8c   : > { %2269 = vmatprep.mubr.msk.bf16.mxu1 %vm2632_vm0, %v2631_v1 }
  0x8d   : > { %2362 = vmatmul.mubr.msk.bf16.gmra.mrb[4].mxu0 %vm294_vm3, %v1230_v27 }
  0x8e   : > { %2365 = vmatprep.mubr.msk.bf16.mxu0 %vm2632_vm0, %v2631_v1 }
  0x93   : > { %2270 = vmatmul.mubr.msk.bf16.vlgmr.msra.gmra.mrb[0].mxu1 %vm294_vm3, %v2830_v12  ;;  %v1248_v12 = vsel %vm1204_vm7, %v1238_v25, %v1247_v32 }
  0x94   : > { %2273 = vmatprep.mubr.msk.bf16.mxu1 %vm2632_vm0, %v2631_v1  ;;  %2400 = vmatpush3.bf16.msra.mxu1 %v2675_v0  ;;  %v1256_v0 = vor.u32 %v1255_v40, %v1252_v38 }
  0x95   : > { %2366 = vmatmul.mubr.msk.bf16.gmra.mrb[8].mxu0 %vm294_vm3, %v1239_v60 }
  0x96   : > { %2369 = vmatprep.mubr.msk.bf16.mxu0 %vm2632_vm0, %v2631_v1  ;;  %v1257_v34 = vsel %vm1204_vm7, %v1247_v32, %v1256_v0 }
  0x9b   : > { %2274 = vmatmul.mubr.msk.bf16.gmra.mrb[4].mxu1 %vm294_vm3, %v2837_v37  ;;  %v1485_v37 = vlaneseq }
  0x9c   : > { %2277 = vmatprep.mubr.msk.bf16.mxu1 %vm2632_vm0, %v2631_v1 }
  0x9d   : > { %2370 = vmatmul.mubr.msk.bf16.gmra.mrb[12].mxu0 %vm294_vm3, %v1248_v12 }
  0x9e   : > { %2373 = vmatprep.mubr.msk.bf16.mxu0 %vm2632_vm0, %v2631_v1 }
  0xa3   : > { %2278 = vmatmul.mubr.msk.bf16.gmra.mrb[8].mxu1 %vm294_vm3, %v2860_v49  ;;  %v3088_v49 = vshrl.u32 %v1485_v37, 7 }
  0xa4   : > { %2281 = vmatprep.mubr.msk.bf16.mxu1 %vm2632_vm0, %v2631_v1 }
  0xa5   : > { %2374 = vmatmul.mubr.msk.bf16.gmra.mrb[16].mxu0 %vm294_vm3, %v1257_v34  ;;  %v1490_v14 = vadd.s32 32, %v3088_v49  ;;  %v1491_v55 = vadd.s32 40, %v3088_v49  ;;  %v3127_v9 = vadd.s32 48, %v3088_v49  ;;  %v3132_v56 = vadd.s32 56, %v3088_v49 }
  0xa6   : > { %2379 = vmatprep.mubr.msk.bf16.mxu0 %vm2632_vm0, %v2631_v1  ;;  %v3148_v60 = vadd.s32 64, %v3088_v49  ;;  %v3155_v53 = vadd.s32 72, %v3088_v49 }
  0xa7   : > { %v3117_v16 = vmul.u32.u64.low 3435973837, %v1490_v14  ;;  %v3118_v57 = vmul.u32.u64.high 3435973837, %v1490_v14, %v3117_v16  ;;  %v3123_v62 = vmul.u32.u64.low 3435973837, %v1491_v55  ;;  %v3124_v17 = vmul.u32.u64.high 3435973837, %v1491_v55, %v3123_v62 }
  0xa8   : > { %v3138_v7 = vmul.u32.u64.low 3435973837, %v3127_v9  ;;  %v3139_v20 = vmul.u32.u64.high 3435973837, %v3127_v9, %v3138_v7  ;;  %v3143_v8 = vmul.u32.u64.low 3435973837, %v3132_v56  ;;  %v3144_v28 = vmul.u32.u64.high 3435973837, %v3132_v56, %v3143_v8 }
  0xa9   : > { %v1546_v41 = vshrl.u32 %v3118_v57, 3  ;;  %v1557_v29 = vshrl.u32 %v3124_v17, 3 }
  0xaa   : > { %v1568_v34 = vshrl.u32 %v3139_v20, 3 }
  0xab   : > { %2282 = vmatmul.mubr.msk.bf16.gmra.mrb[12].mxu1 %vm294_vm3, %v2863_v50  ;;  %v1487_v50 = vadd.s32 8, %v3088_v49  ;;  %v1547_v51 = vmul.u32 10, %v1546_v41  ;;  %v1558_v12 = vmul.u32 10, %v1557_v29 }
  0xac   : > { %2285 = vmatprep.mubr.msk.bf16.mxu1 %vm2632_vm0, %v2631_v1 }
  0xad   : > { %2380 = vmatmul.mubr.msk.bf16.vlgmr.msra.gmra.mrb[0].mxu0 %vm294_vm3, %v2876_v63  ;;  %v1548_v0 = vsub.s32 %v1490_v14, %v1547_v51  ;;  %v1559_v14 = vsub.s32 %v1491_v55, %v1558_v12 }
  0xae   : > { %2383 = vmatprep.mubr.msk.bf16.mxu0 %vm2632_vm0, %v2631_v1 }
  0xaf   : > { %vm1610_vm5 = vcmp.ne.s32.totalorder %v1548_v0, 0  ;;  %vm1620_vm6 = vcmp.lt.s32.totalorder %v1548_v0, 0 }
  0xb3   : > { %2286 = vmatmul.mubr.msk.bf16.gmra.mrb[16].mxu1 %vm294_vm3, %v2879_v2 }
  0xb4   : > { %2303 = vmatprep.mubr.msk.bf16.mxu1 %vm2632_vm0, %v2631_v1 }
  0xb5   : > { %2384 = vmatmul.mubr.msk.bf16.gmra.mrb[4].mxu0 %vm294_vm3, %v2882_v4  ;;  %v1488_v4 = vadd.s32 16, %v3088_v49 }
  0xb6   : > { %2387 = vmatprep.mubr.msk.bf16.mxu0 %vm2632_vm0, %v2631_v1 }
  0xb7   : > { %v3104_v43 = vmul.u32.u64.low 3435973837, %v1488_v4  ;;  %v3105_v44 = vmul.u32.u64.high 3435973837, %v1488_v4, %v3104_v43 }
  0xb9   : > { %v1524_v59 = vshrl.u32 %v3105_v44, 3 }
  0xbb   : > { %2304 = vmatmul.mubr.msk.bf16.vlgmr.msra.gmra.mrb[12].mxu1 %vm294_vm3, %v2892_v21  ;;  %v1525_v22 = vmul.u32 10, %v1524_v59 }
  0xbc   : > { %2307 = vmatprep.mubr.msk.bf16.mxu1 %vm2632_vm0, %v2631_v1 }
  0xbd   : > { %2388 = vmatmul.mubr.msk.bf16.gmra.mrb[8].mxu0 %vm294_vm3, %v2895_v23  ;;  %v1526_v27 = vsub.s32 %v1488_v4, %v1525_v22 }
  0xbe   : > { %2391 = vmatprep.mubr.msk.bf16.mxu0 %vm2632_vm0, %v2631_v1 }
  0xbf   : > { %vm1608_vm13 = vcmp.ne.s32.totalorder %v1526_v27, 0  ;;  %vm1618_vm14 = vcmp.lt.s32.totalorder %v1526_v27, 0  ;;  %v1638_v5 = vadd.s32 10, %v1526_v27 }
  0xc0   : > { %vm3173_vm2 = vmand %vm1618_vm14, %vm1608_vm13 }
  0xc3   : > { %2308 = vmatmul.mubr.msk.bf16.gmra.mrb[16].mxu1 %vm294_vm3, %v2915_v33  ;;  %v3096_v23 = vmul.u32.u64.low 3435973837, %v1487_v50  ;;  %v3097_v33 = vmul.u32.u64.high 3435973837, %v1487_v50, %v3096_v23 }
  0xc5   : > { %2392 = vmatmul.mubr.msk.bf16.gmra.mrb[12].mxu0 %vm294_vm3, %v2918_v35  ;;  %v1489_v35 = vadd.s32 24, %v3088_v49  ;;  %v1513_v54 = vshrl.u32 %v3097_v33, 3 }
  0xc6   : > { %2395 = vmatprep.mubr.msk.bf16.mxu0 %vm2632_vm0, %v2631_v1 }
  0xc7   : > { %v3107_v6 = vmul.u32.u64.low 3435973837, %v1489_v35  ;;  %v3108_v45 = vmul.u32.u64.high 3435973837, %v1489_v35, %v3107_v6  ;;  %v1514_v11 = vmul.u32 10, %v1513_v54 }
  0xc8   : > { %v1569_v54 = vmul.u32 10, %v1568_v34 }
  0xc9   : > { %v1535_v61 = vshrl.u32 %v3108_v45, 3  ;;  %v1515_v15 = vsub.s32 %v1487_v50, %v1514_v11  ;;  %v3163_v37 = vmul.u32.u64.low 3435973837, %v3148_v60  ;;  %v3164_v50 = vmul.u32.u64.high 3435973837, %v3148_v60, %v3163_v37 }
  0xca   : > { %v1570_v59 = vsub.s32 %v3127_v9, %v1569_v54 }
  0xcb   : > { %v1536_v19 = vmul.u32 10, %v1535_v61  ;;  %vm1607_vm8 = vcmp.ne.s32.totalorder %v1515_v15, 0  ;;  %vm1617_vm9 = vcmp.lt.s32.totalorder %v1515_v15, 0  ;;  %v1637_v30 = vadd.s32 10, %v1515_v15 }
  0xcc   : > { %vm3150_vm12 = vmand %vm1617_vm9, %vm1607_vm8  ;;  %v1590_v11 = vshrl.u32 %v3164_v50, 3 }
  0xcd   : > { %2396 = vmatmul.mubr.msk.bf16.gmra.mrb[16].mxu0 %vm294_vm3, %v2926_v39  ;;  %v3101_v39 = vmul.u32.u64.low 3435973837, %v3088_v49  ;;  %v3102_v36 = vmul.u32.u64.high 3435973837, %v3088_v49, %v3101_v39  ;;  %v1537_v25 = vsub.s32 %v1489_v35, %v1536_v19  ;;  %v1647_v23 = vsel %vm3150_vm12, %v1637_v30, %v1515_v15 }
  0xce   : > { %v1579_v39 = vshrl.u32 %v3144_v28, 3  ;;  %vm1657_vm7 = vcmp.lt.s32.totalorder %v1647_v23, 8  ;;  %vm1621_vm12 = vcmp.lt.s32.totalorder %v1559_v14, 0 }
  0xcf   : > { %v1502_v58 = vshrl.u32 %v3102_v36, 3  ;;  %vm1609_vm15 = vcmp.ne.s32.totalorder %v1537_v25, 0  ;;  %vm1619_vm0 = vcmp.lt.s32.totalorder %v1537_v25, 0  ;;  %v3202_v55 = vsel %vm1657_vm7, 1.0, %v2631_v1 }
  0xd0   : > { %v3179_v36 = vmul.u32.u64.low 3435973837, %v3155_v53  ;;  %v3180_v43 = vmul.u32.u64.high 3435973837, %v3155_v53, %v3179_v36  ;;  %vm3189_vm4 = vmand %vm1619_vm0, %vm1609_vm15  ;;  %v1580_v16 = vmul.u32 10, %v1579_v39  ;;  %vm1686_vm15 = vcmask 261120  }
  0xd1   : > { %v1503_v10 = vmul.u32 10, %v1502_v58  ;;  %vm1612_vm0 = vcmp.ne.s32.totalorder %v1570_v59, 0 }
  0xd2   : > { %v1581_v19 = vsub.s32 %v3132_v56, %v1580_v16 }
  0xd3   : > { %v1504_v24 = vsub.s32 %v3088_v49, %v1503_v10  ;;  %v1641_v10 = vadd.s32 10, %v1559_v14 }
  0xd4   : > { %v1643_v40 = vadd.s32 10, %v1581_v19 }
  0xd5   : > { %vm1606_vm10 = vcmp.ne.s32.totalorder %v1504_v24, 0  ;;  %vm1616_vm11 = vcmp.lt.s32.totalorder %v1504_v24, 0  ;;  %v1636_v31 = vadd.s32 10, %v1504_v24 }
  0xd6   : > { %vm3157_vm1 = vmand %vm1616_vm11, %vm1606_vm10  ;;  %vm1611_vm11 = vcmp.ne.s32.totalorder %v1559_v14, 0 }
  0xd7   : > { %vm3197_vm10 = vmand %vm1620_vm6, %vm1610_vm5  ;;  %vm1623_vm5 = vcmp.lt.s32.totalorder %v1581_v19, 0 }
  0xd8   : > { %vm3217_vm14 = vmand %vm1621_vm12, %vm1611_vm11 }
  0xd9   : > { %v1651_v28 = vsel %vm3217_vm14, %v1641_v10, %v1559_v14 }
  0xda   : > { %vm3246_vm7 = vcmp.lt.s32.totalorder %v1651_v28, 8 }
 0x166   : > { %v3091_v63 = vpop.f32.mrb[0].mxu1 }
 0x167   : > { %v2271_v2 = vpop.f32.mrb[1].mxu1 }
 0x168   : > { %v3094_v21 = vpop.f32.mrb[2].mxu1 }
 0x169   : > { %v2272_v42 = vpop.f32.mrb[3].mxu1 }
 0x16a   : > { %v1639_v42 = vadd.s32 10, %v1537_v25 }
 0x16e   : > { %v3111_v13 = vpop.f32.mrb[4].mxu1 }
 0x16f   : > { %v2275_v46 = vpop.f32.mrb[5].mxu1 }
 0x170   : > { %v3113_v52 = vpop.f32.mrb[6].mxu1  ;;  %v1648_v46 = vsel %vm3173_vm2, %v1638_v5, %v1526_v27 }
 0x171   : > { %v2276_v3 = vpop.f32.mrb[7].mxu1  ;;  %vm1658_vm9 = vcmp.lt.s32.totalorder %v1648_v46, 8 }
 0x172   : > { %v1640_v3 = vadd.s32 10, %v1548_v0 }
 0x174   : > { %v1650_v15 = vsel %vm3197_vm10, %v1640_v3, %v1548_v0 }
 0x175   : > { %vm1660_vm2 = vcmp.lt.s32.totalorder %v1650_v15, 8 }
 0x176   : > { %v3129_v47 = vpop.f32.mrb[8].mxu1  ;;  %v3244_v5 = vsel %vm1660_vm2, 1.0, %v2631_v1 }
 0x177   : > { %v2279_v18 = vpop.f32.mrb[9].mxu1 }
 0x178   : > { %v3134_v26 = vpop.f32.mrb[10].mxu1  ;;  %v3213_v18 = vsel %vm1658_vm9, 1.0, %v2631_v1 }
 0x179   : > { %v2280_v48 = vpop.f32.mrb[11].mxu1 }
 0x17a   : > { %v1601_v48 = vshrl.u32 %v3180_v43, 3  ;;  %v3275_v43 = vsel %vm3246_vm7, 1.0, %v2631_v1 }
 0x17c   : > { %v1602_v29 = vmul.u32 10, %v1601_v48 }
 0x17e   : > { %v1603_v39 = vsub.s32 %v3155_v53, %v1602_v29 }
 0x180   : > { %v1436_v38 = vpop.f32.mrb[0].mxu0  ;;  %vm1615_vm12 = vcmp.ne.s32.totalorder %v1603_v39, 0 }
 0x181   : > { %v3167_v2 = vadd.f32 %v1436_v38, %v3091_v63  ;;  %v2381_v4 = vpop.f32.mrb[1].mxu0  ;;  %v1646_v63 = vsel %vm3157_vm1, %v1636_v31, %v1504_v24  ;;  %vm1622_vm1 = vcmp.lt.s32.totalorder %v1570_v59, 0  ;;  %v1591_v24 = vmul.u32 10, %v1590_v11 }
 0x182   : > { %v1439_v35 = vpop.f32.mrb[2].mxu0  ;;  %vm1656_vm8 = vcmp.lt.s32.totalorder %v1646_v63, 8  ;;  %vm3239_vm6 = vmand %vm1622_vm1, %vm1612_vm0 }
 0x183   : > { %v3185_v44 = vadd.f32 %v1439_v35, %v3094_v21  ;;  %v2382_v6 = vpop.f32.mrb[3].mxu0  ;;  %v1649_v21 = vsel %vm3189_vm4, %v1639_v42, %v1537_v25  ;;  %v3207_v61 = vsel %vm1656_vm8, 1.0, %v2631_v1  ;;  %v1642_v25 = vadd.s32 10, %v1570_v59 }
 0x184   : > { %vm1659_vm13 = vcmp.lt.s32.totalorder %v1649_v21, 8  ;;  %v1676_v27 = vmul.f32 %v3167_v2, %v3207_v61  ;;  %vm1613_vm4 = vcmp.ne.s32.totalorder %v1581_v19, 0  ;;  %v1592_v0 = vsub.s32 %v3148_v60, %v1591_v24 }
 0x185   : > { %v3229_v20 = vsel %vm1659_vm13, 1.0, %v2631_v1  ;;  %vm3260_vm8 = vmand %vm1623_vm5, %vm1613_vm4  ;;  %v1652_v60 = vsel %vm3239_vm6, %v1642_v25, %v1570_v59  ;;  %vm1625_vm13 = vcmp.lt.s32.totalorder %v1603_v39, 0  ;;  %vm1737_vm5 = vcmask 64512  }
 0x186   : > { %v1687_v34 = vsel %vm1686_vm15, %v1676_v27, 0.0  ;;  %v1653_v45 = vsel %vm3260_vm8, %v1643_v40, %v1581_v19  ;;  %vm1614_vm9 = vcmp.ne.s32.totalorder %v1592_v0, 0  ;;  %vm1624_vm10 = vcmp.lt.s32.totalorder %v1592_v0, 0  ;;  %vm1635_vm1 = vmand %vm1625_vm13, %vm1615_vm12 }
 0x187   : > { %vm1662_vm11 = vcmp.lt.s32.totalorder %v1652_v60, 8  ;;  %v1644_v54 = vadd.s32 10, %v1592_v0  ;;  %vm1663_vm14 = vcmp.lt.s32.totalorder %v1653_v45, 8  ;;  %vm3283_vm0 = vmand %vm1624_vm10, %vm1614_vm9  ;;  %vm1740_vm6 = vcmask 195584  }
 0x188   : > { %v1444_v58 = vpop.f32.mrb[4].mxu0  ;;  %v3288_v59 = vsel %vm1662_vm11, 1.0, %v2631_v1  ;;  %v3293_v19 = vsel %vm1663_vm14, 1.0, %v2631_v1 }
 0x189   : > { %v3210_v62 = vadd.f32 %v1444_v58, %v3111_v13  ;;  %v2385_v17 = vpop.f32.mrb[5].mxu0  ;;  %v1677_v13 = vmul.f32 %v3185_v44, %v3202_v55  ;;  %v1654_v48 = vsel %vm3283_vm0, %v1644_v54, %v1592_v0 }
 0x18a   : > { %v1447_v22 = vpop.f32.mrb[6].mxu0  ;;  %v1645_v17 = vadd.s32 10, %v1603_v39  ;;  %vm1664_vm2 = vcmp.lt.s32.totalorder %v1654_v48, 8 }
 0x18b   : > { %v3226_v41 = vadd.f32 %v1447_v22, %v3113_v52  ;;  %v2386_v7 = vpop.f32.mrb[7].mxu0  ;;  %v1678_v56 = vmul.f32 %v3210_v62, %v3213_v18  ;;  %v1688_v51 = vsel %vm1686_vm15, %v1677_v13, 0.0 }
 0x18c   : > { %v1689_v35 = vadd.f32 %v1688_v51, %v1687_v34  ;;  %v3306_v51 = vsel %vm1664_vm2, 1.0, %v2631_v1 }
 0x18d   : > { %v1690_v37 = vsel %vm1686_vm15, %v1678_v56, 0.0  ;;  %v1679_v50 = vmul.f32 %v3226_v41, %v3229_v20  ;;  %v1655_v56 = vsel %vm1635_vm1, %v1645_v17, %v1603_v39 }
 0x18e   : > { %v892_v8 = vpop.f32.mrb[12].mxu1  ;;  %v1691_v6 = vadd.f32 %v1690_v37, %v1689_v35  ;;  %vm1665_vm4 = vcmp.lt.s32.totalorder %v1655_v56, 8 }
 0x18f   : > { %v2305_v52 = vpop.f32.mrb[13].mxu1  ;;  %v1692_v53 = vsel %vm1686_vm15, %v1679_v50, 0.0 }
 0x190   : > { %v895_v30 = vpop.f32.mrb[14].mxu1  ;;  %v1452_v32 = vpop.f32.mrb[8].mxu0  ;;  %v1693_v57 = vadd.f32 %v1692_v53, %v1691_v6 }
 0x191   : > { %v2306_v38 = vpop.f32.mrb[15].mxu1  ;;  %v3256_v4 = vadd.f32 %v1452_v32, %v3129_v47  ;;  %v2389_v23 = vpop.f32.mrb[9].mxu0 }
 0x192   : > { %v1455_v42 = vpop.f32.mrb[10].mxu0  ;;  %v3312_v38 = vsel %vm1665_vm4, 1.0, %v2631_v1 }
 0x193   : > { %v1680_v36 = vmul.f32 %v3256_v4, %v3244_v5  ;;  %v3270_v47 = vadd.f32 %v1455_v42, %v3134_v26  ;;  %v2390_v63 = vpop.f32.mrb[11].mxu0 }
 0x195   : > { %v1694_v26 = vsel %vm1686_vm15, %v1680_v36, 0.0  ;;  %v1681_v21 = vmul.f32 %v3270_v47, %v3275_v43 }
 0x196   : > { %v900_v14 = vpop.f32.mrb[16].mxu1  ;;  %v1695_v15 = vadd.f32 %v1694_v26, %v1693_v57 }
 0x197   : > { %v2309_v46 = vpop.f32.mrb[17].mxu1  ;;  %v1696_v13 = vsel %vm1686_vm15, %v1681_v21, 0.0 }
 0x198   : > { %v903_v3 = vpop.f32.mrb[18].mxu1  ;;  %v1460_v58 = vpop.f32.mrb[12].mxu0  ;;  %v1697_v52 = vadd.f32 %v1696_v13, %v1695_v15 }
 0x199   : > { %v2310_v11 = vpop.f32.mrb[19].mxu1  ;;  %v3290_v10 = vadd.f32 %v1460_v58, %v892_v8  ;;  %v2393_v22 = vpop.f32.mrb[13].mxu0 }
 0x19a   : > { %v1463_v9 = vpop.f32.mrb[14].mxu0  ;;  %v3330_v11 = vsub.s32 0, %v3088_v49 }
 0x19b   : > { %v1682_v7 = vmul.f32 %v3290_v10, %v3288_v59  ;;  %v3300_v24 = vadd.f32 %v1463_v9, %v895_v30  ;;  %v2394_v27 = vpop.f32.mrb[15].mxu0 }
 0x19d   : > { %v1698_v8 = vsel %vm1686_vm15, %v1682_v7, 0.0  ;;  %v1683_v28 = vmul.f32 %v3300_v24, %v3293_v19 }
 0x19e   : > { %v1699_v25 = vadd.f32 %v1698_v8, %v1697_v52 }
 0x19f   : > { %v1700_v31 = vsel %vm1686_vm15, %v1683_v28, 0.0 }
 0x1a0   : > { %v1468_v29 = vpop.f32.mrb[16].mxu0  ;;  %v1701_v37 = vadd.f32 %v1700_v31, %v1699_v25 }
 0x1a1   : > { %v3309_v32 = vadd.f32 %v1468_v29, %v900_v14  ;;  %v2397_v30 = vpop.f32.mrb[17].mxu0 }
 0x1a2   : > { %v1471_v12 = vpop.f32.mrb[18].mxu0 }
 0x1a3   : > { %v1684_v40 = vmul.f32 %v3309_v32, %v3306_v51  ;;  %v3316_v0 = vadd.f32 %v1471_v12, %v903_v3  ;;  %v2398_v34 = vpop.f32.mrb[19].mxu0 }
 0x1a5   : > { %v1702_v50 = vsel %vm1686_vm15, %v1684_v40, 0.0  ;;  %v1685_v23 = vmul.f32 %v3316_v0, %v3312_v38 }
 0x1a6   : > { %v1703_v33 = vadd.f32 %v1702_v50, %v1701_v37 }
 0x1a7   : > { %v1704_v35 = vsel %vm1686_vm15, %v1685_v23, 0.0 }
 0x1a8   : > { %v1705_v42 = vadd.f32 %v1704_v35, %v1703_v33 }
 0x1aa   : > { %v1706_v60 = vrot.slane %v1705_v42, 4 }
 0x1ac   : > { %v1707_v39 = vadd.f32 %v1706_v60, %v1705_v42 }
 0x1ae   : > { %v1708_v1 = vrot.slane %v1707_v39, 2 }
 0x1b0   : > { %v1709_v36 = vadd.f32 %v1708_v1, %v1707_v39 }
 0x1b2   : > { %v1710_v63 = vrot.slane %v1709_v36, 1 }
 0x1b4   : > { %v1711_v6 = vadd.f32 %v1710_v63, %v1709_v36 }
 0x1b6   : > { %v1712_v45 = vmul.f32 0.015625, %v1711_v6 }
 0x1b8   : > { %1722 = vrot.lane.b32.xlu1 %v1712_v45, %s2633_s13  ;;  %1714 = vrot.lane.b32.xlu0 %v1712_v45, %s2634_s14 }
 0x1bc   : > { %1718 = vrot.lane.b32.xlu0 %v1712_v45, %s2635_s17 }
 0x22a   : > { %v1715_v53 = vpop.permute.xlu0 %1714  ;;  %v1723_v26 = vpop.permute.xlu1 %1722 }
 0x22b   : > { %v1717_v14 = vadd.f32 %v1715_v53, %v1712_v45 }
 0x22e   : > { %v1719_v46 = vpop.permute.xlu0 %1718 }
 0x22f   : > { %v1721_v54 = vadd.f32 %v1719_v46, %v1717_v14 }
 0x231   : > { %v1725_v21 = vadd.f32 %v1723_v26, %v1721_v54 }
 0x233   : > { %v1726_v3 = vmul.f32 0.25, %v1725_v21 }
 0x235   : > { %1731 = vrot.lane.b32.xlu0 %v1726_v3, %s2636_s18  ;;  %1728 = vrot.lane.b32.xlu1 %v1726_v3, %s2637_s19 }
 0x239   : > { %1734 = vrot.lane.b32.xlu1 %v1726_v3, %s2638_s20 }
 0x2a7   : > { %v1729_v16 = vpop.permute.xlu1 %1728  ;;  %v1732_v57 = vpop.permute.xlu0 %1731 }
 0x2a8   : > { %v1738_v58 = vsel %vm1737_vm5, %v1726_v3, %v1729_v16 }
 0x2a9   : > { %v1739_v17 = vsel %vm294_vm3, %v1738_v58, %v1732_v57 }
 0x2ab   : > { %v1735_v22 = vpop.permute.xlu1 %1734 }
 0x2ac   : > { %v1741_v15 = vsel %vm1740_vm6, %v1739_v17, %v1735_v22 }
 0x2ad   : > { %v1745_v9 = vrot.slane %v1741_v15, %v3330_v11 }
 0x2af   : > { %v3336_v48 = vsub.f32 %v3167_v2, %v1745_v9  ;;  %v3339_v13 = vsub.f32 %v3185_v44, %v1745_v9  ;;  %v3342_v7 = vsub.f32 %v3210_v62, %v1745_v9  ;;  %v3345_v27 = vsub.f32 %v3226_v41, %v1745_v9 }
 0x2b0   : > { %v3348_v49 = vsub.f32 %v3256_v4, %v1745_v9  ;;  %v3355_v2 = vsub.f32 %v3270_v47, %v1745_v9  ;;  %v3362_v41 = vsub.f32 %v3290_v10, %v1745_v9  ;;  %v3370_v47 = vsub.f32 %v3300_v24, %v1745_v9 }
 0x2b1   : > { %v1756_v56 = vmul.f32 %v3336_v48, %v3336_v48  ;;  %v1757_v8 = vmul.f32 %v3339_v13, %v3339_v13  ;;  %v1758_v44 = vmul.f32 %v3342_v7, %v3342_v7  ;;  %v1759_v62 = vmul.f32 %v3345_v27, %v3345_v27 }
 0x2b2   : > { %v1760_v4 = vmul.f32 %v3348_v49, %v3348_v49  ;;  %v1761_v29 = vmul.f32 %v3355_v2, %v3355_v2  ;;  %v3378_v40 = vsub.f32 %v3309_v32, %v1745_v9  ;;  %v3385_v34 = vsub.f32 %v3316_v0, %v1745_v9  ;;  %v1829_v9 = vld [vmem:[%s3466_s2] sm:$0x1] }
 0x2b3   : > { %v1766_v28 = vmul.f32 %v1756_v56, %v3207_v61  ;;  %v1767_v52 = vmul.f32 %v1757_v8, %v3202_v55  ;;  %v1768_v25 = vmul.f32 %v1758_v44, %v3213_v18  ;;  %v1769_v31 = vmul.f32 %v1759_v62, %v3229_v20  ;;  %v1830_v44 = vld [vmem:[%s3467_s3] sm:$0x1] }
 0x2b4   : > { %v1762_v55 = vmul.f32 %v3362_v41, %v3362_v41  ;;  %v1770_v61 = vmul.f32 %v1760_v4, %v3244_v5  ;;  %v1763_v20 = vmul.f32 %v3370_v47, %v3370_v47  ;;  %v1771_v37 = vmul.f32 %v1761_v29, %v3275_v43 }
 0x2b5   : > { %v1776_v10 = vsel %vm1686_vm15, %v1766_v28, 0.0  ;;  %v1777_v30 = vsel %vm1686_vm15, %v1767_v52, 0.0  ;;  %v1779_v18 = vsel %vm1686_vm15, %v1768_v25, 0.0  ;;  %v1781_v50 = vsel %vm1686_vm15, %v1769_v31, 0.0 }
 0x2b6   : > { %v1778_v12 = vadd.f32 %v1777_v30, %v1776_v10  ;;  %v1764_v23 = vmul.f32 %v3378_v40, %v3378_v40  ;;  %v1772_v33 = vmul.f32 %v1762_v55, %v3288_v59  ;;  %v1783_v5 = vsel %vm1686_vm15, %v1770_v61, 0.0 }
 0x2b7   : > { %v1765_v0 = vmul.f32 %v3385_v34, %v3385_v34  ;;  %v1773_v42 = vmul.f32 %v1763_v20, %v3293_v19  ;;  %v1785_v60 = vsel %vm1686_vm15, %v1771_v37, 0.0  ;;  %v1835_v8 = vrot.slane %v1829_v9, %v3330_v11 }
 0x2b8   : > { %v1780_v24 = vadd.f32 %v1779_v18, %v1778_v12  ;;  %v1774_v43 = vmul.f32 %v1764_v23, %v3306_v51  ;;  %v1787_v1 = vsel %vm1686_vm15, %v1772_v33, 0.0  ;;  %v1852_v62 = vrot.slane %v1830_v44, %v3330_v11 }
 0x2b9   : > { %v1775_v63 = vmul.f32 %v1765_v0, %v3312_v38  ;;  %v1789_v59 = vsel %vm1686_vm15, %v1773_v42, 0.0 }
 0x2ba   : > { %v1782_v32 = vadd.f32 %v1781_v50, %v1780_v24  ;;  %v1791_v45 = vsel %vm1686_vm15, %v1774_v43, 0.0 }
 0x2bb   : > { %v1793_v14 = vsel %vm1686_vm15, %v1775_v63, 0.0 }
 0x2bc   : > { %v1784_v35 = vadd.f32 %v1783_v5, %v1782_v32 }
 0x2be   : > { %v1786_v39 = vadd.f32 %v1785_v60, %v1784_v35 }
 0x2c0   : > { %v1788_v36 = vadd.f32 %v1787_v1, %v1786_v39 }
 0x2c2   : > { %v1790_v6 = vadd.f32 %v1789_v59, %v1788_v36 }
 0x2c4   : > { %v1792_v53 = vadd.f32 %v1791_v45, %v1790_v6 }
 0x2c6   : > { %v1794_v46 = vadd.f32 %v1793_v14, %v1792_v53 }
 0x2c8   : > { %v1795_v19 = vrot.slane %v1794_v46, 4 }
 0x2ca   : > { %v1796_v54 = vadd.f32 %v1795_v19, %v1794_v46 }
 0x2cc   : > { %v1797_v26 = vrot.slane %v1796_v54, 2 }
 0x2ce   : > { %v1798_v21 = vadd.f32 %v1797_v26, %v1796_v54 }
 0x2d0   : > { %v1799_v3 = vrot.slane %v1798_v21, 1 }
 0x2d2   : > { %v1800_v51 = vadd.f32 %v1799_v3, %v1798_v21 }
 0x2d4   : > { %v1801_v16 = vmul.f32 0.015625, %v1800_v51 }
 0x2d6   : > { %1807 = vrot.lane.b32.xlu1 %v1801_v16, %s2635_s17  ;;  %1803 = vrot.lane.b32.xlu0 %v1801_v16, %s2634_s14 }
 0x2da   : > { %1811 = vrot.lane.b32.xlu0 %v1801_v16, %s2633_s13 }
 0x348   : > { %v1804_v38 = vpop.permute.xlu0 %1803  ;;  %v1808_v58 = vpop.permute.xlu1 %1807 }
 0x349   : > { %v1806_v57 = vadd.f32 %v1804_v38, %v1801_v16 }
 0x34b   : > { %v1810_v17 = vadd.f32 %v1808_v58, %v1806_v57 }
 0x34c   : > { %v1812_v22 = vpop.permute.xlu0 %1811 }
 0x34d   : > { %v1814_v15 = vadd.f32 %v1812_v22, %v1810_v17 }
 0x34f   : > { %v1815_v56 = vmul.f32 0.25, %v1814_v15 }
 0x351   : > { %1820 = vrot.lane.b32.xlu0 %v1815_v56, %s2636_s18  ;;  %1817 = vrot.lane.b32.xlu1 %v1815_v56, %s2637_s19 }
 0x355   : > { %1823 = vrot.lane.b32.xlu1 %v1815_v56, %s2638_s20  ;;  %1836 = vrot.lane.b32.xlu0 %v1835_v8, %s2637_s19 }
 0x359   : > { %1839 = vrot.lane.b32.xlu1 %v1835_v8, %s2636_s18  ;;  %1842 = vrot.lane.b32.xlu0 %v1835_v8, %s2638_s20 }
 0x35d   : > { %1853 = vrot.lane.b32.xlu1 %v1852_v62, %s2637_s19  ;;  %1856 = vrot.lane.b32.xlu0 %v1852_v62, %s2636_s18 }
 0x361   : > { %1859 = vrot.lane.b32.xlu1 %v1852_v62, %s2638_s20 }
 0x3c3   : > { %v1821_v4 = vpop.permute.xlu0 %1820  ;;  %v1818_v28 = vpop.permute.xlu1 %1817 }
 0x3c4   : > { %v1826_v52 = vsel %vm1737_vm5, %v1815_v56, %v1818_v28 }
 0x3c5   : > { %v1827_v25 = vsel %vm294_vm3, %v1826_v52, %v1821_v4 }
 0x3c7   : > { %v1824_v29 = vpop.permute.xlu1 %1823  ;;  %v1837_v31 = vpop.permute.xlu0 %1836 }
 0x3c8   : > { %v1828_v10 = vsel %vm1740_vm6, %v1827_v25, %v1824_v29  ;;  %v1845_v61 = vsel %vm1737_vm5, %v1829_v9, %v1837_v31 }
 0x3c9   : > { %v1865_v30 = vadd.f32 1e-05, %v1828_v10 }
 0x3cb   : > { %2621 = vrsqrt.f32 %v1865_v30  ;;  %v1840_v12 = vpop.permute.xlu1 %1839  ;;  %v1843_v55 = vpop.permute.xlu0 %1842 }
 0x3cc   : > { %v1846_v37 = vsel %vm294_vm3, %v1845_v61, %v1840_v12 }
 0x3cd   : > { %v1847_v23 = vsel %vm1740_vm6, %v1846_v37, %v1843_v55 }
 0x3ce   : > { %v1884_v0 = vrot.slane %v1847_v23, %v3330_v11 }
 0x3cf   : > { %v1854_v18 = vpop.permute.xlu1 %1853  ;;  %v1857_v24 = vpop.permute.xlu0 %1856 }
 0x3d0   : > { %v1862_v20 = vsel %vm1737_vm5, %v1830_v44, %v1854_v18 }
 0x3d1   : > { %v1863_v50 = vsel %vm294_vm3, %v1862_v20, %v1857_v24  ;;  %vm1959_vm3 = vcmask 257024  }
 0x3d3   : > { %v1860_v32 = vpop.permute.xlu1 %1859 }
 0x3d4   : > { %v1864_v33 = vsel %vm1740_vm6, %v1863_v50, %v1860_v32 }
 0x3d5   : > { %v2622_v5 = vpop.eup %2621  ;;  %v1898_v42 = vrot.slane %v1864_v33, %v3330_v11 }
 0x3d6   : > { %v1870_v35 = vrot.slane %v2622_v5, %v3330_v11 }
 0x3d8   : > { %v1871_v60 = vmul.f32 %v1870_v35, %v3336_v48  ;;  %v1872_v39 = vmul.f32 %v1870_v35, %v3339_v13  ;;  %v1873_v43 = vmul.f32 %v1870_v35, %v3342_v7  ;;  %v1874_v1 = vmul.f32 %v1870_v35, %v3345_v27 }
 0x3d9   : > { %v1875_v36 = vmul.f32 %v1870_v35, %v3348_v49  ;;  %v1876_v63 = vmul.f32 %v1870_v35, %v3355_v2  ;;  %v1877_v59 = vmul.f32 %v1870_v35, %v3362_v41  ;;  %v1878_v6 = vmul.f32 %v1870_v35, %v3370_v47 }
 0x3da   : > { %v1879_v11 = vmul.f32 %v1870_v35, %v3378_v40  ;;  %v1880_v48 = vmul.f32 %v1870_v35, %v3385_v34  ;;  %v1885_v45 = vmul.f32 %v1884_v0, %v1871_v60  ;;  %v1886_v13 = vmul.f32 %v1884_v0, %v1872_v39 }
 0x3db   : > { %v1887_v53 = vmul.f32 %v1884_v0, %v1873_v43  ;;  %v1888_v7 = vmul.f32 %v1884_v0, %v1874_v1  ;;  %v1889_v14 = vmul.f32 %v1884_v0, %v1875_v36  ;;  %v1890_v27 = vmul.f32 %v1884_v0, %v1876_v63 }
 0x3dc   : > { %v1891_v46 = vmul.f32 %v1884_v0, %v1877_v59  ;;  %v1892_v49 = vmul.f32 %v1884_v0, %v1878_v6  ;;  %v1893_v19 = vmul.f32 %v1884_v0, %v1879_v11  ;;  %v1894_v2 = vmul.f32 %v1884_v0, %v1880_v48 }
 0x3dd   : > { %v1899_v54 = vadd.f32 %v1898_v42, %v1885_v45  ;;  %v1900_v41 = vadd.f32 %v1898_v42, %v1886_v13  ;;  %v1901_v26 = vadd.f32 %v1898_v42, %v1887_v53  ;;  %v1902_v47 = vadd.f32 %v1898_v42, %v1888_v7 }
 0x3de   : > { %v1903_v21 = vadd.f32 %v1898_v42, %v1889_v14  ;;  %v1904_v3 = vadd.f32 %v1898_v42, %v1890_v27  ;;  %v1905_v40 = vadd.f32 %v1898_v42, %v1891_v46  ;;  %v1906_v51 = vadd.f32 %v1898_v42, %v1892_v49 }
 0x3df   : > { %v1907_v34 = vadd.f32 %v1898_v42, %v1893_v19  ;;  %v1908_v16 = vadd.f32 %v1898_v42, %v1894_v2  ;;  %v1909_v38 = vmax.f32 %v1899_v54, 0.0  ;;  %v1910_v57 = vmax.f32 %v1900_v41, 0.0 }
 0x3e0   : > { %v1911_v58 = vmax.f32 %v1901_v26, 0.0  ;;  %v1912_v17 = vmax.f32 %v1902_v47, 0.0  ;;  %v1913_v22 = vmax.f32 %v1903_v21, 0.0  ;;  %v1914_v15 = vmax.f32 %v1904_v3, 0.0 }
 0x3e1   : > { %v1915_v9 = vmax.f32 %v1905_v40, 0.0  ;;  %v1916_v56 = vmax.f32 %v1906_v51, 0.0  ;;  %v1917_v8 = vmax.f32 %v1907_v34, 0.0  ;;  %v1918_v44 = vmax.f32 %v1908_v16, 0.0 }
 0x3e2   : > { %v2137_v62 = vpack.c.bf16 %v1909_v38, %v1909_v38  ;;  %v2138_v4 = vpack.c.bf16 %v1910_v57, %v1910_v57  ;;  %v2139_v28 = vpack.c.bf16 %v1911_v58, %v1911_v58  ;;  %v2140_v52 = vpack.c.bf16 %v1912_v17, %v1912_v17 }
 0x3e3   : > { %v2141_v25 = vpack.c.bf16 %v1913_v22, %v1913_v22  ;;  %v2142_v29 = vpack.c.bf16 %v1914_v15, %v1914_v15  ;;  %v2143_v31 = vpack.c.bf16 %v1915_v9, %v1915_v9  ;;  %v2144_v10 = vpack.c.bf16 %v1916_v56, %v1916_v56 }
 0x3e4   : > { %v2145_v30 = vpack.c.bf16 %v1917_v8, %v1917_v8  ;;  %v2146_v12 = vpack.c.bf16 %v1918_v44, %v1918_v44  ;;  %1960 = vst.msk [vmem:[%s197_s16] sm:$0xf] %vm1959_vm3, %v2137_v62  ;;  %1961 = vst.msk [vmem:[%s197_s16 + $0x4] sm:$0xf] %vm1959_vm3, %v2138_v4 }
 0x3e5   : > { %1962 = vst.msk [vmem:[%s197_s16 + $0x8] sm:$0xf] %vm1959_vm3, %v2139_v28  ;;  %1963 = vst.msk [vmem:[%s197_s16 + $0xc] sm:$0xf] %vm1959_vm3, %v2140_v52 }
 0x3e6   : > { %1964 = vst.msk [vmem:[%s197_s16 + $0x10] sm:$0xf] %vm1959_vm3, %v2141_v25  ;;  %1965 = vst.msk [vmem:[%s197_s16 + $0x14] sm:$0xf] %vm1959_vm3, %v2142_v29 }
 0x3e7   : > { %1966 = vst.msk [vmem:[%s197_s16 + $0x18] sm:$0xf] %vm1959_vm3, %v2143_v31  ;;  %1967 = vst.msk [vmem:[%s197_s16 + $0x1c] sm:$0xf] %vm1959_vm3, %v2144_v10 }
 0x3e8   : > { %1968 = vst.msk [vmem:[%s197_s16 + $0x20] sm:$0xf] %vm1959_vm3, %v2145_v30  ;;  %1969 = vst.msk [vmem:[%s197_s16 + $0x24] sm:$0xf] %vm1959_vm3, %v2146_v12 }
 0x3e9 PF: > { %s14_s15 = sadd.s32 1, %s2629_s15  }
 0x3ea   : > { %p11_p4 = scmp.ge.s32.totalorder %s14_s15, 4  }
 0x3ec   :  { %13 = sbr.rel (!%p11_p4) target bundleno = 1 (0x1), region = 74 }

// kernel: forward.19
= control target key start
LH: loop header
LB: loop body
LE: loop exit
PB: predicated region body
PF: predicated region fallthrough
CT: control target
= control target key end

     0   :  { %s4953_s9 = smov 0   ;;  %s5872_s0 = inlined_call_operand.vmem [shape: bf16[2,326,8], index: 0, kind: input, shape index: {}]   ;;  %s5873_s1 = inlined_call_operand.vmem [shape: bf16[9,8,3], index: 1, kind: input, shape index: {}]   ;;  %s5874_s2 = inlined_call_operand.vmem [shape: f32[2,288,3], index: 2, kind: output, shape index: {}]  }
   0x1 LB: > { %s3721_s10 = sadd.s32 4294967295, %s4936_s9   ;;  %p3725_p0 = scmp.ge.s32.totalorder %s4936_s9, 1  ;;  %s4936_s9 = sphi %s4953_s9, %s12_s9  }
   0x2   : > { %p112_p1 = scmp.lt.s32.totalorder %s4936_s9, 3 }
   0x4   : > { %p113_p2 = pnand %p3725_p0, %p112_p1 }
   0x5   : > { %vm482_vm0 = vcmask (!%p113_p2), 1043456   ;;  %v3842_v0 = vld [vmem:[%s5873_s1 + $0x10] sm:$0xf] (!%p113_p2)  ;;  %v3728_v1 = vld [vmem:[%s5873_s1 + $0x4] sm:$0xf] (!%p113_p2)  ;;  %p134_p3 = scmp.lt.s32.totalorder (!%p113_p2), %s3721_s10, 1 }
   0x6   : > { %116 = sbr.rel (%p113_p2) target bundleno = 580 (0x244), region = 28  ;;  %4769 = vmatprep.subr.msk.bf16.mxu0 (!%p113_p2), %vm482_vm0, %v3842_v0  ;;  %4765 = vmatprep.subr.msk.bf16.mxu1 (!%p113_p2), %vm482_vm0, %v3728_v1  ;;  %v4970_v2 = vsel (!%p113_p2), %vm482_vm0, %v3842_v0, 0  ;;  %v484_v3 = vsel (!%p113_p2), %vm482_vm0, %v3728_v1, 0  ;;  %v3862_v4 = vld [vmem:[%s5873_s1 + $0x14] sm:$0xf] (!%p113_p2)  ;;  %vm427_vm2 = vcmask (!%p113_p2), 64512  }
   0x7   : > { %4286 = vmatpush3.bf16.msra.mxu0 (!%p113_p2), %v4970_v2  ;;  %4134 = vmatpush3.bf16.msra.mxu1 (!%p113_p2), %v484_v3  ;;  %v181_v5 = vld [vmem:[%s5873_s1] sm:$0xf] (!%p113_p2)  ;;  %vm278_vm1 = vsmask.f32 (!%p113_p2), 7424  ;;  %v4991_v6 = vsel (!%p113_p2), %vm482_vm0, %v3862_v4, 0  ;;  %vm2085_vm4 = vcmask (!%p113_p2), 1045504  }
   0x8   : > { %4771 = vmatprep.subr.msk.bf16.mxu0 (!%p113_p2), %vm482_vm0, %v3862_v4  ;;  %4766 = vmatprep.subr.msk.bf16.mxu1 (!%p113_p2), %vm482_vm0, %v181_v5  ;;  %vm1638_vm3 = vsmask.f32 (!%p113_p2), 6400  ;;  %v700_v12 = vsel (!%p113_p2), %vm482_vm0, %v181_v5, 0  ;;  %v5039_v39 = vld [vmem:[%s5873_s1 + $0x8] sm:$0xf] (!%p113_p2)  ;;  %vm885_vm5 = vcmask (!%p113_p2), 1046528  }
   0x9   : > { %v5073_v1 = vld [vmem:[%s5873_s1 + $0x18] sm:$0xf] (!%p113_p2)  ;;  %vm2838_vm6 = vsmask.f32 (!%p113_p2), 5376  ;;  %vm3285_vm7 = vcmask (!%p113_p2), 1044480   ;;  %vm3629_vm8 = vcmask (!%p113_p2), 23552  }
   0xd   : > { %s5876_s10 = smov (!%p134_p3, %s3721_s10), 1 }
   0xe   : > { %s4775_s19 = smul.u32 164, %s5876_s10 }
   0xf   : > { %s4776_s7 = smul.u32 288, %s5876_s10 }
  0x10   : > { %s4988_s22 = scalar_lea.vmem %s5872_s0, %s4775_s19 }
  0x11   : > { %v145_v7 = vld [vmem:[%s4988_s22] sm:$0xf]  ;;  %v4995_v8 = vld [vmem:[%s4988_s22 + $0x4] sm:$0xf]  ;;  %v5001_v10 = vld [vmem:[%s4988_s22 + $0x8] sm:$0xff]   ;;  %s5787_s12 = scalar_lea.vmem %s5874_s2, %s4776_s7 }
  0x12   : > { %v4998_v9 = vcombine.low %v145_v7, %v4995_v8  ;;  %v1193_v11 = vld [vmem:[%s4988_s22 + $0x8] sm:$0xe]  ;;  %v5006_v13 = vld [vmem:[%s4988_s22 + $0xc] sm:$0xf]  ;;  %v287_v16 = vshll.u32 %v5001_v10, 16  ;;  %v291_v17 = vshrl.u32 %v5001_v10, 16 }
  0x13   : > { %v5013_v18 = vld [vmem:[%s4988_s22 + $0x10] sm:$0xff]   ;;  %v5019_v20 = vcombine.low %v1193_v11, %v5006_v13  ;;  %v5027_v28 = vld [vmem:[%s4988_s22 + $0x18] sm:$0xff]   ;;  %v5033_v34 = vld [vmem:[%s4988_s22 + $0x20] sm:$0xff]  }
  0x14   : > { %v280_v14 = vshrl.u32 %v4998_v9, 16  ;;  %v282_v15 = vshll.u32 %v4998_v9, 16  ;;  %v5016_v19 = vld [vmem:[%s4988_s22 + $0x10] sm:$0xff]   ;;  %v289_v22 = vrot.slane %v287_v16, 1  ;;  %v1648_v23 = vshrl.u32 %v5013_v18, 16  ;;  %v5030_v33 = vld [vmem:[%s4988_s22 + $0x18] sm:$0xff]  }
  0x15   : > { %v1651_v24 = vshll.u32 %v5013_v18, 16  ;;  %v1640_v25 = vshrl.u32 %v5019_v20, 16  ;;  %v1643_v26 = vshll.u32 %v5019_v20, 16  ;;  %v295_v27 = vshll.u32 %v5016_v19, 16  ;;  %v5048_v48 = vld [vmem:[%s4988_s22 + $0x20] sm:$0xff]   ;;  %v5051_v49 = vld [vmem:[%s4988_s22 + $0x28] sm:$0xff]  }
  0x16   : > { %v284_v21 = vrot.slane %v282_v15, 1  ;;  %v293_v30 = vor.u32 %v291_v17, %v289_v22  ;;  %v1650_v31 = vrot.slane %v1648_v23, 1  ;;  %v1657_v38 = vshrl.u32 %v5027_v28, 16  ;;  %v5057_v54 = vld [vmem:[%s4988_s22 + $0x28] sm:$0xff]   ;;  %v5063_v59 = vld [vmem:[%s4988_s22 + $0x30] sm:$0xff]   ;;  %v5087_v23 = vld [vmem:[%s4988_s22 + $0x38] sm:$0xff]  }
  0x17   : > { %v1653_v32 = vrot.slane %v1651_v24, 2  ;;  %v1642_v35 = vrot.slane %v1640_v25, 1  ;;  %v1645_v36 = vrot.slane %v1643_v26, 2  ;;  %v297_v37 = vrot.slane %v295_v27, 1  ;;  %v5068_v0 = vld [vmem:[%s4988_s22 + $0x30] sm:$0xff]  }
  0x18   : > { %v285_v29 = vor.u32 %v284_v21, %v280_v14  ;;  %v1660_v42 = vshll.u32 %v5027_v28, 16  ;;  %v299_v43 = vshrl.u32 %v5016_v19, 16  ;;  %v1659_v46 = vrot.slane %v1657_v38, 1 }
  0x19   : > { %v1654_v41 = vor.u32 %v1653_v32, %v1650_v31  ;;  %v1646_v44 = vor.u32 %v1645_v36, %v1642_v35  ;;  %v298_v45 = vsel %vm278_vm1, %v293_v30, %v297_v37  ;;  %v303_v47 = vshll.u32 %v5030_v33, 16  ;;  %v5096_v35 = vld [vmem:[%s4988_s22 + $0x38] sm:$0xff]  }
  0x1a   : > { %v290_v40 = vsel %vm278_vm1, %v285_v29, %v289_v22  ;;  %v1662_v50 = vrot.slane %v1660_v42, 2  ;;  %v301_v51 = vor.u32 %v299_v43, %v297_v37  ;;  %v1666_v52 = vshrl.u32 %v5033_v34, 16 }
  0x1b   : > { %4135 = vmatprep.mubr.msk.bf16.mxu1 %vm427_vm2, %v290_v40  ;;  %v1669_v53 = vshll.u32 %v5033_v34, 16  ;;  %v1655_v55 = vsel %vm1638_vm3, %v1646_v44, %v1654_v41  ;;  %v305_v56 = vrot.slane %v303_v47, 1  ;;  %v307_v57 = vshrl.u32 %v5030_v33, 16  ;;  %v5107_v44 = vld [vmem:[%s4988_s22 + $0x40] sm:$0xff]  }
  0x1c   : > { %4136 = vmatmul.mubr.msk.bf16.vlgmr.msra.gmra.mrb[0].mxu1 %vm427_vm2, %v298_v45  ;;  %v311_v58 = vshll.u32 %v5048_v48, 16  ;;  %4287 = vmatprep.mubr.msk.bf16.mxu0 %vm427_vm2, %v1655_v55  ;;  %v1663_v60 = vor.u32 %v1662_v50, %v1659_v46  ;;  %v1668_v61 = vrot.slane %v1666_v52, 1  ;;  %v1675_v63 = vshrl.u32 %v5051_v49, 16 }
  0x1d   : > { %4172 = vmatpush3.bf16.msra.mxu1 %v700_v12  ;;  %v1671_v62 = vrot.slane %v1669_v53, 2  ;;  %v306_v3 = vsel %vm278_vm1, %v301_v51, %v305_v56  ;;  %v309_v4 = vor.u32 %v307_v57, %v305_v56  ;;  %v1678_v7 = vshll.u32 %v5051_v49, 16  ;;  %v5112_v51 = vld [vmem:[%s4988_s22 + $0x40] sm:$0xff]  }
  0x1e   : > { %4767 = vmatprep.subr.msk.bf16.mxu1 %vm482_vm0, %v5039_v39  ;;  %v313_v5 = vrot.slane %v311_v58, 1  ;;  %v1664_v11 = vsel %vm1638_vm3, %v1654_v41, %v1663_v60  ;;  %4139 = vmatprep.mubr.msk.bf16.mxu1 %vm427_vm2, %v306_v3  ;;  %v1677_v14 = vrot.slane %v1675_v63, 1  ;;  %v315_v15 = vshrl.u32 %v5048_v48, 16  ;;  %v5123_v63 = vld [vmem:[%s4988_s22 + $0x48] sm:$0xff]  }
  0x1f   : > { %v1672_v12 = vor.u32 %v1671_v62, %v1668_v61  ;;  %4288 = vmatmul.mubr.msk.bf16.vlgmr.msra.gmra.mrb[0].mxu0 %vm427_vm2, %v1664_v11  ;;  %v1680_v17 = vrot.slane %v1678_v7, 2  ;;  %v319_v21 = vshll.u32 %v5057_v54, 16  ;;  %v1684_v22 = vshrl.u32 %v5063_v59, 16  ;;  %v5120_v62 = vld [vmem:[%s4988_s22 + $0x48] sm:$0xff]  }
  0x20   : > { %v314_v16 = vsel %vm278_vm1, %v309_v4, %v313_v5  ;;  %4324 = vmatpush3.bf16.msra.mxu0 %v4991_v6  ;;  %v317_v25 = vor.u32 %v315_v15, %v313_v5  ;;  %v1687_v26 = vshll.u32 %v5063_v59, 16  ;;  %v323_v27 = vshrl.u32 %v5057_v54, 16 }
  0x21   : > { %v1673_v24 = vsel %vm1638_vm3, %v1663_v60, %v1672_v12  ;;  %v1681_v29 = vor.u32 %v1680_v17, %v1677_v14  ;;  %v321_v30 = vrot.slane %v319_v21, 1  ;;  %v1686_v31 = vrot.slane %v1684_v22, 1  ;;  %4772 = vmatprep.subr.msk.bf16.mxu0 %vm482_vm0, %v5073_v1  ;;  %v5132_v14 = vld [vmem:[%s4988_s22 + $0x50] sm:$0xff]  }
  0x22   : > { %4291 = vmatprep.mubr.msk.bf16.mxu0 %vm427_vm2, %v1673_v24  ;;  %v327_v32 = vshll.u32 %v5068_v0, 16  ;;  %v1689_v6 = vrot.slane %v1687_v26, 2  ;;  %v1693_v36 = vshrl.u32 %v5087_v23, 16  ;;  %v1696_v37 = vshll.u32 %v5087_v23, 16 }
  0x23   : > { %v331_v38 = vshrl.u32 %v5068_v0, 16  ;;  %v1682_v40 = vsel %vm1638_vm3, %v1672_v12, %v1681_v29  ;;  %v322_v41 = vsel %vm278_vm1, %v317_v25, %v321_v30  ;;  %v325_v42 = vor.u32 %v323_v27, %v321_v30  ;;  %v5140_v25 = vld [vmem:[%s4988_s22 + $0x50] sm:$0xff]  }
  0x24   : > { %4140 = vmatmul.mubr.msk.bf16.gmra.mrb[4].mxu1 %vm427_vm2, %v314_v16  ;;  %v329_v43 = vrot.slane %v327_v32, 1  ;;  %v1690_v45 = vor.u32 %v1689_v6, %v1686_v31  ;;  %v1695_v46 = vrot.slane %v1693_v36, 1  ;;  %v1698_v47 = vrot.slane %v1696_v37, 2 }
  0x25   : > { %4143 = vmatprep.mubr.msk.bf16.mxu1 %vm427_vm2, %v322_v41  ;;  %v335_v50 = vshll.u32 %v5096_v35, 16  ;;  %v1702_v55 = vshrl.u32 %v5107_v44, 16  ;;  %v1705_v56 = vshll.u32 %v5107_v44, 16  ;;  %v339_v61 = vshrl.u32 %v5096_v35, 16  ;;  %v5150_v41 = vld [vmem:[%s4988_s22 + $0x58] sm:$0xff]  }
  0x26   : > { %v330_v52 = vsel %vm278_vm1, %v325_v42, %v329_v43  ;;  %v333_v53 = vor.u32 %v331_v38, %v329_v43  ;;  %v1691_v57 = vsel %vm1638_vm3, %v1681_v29, %v1690_v45  ;;  %v1699_v58 = vor.u32 %v1698_v47, %v1695_v46  ;;  %v5145_v29 = vld [vmem:[%s4988_s22 + $0x58] sm:$0xff]  }
  0x27   : > { %v337_v60 = vrot.slane %v335_v50, 1  ;;  %4292 = vmatmul.mubr.msk.bf16.gmra.mrb[4].mxu0 %vm427_vm2, %v1682_v40  ;;  %v1704_v3 = vrot.slane %v1702_v55, 1  ;;  %v1707_v4 = vrot.slane %v1705_v56, 2  ;;  %v343_v5 = vshll.u32 %v5112_v51, 16 }
  0x28   : > { %v347_v7 = vshrl.u32 %v5112_v51, 16  ;;  %4295 = vmatprep.mubr.msk.bf16.mxu0 %vm427_vm2, %v1691_v57  ;;  %v1711_v12 = vshrl.u32 %v5120_v62, 16  ;;  %v1714_v16 = vshll.u32 %v5120_v62, 16  ;;  %v351_v17 = vshll.u32 %v5123_v63, 16  ;;  %v2079_v57 = vld [vmem:[%s4988_s22 + $0x8] sm:$0xc] }
  0x29   : > { %v338_v11 = vsel %vm278_vm1, %v333_v53, %v337_v60  ;;  %v1708_v15 = vor.u32 %v1707_v4, %v1704_v3  ;;  %v345_v21 = vrot.slane %v343_v5, 1  ;;  %v1720_v22 = vshrl.u32 %v5132_v14, 16 }
  0x2a   : > { %v1723_v24 = vshll.u32 %v5132_v14, 16  ;;  %v1700_v26 = vsel %vm1638_vm3, %v1690_v45, %v1699_v58  ;;  %v341_v27 = vor.u32 %v339_v61, %v337_v60  ;;  %v1713_v30 = vrot.slane %v1711_v12, 1 }
  0x2b   : > { %v1716_v31 = vrot.slane %v1714_v16, 2  ;;  %v349_v32 = vor.u32 %v347_v7, %v345_v21  ;;  %v353_v6 = vrot.slane %v351_v17, 1  ;;  %v1709_v36 = vsel %vm1638_vm3, %v1699_v58, %v1708_v15  ;;  %v5164_v58 = vld [vmem:[%s4988_s22 + $0x60] sm:$0xff]  }
  0x2c   : > { %4144 = vmatmul.mubr.msk.bf16.gmra.mrb[8].mxu1 %vm427_vm2, %v330_v52  ;;  %v1722_v37 = vrot.slane %v1720_v22, 1  ;;  %v1725_v38 = vrot.slane %v1723_v24, 2  ;;  %v359_v40 = vshll.u32 %v5140_v25, 16  ;;  %v346_v42 = vsel %vm278_vm1, %v341_v27, %v345_v21 }
  0x2d   : > { %4147 = vmatprep.mubr.msk.bf16.mxu1 %vm427_vm2, %v338_v11  ;;  %v355_v43 = vshrl.u32 %v5123_v63, 16  ;;  %v1729_v45 = vshrl.u32 %v5145_v29, 16  ;;  %v1732_v46 = vshll.u32 %v5145_v29, 16  ;;  %v1717_v47 = vor.u32 %v1716_v31, %v1713_v30  ;;  %v5169_v11 = vld [vmem:[%s4988_s22 + $0x68] sm:$0xff]  }
  0x2e   : > { %v354_v50 = vsel %vm278_vm1, %v349_v32, %v353_v6  ;;  %v363_v52 = vshrl.u32 %v5140_v25, 16  ;;  %v367_v53 = vshll.u32 %v5150_v41, 16  ;;  %v1726_v55 = vor.u32 %v1725_v38, %v1722_v37  ;;  %v5186_v32 = vld [vmem:[%s4988_s22 + $0x70] sm:$0xff]  }
  0x2f   : > { %4296 = vmatmul.mubr.msk.bf16.gmra.mrb[8].mxu0 %vm427_vm2, %v1700_v26  ;;  %v361_v56 = vrot.slane %v359_v40, 1  ;;  %v357_v60 = vor.u32 %v355_v43, %v353_v6  ;;  %v1731_v61 = vrot.slane %v1729_v45, 1  ;;  %v1734_v3 = vrot.slane %v1732_v46, 2  ;;  %v5192_v40 = vld [vmem:[%s4988_s22 + $0x78] sm:$0xff]  }
  0x30   : > { %4299 = vmatprep.mubr.msk.bf16.mxu0 %vm427_vm2, %v1709_v36  ;;  %v1718_v4 = vsel %vm1638_vm3, %v1708_v15, %v1717_v47  ;;  %v369_v7 = vrot.slane %v367_v53, 1  ;;  %v1727_v12 = vsel %vm1638_vm3, %v1717_v47, %v1726_v55  ;;  %v3863_v16 = vcombine.low %v2079_v57, %v5006_v13 }
  0x31   : > { %v365_v5 = vor.u32 %v363_v52, %v361_v56  ;;  %v375_v17 = vshll.u32 %v5164_v58, 16  ;;  %v362_v21 = vsel %vm278_vm1, %v357_v60, %v361_v56  ;;  %v371_v22 = vshrl.u32 %v5150_v41, 16  ;;  %v5207_v56 = vld [vmem:[%s4988_s22 + $0x80] sm:$0xff]  }
  0x32   : > { %v5178_v15 = vor.u32 %v1734_v3, %v1731_v61  ;;  %v379_v26 = vshrl.u32 %v5164_v58, 16  ;;  %v383_v27 = vshll.u32 %v5169_v11, 16  ;;  %v2086_v13 = vrot.slane %v3863_v16, 2 }
  0x33   : > { %v370_v24 = vsel %vm278_vm1, %v365_v5, %v369_v7  ;;  %v2087_v30 = vrot.slane %v5013_v18, 2  ;;  %v377_v31 = vrot.slane %v375_v17, 1  ;;  %v373_v6 = vor.u32 %v371_v22, %v369_v7 }
  0x34   : > { %4148 = vmatmul.mubr.msk.bf16.gmra.mrb[12].mxu1 %vm427_vm2, %v346_v42  ;;  %v1736_v36 = vsel %vm1638_vm3, %v1726_v55, %v5178_v15  ;;  %v385_v38 = vrot.slane %v383_v27, 1  ;;  %v391_v18 = vshll.u32 %v5186_v32, 16  ;;  %v2089_v45 = vrot.slane %v5027_v28, 2  ;;  %v5237_v27 = vld [vmem:[%s4988_s22 + $0x90] ss:$0 sps:$4 sm:$0x11]  }
  0x35   : > { %4151 = vmatprep.mubr.msk.bf16.mxu1 %vm427_vm2, %v354_v50  ;;  %v381_v37 = vor.u32 %v379_v26, %v377_v31  ;;  %v2088_v42 = vsel %vm2085_vm4, %v2086_v13, %v2087_v30  ;;  %v378_v43 = vsel %vm278_vm1, %v373_v6, %v377_v31  ;;  %v387_v46 = vshrl.u32 %v5169_v11, 16 }
  0x36   : > { %v395_v50 = vshrl.u32 %v5186_v32, 16  ;;  %v399_v52 = vshll.u32 %v5192_v40, 16  ;;  %v2091_v53 = vrot.slane %v5033_v34, 2  ;;  %v393_v55 = vrot.slane %v391_v18, 1  ;;  %v5220_v34 = vld [vmem:[%s5873_s1 + $0x1c] sm:$0xf] }
  0x37   : > { %4300 = vmatmul.mubr.msk.bf16.gmra.mrb[12].mxu0 %vm427_vm2, %v1718_v4  ;;  %v386_v47 = vsel %vm278_vm1, %v381_v37, %v385_v38  ;;  %v2617_v28 = vsel %vm482_vm0, %v5073_v1, 0  ;;  %v389_v57 = vor.u32 %v387_v46, %v385_v38  ;;  %v2090_v60 = vsel %vm2085_vm4, %v2087_v30, %v2089_v45  ;;  %v5214_v4 = vld [vmem:[%s4988_s22 + $0x88] sm:$0xff]  }
  0x38   : > { %4303 = vmatprep.mubr.msk.bf16.mxu0 %vm427_vm2, %v1727_v12  ;;  %v397_v61 = vor.u32 %v395_v50, %v393_v55  ;;  %v401_v3 = vrot.slane %v399_v52, 1  ;;  %v2092_v5 = vsel %vm2085_vm4, %v2089_v45, %v2091_v53  ;;  %v407_v7 = vshll.u32 %v5207_v56, 16 }
  0x39   : > { %v394_v1 = vsel %vm278_vm1, %v389_v57, %v393_v55  ;;  %v2093_v12 = vrot.slane %v5051_v49, 2  ;;  %v403_v16 = vshrl.u32 %v5192_v40, 16  ;;  %v415_v22 = vshll.u32 %v5214_v4, 16  ;;  %v5264_v55 = vld [vmem:[%s4988_s22 + $0x60] sm:$0xff]   ;;  %v5283_v57 = vld [vmem:[%s4988_s22 + $0x68] sm:$0xff]  }
  0x3a   : > { %v402_v17 = vsel %vm278_vm1, %v397_v61, %v401_v3  ;;  %v409_v26 = vrot.slane %v407_v7, 1  ;;  %v423_v37 = vshll.u32 %v5237_v27, 16  ;;  %v2097_v38 = vrot.slane %v5087_v23, 2  ;;  %v5301_v7 = vld [vmem:[%s4988_s22 + $0x78] sm:$0xff]  }
  0x3b   : > { %v405_v49 = vor.u32 %v403_v16, %v401_v3  ;;  %v2094_v13 = vsel %vm2085_vm4, %v2091_v53, %v2093_v12  ;;  %v417_v31 = vrot.slane %v415_v22, 1  ;;  %v2099_v18 = vrot.slane %v5107_v44, 2  ;;  %v5317_v22 = vld [vmem:[%s4988_s22 + $0x88] sm:$0xff]  }
  0x3c   : > { %4152 = vmatmul.mubr.msk.bf16.gmra.mrb[16].mxu1 %vm427_vm2, %v362_v21  ;;  %v411_v21 = vshrl.u32 %v5207_v56, 16  ;;  %v425_v45 = vrot.slane %v423_v37, 1  ;;  %v2101_v23 = vrot.slane %v5120_v62, 2  ;;  %v2103_v44 = vrot.slane %v5132_v14, 2 }
  0x3d   : > { %4155 = vmatprep.mubr.msk.bf16.mxu1 %vm427_vm2, %v370_v24  ;;  %v2095_v24 = vrot.slane %v5063_v59, 2  ;;  %v410_v59 = vsel %vm278_vm1, %v405_v49, %v409_v26  ;;  %v2105_v62 = vrot.slane %v5145_v29, 2  ;;  %v978_v14 = vsel %vm482_vm0, %v5039_v39, 0 }
  0x3e   : > { %v413_v30 = vor.u32 %v411_v21, %v409_v26  ;;  %v2102_v52 = vsel %vm2085_vm4, %v2099_v18, %v2101_v23  ;;  %v2104_v53 = vsel %vm2085_vm4, %v2101_v23, %v2103_v44  ;;  %v2109_v61 = vrot.slane %v5283_v57, 2  ;;  %v5321_v26 = vld [vmem:[%s4988_s22 + $0x90] sm:$0xff]  }
  0x3f   : > { %4304 = vmatmul.mubr.msk.bf16.gmra.mrb[16].mxu0 %vm427_vm2, %v1736_v36  ;;  %v2096_v6 = vsel %vm2085_vm4, %v2093_v12, %v2095_v24  ;;  %v419_v36 = vshrl.u32 %v5214_v4, 16  ;;  %v2098_v46 = vsel %vm2085_vm4, %v2095_v24, %v2097_v38  ;;  %v2106_v29 = vsel %vm2085_vm4, %v2103_v44, %v2105_v62  ;;  %v5305_v12 = vld [vmem:[%s4988_s22 + $0x80] sm:$0xff]  }
  0x40   : > { %4325 = vmatprep.mubr.msk.bf16.mxu0 %vm427_vm2, %v2088_v42  ;;  %v418_v42 = vsel %vm278_vm1, %v413_v30, %v417_v31  ;;  %v2113_v16 = vrot.slane %v5301_v7, 2  ;;  %v2117_v49 = vrot.slane %v5317_v22, 2  ;;  %v2393_v30 = vld [vmem:[%s4988_s22 + $0x10] sm:$0xc] }
  0x44   : > { %4156 = vmatmul.mubr.msk.bf16.gmra.mrb[20].mxu1 %vm427_vm2, %v378_v43  ;;  %v421_v43 = vor.u32 %v419_v36, %v417_v31  ;;  %v5331_v31 = vld [vmem:[%s4988_s22 + $0x14] sm:$0xf] }
  0x45   : > { %4159 = vmatprep.mubr.msk.bf16.mxu1 %vm427_vm2, %v386_v47  ;;  %v2100_v47 = vsel %vm2085_vm4, %v2097_v38, %v2099_v18  ;;  %v5341_v37 = vcombine.low %v2393_v30, %v5331_v31  ;;  %v5344_v38 = vld [vmem:[%s4988_s22 + $0x18] sm:$0xff]  }
  0x46   : > { %v426_v50 = vsel %vm278_vm1, %v421_v43, %v425_v45  ;;  %v2526_v43 = vrot.slane %v5344_v38, 2 }
  0x47   : > { %4326 = vmatmul.mubr.msk.bf16.vlgmr.msra.gmra.mrb[0].mxu0 %vm427_vm2, %v2090_v60  ;;  %v5289_v60 = vld [vmem:[%s4988_s22 + $0x70] sm:$0xff]   ;;  %v2525_v18 = vrot.slane %v5341_v37, 2 }
  0x48   : > { %4362 = vmatpush3.bf16.msra.mxu0 %v2617_v28  ;;  %4329 = vmatprep.mubr.msk.bf16.mxu0 %vm427_vm2, %v2092_v5  ;;  %v2107_v28 = vrot.slane %v5264_v55, 2  ;;  %v2111_v3 = vrot.slane %v5289_v60, 2 }
  0x49   : > { %4773 = vmatprep.subr.msk.bf16.mxu0 %vm482_vm0, %v5220_v34 }
  0x4a   : > { %v2108_v39 = vsel %vm2085_vm4, %v2105_v62, %v2107_v28  ;;  %v2110_v5 = vsel %vm2085_vm4, %v2107_v28, %v2109_v61  ;;  %v2114_v21 = vsel %vm2085_vm4, %v2111_v3, %v2113_v16  ;;  %v3064_v62 = vsel %vm482_vm0, %v5220_v34, 0  ;;  %v5379_v28 = vld [vmem:[%s4988_s22 + $0x38] sm:$0xff]  }
  0x4c   : > { %4160 = vmatmul.mubr.msk.bf16.gmra.mrb[24].mxu1 %vm427_vm2, %v394_v1  ;;  %v2112_v1 = vsel %vm2085_vm4, %v2109_v61, %v2111_v3  ;;  %v2534_v61 = vrot.slane %v5379_v28, 2  ;;  %v5398_v3 = vld [vmem:[%s4988_s22 + $0x40] sm:$0xff]  }
  0x4d   : > { %4163 = vmatprep.mubr.msk.bf16.mxu1 %vm427_vm2, %v402_v17  ;;  %v2115_v17 = vrot.slane %v5305_v12, 2 }
  0x4f   : > { %4330 = vmatmul.mubr.msk.bf16.gmra.mrb[4].mxu0 %vm427_vm2, %v2094_v13  ;;  %v2116_v24 = vsel %vm2085_vm4, %v2113_v16, %v2115_v17  ;;  %v2119_v13 = vrot.slane %v5321_v26, 2  ;;  %v879_v16 = vld [vmem:[%s4988_s22] sm:$0xe] }
  0x50   : > { %4333 = vmatprep.mubr.msk.bf16.mxu0 %vm427_vm2, %v2096_v6  ;;  %v2118_v6 = vsel %vm2085_vm4, %v2115_v17, %v2117_v49  ;;  %v2536_v17 = vrot.slane %v5398_v3, 2 }
  0x51   : > { %v2120_v36 = vsel %vm2085_vm4, %v2117_v49, %v2119_v13 }
  0x52   : > { %v2537_v49 = vsel %vm2085_vm4, %v2534_v61, %v2536_v17 }
  0x54   : > { %4164 = vmatmul.mubr.msk.bf16.gmra.mrb[28].mxu1 %vm427_vm2, %v410_v59  ;;  %v5337_v59 = vld [vmem:[%s4988_s22 + $0x98] ss:$0 sps:$4 sm:$0x33]  }
  0x55   : > { %4167 = vmatprep.mubr.msk.bf16.mxu1 %vm427_vm2, %v418_v42  ;;  %v2121_v42 = vrot.slane %v5337_v59, 2 }
  0x57   : > { %4334 = vmatmul.mubr.msk.bf16.gmra.mrb[8].mxu0 %vm427_vm2, %v2098_v46  ;;  %v2122_v45 = vsel %vm2085_vm4, %v2119_v13, %v2121_v42  ;;  %v5357_v46 = vld [vmem:[%s4988_s22 + $0x20] sm:$0xff]   ;;  %v5416_v13 = vld [vmem:[%s4988_s22 + $0x50] sm:$0xff]  }
  0x58   : > { %4337 = vmatprep.mubr.msk.bf16.mxu0 %vm427_vm2, %v2100_v47  ;;  %v2527_v47 = vsel %vm2085_vm4, %v2525_v18, %v2526_v43  ;;  %v2528_v23 = vrot.slane %v5357_v46, 2  ;;  %v2540_v42 = vrot.slane %v5416_v13, 2 }
  0x5c   : > { %4168 = vmatmul.mubr.msk.bf16.gmra.mrb[32].mxu1 %vm427_vm2, %v426_v50  ;;  %v5361_v50 = vld [vmem:[%s4988_s22 + $0x28] sm:$0xff]  }
  0x5d   : > { %4173 = vmatprep.mubr.msk.bf16.mxu1 %vm427_vm2, %v4998_v9  ;;  %v5275_v9 = vld [vmem:[%s5873_s1 + $0xc] sm:$0xf]  ;;  %v2530_v44 = vrot.slane %v5361_v50, 2 }
  0x5f   : > { %4338 = vmatmul.mubr.msk.bf16.gmra.mrb[12].mxu0 %vm427_vm2, %v2102_v52  ;;  %v2529_v52 = vsel %vm2085_vm4, %v2526_v43, %v2528_v23 }
  0x60   : > { %4341 = vmatprep.mubr.msk.bf16.mxu0 %vm427_vm2, %v2104_v53  ;;  %v5373_v53 = vld [vmem:[%s4988_s22 + $0x30] sm:$0xff]  }
  0x64   : > { %4174 = vmatmul.mubr.msk.bf16.vlgmr.msra.gmra.mrb[0].mxu1 %vm427_vm2, %v5001_v10 }
  0x65   : > { %4177 = vmatprep.mubr.msk.bf16.mxu1 %vm427_vm2, %v5016_v19  ;;  %4210 = vmatpush3.bf16.msra.mxu1 %v978_v14  ;;  %v2531_v14 = vsel %vm2085_vm4, %v2528_v23, %v2530_v44  ;;  %v891_v23 = vrot.slane %v5030_v33, 1 }
  0x66   : > { %4768 = vmatprep.subr.msk.bf16.mxu1 %vm482_vm0, %v5275_v9 }
  0x67   : > { %4342 = vmatmul.mubr.msk.bf16.gmra.mrb[16].mxu0 %vm427_vm2, %v2106_v29  ;;  %v5384_v29 = vld [vmem:[%s5873_s1 + $0x20] sm:$0xf] }
  0x68   : > { %4345 = vmatprep.mubr.msk.bf16.mxu0 %vm427_vm2, %v2108_v39  ;;  %v2532_v39 = vrot.slane %v5373_v53, 2 }
  0x6a   : > { %v2533_v34 = vsel %vm2085_vm4, %v2530_v44, %v2532_v39 }
  0x6c   : > { %4178 = vmatmul.mubr.msk.bf16.gmra.mrb[4].mxu1 %vm427_vm2, %v5030_v33 }
  0x6d   : > { %4181 = vmatprep.mubr.msk.bf16.mxu1 %vm427_vm2, %v5048_v48 }
  0x6f   : > { %4346 = vmatmul.mubr.msk.bf16.gmra.mrb[20].mxu0 %vm427_vm2, %v2110_v5  ;;  %v2535_v5 = vsel %vm2085_vm4, %v2532_v39, %v2534_v61  ;;  %v1417_v39 = vsel %vm482_vm0, %v5275_v9, 0  ;;  %v893_v61 = vrot.slane %v5048_v48, 1  ;;  %v4919_v9 = vld [vmem:[%s5873_s1 + $0x10] sm:$0xf] }
  0x70   : > { %4349 = vmatprep.mubr.msk.bf16.mxu0 %vm427_vm2, %v2112_v1  ;;  %v5402_v1 = vld [vmem:[%s4988_s22 + $0x48] sm:$0xff]  }
  0x71   : > { %v894_v48 = vsel %vm885_vm5, %v891_v23, %v893_v61 }
  0x74   : > { %4182 = vmatmul.mubr.msk.bf16.gmra.mrb[8].mxu1 %vm427_vm2, %v5057_v54 }
  0x75   : > { %4185 = vmatprep.mubr.msk.bf16.mxu1 %vm427_vm2, %v5068_v0 }
  0x77   : > { %4350 = vmatmul.mubr.msk.bf16.gmra.mrb[24].mxu0 %vm427_vm2, %v2114_v21  ;;  %v3785_v21 = vcombine.low %v879_v16, %v4995_v8  ;;  %v5421_v8 = vld [vmem:[%s4988_s22 + $0x58] sm:$0xff]   ;;  %v895_v16 = vrot.slane %v5057_v54, 1 }
  0x78   : > { %4353 = vmatprep.mubr.msk.bf16.mxu0 %vm427_vm2, %v2116_v24  ;;  %v2538_v24 = vrot.slane %v5402_v1, 2  ;;  %v2542_v43 = vrot.slane %v5421_v8, 2 }
  0x79   : > { %v886_v30 = vrot.slane %v3785_v21, 1  ;;  %v5463_v21 = vld [vmem:[%s4988_s22 + $0x78] sm:$0xff]   ;;  %v896_v54 = vsel %vm885_vm5, %v893_v61, %v895_v16 }
  0x7a   : > { %v2543_v44 = vsel %vm2085_vm4, %v2540_v42, %v2542_v43 }
  0x7c   : > { %4186 = vmatmul.mubr.msk.bf16.gmra.mrb[12].mxu1 %vm427_vm2, %v5096_v35 }
  0x7d   : > { %4189 = vmatprep.mubr.msk.bf16.mxu1 %vm427_vm2, %v5112_v51 }
  0x7f   : > { %4354 = vmatmul.mubr.msk.bf16.gmra.mrb[28].mxu0 %vm427_vm2, %v2118_v6  ;;  %v887_v6 = vrot.slane %v5001_v10, 1  ;;  %v889_v10 = vrot.slane %v5016_v19, 1 }
  0x80   : > { %4357 = vmatprep.mubr.msk.bf16.mxu0 %vm427_vm2, %v2120_v36  ;;  %v2539_v36 = vsel %vm2085_vm4, %v2536_v17, %v2538_v24 }
  0x81   : > { %v888_v18 = vsel %vm885_vm5, %v886_v30, %v887_v6  ;;  %v897_v30 = vrot.slane %v5068_v0, 1 }
  0x84   : > { %4190 = vmatmul.mubr.msk.bf16.gmra.mrb[16].mxu1 %vm427_vm2, %v5123_v63 }
  0x85   : > { %4193 = vmatprep.mubr.msk.bf16.mxu1 %vm427_vm2, %v5140_v25 }
  0x87   : > { %4358 = vmatmul.mubr.msk.bf16.gmra.mrb[32].mxu0 %vm427_vm2, %v2122_v45  ;;  %v2541_v45 = vsel %vm2085_vm4, %v2538_v24, %v2540_v42  ;;  %v899_v42 = vrot.slane %v5096_v35, 1  ;;  %v901_v35 = vrot.slane %v5112_v51, 1 }
  0x88   : > { %4363 = vmatprep.mubr.msk.bf16.mxu0 %vm427_vm2, %v2527_v47  ;;  %v5434_v47 = vld [vmem:[%s4988_s22 + $0x60] sm:$0xff]  }
  0x89   : > { %v2544_v19 = vrot.slane %v5434_v47, 2 }
  0x8c   : > { %4194 = vmatmul.mubr.msk.bf16.gmra.mrb[20].mxu1 %vm427_vm2, %v5150_v41 }
  0x8d   : > { %4197 = vmatprep.mubr.msk.bf16.mxu1 %vm427_vm2, %v5164_v58 }
  0x8f   : > { %4364 = vmatmul.mubr.msk.bf16.vlgmr.msra.gmra.mrb[0].mxu0 %vm427_vm2, %v2529_v52  ;;  %v5439_v52 = vld [vmem:[%s4988_s22 + $0x68] sm:$0xff]  }
  0x90   : > { %4400 = vmatpush3.bf16.msra.mxu0 %v3064_v62  ;;  %4367 = vmatprep.mubr.msk.bf16.mxu0 %vm427_vm2, %v2531_v14  ;;  %v890_v62 = vsel %vm885_vm5, %v887_v6, %v889_v10  ;;  %v892_v14 = vsel %vm885_vm5, %v889_v10, %v891_v23  ;;  %v2546_v33 = vrot.slane %v5439_v52, 2  ;;  %v898_v10 = vsel %vm885_vm5, %v895_v16, %v897_v30 }
  0x91   : > { %4774 = vmatprep.subr.msk.bf16.mxu0 %vm482_vm0, %v5384_v29  ;;  %v2840_v16 = vshrl.u32 %v5341_v37, 16 }
  0x92   : > { %v2547_v17 = vsel %vm2085_vm4, %v2544_v19, %v2546_v33 }
  0x94   : > { %4198 = vmatmul.mubr.msk.bf16.gmra.mrb[24].mxu1 %vm427_vm2, %v5169_v11 }
  0x95   : > { %4201 = vmatprep.mubr.msk.bf16.mxu1 %vm427_vm2, %v5186_v32 }
  0x97   : > { %4368 = vmatmul.mubr.msk.bf16.gmra.mrb[4].mxu0 %vm427_vm2, %v2533_v34  ;;  %v2545_v34 = vsel %vm2085_vm4, %v2542_v43, %v2544_v19  ;;  %v5481_v43 = vld [vmem:[%s4988_s22 + $0x88] sm:$0xff]   ;;  %v903_v19 = vrot.slane %v5123_v63, 1  ;;  %v2843_v63 = vshll.u32 %v5341_v37, 16 }
  0x98   : > { %4371 = vmatprep.mubr.msk.bf16.mxu0 %vm427_vm2, %v2535_v5  ;;  %v5454_v5 = vld [vmem:[%s4988_s22 + $0x70] sm:$0xff]   ;;  %v2554_v23 = vrot.slane %v5481_v43, 2 }
  0x99   : > { %v2548_v24 = vrot.slane %v5454_v5, 2  ;;  %v904_v51 = vsel %vm885_vm5, %v901_v35, %v903_v19 }
  0x9b   : > { %v2549_v6 = vsel %vm2085_vm4, %v2546_v33, %v2548_v24  ;;  %v902_v33 = vsel %vm885_vm5, %v899_v42, %v901_v35 }
  0x9c   : > { %4202 = vmatmul.mubr.msk.bf16.gmra.mrb[28].mxu1 %vm427_vm2, %v5192_v40 }
  0x9d   : > { %4205 = vmatprep.mubr.msk.bf16.mxu1 %vm427_vm2, %v5207_v56 }
  0x9f   : > { %4372 = vmatmul.mubr.msk.bf16.gmra.mrb[8].mxu0 %vm427_vm2, %v2537_v49  ;;  %v2550_v49 = vrot.slane %v5463_v21, 2 }
  0xa0   : > { %4375 = vmatprep.mubr.msk.bf16.mxu0 %vm427_vm2, %v2539_v36  ;;  %v5476_v36 = vld [vmem:[%s4988_s22 + $0x80] sm:$0xff]  }
  0xa1   : > { %v2552_v0 = vrot.slane %v5476_v36, 2 }
  0xa4   : > { %4206 = vmatmul.mubr.msk.bf16.gmra.mrb[32].mxu1 %vm427_vm2, %v5214_v4 }
  0xa5   : > { %4211 = vmatprep.mubr.msk.bf16.mxu1 %vm427_vm2, %v888_v18  ;;  %v2551_v18 = vsel %vm2085_vm4, %v2548_v24, %v2550_v49 }
  0xa7   : > { %4376 = vmatmul.mubr.msk.bf16.gmra.mrb[12].mxu0 %vm427_vm2, %v2541_v45  ;;  %v900_v45 = vsel %vm885_vm5, %v897_v30, %v899_v42  ;;  %v907_v30 = vrot.slane %v5150_v41, 1  ;;  %v2845_v42 = vrot.slane %v2843_v63, 3  ;;  %v2866_v41 = vshrl.u32 %v5361_v50, 16 }
  0xa8   : > { %4379 = vmatprep.mubr.msk.bf16.mxu0 %vm427_vm2, %v2543_v44  ;;  %v2553_v44 = vsel %vm2085_vm4, %v2550_v49, %v2552_v0  ;;  %v4843_v49 = vld [vmem:[%s4988_s22 + $0xa0] ss:$0 sps:$4 sm:$0x33]  }
  0xac   : > { %4212 = vmatmul.mubr.msk.bf16.vlgmr.msra.gmra.mrb[0].mxu1 %vm427_vm2, %v890_v62  ;;  %v5494_v62 = vld [vmem:[%s4988_s22 + $0x90] sm:$0xff]  }
  0xad   : > { %4215 = vmatprep.mubr.msk.bf16.mxu1 %vm427_vm2, %v892_v14  ;;  %4248 = vmatpush3.bf16.msra.mxu1 %v1417_v39  ;;  %v5498_v14 = vld [vmem:[%s4988_s22 + $0x98] sm:$0xff]   ;;  %v2555_v39 = vsel %vm2085_vm4, %v2552_v0, %v2554_v23  ;;  %v2556_v61 = vrot.slane %v5494_v62, 2  ;;  %v2560_v0 = vrot.slane %v4843_v49, 2 }
  0xae   : > { %4770 = vmatprep.subr.msk.bf16.mxu1 %vm482_vm0, %v4919_v9  ;;  %v2848_v9 = vshrl.u32 %v5344_v38, 16 }
  0xaf   : > { %4380 = vmatmul.mubr.msk.bf16.gmra.mrb[16].mxu0 %vm427_vm2, %v2545_v34  ;;  %v2558_v34 = vrot.slane %v5498_v14, 2  ;;  %v2557_v24 = vsel %vm2085_vm4, %v2554_v23, %v2556_v61  ;;  %v2860_v23 = vshll.u32 %v5357_v46, 16 }
  0xb0   : > { %4383 = vmatprep.mubr.msk.bf16.mxu0 %vm427_vm2, %v2547_v17  ;;  %v2851_v17 = vshll.u32 %v5344_v38, 16  ;;  %v2850_v37 = vrot.slane %v2848_v9, 2  ;;  %v2868_v9 = vrot.slane %v2866_v41, 2  ;;  %v2893_v41 = vshrl.u32 %v5398_v3, 16 }
  0xb4   : > { %4216 = vmatmul.mubr.msk.bf16.gmra.mrb[4].mxu1 %vm427_vm2, %v894_v48  ;;  %v905_v48 = vrot.slane %v5140_v25, 1 }
  0xb5   : > { %4219 = vmatprep.mubr.msk.bf16.mxu1 %vm427_vm2, %v896_v54  ;;  %v2559_v54 = vsel %vm2085_vm4, %v2556_v61, %v2558_v34 }
  0xb6   : > { %v908_v25 = vsel %vm885_vm5, %v905_v48, %v907_v30 }
  0xb7   : > { %4384 = vmatmul.mubr.msk.bf16.gmra.mrb[20].mxu0 %vm427_vm2, %v2549_v6  ;;  %v2842_v6 = vrot.slane %v2840_v16, 2  ;;  %v911_v16 = vrot.slane %v5169_v11, 1  ;;  %v2884_v11 = vshrl.u32 %v5379_v28, 16 }
  0xb8   : > { %4387 = vmatprep.mubr.msk.bf16.mxu0 %vm427_vm2, %v2551_v18  ;;  %v2853_v18 = vrot.slane %v2851_v17, 3 }
  0xb9   : > { %v2846_v35 = vor.u32 %v2845_v42, %v2842_v6  ;;  %v2887_v6 = vshll.u32 %v5379_v28, 16 }
  0xbc   : > { %4220 = vmatmul.mubr.msk.bf16.gmra.mrb[8].mxu1 %vm427_vm2, %v898_v10  ;;  %v906_v10 = vsel %vm885_vm5, %v903_v19, %v905_v48  ;;  %v909_v19 = vrot.slane %v5164_v58, 1  ;;  %v2875_v58 = vshrl.u32 %v5373_v53, 16 }
  0xbd   : > { %4223 = vmatprep.mubr.msk.bf16.mxu1 %vm427_vm2, %v900_v45  ;;  %v2857_v45 = vshrl.u32 %v5357_v46, 16 }
  0xbe   : > { %v910_v48 = vsel %vm885_vm5, %v907_v30, %v909_v19  ;;  %v913_v30 = vrot.slane %v5186_v32, 1  ;;  %v2896_v32 = vshll.u32 %v5398_v3, 16 }
  0xbf   : > { %4388 = vmatmul.mubr.msk.bf16.gmra.mrb[24].mxu0 %vm427_vm2, %v2553_v44  ;;  %v2854_v44 = vor.u32 %v2853_v18, %v2850_v37  ;;  %v2859_v61 = vrot.slane %v2857_v45, 2  ;;  %v2877_v37 = vrot.slane %v2875_v58, 2  ;;  %v2886_v45 = vrot.slane %v2884_v11, 2 }
  0xc0   : > { %4391 = vmatprep.mubr.msk.bf16.mxu0 %vm427_vm2, %v2555_v39  ;;  %v2869_v39 = vshll.u32 %v5361_v50, 16  ;;  %v2911_v58 = vshrl.u32 %v5416_v13, 16  ;;  %v2923_v11 = vshll.u32 %v5421_v8, 16 }
  0xc1   : > { %v2855_v63 = vsel %vm2838_vm6, %v2846_v35, %v2854_v44  ;;  %v914_v35 = vsel %vm885_vm5, %v911_v16, %v913_v30 }
  0xc2   : > { %v2871_v17 = vrot.slane %v2869_v39, 3 }
  0xc4   : > { %4224 = vmatmul.mubr.msk.bf16.gmra.mrb[12].mxu1 %vm427_vm2, %v902_v33  ;;  %v2561_v33 = vsel %vm2085_vm4, %v2558_v34, %v2560_v0  ;;  %v2878_v34 = vshll.u32 %v5373_v53, 16  ;;  %v2872_v49 = vor.u32 %v2871_v17, %v2868_v9  ;;  %v3378_v0 = vsel %vm482_vm0, %v5384_v29, 0 }
  0xc5   : > { %4227 = vmatprep.mubr.msk.bf16.mxu1 %vm427_vm2, %v904_v51  ;;  %v2862_v51 = vrot.slane %v2860_v23, 3  ;;  %v2889_v23 = vrot.slane %v2887_v6, 3  ;;  %v2902_v29 = vshrl.u32 %v5402_v1, 16 }
  0xc6   : > { %v2880_v18 = vrot.slane %v2878_v34, 3  ;;  %v2914_v34 = vshll.u32 %v5416_v13, 16 }
  0xc7   : > { %4392 = vmatmul.mubr.msk.bf16.gmra.mrb[28].mxu0 %vm427_vm2, %v2557_v24  ;;  %v2863_v24 = vor.u32 %v2862_v51, %v2859_v61  ;;  %v2890_v39 = vor.u32 %v2889_v23, %v2886_v45  ;;  %v2895_v61 = vrot.slane %v2893_v41, 2  ;;  %v2898_v51 = vrot.slane %v2896_v32, 3 }
  0xc8   : > { %4395 = vmatprep.mubr.msk.bf16.mxu0 %vm427_vm2, %v2559_v54  ;;  %v912_v54 = vsel %vm885_vm5, %v909_v19, %v911_v16  ;;  %v2905_v19 = vshll.u32 %v5402_v1, 16  ;;  %v2904_v17 = vrot.slane %v2902_v29, 2  ;;  %v2925_v23 = vrot.slane %v2923_v11, 3  ;;  %v4921_v29 = vld [vmem:[%s4988_s22 + $0x18] sm:$0xff]  }
  0xc9   : > { %v2864_v42 = vsel %vm2838_vm6, %v2854_v44, %v2863_v24  ;;  %v2881_v44 = vor.u32 %v2880_v18, %v2877_v37  ;;  %v2916_v37 = vrot.slane %v2914_v34, 3  ;;  %v1325_v18 = vrot.slane %v5019_v20, 1 }
  0xca   : > { %v2929_v32 = vshrl.u32 %v5434_v47, 16  ;;  %v2932_v20 = vshll.u32 %v5434_v47, 16  ;;  %v2950_v34 = vshll.u32 %v5454_v5, 16  ;;  %v2959_v11 = vshll.u32 %v5463_v21, 16 }
  0xcb   : > { %v2882_v16 = vsel %vm2838_vm6, %v2872_v49, %v2881_v44  ;;  %v2891_v9 = vsel %vm2838_vm6, %v2881_v44, %v2890_v39 }
  0xcc   : > { %4228 = vmatmul.mubr.msk.bf16.gmra.mrb[16].mxu1 %vm427_vm2, %v906_v10  ;;  %v915_v10 = vrot.slane %v5192_v40, 1 }
  0xcd   : > { %4231 = vmatprep.mubr.msk.bf16.mxu1 %vm427_vm2, %v908_v25  ;;  %v2873_v25 = vsel %vm2838_vm6, %v2863_v24, %v2872_v49 }
  0xce   : > { %v916_v40 = vsel %vm885_vm5, %v913_v30, %v915_v10  ;;  %v921_v30 = vrot.slane %v5237_v27, 1 }
  0xcf   : > { %4396 = vmatmul.mubr.msk.bf16.gmra.mrb[32].mxu0 %vm427_vm2, %v2561_v33  ;;  %v917_v33 = vrot.slane %v5207_v56, 1 }
  0xd0   : > { %4401 = vmatprep.mubr.msk.bf16.mxu0 %vm427_vm2, %v2855_v63  ;;  %v919_v63 = vrot.slane %v5214_v4, 1  ;;  %v2920_v4 = vshrl.u32 %v5421_v8, 16 }
  0xd1   : > { %v918_v24 = vsel %vm885_vm5, %v915_v10, %v917_v33  ;;  %v4920_v10 = vld [vmem:[%s4988_s22 + $0x10] sm:$0xff]  }
  0xd2   : > { %v920_v56 = vsel %vm885_vm5, %v917_v33, %v919_v63  ;;  %v2922_v45 = vrot.slane %v2920_v4, 2  ;;  %v2956_v4 = vshrl.u32 %v5463_v21, 16 }
  0xd4   : > { %4232 = vmatmul.mubr.msk.bf16.gmra.mrb[20].mxu1 %vm427_vm2, %v910_v48  ;;  %v2907_v48 = vrot.slane %v2905_v19, 3  ;;  %v2926_v44 = vor.u32 %v2925_v23, %v2922_v45  ;;  %v1328_v19 = vrot.slane %v4921_v29, 1  ;;  %v2958_v45 = vrot.slane %v2956_v4, 2 }
  0xd5   : > { %4235 = vmatprep.mubr.msk.bf16.mxu1 %vm427_vm2, %v912_v54  ;;  %v2899_v54 = vor.u32 %v2898_v51, %v2895_v61  ;;  %v2931_v61 = vrot.slane %v2929_v32, 2  ;;  %v2934_v51 = vrot.slane %v2932_v20, 3  ;;  %v2961_v23 = vrot.slane %v2959_v11, 3  ;;  %v4927_v11 = vld [vmem:[%s4988_s22 + $0x48] sm:$0xff]  }
  0xd6   : > { %v2908_v49 = vor.u32 %v2907_v48, %v2904_v17  ;;  %v2968_v32 = vshll.u32 %v5476_v36, 16  ;;  %v2995_v4 = vshll.u32 %v5498_v14, 16 }
  0xd7   : > { %4402 = vmatmul.mubr.msk.bf16.vlgmr.msra.gmra.mrb[0].mxu0 %vm427_vm2, %v2864_v42  ;;  %v2900_v6 = vsel %vm2838_vm6, %v2890_v39, %v2899_v54  ;;  %v2913_v42 = vrot.slane %v2911_v58, 2  ;;  %v2941_v39 = vshll.u32 %v5439_v52, 16  ;;  %v2947_v58 = vshrl.u32 %v5454_v5, 16 }
  0xd8   : > { %4438 = vmatpush3.bf16.msra.mxu0 %v3378_v0  ;;  %4405 = vmatprep.mubr.msk.bf16.mxu0 %vm427_vm2, %v2873_v25  ;;  %v1326_v0 = vrot.slane %v4920_v10, 1  ;;  %v2909_v25 = vsel %vm2838_vm6, %v2899_v54, %v2908_v49  ;;  %v2935_v54 = vor.u32 %v2934_v51, %v2931_v61  ;;  %v4924_v10 = vld [vmem:[%s4988_s22 + $0x30] sm:$0xff]   ;;  %v2962_v20 = vor.u32 %v2961_v23, %v2958_v45  ;;  %v4926_v51 = vld [vmem:[%s4988_s22 + $0x40] sm:$0xff]  }
  0xd9   : > { %v2917_v41 = vor.u32 %v2916_v37, %v2913_v42  ;;  %v2943_v48 = vrot.slane %v2941_v39, 3  ;;  %v2949_v37 = vrot.slane %v2947_v58, 2  ;;  %v4925_v39 = vld [vmem:[%s4988_s22 + $0x38] sm:$0xff]   ;;  %v2970_v61 = vrot.slane %v2968_v32, 3 }
  0xda   : > { %v1327_v27 = vsel %vm885_vm5, %v1325_v18, %v1326_v0  ;;  %v2936_v42 = vsel %vm2838_vm6, %v2926_v44, %v2935_v54  ;;  %v2952_v18 = vrot.slane %v2950_v34, 3  ;;  %v1336_v29 = vrot.slane %v4925_v39, 1 }
  0xdb   : > { %v2918_v33 = vsel %vm2838_vm6, %v2908_v49, %v2917_v41  ;;  %v2986_v58 = vshll.u32 %v5494_v62, 16  ;;  %v2997_v23 = vrot.slane %v2995_v4, 3  ;;  %v3291_v4 = vrot.slane %v5361_v50, 3 }
  0xdc   : > { %4236 = vmatmul.mubr.msk.bf16.gmra.mrb[24].mxu1 %vm427_vm2, %v914_v35  ;;  %v922_v35 = vsel %vm885_vm5, %v919_v63, %v921_v30  ;;  %v3293_v50 = vrot.slane %v5373_v53, 3 }
  0xdd   : > { %4239 = vmatprep.mubr.msk.bf16.mxu1 %vm427_vm2, %v916_v40  ;;  %v2938_v40 = vshrl.u32 %v5439_v52, 16 }
  0xdf   : > { %4406 = vmatmul.mubr.msk.bf16.gmra.mrb[4].mxu0 %vm427_vm2, %v2882_v16  ;;  %v4922_v16 = vld [vmem:[%s4988_s22 + $0x20] sm:$0xff]   ;;  %v2940_v17 = vrot.slane %v2938_v40, 2  ;;  %v2977_v40 = vshll.u32 %v5481_v43, 16 }
  0xe0   : > { %4409 = vmatprep.mubr.msk.bf16.mxu0 %vm427_vm2, %v2891_v9  ;;  %v1330_v63 = vrot.slane %v4922_v16, 1  ;;  %v2927_v9 = vsel %vm2838_vm6, %v2917_v41, %v2926_v44  ;;  %v2953_v41 = vor.u32 %v2952_v18, %v2949_v37  ;;  %v2974_v44 = vshrl.u32 %v5481_v43, 16  ;;  %v4928_v18 = vld [vmem:[%s4988_s22 + $0x50] sm:$0xff]  }
  0xe1   : > { %v2944_v49 = vor.u32 %v2943_v48, %v2940_v17  ;;  %v1338_v16 = vrot.slane %v4926_v51, 1  ;;  %v2979_v17 = vrot.slane %v2977_v40, 3  ;;  %v2988_v37 = vrot.slane %v2986_v58, 3  ;;  %v4929_v40 = vld [vmem:[%s4988_s22 + $0x58] sm:$0xff]  }
  0xe2   : > { %v1344_v39 = vrot.slane %v4929_v40, 1  ;;  %v1747_v40 = vshrl.u32 %v5283_v57, 16 }
  0xe4   : > { %4240 = vmatmul.mubr.msk.bf16.gmra.mrb[28].mxu1 %vm427_vm2, %v918_v24  ;;  %v1329_v24 = vsel %vm885_vm5, %v1326_v0, %v1328_v19  ;;  %v1334_v0 = vrot.slane %v4924_v10, 1  ;;  %v1342_v10 = vrot.slane %v4928_v18, 1  ;;  %v3295_v18 = vrot.slane %v5379_v28, 3 }
  0xe5   : > { %4243 = vmatprep.mubr.msk.bf16.mxu1 %vm427_vm2, %v920_v56  ;;  %v1331_v56 = vsel %vm885_vm5, %v1328_v19, %v1330_v63  ;;  %v2954_v19 = vsel %vm2838_vm6, %v2944_v49, %v2953_v41 }
  0xe6   : > { %v1337_v48 = vsel %vm885_vm5, %v1334_v0, %v1336_v29  ;;  %v3296_v53 = vsel %vm3285_vm7, %v3293_v50, %v3295_v18 }
  0xe7   : > { %4410 = vmatmul.mubr.msk.bf16.gmra.mrb[8].mxu0 %vm427_vm2, %v2900_v6  ;;  %v4923_v6 = vld [vmem:[%s4988_s22 + $0x28] sm:$0xff]  }
  0xe8   : > { %4413 = vmatprep.mubr.msk.bf16.mxu0 %vm427_vm2, %v2909_v25  ;;  %v1332_v30 = vrot.slane %v4923_v6, 1  ;;  %v2945_v25 = vsel %vm2838_vm6, %v2935_v54, %v2944_v49  ;;  %v1339_v54 = vsel %vm885_vm5, %v1336_v29, %v1338_v16  ;;  %v2992_v49 = vshrl.u32 %v5498_v14, 16 }
  0xe9   : > { %v1340_v6 = vrot.slane %v4927_v11, 1  ;;  %v1352_v11 = vrot.slane %v5301_v7, 1 }
  0xea   : > { %v2994_v45 = vrot.slane %v2992_v49, 2 }
  0xec   : > { %4244 = vmatmul.mubr.msk.bf16.gmra.mrb[32].mxu1 %vm427_vm2, %v922_v35  ;;  %v1333_v35 = vsel %vm885_vm5, %v1330_v63, %v1332_v30  ;;  %v2963_v63 = vsel %vm2838_vm6, %v2953_v41, %v2962_v20 }
  0xed   : > { %4249 = vmatprep.mubr.msk.bf16.mxu1 %vm427_vm2, %v1327_v27  ;;  %v2965_v27 = vshrl.u32 %v5476_v36, 16 }
  0xef   : > { %4414 = vmatmul.mubr.msk.bf16.gmra.mrb[12].mxu0 %vm427_vm2, %v2918_v33  ;;  %v2967_v33 = vrot.slane %v2965_v27, 2 }
  0xf0   : > { %4417 = vmatprep.mubr.msk.bf16.mxu0 %vm427_vm2, %v2927_v9  ;;  %v2976_v9 = vrot.slane %v2974_v44, 2  ;;  %v3279_v44 = vld [vmem:[%s4988_s22 + $0x10] sm:$0x8] }
  0xf2   : > { %v2980_v34 = vor.u32 %v2979_v17, %v2976_v9 }
  0xf4   : > { %4250 = vmatmul.mubr.msk.bf16.vlgmr.msra.gmra.mrb[0].mxu1 %vm427_vm2, %v1329_v24  ;;  %v2971_v24 = vor.u32 %v2970_v61, %v2967_v33  ;;  %v1346_v61 = vrot.slane %v5264_v55, 1 }
  0xf5   : > { %4253 = vmatprep.mubr.msk.bf16.mxu1 %vm427_vm2, %v1331_v56  ;;  %4476 = vmatpush3.bf16.msra.mxu1 %v4970_v2  ;;  %v1335_v2 = vsel %vm885_vm5, %v1332_v30, %v1334_v0  ;;  %v2983_v56 = vshrl.u32 %v5494_v62, 16  ;;  %v5634_v0 = vld [vmem:[%s4988_s22 + $0xa0] ss:$0 sps:$4 sm:$0x77]  }
  0xf6   : > { %v2972_v30 = vsel %vm2838_vm6, %v2962_v20, %v2971_v24  ;;  %v3001_v27 = vshrl.u32 %v5634_v0, 16  ;;  %v3004_v32 = vshll.u32 %v5634_v0, 16  ;;  %v2998_v20 = vor.u32 %v2997_v23, %v2994_v45 }
  0xf7   : > { %4418 = vmatmul.mubr.msk.bf16.gmra.mrb[16].mxu0 %vm427_vm2, %v2936_v42  ;;  %v2985_v42 = vrot.slane %v2983_v56, 2  ;;  %v1347_v17 = vsel %vm885_vm5, %v1344_v39, %v1346_v61  ;;  %v1350_v56 = vrot.slane %v5289_v60, 1  ;;  %v1358_v45 = vrot.slane %v5321_v26, 1 }
  0xf8   : > { %4421 = vmatprep.mubr.msk.bf16.mxu0 %vm427_vm2, %v2945_v25  ;;  %v2981_v25 = vsel %vm2838_vm6, %v2971_v24, %v2980_v34  ;;  %v3006_v33 = vrot.slane %v3004_v32, 3  ;;  %v3287_v24 = vrot.slane %v5344_v38, 3  ;;  %v3289_v38 = vrot.slane %v5357_v46, 3 }
  0xf9   : > { %v2989_v41 = vor.u32 %v2988_v37, %v2985_v42  ;;  %v1353_v46 = vsel %vm885_vm5, %v1350_v56, %v1352_v11  ;;  %v1738_v23 = vshrl.u32 %v5264_v55, 16 }
  0xfa   : > { %v3292_v42 = vsel %vm3285_vm7, %v3289_v38, %v3291_v4 }
  0xfb   : > { %v2990_v29 = vsel %vm2838_vm6, %v2980_v34, %v2989_v41  ;;  %v2999_v51 = vsel %vm2838_vm6, %v2989_v41, %v2998_v20  ;;  %v4846_v41 = vld [vmem:[%s4988_s22 + $0x98] ss:$0 sps:$4 sm:$0x11]   ;;  %v1740_v32 = vrot.slane %v1738_v23, 1 }
  0xfc   : > { %4254 = vmatmul.mubr.msk.bf16.gmra.mrb[4].mxu1 %vm427_vm2, %v1333_v35  ;;  %v1341_v35 = vsel %vm885_vm5, %v1338_v16, %v1340_v6  ;;  %v3941_v16 = vcombine.low %v3279_v44, %v5331_v31  ;;  %v3299_v44 = vrot.slane %v5402_v1, 3 }
  0xfd   : > { %4257 = vmatprep.mubr.msk.bf16.mxu1 %vm427_vm2, %v1335_v2  ;;  %v1343_v2 = vsel %vm885_vm5, %v1340_v6, %v1342_v10  ;;  %v3290_v6 = vsel %vm3285_vm7, %v3287_v24, %v3289_v38 }
  0xff   : > { %4422 = vmatmul.mubr.msk.bf16.gmra.mrb[20].mxu0 %vm427_vm2, %v2954_v19  ;;  %v3003_v19 = vrot.slane %v3001_v27, 2 }
 0x100   : > { %4425 = vmatprep.mubr.msk.bf16.mxu0 %vm427_vm2, %v2963_v63  ;;  %v1345_v63 = vsel %vm885_vm5, %v1342_v10, %v1344_v39  ;;  %v1356_v10 = vrot.slane %v5317_v22, 1  ;;  %v1750_v39 = vshll.u32 %v5283_v57, 16 }
 0x101   : > { %v3007_v9 = vor.u32 %v3006_v33, %v3003_v19  ;;  %v1759_v33 = vshll.u32 %v5289_v60, 16 }
 0x102   : > { %v1359_v27 = vsel %vm885_vm5, %v1356_v10, %v1358_v45 }
 0x103   : > { %v3008_v31 = vsel %vm2838_vm6, %v2998_v20, %v3007_v9 }
 0x104   : > { %4258 = vmatmul.mubr.msk.bf16.gmra.mrb[8].mxu1 %vm427_vm2, %v1337_v48  ;;  %v3286_v48 = vrot.slane %v3941_v16, 3  ;;  %v1752_v16 = vrot.slane %v1750_v39, 2 }
 0x105   : > { %4261 = vmatprep.mubr.msk.bf16.mxu1 %vm427_vm2, %v1339_v54  ;;  %v1348_v54 = vrot.slane %v5283_v57, 1 }
 0x106   : > { %v3288_v58 = vsel %vm3285_vm7, %v3286_v48, %v3287_v24  ;;  %v3303_v48 = vrot.slane %v5421_v8, 3  ;;  %v1765_v24 = vshrl.u32 %v5301_v7, 16 }
 0x107   : > { %4426 = vmatmul.mubr.msk.bf16.gmra.mrb[24].mxu0 %vm427_vm2, %v2972_v30  ;;  %v1349_v34 = vsel %vm885_vm5, %v1346_v61, %v1348_v54  ;;  %v1351_v49 = vsel %vm885_vm5, %v1348_v54, %v1350_v56  ;;  %v1354_v30 = vrot.slane %v5305_v12, 1  ;;  %v1768_v54 = vshll.u32 %v5301_v7, 16 }
 0x108   : > { %4429 = vmatprep.mubr.msk.bf16.mxu0 %vm427_vm2, %v2981_v25  ;;  %v3294_v25 = vsel %vm3285_vm7, %v3291_v4, %v3293_v50 }
 0x109   : > { %v1355_v37 = vsel %vm885_vm5, %v1352_v11, %v1354_v30  ;;  %v1357_v28 = vsel %vm885_vm5, %v1354_v30, %v1356_v10  ;;  %v1770_v38 = vrot.slane %v1768_v54, 2  ;;  %v1783_v30 = vshrl.u32 %v5317_v22, 16 }
 0x10b   : > { %v1785_v10 = vrot.slane %v1783_v30, 1 }
 0x10c   : > { %4262 = vmatmul.mubr.msk.bf16.gmra.mrb[12].mxu1 %vm427_vm2, %v1341_v35  ;;  %v1741_v35 = vshll.u32 %v5264_v55, 16  ;;  %v1360_v55 = vrot.slane %v4846_v41, 1  ;;  %v1804_v41 = vshll.u32 %v5337_v59, 16 }
 0x10d   : > { %4265 = vmatprep.mubr.msk.bf16.mxu1 %vm427_vm2, %v1343_v2  ;;  %v3297_v2 = vrot.slane %v5398_v3, 3  ;;  %v1756_v3 = vshrl.u32 %v5289_v60, 16 }
 0x10e   : > { %v1743_v20 = vrot.slane %v1741_v35, 2  ;;  %v1361_v1 = vsel %vm885_vm5, %v1358_v45, %v1360_v55  ;;  %v3309_v45 = vrot.slane %v5454_v5, 3 }
 0x10f   : > { %4430 = vmatmul.mubr.msk.bf16.gmra.mrb[28].mxu0 %vm427_vm2, %v2990_v29  ;;  %v3298_v29 = vsel %vm3285_vm7, %v3295_v18, %v3297_v2  ;;  %v3300_v61 = vsel %vm3285_vm7, %v3297_v2, %v3299_v44  ;;  %v1758_v9 = vrot.slane %v1756_v3, 1  ;;  %v3319_v3 = vrot.slane %v5498_v14, 3 }
 0x110   : > { %4433 = vmatprep.mubr.msk.bf16.mxu0 %vm427_vm2, %v2999_v51  ;;  %v1744_v19 = vor.u32 %v1743_v20, %v1740_v32  ;;  %v1749_v51 = vrot.slane %v1747_v40, 1  ;;  %v3315_v40 = vrot.slane %v5481_v43, 3 }
 0x112   : > { %v1745_v57 = vsel %vm1638_vm3, %v5178_v15, %v1744_v19  ;;  %v1753_v60 = vor.u32 %v1752_v16, %v1749_v51  ;;  %v1777_v15 = vshll.u32 %v5305_v12, 16 }
 0x114   : > { %4266 = vmatmul.mubr.msk.bf16.gmra.mrb[16].mxu1 %vm427_vm2, %v1345_v63  ;;  %v3301_v63 = vrot.slane %v5416_v13, 3  ;;  %v1774_v13 = vshrl.u32 %v5305_v12, 16  ;;  %v1754_v8 = vsel %vm1638_vm3, %v1744_v19, %v1753_v60  ;;  %v1779_v11 = vrot.slane %v1777_v15, 2 }
 0x115   : > { %4269 = vmatprep.mubr.msk.bf16.mxu1 %vm427_vm2, %v1347_v17  ;;  %v1761_v17 = vrot.slane %v1759_v33, 2 }
 0x116   : > { %v1776_v4 = vrot.slane %v1774_v13, 1 }
 0x117   : > { %4434 = vmatmul.mubr.msk.bf16.gmra.mrb[32].mxu0 %vm427_vm2, %v3008_v31  ;;  %v3302_v31 = vsel %vm3285_vm7, %v3299_v44, %v3301_v63  ;;  %v1762_v56 = vor.u32 %v1761_v17, %v1758_v9  ;;  %v3313_v44 = vrot.slane %v5476_v36, 3  ;;  %v3317_v36 = vrot.slane %v5494_v62, 3 }
 0x118   : > { %4439 = vmatprep.mubr.msk.bf16.mxu0 %vm427_vm2, %v3288_v58  ;;  %v3304_v58 = vsel %vm3285_vm7, %v3301_v63, %v3303_v48  ;;  %v1780_v50 = vor.u32 %v1779_v11, %v1776_v4 }
 0x119   : > { %v1763_v7 = vsel %vm1638_vm3, %v1753_v60, %v1762_v56  ;;  %v3318_v43 = vsel %vm3285_vm7, %v3315_v40, %v3317_v36  ;;  %v3320_v33 = vsel %vm3285_vm7, %v3317_v36, %v3319_v3 }
 0x11c   : > { %4270 = vmatmul.mubr.msk.bf16.gmra.mrb[20].mxu1 %vm427_vm2, %v1349_v34  ;;  %v1767_v34 = vrot.slane %v1765_v24, 1 }
 0x11d   : > { %4273 = vmatprep.mubr.msk.bf16.mxu1 %vm427_vm2, %v1351_v49  ;;  %v3305_v49 = vrot.slane %v5434_v47, 3  ;;  %v1792_v47 = vshrl.u32 %v5321_v26, 16 }
 0x11e   : > { %v1771_v12 = vor.u32 %v1770_v38, %v1767_v34 }
 0x11f   : > { %4440 = vmatmul.mubr.msk.bf16.vlgmr.msra.gmra.mrb[0].mxu0 %vm427_vm2, %v3290_v6  ;;  %v3307_v6 = vrot.slane %v5439_v52, 3  ;;  %v1794_v23 = vrot.slane %v1792_v47, 1 }
 0x120   : > { %4443 = vmatprep.mubr.msk.bf16.mxu0 %vm427_vm2, %v3292_v42  ;;  %v1786_v42 = vshll.u32 %v5317_v22, 16  ;;  %v1772_v52 = vsel %vm1638_vm3, %v1762_v56, %v1771_v12  ;;  %v1781_v22 = vsel %vm1638_vm3, %v1771_v12, %v1780_v50 }
 0x121   : > { %v3308_v18 = vsel %vm3285_vm7, %v3305_v49, %v3307_v6  ;;  %v3310_v2 = vsel %vm3285_vm7, %v3307_v6, %v3309_v45 }
 0x124   : > { %4274 = vmatmul.mubr.msk.bf16.gmra.mrb[24].mxu1 %vm427_vm2, %v1353_v46  ;;  %v3306_v46 = vsel %vm3285_vm7, %v3303_v48, %v3305_v49 }
 0x125   : > { %4277 = vmatprep.mubr.msk.bf16.mxu1 %vm427_vm2, %v1355_v37  ;;  %v1795_v37 = vshll.u32 %v5321_v26, 16 }
 0x127   : > { %4444 = vmatmul.mubr.msk.bf16.gmra.mrb[4].mxu0 %vm427_vm2, %v3294_v25  ;;  %v1788_v25 = vrot.slane %v1786_v42, 2  ;;  %v1797_v35 = vrot.slane %v1795_v37, 2 }
 0x128   : > { %4447 = vmatprep.mubr.msk.bf16.mxu0 %vm427_vm2, %v3296_v53  ;;  %v3311_v53 = vrot.slane %v5463_v21, 3  ;;  %v1806_v21 = vrot.slane %v1804_v41, 2 }
 0x129   : > { %v1789_v26 = vor.u32 %v1788_v25, %v1785_v10 }
 0x12a   : > { %v3312_v5 = vsel %vm3285_vm7, %v3309_v45, %v3311_v53  ;;  %v3314_v39 = vsel %vm3285_vm7, %v3311_v53, %v3313_v44 }
 0x12b   : > { %v1790_v32 = vsel %vm1638_vm3, %v1780_v50, %v1789_v26 }
 0x12c   : > { %4278 = vmatmul.mubr.msk.bf16.gmra.mrb[28].mxu1 %vm427_vm2, %v1357_v28  ;;  %v1801_v28 = vshrl.u32 %v5337_v59, 16 }
 0x12d   : > { %4281 = vmatprep.mubr.msk.bf16.mxu1 %vm427_vm2, %v1359_v27  ;;  %v1798_v27 = vor.u32 %v1797_v35, %v1794_v23 }
 0x12e   : > { %v1803_v20 = vrot.slane %v1801_v28, 1 }
 0x12f   : > { %4448 = vmatmul.mubr.msk.bf16.gmra.mrb[8].mxu0 %vm427_vm2, %v3298_v29  ;;  %v1799_v55 = vsel %vm1638_vm3, %v1789_v26, %v1798_v27  ;;  %v3316_v29 = vsel %vm3285_vm7, %v3313_v44, %v3315_v40 }
 0x130   : > { %4451 = vmatprep.mubr.msk.bf16.mxu0 %vm427_vm2, %v3300_v61  ;;  %v1807_v59 = vor.u32 %v1806_v21, %v1803_v20  ;;  %v3321_v61 = vrot.slane %v5634_v0, 3 }
 0x132   : > { %v1808_v19 = vsel %vm1638_vm3, %v1798_v27, %v1807_v59 }
 0x134   : > { %4282 = vmatmul.mubr.msk.bf16.gmra.mrb[32].mxu1 %vm427_vm2, %v1361_v1  ;;  %v3322_v1 = vsel %vm3285_vm7, %v3319_v3, %v3321_v61 }
 0x135   : > { %4307 = vmatprep.mubr.msk.bf16.mxu1 %vm427_vm2, %v1745_v57 }
 0x137   : > { %4452 = vmatmul.mubr.msk.bf16.gmra.mrb[12].mxu0 %vm427_vm2, %v3302_v31 }
 0x138   : > { %4455 = vmatprep.mubr.msk.bf16.mxu0 %vm427_vm2, %v3304_v58 }
 0x13c   : > { %4308 = vmatmul.mubr.msk.bf16.vlgmr.msra.gmra.mrb[20].mxu1 %vm427_vm2, %v1754_v8 }
 0x13d   : > { %4311 = vmatprep.mubr.msk.bf16.mxu1 %vm427_vm2, %v1763_v7 }
 0x13f   : > { %4456 = vmatmul.mubr.msk.bf16.gmra.mrb[16].mxu0 %vm427_vm2, %v3306_v46 }
 0x140   : > { %4459 = vmatprep.mubr.msk.bf16.mxu0 %vm427_vm2, %v3308_v18 }
 0x144   : > { %4312 = vmatmul.mubr.msk.bf16.gmra.mrb[24].mxu1 %vm427_vm2, %v1772_v52 }
 0x145   : > { %4315 = vmatprep.mubr.msk.bf16.mxu1 %vm427_vm2, %v1781_v22 }
 0x147   : > { %4460 = vmatmul.mubr.msk.bf16.gmra.mrb[20].mxu0 %vm427_vm2, %v3310_v2 }
 0x148   : > { %4463 = vmatprep.mubr.msk.bf16.mxu0 %vm427_vm2, %v3312_v5 }
 0x14c   : > { %4316 = vmatmul.mubr.msk.bf16.gmra.mrb[28].mxu1 %vm427_vm2, %v1790_v32 }
 0x14d   : > { %4319 = vmatprep.mubr.msk.bf16.mxu1 %vm427_vm2, %v1799_v55 }
 0x14f   : > { %4464 = vmatmul.mubr.msk.bf16.gmra.mrb[24].mxu0 %vm427_vm2, %v3314_v39 }
 0x150   : > { %4467 = vmatprep.mubr.msk.bf16.mxu0 %vm427_vm2, %v3316_v29 }
 0x154   : > { %4320 = vmatmul.mubr.msk.bf16.gmra.mrb[32].mxu1 %vm427_vm2, %v1808_v19 }
 0x157   : > { %4468 = vmatmul.mubr.msk.bf16.gmra.mrb[28].mxu0 %vm427_vm2, %v3318_v43 }
 0x158   : > { %4471 = vmatprep.mubr.msk.bf16.mxu0 %vm427_vm2, %v3320_v33 }
 0x15f   : > { %4472 = vmatmul.mubr.msk.bf16.gmra.mrb[32].mxu0 %vm427_vm2, %v3322_v1 }
 0x1c7   : > { %v4251_v51 = vpop.f32.mrb[0].mxu1 }
 0x1c8   : > { %v1453_v62 = vpop.f32.mrb[1].mxu1 }
 0x1c9   : > { %v4252_v16 = vpop.f32.mrb[2].mxu1 }
 0x1ca   : > { %v1456_v14 = vpop.f32.mrb[3].mxu1 }
 0x1cf   : > { %v4255_v63 = vpop.f32.mrb[4].mxu1 }
 0x1d0   : > { %v1469_v57 = vpop.f32.mrb[5].mxu1 }
 0x1d1   : > { %v4256_v9 = vpop.f32.mrb[6].mxu1 }
 0x1d2   : > { %v1472_v17 = vpop.f32.mrb[7].mxu1 }
 0x1d7   : > { %v4259_v48 = vpop.f32.mrb[8].mxu1 }
 0x1d8   : > { %v1485_v60 = vpop.f32.mrb[9].mxu1 }
 0x1d9   : > { %v4260_v24 = vpop.f32.mrb[10].mxu1 }
 0x1da   : > { %v1488_v54 = vpop.f32.mrb[11].mxu1 }
 0x1df   : > { %v5767_v31 = vpop.f32.mrb[12].mxu1 }
 0x1e0   : > { %v5769_v56 = vpop.f32.mrb[13].mxu1 }
 0x1e1   : > { %v5771_v0 = vpop.f32.mrb[14].mxu1 }
 0x1e2   : > { %v5773_v13 = vpop.f32.mrb[15].mxu1 }
 0x1e7   : > { %v5775_v15 = vpop.f32.mrb[16].mxu1 }
 0x1e8   : > { %v5777_v58 = vpop.f32.mrb[17].mxu1 }
 0x1e9   : > { %v5779_v8 = vpop.f32.mrb[18].mxu1 }
 0x1ea   : > { %v5781_v34 = vpop.f32.mrb[19].mxu1 }
 0x1f2   : > { %v4441_v38 = vpop.f32.mrb[0].mxu0 }
 0x1f3   : > { %v4477_v49 = vadd.f32 %v4441_v38, %v4251_v51  ;;  %v3414_v7 = vpop.f32.mrb[1].mxu0 }
 0x1f4   : > { %v4478_v4 = vadd.f32 %v3414_v7, %v1453_v62  ;;  %v4442_v11 = vpop.f32.mrb[2].mxu0 }
 0x1f5   : > { %4847 = vtanh.f32 %v4477_v49  ;;  %v4479_v6 = vadd.f32 %v4442_v11, %v4252_v16  ;;  %v3417_v12 = vpop.f32.mrb[3].mxu0 }
 0x1f6   : > { %4849 = vtanh.f32 %v4478_v4  ;;  %v4480_v30 = vadd.f32 %v3417_v12, %v1456_v14 }
 0x1f7   : > { %4851 = vtanh.f32 %v4479_v6 }
 0x1f8   : > { %4853 = vtanh.f32 %v4480_v30 }
 0x1fa   : > { %v4445_v42 = vpop.f32.mrb[4].mxu0 }
 0x1fb   : > { %v4481_v46 = vadd.f32 %v4445_v42, %v4255_v63  ;;  %v3430_v50 = vpop.f32.mrb[5].mxu0 }
 0x1fc   : > { %v4482_v47 = vadd.f32 %v3430_v50, %v1469_v57  ;;  %v4446_v37 = vpop.f32.mrb[6].mxu0 }
 0x1fd   : > { %4855 = vtanh.f32 %v4481_v46  ;;  %v4483_v18 = vadd.f32 %v4446_v37, %v4256_v9  ;;  %v3433_v52 = vpop.f32.mrb[7].mxu0 }
 0x1fe   : > { %4857 = vtanh.f32 %v4482_v47  ;;  %v4484_v10 = vadd.f32 %v3433_v52, %v1472_v17 }
 0x1ff   : > { %v4848_v25 = vpop.eup %4847  ;;  %4859 = vtanh.f32 %v4483_v18 }
 0x200   : > { %v4850_v45 = vpop.eup %4849  ;;  %3632 = vst.msk [vmem:[%s5787_s12 + $0x10] sm:$0xff] %vm3629_vm8, %v4848_v25  ;;  %4861 = vtanh.f32 %v4484_v10 }
 0x201   : > { %v4852_v22 = vpop.eup %4851  ;;  %3630 = vst.msk [vmem:[%s5787_s12] sm:$0xff] %vm3629_vm8, %v4850_v45 }
 0x202   : > { %v4854_v23 = vpop.eup %4853  ;;  %3633 = vst.msk [vmem:[%s5787_s12 + $0x18] sm:$0xff] %vm3629_vm8, %v4852_v22  ;;  %v4449_v35 = vpop.f32.mrb[8].mxu0 }
 0x203   : > { %3631 = vst.msk [vmem:[%s5787_s12 + $0x8] sm:$0xff] %vm3629_vm8, %v4854_v23  ;;  %v4485_v53 = vadd.f32 %v4449_v35, %v4259_v48  ;;  %v3446_v26 = vpop.f32.mrb[9].mxu0 }
 0x204   : > { %v4486_v28 = vadd.f32 %v3446_v26, %v1485_v60  ;;  %v4450_v41 = vpop.f32.mrb[10].mxu0 }
 0x205   : > { %4863 = vtanh.f32 %v4485_v53  ;;  %v4487_v2 = vadd.f32 %v4450_v41, %v4260_v24  ;;  %v3449_v27 = vpop.f32.mrb[11].mxu0 }
 0x206   : > { %4865 = vtanh.f32 %v4486_v28  ;;  %v4488_v5 = vadd.f32 %v3449_v27, %v1488_v54 }
 0x207   : > { %v4856_v32 = vpop.eup %4855  ;;  %4867 = vtanh.f32 %v4487_v2 }
 0x208   : > { %v4858_v20 = vpop.eup %4857  ;;  %3636 = vst.msk [vmem:[%s5787_s12 + $0x30] sm:$0xff] %vm3629_vm8, %v4856_v32  ;;  %4869 = vtanh.f32 %v4488_v5 }
 0x209   : > { %v4860_v21 = vpop.eup %4859  ;;  %3634 = vst.msk [vmem:[%s5787_s12 + $0x20] sm:$0xff] %vm3629_vm8, %v4858_v20 }
 0x20a   : > { %v4862_v44 = vpop.eup %4861  ;;  %3637 = vst.msk [vmem:[%s5787_s12 + $0x38] sm:$0xff] %vm3629_vm8, %v4860_v21  ;;  %v4453_v55 = vpop.f32.mrb[12].mxu0 }
 0x20b   : > { %3635 = vst.msk [vmem:[%s5787_s12 + $0x28] sm:$0xff] %vm3629_vm8, %v4862_v44  ;;  %v4489_v40 = vadd.f32 %v4453_v55, %v5767_v31  ;;  %v3462_v59 = vpop.f32.mrb[13].mxu0 }
 0x20c   : > { %v4490_v39 = vadd.f32 %v3462_v59, %v5769_v56  ;;  %v4454_v29 = vpop.f32.mrb[14].mxu0 }
 0x20d   : > { %4871 = vtanh.f32 %v4489_v40  ;;  %v4491_v19 = vadd.f32 %v4454_v29, %v5771_v0  ;;  %v3465_v36 = vpop.f32.mrb[15].mxu0 }
 0x20e   : > { %4873 = vtanh.f32 %v4490_v39  ;;  %v4492_v43 = vadd.f32 %v3465_v36, %v5773_v13 }
 0x20f   : > { %v4309_v3 = vpop.f32.mrb[20].mxu1  ;;  %v4864_v61 = vpop.eup %4863  ;;  %4875 = vtanh.f32 %v4491_v19 }
 0x210   : > { %v1980_v33 = vpop.f32.mrb[21].mxu1  ;;  %v4866_v51 = vpop.eup %4865  ;;  %3640 = vst.msk [vmem:[%s5787_s12 + $0x50] sm:$0xff] %vm3629_vm8, %v4864_v61  ;;  %4877 = vtanh.f32 %v4492_v43 }
 0x211   : > { %v4310_v1 = vpop.f32.mrb[22].mxu1  ;;  %v4868_v16 = vpop.eup %4867  ;;  %3638 = vst.msk [vmem:[%s5787_s12 + $0x40] sm:$0xff] %vm3629_vm8, %v4866_v51 }
 0x212   : > { %v1983_v62 = vpop.f32.mrb[23].mxu1  ;;  %v4870_v14 = vpop.eup %4869  ;;  %3641 = vst.msk [vmem:[%s5787_s12 + $0x58] sm:$0xff] %vm3629_vm8, %v4868_v16 }
 0x213   : > { %v4457_v63 = vpop.f32.mrb[16].mxu0  ;;  %3639 = vst.msk [vmem:[%s5787_s12 + $0x48] sm:$0xff] %vm3629_vm8, %v4870_v14 }
 0x214   : > { %v4493_v57 = vadd.f32 %v4457_v63, %v5775_v15  ;;  %v3478_v9 = vpop.f32.mrb[17].mxu0 }
 0x215   : > { %v4494_v17 = vadd.f32 %v3478_v9, %v5777_v58  ;;  %v4458_v48 = vpop.f32.mrb[18].mxu0 }
 0x216   : > { %4879 = vtanh.f32 %v4493_v57  ;;  %v4495_v60 = vadd.f32 %v4458_v48, %v5779_v8  ;;  %v3481_v24 = vpop.f32.mrb[19].mxu0 }
 0x217   : > { %v4313_v54 = vpop.f32.mrb[24].mxu1  ;;  %4881 = vtanh.f32 %v4494_v17  ;;  %v4496_v31 = vadd.f32 %v3481_v24, %v5781_v34  ;;  %v4872_v0 = vpop.eup %4871 }
 0x218   : > { %v1996_v56 = vpop.f32.mrb[25].mxu1  ;;  %4883 = vtanh.f32 %v4495_v60  ;;  %v4874_v15 = vpop.eup %4873  ;;  %3644 = vst.msk [vmem:[%s5787_s12 + $0x70] sm:$0xff] %vm3629_vm8, %v4872_v0 }
 0x219   : > { %v4314_v13 = vpop.f32.mrb[26].mxu1  ;;  %4885 = vtanh.f32 %v4496_v31  ;;  %v4876_v38 = vpop.eup %4875  ;;  %3642 = vst.msk [vmem:[%s5787_s12 + $0x60] sm:$0xff] %vm3629_vm8, %v4874_v15 }
 0x21a   : > { %v1999_v58 = vpop.f32.mrb[27].mxu1  ;;  %v4878_v8 = vpop.eup %4877  ;;  %3645 = vst.msk [vmem:[%s5787_s12 + $0x78] sm:$0xff] %vm3629_vm8, %v4876_v38 }
 0x21b   : > { %v4461_v49 = vpop.f32.mrb[20].mxu0  ;;  %3643 = vst.msk [vmem:[%s5787_s12 + $0x68] sm:$0xff] %vm3629_vm8, %v4878_v8 }
 0x21c   : > { %v4497_v34 = vadd.f32 %v4461_v49, %v4309_v3  ;;  %v3494_v7 = vpop.f32.mrb[21].mxu0 }
 0x21d   : > { %v4498_v4 = vadd.f32 %v3494_v7, %v1980_v33  ;;  %v4462_v11 = vpop.f32.mrb[22].mxu0 }
 0x21e   : > { %4887 = vtanh.f32 %v4497_v34  ;;  %v4499_v6 = vadd.f32 %v4462_v11, %v4310_v1  ;;  %v3497_v12 = vpop.f32.mrb[23].mxu0 }
 0x21f   : > { %v4317_v30 = vpop.f32.mrb[28].mxu1  ;;  %4889 = vtanh.f32 %v4498_v4  ;;  %v4500_v42 = vadd.f32 %v3497_v12, %v1983_v62 }
 0x220   : > { %v2012_v46 = vpop.f32.mrb[29].mxu1  ;;  %v4880_v50 = vpop.eup %4879  ;;  %4891 = vtanh.f32 %v4499_v6 }
 0x221   : > { %v4318_v47 = vpop.f32.mrb[30].mxu1  ;;  %v4882_v37 = vpop.eup %4881  ;;  %3648 = vst.msk [vmem:[%s5787_s12 + $0x90] sm:$0xff] %vm3629_vm8, %v4880_v50  ;;  %4893 = vtanh.f32 %v4500_v42 }
 0x222   : > { %v2015_v18 = vpop.f32.mrb[31].mxu1  ;;  %v4884_v52 = vpop.eup %4883  ;;  %3646 = vst.msk [vmem:[%s5787_s12 + $0x80] sm:$0xff] %vm3629_vm8, %v4882_v37 }
 0x223   : > { %v4886_v10 = vpop.eup %4885  ;;  %3649 = vst.msk [vmem:[%s5787_s12 + $0x98] sm:$0xff] %vm3629_vm8, %v4884_v52  ;;  %v4465_v25 = vpop.f32.mrb[24].mxu0 }
 0x224   : > { %3647 = vst.msk [vmem:[%s5787_s12 + $0x88] sm:$0xff] %vm3629_vm8, %v4886_v10  ;;  %v4501_v45 = vadd.f32 %v4465_v25, %v4313_v54  ;;  %v3510_v22 = vpop.f32.mrb[25].mxu0 }
 0x225   : > { %v4502_v23 = vadd.f32 %v3510_v22, %v1996_v56  ;;  %v4466_v35 = vpop.f32.mrb[26].mxu0 }
 0x226   : > { %4895 = vtanh.f32 %v4501_v45  ;;  %v4503_v53 = vadd.f32 %v4466_v35, %v4314_v13  ;;  %v3513_v26 = vpop.f32.mrb[27].mxu0 }
 0x227   : > { %v4321_v28 = vpop.f32.mrb[32].mxu1  ;;  %4897 = vtanh.f32 %v4502_v23  ;;  %v4504_v41 = vadd.f32 %v3513_v26, %v1999_v58 }
 0x228   : > { %v2028_v2 = vpop.f32.mrb[33].mxu1  ;;  %v4888_v27 = vpop.eup %4887  ;;  %4899 = vtanh.f32 %v4503_v53 }
 0x229   : > { %v4322_v5 = vpop.f32.mrb[34].mxu1  ;;  %v4890_v32 = vpop.eup %4889  ;;  %3652 = vst.msk [vmem:[%s5787_s12 + $0xb0] sm:$0xff] %vm3629_vm8, %v4888_v27  ;;  %4901 = vtanh.f32 %v4504_v41 }
 0x22a   : > { %v2031_v20 = vpop.f32.mrb[35].mxu1  ;;  %v4892_v21 = vpop.eup %4891  ;;  %3650 = vst.msk [vmem:[%s5787_s12 + $0xa0] sm:$0xff] %vm3629_vm8, %v4890_v32 }
 0x22b   : > { %v4894_v44 = vpop.eup %4893  ;;  %3653 = vst.msk [vmem:[%s5787_s12 + $0xb8] sm:$0xff] %vm3629_vm8, %v4892_v21  ;;  %v4469_v55 = vpop.f32.mrb[28].mxu0 }
 0x22c   : > { %3651 = vst.msk [vmem:[%s5787_s12 + $0xa8] sm:$0xff] %vm3629_vm8, %v4894_v44  ;;  %v4505_v40 = vadd.f32 %v4469_v55, %v4317_v30  ;;  %v3526_v59 = vpop.f32.mrb[29].mxu0 }
 0x22d   : > { %v4506_v39 = vadd.f32 %v3526_v59, %v2012_v46  ;;  %v4470_v29 = vpop.f32.mrb[30].mxu0 }
 0x22e   : > { %4903 = vtanh.f32 %v4505_v40  ;;  %v4507_v19 = vadd.f32 %v4470_v29, %v4318_v47  ;;  %v3529_v36 = vpop.f32.mrb[31].mxu0 }
 0x22f   : > { %4905 = vtanh.f32 %v4506_v39  ;;  %v4508_v3 = vadd.f32 %v3529_v36, %v2015_v18 }
 0x230   : > { %v4896_v43 = vpop.eup %4895  ;;  %4907 = vtanh.f32 %v4507_v19 }
 0x231   : > { %v4898_v33 = vpop.eup %4897  ;;  %3656 = vst.msk [vmem:[%s5787_s12 + $0xd0] sm:$0xff] %vm3629_vm8, %v4896_v43  ;;  %4909 = vtanh.f32 %v4508_v3 }
 0x232   : > { %v4900_v61 = vpop.eup %4899  ;;  %3654 = vst.msk [vmem:[%s5787_s12 + $0xc0] sm:$0xff] %vm3629_vm8, %v4898_v33  ;;  %v4473_v51 = vpop.f32.mrb[32].mxu0 }
 0x233   : > { %v4902_v1 = vpop.eup %4901  ;;  %3657 = vst.msk [vmem:[%s5787_s12 + $0xd8] sm:$0xff] %vm3629_vm8, %v4900_v61  ;;  %v4509_v62 = vadd.f32 %v4473_v51, %v4321_v28  ;;  %v3542_v16 = vpop.f32.mrb[33].mxu0 }
 0x234   : > { %3655 = vst.msk [vmem:[%s5787_s12 + $0xc8] sm:$0xff] %vm3629_vm8, %v4902_v1  ;;  %v4510_v14 = vadd.f32 %v3542_v16, %v2028_v2  ;;  %v4474_v63 = vpop.f32.mrb[34].mxu0 }
 0x235   : > { %4911 = vtanh.f32 %v4509_v62  ;;  %v4511_v57 = vadd.f32 %v4474_v63, %v4322_v5  ;;  %v3545_v9 = vpop.f32.mrb[35].mxu0 }
 0x236   : > { %4913 = vtanh.f32 %v4510_v14  ;;  %v4512_v17 = vadd.f32 %v3545_v9, %v2031_v20 }
 0x237   : > { %4915 = vtanh.f32 %v4511_v57 }
 0x238   : > { %v4904_v48 = vpop.eup %4903  ;;  %4917 = vtanh.f32 %v4512_v17 }
 0x239   : > { %v4906_v60 = vpop.eup %4905  ;;  %3660 = vst.msk [vmem:[%s5787_s12 + $0xf0] sm:$0xff] %vm3629_vm8, %v4904_v48 }
 0x23a   : > { %v4908_v24 = vpop.eup %4907  ;;  %3658 = vst.msk [vmem:[%s5787_s12 + $0xe0] sm:$0xff] %vm3629_vm8, %v4906_v60 }
 0x23b   : > { %v4910_v54 = vpop.eup %4909  ;;  %3661 = vst.msk [vmem:[%s5787_s12 + $0xf8] sm:$0xff] %vm3629_vm8, %v4908_v24 }
 0x23c   : > { %3659 = vst.msk [vmem:[%s5787_s12 + $0xe8] sm:$0xff] %vm3629_vm8, %v4910_v54 }
 0x23f   : > { %v4912_v31 = vpop.eup %4911 }
 0x240   : > { %v4914_v56 = vpop.eup %4913  ;;  %3664 = vst.msk [vmem:[%s5787_s12 + $0x110] sm:$0xff] %vm3629_vm8, %v4912_v31 }
 0x241   : > { %v4916_v0 = vpop.eup %4915  ;;  %3662 = vst.msk [vmem:[%s5787_s12 + $0x100] sm:$0xff] %vm3629_vm8, %v4914_v56 }
 0x242   : > { %v4918_v13 = vpop.eup %4917  ;;  %3665 = vst.msk [vmem:[%s5787_s12 + $0x118] sm:$0xff] %vm3629_vm8, %v4916_v0 }
 0x243   : > { %3663 = vst.msk [vmem:[%s5787_s12 + $0x108] sm:$0xff] %vm3629_vm8, %v4918_v13 }
 0x244 PF: > { %s12_s9 = sadd.s32 1, %s4936_s9  }
 0x245   : > { %p9_p4 = scmp.ge.s32.totalorder %s12_s9, 4  }
 0x247   :  { %11 = sbr.rel (!%p9_p4) target bundleno = 1 (0x1), region = 66 }

</bundles_post_ra>
